<compile_context>
chip_gen: v5e
topology: v5e:2x2
jax: 0.10.0
libtpu: 0.0.40
codegen_flags: <defaults>
</compile_context>

<pallas_src>
import jax
import jax.numpy as jnp
from jax.experimental import pallas as pl
from jax.experimental.pallas import tpu as pltpu

TILE_B_MAX = 1024   # ~15 MiB VMEM footprint at tile_b=1024 (x dbl-buf + h1/h2 + weights)


def _round_up(x, m):
    return (x + m - 1) // m * m


def _leaky_relu(x, slope=0.2):
    return jnp.where(x > 0, x, slope * x)


def discriminator_kernel(x_ref, w1_ref, b1_ref, w2_ref, b2_ref, w3_ref, b3_ref,
                         out_ref):
    # x_ref: (tile_b, 784) f32 straight from HBM; cast to bf16 only for the MXU.
    x = x_ref[...].astype(jnp.bfloat16)

    # Layer 1: bf16 MXU matmul (K = 784, Mosaic masks the lane remainder),
    # f32 accumulation and f32 elementwise.
    h1 = jnp.dot(x, w1_ref[...], preferred_element_type=jnp.float32)
    h1 = _leaky_relu(h1 + b1_ref[...])                       # (tile_b, 512) f32

    # Layer 2: downcast to bf16 only for the MXU.
    h2 = jnp.dot(h1.astype(jnp.bfloat16), w2_ref[...],
                 preferred_element_type=jnp.float32)
    h2 = _leaky_relu(h2 + b2_ref[...])                       # (tile_b, 256) f32

    # Layer 3 (256 -> 1) on VPU + XLU (no degenerate MXU matmul), producing a
    # LANE-DENSE (1, tile_b) row: XLU transpose then sublane reduction.
    h2t = jnp.transpose(h2)                                   # (256, tile_b)
    logit = jnp.sum(h2t * w3_ref[...], axis=0, keepdims=True) + b3_ref[...]
    out_ref[...] = jax.nn.sigmoid(logit).astype(out_ref.dtype)   # (1, tile_b)


def prepare_params(params):
    """One-time cast/layout of parameters: bf16 matmul weights, f32 biases,
    w3 laid out as a (256, 1) column for the VPU/XLU final layer."""
    w1, b1, w2, b2, w3, b3 = params
    return (
        w1.astype(jnp.bfloat16),                 # (784, 512)
        b1.reshape(1, -1).astype(jnp.float32),   # (1, 512)
        w2.astype(jnp.bfloat16),                 # (512, 256)
        b2.reshape(1, -1).astype(jnp.float32),   # (1, 256)
        w3.reshape(-1, 1).astype(jnp.float32),   # (256, 1)
        b3.reshape(1, 1).astype(jnp.float32),    # (1, 1)
    )


@jax.jit
def discriminator_forward(img, prep_params):
    """img: (B, 1, 28, 28) float32 (NCHW). Returns (B, 1) validity scores."""
    w1, b1, w2, b2, w3, b3 = prep_params
    B = img.shape[0]
    x = img.reshape(B, -1).astype(jnp.float32)   # (B, 784), no padding / no copy
    in_dim = x.shape[1]

    # Batch tile: multiple of 256 (MXU-friendly M, lane-aligned output row),
    # capped at TILE_B_MAX, and split so that >=2 tiles exist when B allows
    # (lets "parallel" shard across the 2 TensorCores on v7x).
    tile_b = min(TILE_B_MAX, _round_up(pl.cdiv(B, 2), 256))
    num_tiles = pl.cdiv(B, tile_b)

    def resident(shape):
        # Full-array block, same block index every grid step -> stays in VMEM.
        return pl.BlockSpec(shape, lambda i: (0,) * len(shape))

    out = pl.pallas_call(
        discriminator_kernel,
        out_shape=jax.ShapeDtypeStruct((1, num_tiles * tile_b), jnp.float32),
        grid=(num_tiles,),
        in_specs=[
            pl.BlockSpec((tile_b, in_dim), lambda i: (i, 0)),   # batch-tiled x
            resident(w1.shape), resident(b1.shape),
            resident(w2.shape), resident(b2.shape),
            resident(w3.shape), resident(b3.shape),
        ],
        out_specs=pl.BlockSpec((1, tile_b), lambda i: (0, i)),  # lane-dense row
        compiler_params=pltpu.CompilerParams(
            dimension_semantics=("parallel",),                  # megacore-shardable
            vmem_limit_bytes=32 * 1024 * 1024),
    )(x, w1, b1, w2, b2, w3, b3)

    # Rows beyond B (partial edge tile) carry garbage and are sliced off here.
    return out[0, :B].reshape(B, 1)


def init_params(key, img_shape=(1, 28, 28)):
    """Deterministic init mimicking PyTorch nn.Linear default (uniform +-1/sqrt(fan_in))."""
    in_dim = int(img_shape[0] * img_shape[1] * img_shape[2])
    dims = [(in_dim, 512), (512, 256), (256, 1)]
    params = []
    for (fan_in, fan_out) in dims:
        key, kw, kb = jax.random.split(key, 3)
        bound = 1.0 / jnp.sqrt(fan_in)
        w = jax.random.uniform(kw, (fan_in, fan_out), jnp.float32,
                               minval=-bound, maxval=bound)
        b = jax.random.uniform(kb, (1, fan_out), jnp.float32,
                               minval=-bound, maxval=bound)
        params += [w, b]
    return tuple(params)


if __name__ == "__main__":
    key = jax.random.PRNGKey(0)
    key, k_img = jax.random.split(key)

    B = 2
    img_shape = (1, 28, 28)
    img = jax.random.normal(k_img, (B,) + img_shape, dtype=jnp.float32)

    params = init_params(key, img_shape)
    prep = prepare_params(params)

    validity = discriminator_forward(img, prep)
    jax.block_until_ready(validity)

    # Reference in plain JAX using the same bf16-quantized weights / activations.
    w1p, b1p, w2p, b2p, w3p, b3p = prep
    x = img.reshape(B, -1).astype(jnp.float32)
    xq = x.astype(jnp.bfloat16).astype(jnp.float32)
    h1 = xq @ w1p.astype(jnp.float32) + b1p
    h1 = jnp.where(h1 > 0, h1, 0.2 * h1)
    h2 = h1.astype(jnp.bfloat16).astype(jnp.float32) @ w2p.astype(jnp.float32) + b2p
    h2 = jnp.where(h2 > 0, h2, 0.2 * h2)
    ref = jax.nn.sigmoid(h2 @ w3p + b3p)

    assert validity.shape == (B, 1)
    assert jnp.allclose(validity, ref, atol=5e-3, rtol=5e-3), (
        jnp.max(jnp.abs(validity - ref)))

    print("KERNEL_OK")
</pallas_src>

<mosaic_0001>
module attributes {stable_mosaic.version = 11 : i64} {
  func.func @discriminator_kernel(%arg0: i32, %arg1: memref<256x784xf32, #tpu.memory_space<vmem>>, %arg2: memref<784x512xbf16, #tpu.memory_space<vmem>>, %arg3: memref<1x512xf32, #tpu.memory_space<vmem>>, %arg4: memref<512x256xbf16, #tpu.memory_space<vmem>>, %arg5: memref<1x256xf32, #tpu.memory_space<vmem>>, %arg6: memref<256x1xf32, #tpu.memory_space<vmem>>, %arg7: memref<1x1xf32, #tpu.memory_space<vmem>>, %arg8: memref<1x256xf32, #tpu.memory_space<vmem>>) attributes {dimension_semantics = [#tpu.dimension_semantics<parallel>], iteration_bounds = array<i64: 1>, scalar_prefetch = 0 : i64, scratch_operands = 0 : i64, tpu.core_type = #tpu.core_type<tc>, window_params = [{transform_indices = @transform_0, window_bounds = array<i64: 256, 784>}, {pipeline_mode = #tpu.pipeline_mode<synchronous>, transform_indices = @transform_1, window_bounds = array<i64: 784, 512>}, {pipeline_mode = #tpu.pipeline_mode<synchronous>, transform_indices = @transform_2, window_bounds = array<i64: 1, 512>}, {pipeline_mode = #tpu.pipeline_mode<synchronous>, transform_indices = @transform_3, window_bounds = array<i64: 512, 256>}, {pipeline_mode = #tpu.pipeline_mode<synchronous>, transform_indices = @transform_4, window_bounds = array<i64: 1, 256>}, {pipeline_mode = #tpu.pipeline_mode<synchronous>, transform_indices = @transform_5, window_bounds = array<i64: 256, 1>}, {pipeline_mode = #tpu.pipeline_mode<synchronous>, transform_indices = @transform_6, window_bounds = array<i64: 1, 1>}, {transform_indices = @transform_7, window_bounds = array<i64: 1, 256>}]} {
    %c0 = arith.constant 0 : index
    %c0_0 = arith.constant 0 : index
    %0 = vector.load %arg1[%c0, %c0_0] : memref<256x784xf32, #tpu.memory_space<vmem>>, vector<256x784xf32>
    %1 = arith.truncf %0 : vector<256x784xf32> to vector<256x784xbf16>
    %c0_1 = arith.constant 0 : index
    %c0_2 = arith.constant 0 : index
    %2 = vector.load %arg2[%c0_1, %c0_2] : memref<784x512xbf16, #tpu.memory_space<vmem>>, vector<784x512xbf16>
    %cst = arith.constant dense<0.000000e+00> : vector<256x512xf32>
    %3 = tpu.matmul %1, %2, %cst {dimension_numbers = #tpu.dot_dimension_numbers<[1], [0], [0], [1], [0, 0, 1, 1], [], []>} : vector<256x784xbf16>, vector<784x512xbf16>, vector<256x512xf32> -> vector<256x512xf32>
    %c0_3 = arith.constant 0 : index
    %c0_4 = arith.constant 0 : index
    %4 = vector.load %arg3[%c0_3, %c0_4] : memref<1x512xf32, #tpu.memory_space<vmem>>, vector<1x512xf32>
    %5 = vector.broadcast %4 : vector<1x512xf32> to vector<256x512xf32>
    %6 = arith.addf %3, %5 : vector<256x512xf32>
    %cst_5 = arith.constant 0.000000e+00 : f32
    %7 = vector.broadcast %cst_5 : f32 to vector<256x512xf32>
    %8 = arith.cmpf ogt, %6, %7 : vector<256x512xf32>
    %cst_6 = arith.constant 2.000000e-01 : f32
    %9 = vector.broadcast %cst_6 : f32 to vector<256x512xf32>
    %10 = arith.mulf %9, %6 : vector<256x512xf32>
    %11 = arith.select %8, %6, %10 : vector<256x512xi1>, vector<256x512xf32>
    %12 = arith.truncf %11 : vector<256x512xf32> to vector<256x512xbf16>
    %c0_7 = arith.constant 0 : index
    %c0_8 = arith.constant 0 : index
    %13 = vector.load %arg4[%c0_7, %c0_8] : memref<512x256xbf16, #tpu.memory_space<vmem>>, vector<512x256xbf16>
    %cst_9 = arith.constant dense<0.000000e+00> : vector<256x256xf32>
    %14 = tpu.matmul %12, %13, %cst_9 {dimension_numbers = #tpu.dot_dimension_numbers<[1], [0], [0], [1], [0, 0, 1, 1], [], []>} : vector<256x512xbf16>, vector<512x256xbf16>, vector<256x256xf32> -> vector<256x256xf32>
    %c0_10 = arith.constant 0 : index
    %c0_11 = arith.constant 0 : index
    %15 = vector.load %arg5[%c0_10, %c0_11] : memref<1x256xf32, #tpu.memory_space<vmem>>, vector<1x256xf32>
    %16 = vector.broadcast %15 : vector<1x256xf32> to vector<256x256xf32>
    %17 = arith.addf %14, %16 : vector<256x256xf32>
    %cst_12 = arith.constant 0.000000e+00 : f32
    %18 = vector.broadcast %cst_12 : f32 to vector<256x256xf32>
    %19 = arith.cmpf ogt, %17, %18 : vector<256x256xf32>
    %cst_13 = arith.constant 2.000000e-01 : f32
    %20 = vector.broadcast %cst_13 : f32 to vector<256x256xf32>
    %21 = arith.mulf %20, %17 : vector<256x256xf32>
    %22 = arith.select %19, %17, %21 : vector<256x256xi1>, vector<256x256xf32>
    %23 = tpu.transpose %22, [1, 0] : vector<256x256xf32> -> vector<256x256xf32>
    %c0_14 = arith.constant 0 : index
    %c0_15 = arith.constant 0 : index
    %24 = vector.load %arg6[%c0_14, %c0_15] : memref<256x1xf32, #tpu.memory_space<vmem>>, vector<256x1xf32>
    %25 = vector.broadcast %24 : vector<256x1xf32> to vector<256x256xf32>
    %26 = arith.mulf %23, %25 : vector<256x256xf32>
    %cst_16 = arith.constant dense<0.000000e+00> : vector<256xf32>
    %27 = vector.multi_reduction <add>, %26, %cst_16 [0] : vector<256x256xf32> to vector<256xf32>
    %28 = vector.shape_cast %27 : vector<256xf32> to vector<1x256xf32>
    %c0_17 = arith.constant 0 : index
    %c0_18 = arith.constant 0 : index
    %29 = vector.load %arg7[%c0_17, %c0_18] : memref<1x1xf32, #tpu.memory_space<vmem>>, vector<1x1xf32>
    %30 = vector.broadcast %29 : vector<1x1xf32> to vector<1x256xf32>
    %31 = arith.addf %28, %30 : vector<1x256xf32>
    %32 = arith.negf %31 : vector<1x256xf32>
    %33 = math.exp %32 : vector<1x256xf32>
    %cst_19 = arith.constant 1.000000e+00 : f32
    %34 = vector.broadcast %cst_19 : f32 to vector<1x256xf32>
    %35 = arith.addf %34, %33 : vector<1x256xf32>
    %36 = arith.divf %34, %35 : vector<1x256xf32>
    %c0_20 = arith.constant 0 : index
    %c0_21 = arith.constant 0 : index
    %37 = vector.load %arg8[%c0_20, %c0_21] : memref<1x256xf32, #tpu.memory_space<vmem>>, vector<1x256xf32>
    tpu.vector_store %arg8[%c0_20, %c0_21], %36 {strides = array<i32>} : memref<1x256xf32, #tpu.memory_space<vmem>>, vector<1x256xf32>,
    return
  }
  func.func @transform_0(%arg0: i32) -> (i32, i32) {
    %c0_i32 = arith.constant 0 : i32
    %c0_i32_0 = arith.constant 0 : i32
    return %arg0, %c0_i32 : i32, i32
  }
  func.func @transform_1(%arg0: i32) -> (i32, i32) {
    %c0_i32 = arith.constant 0 : i32
    %c0_i32_0 = arith.constant 0 : i32
    %c0_i32_1 = arith.constant 0 : i32
    return %c0_i32, %c0_i32_0 : i32, i32
  }
  func.func @transform_2(%arg0: i32) -> (i32, i32) {
    %c0_i32 = arith.constant 0 : i32
    %c0_i32_0 = arith.constant 0 : i32
    %c0_i32_1 = arith.constant 0 : i32
    return %c0_i32, %c0_i32_0 : i32, i32
  }
  func.func @transform_3(%arg0: i32) -> (i32, i32) {
    %c0_i32 = arith.constant 0 : i32
    %c0_i32_0 = arith.constant 0 : i32
    %c0_i32_1 = arith.constant 0 : i32
    return %c0_i32, %c0_i32_0 : i32, i32
  }
  func.func @transform_4(%arg0: i32) -> (i32, i32) {
    %c0_i32 = arith.constant 0 : i32
    %c0_i32_0 = arith.constant 0 : i32
    %c0_i32_1 = arith.constant 0 : i32
    return %c0_i32, %c0_i32_0 : i32, i32
  }
  func.func @transform_5(%arg0: i32) -> (i32, i32) {
    %c0_i32 = arith.constant 0 : i32
    %c0_i32_0 = arith.constant 0 : i32
    %c0_i32_1 = arith.constant 0 : i32
    return %c0_i32, %c0_i32_0 : i32, i32
  }
  func.func @transform_6(%arg0: i32) -> (i32, i32) {
    %c0_i32 = arith.constant 0 : i32
    %c0_i32_0 = arith.constant 0 : i32
    %c0_i32_1 = arith.constant 0 : i32
    return %c0_i32, %c0_i32_0 : i32, i32
  }
  func.func @transform_7(%arg0: i32) -> (i32, i32) {
    %c0_i32 = arith.constant 0 : i32
    %c0_i32_0 = arith.constant 0 : i32
    return %c0_i32, %arg0 : i32, i32
  }
}

</mosaic_0001>

<bundles_post_ra>
// kernel: discriminator_forward.1
= control target key start
LH: loop header
LB: loop body
LE: loop exit
PB: predicated region body
PF: predicated region fallthrough
CT: control target
= control target key end

     0   :  { %s12527_s0 = inlined_call_operand.vmem [shape: f32[2,784], index: 0, kind: input, shape index: {}]   ;;  %s12528_s1 = inlined_call_operand.hbm [shape: bf16[784,512], index: 1, kind: input, shape index: {}]   ;;  %s12529_s2 = inlined_call_operand.vmem [shape: f32[1,512], index: 2, kind: input, shape index: {}]   ;;  %s12530_s3 = inlined_call_operand.hbm [shape: bf16[512,256], index: 3, kind: input, shape index: {}]   ;;  %s12531_s4 = inlined_call_operand.vmem [shape: f32[1,256], index: 4, kind: input, shape index: {}]   ;;  %s12532_s5 = inlined_call_operand.vmem [shape: f32[256,1], index: 5, kind: input, shape index: {}]   ;;  %s12533_s6 = inlined_call_operand.<no memory space> [shape: f32[1,1], index: 6, kind: input, shape index: {}]   ;;  %s12534_s7 = inlined_call_operand.vmem [shape: f32[1,256], index: 7, kind: output, shape index: {}]  }
   0x1   :  { %v12_v0 = vstv %s12533_s6 }
   0x2   :  { %13 = vst [vmem:[#allocation2] sm:$0x1] %v12_v0 }
   0x3   :  { %14 = vsyncpa [#allocation4], 0  ;;  %s22_s28 = sshll.u32 %s12528_s1, 4  ;;  %s23_s28 = int_to_ptr.hbm [resolvable:$true] %s22_s28 }
   0x4   :  { %15 = vsyncpa [#allocation6], 0  ;;  %s8826_s29 = smov [#allocation3]   ;;  %s37_s10 = sshll.u32 %s12530_s3, 4  ;;  %s38_s10 = int_to_ptr.hbm [resolvable:$true] %s37_s10 }
   0x5   :  { %s24_s30 = sshll.u32 %s8826_s29, 4  ;;  %s8827_s11 = smov 256   ;;  %s25_s30 = int_to_ptr.vmem [resolvable:$true] %s24_s30 }
   0x6   :  { %s8828_s12 = smov 16   ;;  %s8829_s6 = smov [#allocation5]  }
   0x7   :  { %30 = dma.hbm_to_vmem [thread:$0]  %s23_s28, 25088, %s25_s30, [#allocation4], %s8827_s11, %s8827_s11, %s8828_s12  }
   0x8   :  { %s39_s13 = sshll.u32 %s8829_s6, 4  ;;  %s8830_s14 = smov 128   ;;  %s40_s13 = int_to_ptr.vmem [resolvable:$true] %s39_s13 }
   0x9   :  { %s8831_s15 = smov 8  }
   0xa   :  { %45 = dma.hbm_to_vmem [thread:$0]  %s38_s10, 8192, %s40_s13, [#allocation6], %s8830_s14, %s8830_s14, %s8831_s15  }
   0xb   :  { %8822 = dma.done.wait [#allocation4], 25088  }
   0xc   :  { %8823 = vsyncadd [#allocation4], 4294942208 }
   0xd   :  { %8824 = dma.done.wait [#allocation6], 8192  }
   0xe   :  { %8825 = vsyncadd [#allocation6], 4294959104  ;;  %v7501_v1 = vld [vmem:[#allocation3 + $0xe0] sm:$0xf]  ;;  %v8523_v2 = vld [vmem:[#allocation3 + $0xec] sm:$0xf0] }
   0xf   :  { %v7629_v3 = vld [vmem:[#allocation3 + $0x1e0] sm:$0xf]  ;;  %v7502_v4 = vor.u32 %v8523_v2, %v7501_v1  ;;  %v8555_v5 = vld [vmem:[#allocation3 + $0x1ec] sm:$0xf0]  ;;  %vm2582_vm0 = vcmask 130048  }
  0x10   :  { %v7757_v6 = vld [vmem:[#allocation3 + $0x2e0] sm:$0xf]  ;;  %v8587_v7 = vld [vmem:[#allocation3 + $0x2ec] sm:$0xf0]  ;;  %v7630_v8 = vor.u32 %v8555_v5, %v7629_v3 }
  0x11   :  { %v7758_v9 = vor.u32 %v8587_v7, %v7757_v6  ;;  %v7885_v10 = vld [vmem:[#allocation3 + $0x3e0] sm:$0xf]  ;;  %v8619_v11 = vld [vmem:[#allocation3 + $0x3ec] sm:$0xf0]  ;;  %2631 = vmatpush.bf16.msra.mxu0 %v7502_v4 }
  0x12   :  { %v7485_v12 = vld [vmem:[#allocation3 + $0xc0] sm:$0xf]  ;;  %v7886_v13 = vor.u32 %v8619_v11, %v7885_v10  ;;  %v8519_v14 = vld [vmem:[#allocation3 + $0xcc] sm:$0xf0]  ;;  %2720 = vmatpush.bf16.msra.mxu1 %v7630_v8 }
  0x13   :  { %v7613_v15 = vld [vmem:[#allocation3 + $0x1c0] sm:$0xf]  ;;  %v8551_v16 = vld [vmem:[#allocation3 + $0x1cc] sm:$0xf0]  ;;  %2809 = vmatpush.bf16.msra.mxu2 %v7758_v9  ;;  %v7486_v17 = vor.u32 %v8519_v14, %v7485_v12 }
  0x14   :  { %v7614_v18 = vor.u32 %v8551_v16, %v7613_v15  ;;  %v7741_v19 = vld [vmem:[#allocation3 + $0x2c0] sm:$0xf]  ;;  %v8583_v20 = vld [vmem:[#allocation3 + $0x2cc] sm:$0xf0]  ;;  %2898 = vmatpush.bf16.msra.mxu3 %v7886_v13 }
  0x15   :  { %v7869_v21 = vld [vmem:[#allocation3 + $0x3c0] sm:$0xf]  ;;  %v7742_v22 = vor.u32 %v8583_v20, %v7741_v19  ;;  %v8615_v23 = vld [vmem:[#allocation3 + $0x3cc] sm:$0xf0]  ;;  %2632 = vmatpush.bf16.msra.mxu0 %v7486_v17  ;;  %v61_v17 = vld [vmem:[%s12527_s0] sm:$0xff] }
  0x16   :  { %v7469_v24 = vld [vmem:[#allocation3 + $0xa0] sm:$0xf]  ;;  %v8515_v25 = vld [vmem:[#allocation3 + $0xac] sm:$0xf0]  ;;  %v7870_v26 = vor.u32 %v8615_v23, %v7869_v21  ;;  %2721 = vmatpush.bf16.msra.mxu1 %v7614_v18  ;;  %v63_v18 = vld [vmem:[%s12527_s0 + $0xe] sm:$0xff] }
  0x17   :  { %v7597_v27 = vld [vmem:[#allocation3 + $0x1a0] sm:$0xf]  ;;  %v8547_v28 = vld [vmem:[#allocation3 + $0x1ac] sm:$0xf0]  ;;  %v7470_v30 = vor.u32 %v8515_v25, %v7469_v24  ;;  %2810 = vmatpush.bf16.msra.mxu2 %v7742_v22  ;;  %573 = vst [vmem:[#allocation1] ss:$4 sm:$0xff] %v61_v17 }
  0x18   :  { %v7725_v29 = vld [vmem:[#allocation3 + $0x2a0] sm:$0xf]  ;;  %v8579_v31 = vld [vmem:[#allocation3 + $0x2ac] sm:$0xf0]  ;;  %v7598_v34 = vor.u32 %v8547_v28, %v7597_v27  ;;  %2899 = vmatpush.bf16.msra.mxu3 %v7870_v26  ;;  %575 = vst [vmem:[#allocation1 + $0x1] ss:$4 sm:$0xff] %v63_v18 }
  0x19   :  { %v7853_v32 = vld [vmem:[#allocation3 + $0x3a0] sm:$0xf]  ;;  %v8611_v33 = vld [vmem:[#allocation3 + $0x3ac] sm:$0xf0]  ;;  %v7726_v35 = vor.u32 %v8579_v31, %v7725_v29  ;;  %2633 = vmatpush.bf16.msra.mxu0 %v7470_v30  ;;  %v7487_v17 = vld [vmem:[#allocation3 + $0xd0] sm:$0xf0] }
  0x1a   :  { %v7453_v36 = vld [vmem:[#allocation3 + $0x80] sm:$0xf]  ;;  %v8511_v37 = vld [vmem:[#allocation3 + $0x8c] sm:$0xf0]  ;;  %v7854_v39 = vor.u32 %v8611_v33, %v7853_v32  ;;  %2722 = vmatpush.bf16.msra.mxu1 %v7598_v34 }
  0x1b   :  { %v7581_v38 = vld [vmem:[#allocation3 + $0x180] sm:$0xf]  ;;  %v8543_v40 = vld [vmem:[#allocation3 + $0x18c] sm:$0xf0]  ;;  %v7454_v45 = vor.u32 %v8511_v37, %v7453_v36  ;;  %2811 = vmatpush.bf16.msra.mxu2 %v7726_v35 }
  0x1c   :  { %v7709_v41 = vld [vmem:[#allocation3 + $0x280] sm:$0xf]  ;;  %v8575_v42 = vld [vmem:[#allocation3 + $0x28c] sm:$0xf0]  ;;  %v7582_v46 = vor.u32 %v8543_v40, %v7581_v38  ;;  %2900 = vmatpush.bf16.msra.mxu3 %v7854_v39  ;;  %v8521_v38 = vld [vmem:[#allocation3 + $0xe4] sm:$0xf] }
  0x1d   :  { %v7837_v43 = vld [vmem:[#allocation3 + $0x380] sm:$0xf]  ;;  %v8607_v44 = vld [vmem:[#allocation3 + $0x38c] sm:$0xf0]  ;;  %v7710_v47 = vor.u32 %v8575_v42, %v7709_v41  ;;  %2634 = vmatpush.bf16.msra.mxu0 %v7454_v45  ;;  %v7503_v39 = vld [vmem:[#allocation3 + $0xf0] sm:$0xf0] }
  0x1e   :  { %v7437_v48 = vld [vmem:[#allocation3 + $0x60] sm:$0xf]  ;;  %v8507_v49 = vld [vmem:[#allocation3 + $0x6c] sm:$0xf0]  ;;  %v7838_v51 = vor.u32 %v8607_v44, %v7837_v43  ;;  %2723 = vmatpush.bf16.msra.mxu1 %v7582_v46 }
  0x1f   :  { %v7565_v50 = vld [vmem:[#allocation3 + $0x160] sm:$0xf]  ;;  %v8539_v52 = vld [vmem:[#allocation3 + $0x16c] sm:$0xf0]  ;;  %v7438_v57 = vor.u32 %v8507_v49, %v7437_v48  ;;  %2812 = vmatpush.bf16.msra.mxu2 %v7710_v47  ;;  %v7506_v47 = vor.u32 %v8521_v38, %v7503_v39 }
  0x20   :  { %v7693_v53 = vld [vmem:[#allocation3 + $0x260] sm:$0xf]  ;;  %v8571_v54 = vld [vmem:[#allocation3 + $0x26c] sm:$0xf0]  ;;  %v7566_v58 = vor.u32 %v8539_v52, %v7565_v50  ;;  %2901 = vmatpush.bf16.msra.mxu3 %v7838_v51 }
  0x21   :  { %v7821_v55 = vld [vmem:[#allocation3 + $0x360] sm:$0xf]  ;;  %v8603_v56 = vld [vmem:[#allocation3 + $0x36c] sm:$0xf0]  ;;  %v7694_v59 = vor.u32 %v8571_v54, %v7693_v53  ;;  %2635 = vmatpush.bf16.msra.mxu0 %v7438_v57  ;;  %v77_v57 = vld [vmem:[%s12527_s0 + $0x70] sm:$0xff] }
  0x22   :  { %v7421_v60 = vld [vmem:[#allocation3 + $0x40] sm:$0xf]  ;;  %v8503_v61 = vld [vmem:[#allocation3 + $0x4c] sm:$0xf0]  ;;  %v7822_v63 = vor.u32 %v8603_v56, %v7821_v55  ;;  %2724 = vmatpush.bf16.msra.mxu1 %v7566_v58  ;;  %v79_v58 = vld [vmem:[%s12527_s0 + $0x7e] sm:$0xff] }
  0x23   :  { %v7549_v62 = vld [vmem:[#allocation3 + $0x140] sm:$0xf]  ;;  %v8535_v0 = vld [vmem:[#allocation3 + $0x14c] sm:$0xf0]  ;;  %v7422_v6 = vor.u32 %v8503_v61, %v7421_v60  ;;  %2813 = vmatpush.bf16.msra.mxu2 %v7694_v59 }
  0x24   :  { %v7677_v1 = vld [vmem:[#allocation3 + $0x240] sm:$0xf]  ;;  %v8567_v2 = vld [vmem:[#allocation3 + $0x24c] sm:$0xf0]  ;;  %v7550_v10 = vor.u32 %v8535_v0, %v7549_v62  ;;  %2902 = vmatpush.bf16.msra.mxu3 %v7822_v63 }
  0x25   :  { %v7805_v3 = vld [vmem:[#allocation3 + $0x340] sm:$0xf]  ;;  %v8599_v4 = vld [vmem:[#allocation3 + $0x34c] sm:$0xf0]  ;;  %v7678_v11 = vor.u32 %v8567_v2, %v7677_v1  ;;  %2636 = vmatpush.bf16.msra.mxu0 %v7422_v6 }
  0x26   :  { %v7405_v5 = vld [vmem:[#allocation3 + $0x20] sm:$0xf]  ;;  %v8499_v7 = vld [vmem:[#allocation3 + $0x2c] sm:$0xf0]  ;;  %v7806_v15 = vor.u32 %v8599_v4, %v7805_v3  ;;  %2725 = vmatpush.bf16.msra.mxu1 %v7550_v10 }
  0x27   :  { %v7533_v8 = vld [vmem:[#allocation3 + $0x120] sm:$0xf]  ;;  %v8531_v9 = vld [vmem:[#allocation3 + $0x12c] sm:$0xf0]  ;;  %v7406_v23 = vor.u32 %v8499_v7, %v7405_v5  ;;  %2814 = vmatpush.bf16.msra.mxu2 %v7678_v11 }
  0x28   :  { %v7661_v12 = vld [vmem:[#allocation3 + $0x220] sm:$0xf]  ;;  %v8563_v13 = vld [vmem:[#allocation3 + $0x22c] sm:$0xf0]  ;;  %v7534_v26 = vor.u32 %v8531_v9, %v7533_v8  ;;  %2903 = vmatpush.bf16.msra.mxu3 %v7806_v15  ;;  %v8517_v15 = vld [vmem:[#allocation3 + $0xc4] sm:$0xf] }
  0x29   :  { %v7789_v14 = vld [vmem:[#allocation3 + $0x320] sm:$0xf]  ;;  %v8595_v16 = vld [vmem:[#allocation3 + $0x32c] sm:$0xf0]  ;;  %v7662_v27 = vor.u32 %v8563_v13, %v7661_v12  ;;  %2637 = vmatpush.bf16.msra.mxu0 %v7406_v23  ;;  %v95_v23 = vld [vmem:[%s12527_s0 + $0xee] sm:$0xff] }
  0x2a   :  { %v7389_v19 = vld [vmem:[#allocation3] sm:$0xf]  ;;  %v8495_v20 = vld [vmem:[#allocation3 + $0xc] sm:$0xf0]  ;;  %v7790_v30 = vor.u32 %v8595_v16, %v7789_v14  ;;  %2726 = vmatpush.bf16.msra.mxu1 %v7534_v26 }
  0x2b   :  { %v65_v21 = vld [vmem:[%s12527_s0 + $0x1c] sm:$0xff]  ;;  %v67_v22 = vld [vmem:[%s12527_s0 + $0x2a] sm:$0xff]  ;;  %v7390_v36 = vor.u32 %v8495_v20, %v7389_v19  ;;  %2815 = vmatpush.bf16.msra.mxu2 %v7662_v27  ;;  %v73_v50 = vld [vmem:[%s12527_s0 + $0x54] sm:$0xff]  ;;  %v7490_v20 = vor.u32 %v8517_v15, %v7487_v17 }
  0x2c   :  { %v7517_v24 = vld [vmem:[#allocation3 + $0x100] sm:$0xf]  ;;  %v8527_v25 = vld [vmem:[#allocation3 + $0x10c] sm:$0xf0]  ;;  %577 = vst [vmem:[#allocation1 + $0x2] ss:$4 sm:$0xff] %v65_v21  ;;  %2904 = vmatpush.bf16.msra.mxu3 %v7790_v30 }
  0x2d   :  { %v7645_v28 = vld [vmem:[#allocation3 + $0x200] sm:$0xf]  ;;  %v8559_v29 = vld [vmem:[#allocation3 + $0x20c] sm:$0xf0]  ;;  %579 = vst [vmem:[#allocation1 + $0x3] ss:$4 sm:$0xff] %v67_v22  ;;  %v7518_v40 = vor.u32 %v8527_v25, %v7517_v24  ;;  %2638 = vmatpush.bf16.msra.mxu0 %v7390_v36 }
  0x2e   :  { %v7773_v31 = vld [vmem:[#allocation3 + $0x300] sm:$0xf]  ;;  %v8591_v32 = vld [vmem:[#allocation3 + $0x30c] sm:$0xf0]  ;;  %v7646_v41 = vor.u32 %v8559_v29, %v7645_v28  ;;  %v93_v22 = vld [vmem:[%s12527_s0 + $0xe0] sm:$0xff] }
  0x2f   :  { %v8157_v33 = vld [vmem:[#allocation3 + $0x600] sm:$0xf]  ;;  %v8687_v34 = vld [vmem:[#allocation3 + $0x60c] sm:$0xf0]  ;;  %v7774_v44 = vor.u32 %v8591_v32, %v7773_v31  ;;  %2727 = vmatpush.bf16.msra.mxu1 %v7518_v40 }
  0x30   :  { %v8013_v35 = vld [vmem:[#allocation3 + $0x4e0] sm:$0xf]  ;;  %v8651_v37 = vld [vmem:[#allocation3 + $0x4ec] sm:$0xf0]  ;;  %v8158_v45 = vor.u32 %v8687_v34, %v8157_v33  ;;  %2816 = vmatpush.bf16.msra.mxu2 %v7646_v41 }
  0x31   :  { %v8141_v42 = vld [vmem:[#allocation3 + $0x5e0] sm:$0xf]  ;;  %v8683_v43 = vld [vmem:[#allocation3 + $0x5ec] sm:$0xf0]  ;;  %v8014_v46 = vor.u32 %v8651_v37, %v8013_v35  ;;  %2905 = vmatpush.bf16.msra.mxu3 %v7774_v44 }
  0x32   :  { %v69_v48 = vld [vmem:[%s12527_s0 + $0x38] sm:$0xff]  ;;  %v71_v49 = vld [vmem:[%s12527_s0 + $0x46] sm:$0xff]  ;;  %v8142_v51 = vor.u32 %v8683_v43, %v8141_v42  ;;  %v109_v42 = vld [vmem:[%s12527_s0 + $0x150] sm:$0xff] }
  0x33   :  { %v75_v56 = vld [vmem:[%s12527_s0 + $0x62] sm:$0xff]  ;;  %2987 = vmatpush.bf16.msrb.mxu0 %v8014_v46  ;;  %v81_v59 = vld [vmem:[%s12527_s0 + $0x8c] sm:$0xff]  ;;  %v83_v4 = vld [vmem:[%s12527_s0 + $0x9a] sm:$0xff] }
  0x34   :  { %v588_v52 = vld.sshfl [vmem:[#allocation1] sm:$0xff pattern:$0x73625140]  ;;  %v589_v53 = vld.sshfl [vmem:[#allocation1 + $0x8] sm:$0xff pattern:$0x73625140]  ;;  %3172 = vmatpush.bf16.msrb.mxu2 %v8158_v45  ;;  %3076 = vmatpush.bf16.msrb.mxu1 %v8142_v51 }
  0x35   :  { %v590_v54 = vld.sshfl [vmem:[#allocation1 + $0x10] sm:$0xff pattern:$0x73625140]  ;;  %v591_v55 = vld.sshfl [vmem:[#allocation1 + $0x18] sm:$0xff pattern:$0x73625140]  ;;  %3254 = vmatpush.bf16.msrb.mxu3 %v7506_v47 }
  0x36   :  { %595 = vst [vmem:[#allocation1] ss:$4 sm:$0xff] %v69_v48  ;;  %v85_v5 = vld [vmem:[%s12527_s0 + $0xa8] sm:$0xff]  ;;  %v87_v6 = vld [vmem:[%s12527_s0 + $0xb6] sm:$0xff]  ;;  %v111_v43 = vld [vmem:[%s12527_s0 + $0x15e] sm:$0xff] }
  0x37   :  { %596 = vst [vmem:[#allocation1 + $0x1] ss:$4 sm:$0xff] %v71_v49  ;;  %v89_v7 = vld [vmem:[%s12527_s0 + $0xc4] sm:$0xff]  ;;  %v91_v12 = vld [vmem:[%s12527_s0 + $0xd2] sm:$0xff]  ;;  %v97_v24 = vld [vmem:[%s12527_s0 + $0xfc] sm:$0xff] }
  0x38   :  { %597 = vst [vmem:[#allocation1 + $0x2] ss:$4 sm:$0xff] %v73_v50  ;;  %v7997_v13 = vld [vmem:[#allocation3 + $0x4c0] sm:$0xf]  ;;  %v8647_v14 = vld [vmem:[#allocation3 + $0x4cc] sm:$0xf0] }
  0x39   :  { %598 = vst [vmem:[#allocation1 + $0x3] ss:$4 sm:$0xff] %v75_v56  ;;  %v7998_v16 = vor.u32 %v8647_v14, %v7997_v13  ;;  %v8125_v18 = vld [vmem:[#allocation3 + $0x5c0] sm:$0xf]  ;;  %v8679_v19 = vld [vmem:[#allocation3 + $0x5cc] sm:$0xf0]  ;;  %3255 = vmatpush.bf16.msrb.mxu3 %v7490_v20 }
  0x3a   :  { %v8126_v21 = vor.u32 %v8679_v19, %v8125_v18  ;;  %v99_v33 = vld [vmem:[%s12527_s0 + $0x10a] sm:$0xff]  ;;  %v101_v34 = vld [vmem:[%s12527_s0 + $0x118] sm:$0xff]  ;;  %v107_v41 = vld [vmem:[%s12527_s0 + $0x142] sm:$0xff] }
  0x3b   :  { %2988 = vmatpush.bf16.msrb.mxu0 %v7998_v16  ;;  %v103_v35 = vld [vmem:[%s12527_s0 + $0x126] sm:$0xff]  ;;  %v105_v36 = vld [vmem:[%s12527_s0 + $0x134] sm:$0xff]  ;;  %v129_v13 = vld [vmem:[%s12527_s0 + $0x1dc] sm:$0xff] }
  0x3c   :  { %3077 = vmatpush.bf16.msrb.mxu1 %v8126_v21  ;;  %v113_v44 = vld [vmem:[%s12527_s0 + $0x16c] sm:$0xff]  ;;  %v121_v56 = vld [vmem:[%s12527_s0 + $0x1a4] sm:$0xff] }
  0x40   :  { %v603_v60 = vld.sshfl [vmem:[#allocation1] sm:$0xff pattern:$0x73625140]  ;;  %v604_v61 = vld.sshfl [vmem:[#allocation1 + $0x8] sm:$0xff pattern:$0x73625140] }
  0x41   :  { %v8915_v62 = vpack.c.bf16 %v603_v60, %v588_v52  ;;  %v8917_v63 = vpack.c.bf16 %v604_v61, %v589_v53  ;;  %v605_v0 = vld.sshfl [vmem:[#allocation1 + $0x10] sm:$0xff pattern:$0x73625140]  ;;  %v606_v1 = vld.sshfl [vmem:[#allocation1 + $0x18] sm:$0xff pattern:$0x73625140] }
  0x42   :  { %v8919_v2 = vpack.c.bf16 %v605_v0, %v590_v54  ;;  %v8921_v3 = vpack.c.bf16 %v606_v1, %v591_v55  ;;  %610 = vst [vmem:[#allocation1] ss:$4 sm:$0xff] %v77_v57  ;;  %v115_v53 = vld [vmem:[%s12527_s0 + $0x17a] sm:$0xff]  ;;  %v117_v54 = vld [vmem:[%s12527_s0 + $0x188] sm:$0xff]  ;;  %v123_v61 = vld [vmem:[%s12527_s0 + $0x1b2] sm:$0xff] }
  0x43   :  { %12840 = vst [vmem:[#allocation9_spill] sm:$0xff] %v8915_v62  ;;  %2639 = vmatmul.bf16.vlgmr.msra.gmra.mxu0 %v8915_v62  ;;  %2728 = vmatmul.bf16.vlgmr.msra.gmra.mxu1 %v8917_v63  ;;  %v119_v55 = vld [vmem:[%s12527_s0 + $0x196] sm:$0xff]  ;;  %v7981_v0 = vld [vmem:[#allocation3 + $0x4a0] sm:$0xf] }
  0x44   :  { %12841 = vst [vmem:[#allocation10_spill] sm:$0xff] %v8917_v63  ;;  %2817 = vmatmul.bf16.vlgmr.msra.gmra.mxu2 %v8919_v2  ;;  %2906 = vmatmul.bf16.vlgmr.msra.gmra.mxu3 %v8921_v3  ;;  %v8643_v1 = vld [vmem:[#allocation3 + $0x4ac] sm:$0xf0] }
  0x45   :  { %12842 = vst [vmem:[#allocation11_spill] sm:$0xff] %v8919_v2 }
  0x46   :  { %12843 = vst [vmem:[#allocation12_spill] sm:$0xff] %v8921_v3 }
  0x47   :  { %611 = vst [vmem:[#allocation1 + $0x1] ss:$4 sm:$0xff] %v79_v58 }
  0x48   :  { %612 = vst [vmem:[#allocation1 + $0x2] ss:$4 sm:$0xff] %v81_v59 }
  0x49   :  { %613 = vst [vmem:[#allocation1 + $0x3] ss:$4 sm:$0xff] %v83_v4  ;;  %v8513_v4 = vld [vmem:[#allocation3 + $0xa4] sm:$0xf] }
  0x50   :  { %v618_v8 = vld.sshfl [vmem:[#allocation1] sm:$0xff pattern:$0x73625140]  ;;  %v619_v9 = vld.sshfl [vmem:[#allocation1 + $0x8] sm:$0xff pattern:$0x73625140] }
  0x51   :  { %v620_v10 = vld.sshfl [vmem:[#allocation1 + $0x10] sm:$0xff pattern:$0x73625140]  ;;  %v621_v11 = vld.sshfl [vmem:[#allocation1 + $0x18] sm:$0xff pattern:$0x73625140] }
  0x52   :  { %625 = vst [vmem:[#allocation1] ss:$4 sm:$0xff] %v85_v5  ;;  %v7982_v5 = vor.u32 %v8643_v1, %v7981_v0  ;;  %v7455_v1 = vld [vmem:[#allocation3 + $0x90] sm:$0xf0] }
  0x53   :  { %626 = vst [vmem:[#allocation1 + $0x1] ss:$4 sm:$0xff] %v87_v6  ;;  %v7471_v6 = vld [vmem:[#allocation3 + $0xb0] sm:$0xf0] }
  0x54   :  { %627 = vst [vmem:[#allocation1 + $0x2] ss:$4 sm:$0xff] %v89_v7  ;;  %v8109_v7 = vld [vmem:[#allocation3 + $0x5a0] sm:$0xf]  ;;  %2989 = vmatpush.bf16.msrb.mxu0 %v7982_v5  ;;  %v8671_v5 = vld [vmem:[#allocation3 + $0x58c] sm:$0xf0] }
  0x55   :  { %628 = vst [vmem:[#allocation1 + $0x3] ss:$4 sm:$0xff] %v91_v12  ;;  %v127_v12 = vld [vmem:[%s12527_s0 + $0x1ce] sm:$0xff] }
  0x5c   :  { %v633_v25 = vld.sshfl [vmem:[#allocation1] sm:$0xff pattern:$0x73625140]  ;;  %v634_v26 = vld.sshfl [vmem:[#allocation1 + $0x8] sm:$0xff pattern:$0x73625140] }
  0x5d   :  { %v8951_v27 = vpack.c.bf16 %v633_v25, %v618_v8  ;;  %v8953_v28 = vpack.c.bf16 %v634_v26, %v619_v9  ;;  %v635_v29 = vld.sshfl [vmem:[#allocation1 + $0x10] sm:$0xff pattern:$0x73625140]  ;;  %v636_v30 = vld.sshfl [vmem:[#allocation1 + $0x18] sm:$0xff pattern:$0x73625140]  ;;  %v7474_v9 = vor.u32 %v8513_v4, %v7471_v6 }
  0x5e   :  { %v8955_v31 = vpack.c.bf16 %v635_v29, %v620_v10  ;;  %v8957_v32 = vpack.c.bf16 %v636_v30, %v621_v11  ;;  %640 = vst [vmem:[#allocation1] ss:$4 sm:$0xff] %v93_v22  ;;  %v8675_v8 = vld [vmem:[#allocation3 + $0x5ac] sm:$0xf0]  ;;  %v125_v11 = vld [vmem:[%s12527_s0 + $0x1c0] sm:$0xff]  ;;  %v131_v22 = vld [vmem:[%s12527_s0 + $0x1ea] sm:$0xff] }
  0x5f   :  { %12844 = vst [vmem:[#allocation13_spill] sm:$0xff] %v8951_v27  ;;  %2644 = vmatmul.bf16.gmra.mxu0 %v8951_v27  ;;  %2733 = vmatmul.bf16.gmra.mxu1 %v8953_v28  ;;  %v8110_v10 = vor.u32 %v8675_v8, %v8109_v7  ;;  %v137_v25 = vld [vmem:[%s12527_s0 + $0x214] sm:$0xff]  ;;  %v8093_v4 = vld [vmem:[#allocation3 + $0x580] sm:$0xf]  ;;  %v157_v8 = vld [vmem:[%s12527_s0 + $0x2a0] sm:$0xff] }
  0x60   :  { %12845 = vst [vmem:[#allocation14_spill] sm:$0xff] %v8953_v28  ;;  %2822 = vmatmul.bf16.gmra.mxu2 %v8955_v31  ;;  %2911 = vmatmul.bf16.gmra.mxu3 %v8957_v32  ;;  %v8094_v7 = vor.u32 %v8671_v5, %v8093_v4  ;;  %v185_v4 = vld [vmem:[%s12527_s0 + $0x364] sm:$0xff] }
  0x61   :  { %12846 = vst [vmem:[#allocation15_spill] sm:$0xff] %v8955_v31  ;;  %3256 = vmatpush.bf16.msrb.mxu3 %v7474_v9  ;;  %3078 = vmatpush.bf16.msrb.mxu1 %v8110_v10  ;;  %v159_v9 = vld [vmem:[%s12527_s0 + $0x2ae] sm:$0xff]  ;;  %v161_v10 = vld [vmem:[%s12527_s0 + $0x2bc] sm:$0xff] }
  0x62   :  { %12847 = vst [vmem:[#allocation16_spill] sm:$0xff] %v8957_v32 }
  0x63   :  { %641 = vst [vmem:[#allocation1 + $0x1] ss:$4 sm:$0xff] %v95_v23  ;;  %v133_v23 = vld [vmem:[%s12527_s0 + $0x1f8] sm:$0xff] }
  0x64   :  { %642 = vst [vmem:[#allocation1 + $0x2] ss:$4 sm:$0xff] %v97_v24  ;;  %v135_v24 = vld [vmem:[%s12527_s0 + $0x206] sm:$0xff] }
  0x65   :  { %643 = vst [vmem:[#allocation1 + $0x3] ss:$4 sm:$0xff] %v99_v33  ;;  %3079 = vmatpush.bf16.msrb.mxu1 %v8094_v7 }
  0x6c   :  { %v648_v37 = vld.sshfl [vmem:[#allocation1] sm:$0xff pattern:$0x73625140]  ;;  %v649_v38 = vld.sshfl [vmem:[#allocation1 + $0x8] sm:$0xff pattern:$0x73625140] }
  0x6d   :  { %v650_v39 = vld.sshfl [vmem:[#allocation1 + $0x10] sm:$0xff pattern:$0x73625140]  ;;  %v651_v40 = vld.sshfl [vmem:[#allocation1 + $0x18] sm:$0xff pattern:$0x73625140] }
  0x6e   :  { %655 = vst [vmem:[#allocation1] ss:$4 sm:$0xff] %v101_v34  ;;  %v139_v34 = vld [vmem:[%s12527_s0 + $0x222] sm:$0xff] }
  0x6f   :  { %656 = vst [vmem:[#allocation1 + $0x1] ss:$4 sm:$0xff] %v103_v35  ;;  %v141_v35 = vld [vmem:[%s12527_s0 + $0x230] sm:$0xff] }
  0x70   :  { %657 = vst [vmem:[#allocation1 + $0x2] ss:$4 sm:$0xff] %v105_v36  ;;  %v143_v36 = vld [vmem:[%s12527_s0 + $0x23e] sm:$0xff] }
  0x71   :  { %658 = vst [vmem:[#allocation1 + $0x3] ss:$4 sm:$0xff] %v107_v41 }
  0x78   :  { %v663_v45 = vld.sshfl [vmem:[#allocation1] sm:$0xff pattern:$0x73625140]  ;;  %v664_v46 = vld.sshfl [vmem:[#allocation1 + $0x8] sm:$0xff pattern:$0x73625140] }
  0x79   :  { %v8987_v47 = vpack.c.bf16 %v663_v45, %v648_v37  ;;  %v8989_v48 = vpack.c.bf16 %v664_v46, %v649_v38  ;;  %v665_v49 = vld.sshfl [vmem:[#allocation1 + $0x10] sm:$0xff pattern:$0x73625140]  ;;  %v666_v50 = vld.sshfl [vmem:[#allocation1 + $0x18] sm:$0xff pattern:$0x73625140] }
  0x7a   :  { %v8991_v51 = vpack.c.bf16 %v665_v49, %v650_v39  ;;  %v8993_v52 = vpack.c.bf16 %v666_v50, %v651_v40  ;;  %670 = vst [vmem:[#allocation1] ss:$4 sm:$0xff] %v109_v42  ;;  %v145_v37 = vld [vmem:[%s12527_s0 + $0x24c] sm:$0xff]  ;;  %v147_v46 = vld [vmem:[%s12527_s0 + $0x25a] sm:$0xff] }
  0x7b   :  { %12848 = vst [vmem:[#allocation17_spill] sm:$0xff] %v8987_v47  ;;  %2649 = vmatmul.bf16.gmra.mxu0 %v8987_v47  ;;  %2738 = vmatmul.bf16.gmra.mxu1 %v8989_v48  ;;  %v149_v49 = vld [vmem:[%s12527_s0 + $0x268] sm:$0xff]  ;;  %v151_v50 = vld [vmem:[%s12527_s0 + $0x276] sm:$0xff] }
  0x7c   :  { %12849 = vst [vmem:[#allocation18_spill] sm:$0xff] %v8989_v48  ;;  %2827 = vmatmul.bf16.gmra.mxu2 %v8991_v51  ;;  %2916 = vmatmul.bf16.gmra.mxu3 %v8993_v52 }
  0x7d   :  { %12850 = vst [vmem:[#allocation19_spill] sm:$0xff] %v8991_v51 }
  0x7e   :  { %12851 = vst [vmem:[#allocation20_spill] sm:$0xff] %v8993_v52 }
  0x7f   :  { %671 = vst [vmem:[#allocation1 + $0x1] ss:$4 sm:$0xff] %v111_v43 }
  0x80   :  { %672 = vst [vmem:[#allocation1 + $0x2] ss:$4 sm:$0xff] %v113_v44 }
  0x81   :  { %673 = vst [vmem:[#allocation1 + $0x3] ss:$4 sm:$0xff] %v115_v53  ;;  %v153_v53 = vld [vmem:[%s12527_s0 + $0x284] sm:$0xff] }
  0x88   :  { %v678_v57 = vld.sshfl [vmem:[#allocation1] sm:$0xff pattern:$0x73625140]  ;;  %v679_v58 = vld.sshfl [vmem:[#allocation1 + $0x8] sm:$0xff pattern:$0x73625140] }
  0x89   :  { %v680_v59 = vld.sshfl [vmem:[#allocation1 + $0x10] sm:$0xff pattern:$0x73625140]  ;;  %v681_v60 = vld.sshfl [vmem:[#allocation1 + $0x18] sm:$0xff pattern:$0x73625140] }
  0x8a   :  { %685 = vst [vmem:[#allocation1] ss:$4 sm:$0xff] %v117_v54 }
  0x8b   :  { %686 = vst [vmem:[#allocation1 + $0x1] ss:$4 sm:$0xff] %v119_v55 }
  0x8c   :  { %687 = vst [vmem:[#allocation1 + $0x2] ss:$4 sm:$0xff] %v121_v56 }
  0x8d   :  { %688 = vst [vmem:[#allocation1 + $0x3] ss:$4 sm:$0xff] %v123_v61  ;;  %v8509_v61 = vld [vmem:[#allocation3 + $0x84] sm:$0xf] }
  0x8e   :  { %v7458_v6 = vor.u32 %v8509_v61, %v7455_v1  ;;  %v179_v61 = vld [vmem:[%s12527_s0 + $0x33a] sm:$0xff] }
  0x8f   :  { %v183_v1 = vld [vmem:[%s12527_s0 + $0x356] sm:$0xff] }
  0x90   :  { %3257 = vmatpush.bf16.msrb.mxu3 %v7458_v6 }
  0x94   :  { %v693_v14 = vld.sshfl [vmem:[#allocation1] sm:$0xff pattern:$0x73625140]  ;;  %v694_v15 = vld.sshfl [vmem:[#allocation1 + $0x8] sm:$0xff pattern:$0x73625140] }
  0x95   :  { %v9023_v16 = vpack.c.bf16 %v693_v14, %v678_v57  ;;  %v9025_v17 = vpack.c.bf16 %v694_v15, %v679_v58  ;;  %v695_v18 = vld.sshfl [vmem:[#allocation1 + $0x10] sm:$0xff pattern:$0x73625140]  ;;  %v696_v19 = vld.sshfl [vmem:[#allocation1 + $0x18] sm:$0xff pattern:$0x73625140] }
  0x96   :  { %v9027_v20 = vpack.c.bf16 %v695_v18, %v680_v59  ;;  %v9029_v21 = vpack.c.bf16 %v696_v19, %v681_v60  ;;  %700 = vst [vmem:[#allocation1] ss:$4 sm:$0xff] %v125_v11  ;;  %v155_v58 = vld [vmem:[%s12527_s0 + $0x292] sm:$0xff]  ;;  %v7965_v59 = vld [vmem:[#allocation3 + $0x480] sm:$0xf] }
  0x97   :  { %12852 = vst [vmem:[#allocation21_spill] sm:$0xff] %v9023_v16  ;;  %2654 = vmatmul.bf16.gmra.mxu0 %v9023_v16  ;;  %2743 = vmatmul.bf16.gmra.mxu1 %v9025_v17  ;;  %v8639_v60 = vld [vmem:[#allocation3 + $0x48c] sm:$0xf0] }
  0x98   :  { %12853 = vst [vmem:[#allocation22_spill] sm:$0xff] %v9025_v17  ;;  %2832 = vmatmul.bf16.gmra.mxu2 %v9027_v20  ;;  %2921 = vmatmul.bf16.gmra.mxu3 %v9029_v21  ;;  %v7966_v0 = vor.u32 %v8639_v60, %v7965_v59 }
  0x99   :  { %12854 = vst [vmem:[#allocation23_spill] sm:$0xff] %v9027_v20  ;;  %v7743_v20 = vld [vmem:[#allocation3 + $0x2d0] sm:$0xf0] }
  0x9a   :  { %12855 = vst [vmem:[#allocation24_spill] sm:$0xff] %v9029_v21  ;;  %2990 = vmatpush.bf16.msrb.mxu0 %v7966_v0  ;;  %v181_v0 = vld [vmem:[%s12527_s0 + $0x348] sm:$0xff] }
  0x9b   :  { %701 = vst [vmem:[#allocation1 + $0x1] ss:$4 sm:$0xff] %v127_v12  ;;  %v8581_v21 = vld [vmem:[#allocation3 + $0x2c4] sm:$0xf] }
  0x9c   :  { %702 = vst [vmem:[#allocation1 + $0x2] ss:$4 sm:$0xff] %v129_v13 }
  0x9d   :  { %703 = vst [vmem:[#allocation1 + $0x3] ss:$4 sm:$0xff] %v131_v22 }
  0xa4   :  { %v708_v26 = vld.sshfl [vmem:[#allocation1] sm:$0xff pattern:$0x73625140]  ;;  %v709_v29 = vld.sshfl [vmem:[#allocation1 + $0x8] sm:$0xff pattern:$0x73625140] }
  0xa5   :  { %v710_v30 = vld.sshfl [vmem:[#allocation1 + $0x10] sm:$0xff pattern:$0x73625140]  ;;  %v711_v33 = vld.sshfl [vmem:[#allocation1 + $0x18] sm:$0xff pattern:$0x73625140] }
  0xa6   :  { %715 = vst [vmem:[#allocation1] ss:$4 sm:$0xff] %v133_v23  ;;  %v163_v23 = vld [vmem:[%s12527_s0 + $0x2ca] sm:$0xff] }
  0xa7   :  { %716 = vst [vmem:[#allocation1 + $0x1] ss:$4 sm:$0xff] %v135_v24  ;;  %v165_v24 = vld [vmem:[%s12527_s0 + $0x2d8] sm:$0xff] }
  0xa8   :  { %717 = vst [vmem:[#allocation1 + $0x2] ss:$4 sm:$0xff] %v137_v25  ;;  %v167_v25 = vld [vmem:[%s12527_s0 + $0x2e6] sm:$0xff] }
  0xa9   :  { %718 = vst [vmem:[#allocation1 + $0x3] ss:$4 sm:$0xff] %v139_v34 }
  0xb0   :  { %v723_v38 = vld.sshfl [vmem:[#allocation1] sm:$0xff pattern:$0x73625140]  ;;  %v724_v39 = vld.sshfl [vmem:[#allocation1 + $0x8] sm:$0xff pattern:$0x73625140] }
  0xb1   :  { %v9059_v40 = vpack.c.bf16 %v723_v38, %v708_v26  ;;  %v9061_v41 = vpack.c.bf16 %v724_v39, %v709_v29  ;;  %v725_v42 = vld.sshfl [vmem:[#allocation1 + $0x10] sm:$0xff pattern:$0x73625140]  ;;  %v726_v43 = vld.sshfl [vmem:[#allocation1 + $0x18] sm:$0xff pattern:$0x73625140] }
  0xb2   :  { %v9063_v44 = vpack.c.bf16 %v725_v42, %v710_v30  ;;  %v9065_v45 = vpack.c.bf16 %v726_v43, %v711_v33  ;;  %730 = vst [vmem:[#allocation1] ss:$4 sm:$0xff] %v141_v35  ;;  %v169_v26 = vld [vmem:[%s12527_s0 + $0x2f4] sm:$0xff]  ;;  %v171_v35 = vld [vmem:[%s12527_s0 + $0x302] sm:$0xff]  ;;  %v177_v43 = vld [vmem:[%s12527_s0 + $0x32c] sm:$0xff] }
  0xb3   :  { %12856 = vst [vmem:[#allocation25_spill] sm:$0xff] %v9059_v40  ;;  %2659 = vmatmul.bf16.gmra.mxu0 %v9059_v40  ;;  %2748 = vmatmul.bf16.gmra.mxu1 %v9061_v41  ;;  %v173_v39 = vld [vmem:[%s12527_s0 + $0x310] sm:$0xff]  ;;  %v175_v42 = vld [vmem:[%s12527_s0 + $0x31e] sm:$0xff] }
  0xb4   :  { %12857 = vst [vmem:[#allocation26_spill] sm:$0xff] %v9061_v41  ;;  %2837 = vmatmul.bf16.gmra.mxu2 %v9063_v44  ;;  %2926 = vmatmul.bf16.gmra.mxu3 %v9065_v45 }
  0xb5   :  { %12858 = vst [vmem:[#allocation27_spill] sm:$0xff] %v9063_v44 }
  0xb6   :  { %12859 = vst [vmem:[#allocation28_spill] sm:$0xff] %v9065_v45  ;;  %v8015_v45 = vld [vmem:[#allocation3 + $0x4f0] sm:$0xf0] }
  0xb7   :  { %731 = vst [vmem:[#allocation1 + $0x1] ss:$4 sm:$0xff] %v143_v36  ;;  %v1592_v36 = vld [vmem:[%s12529_s2] sm:$0xf] }
  0xb8   :  { %732 = vst [vmem:[#allocation1 + $0x2] ss:$4 sm:$0xff] %v145_v37  ;;  %v9125_v37 = vperm.slane %v1592_v36, 0  ;;  %v189_v36 = vld [vmem:[%s12527_s0 + $0x380] sm:$0xff] }
  0xb9   :  { %733 = vst [vmem:[#allocation1 + $0x3] ss:$4 sm:$0xff] %v147_v46 }
  0xba   :  { %12864 = vst [vmem:[#allocation33_spill] sm:$0xff] %v9125_v37 }
  0xc0   :  { %v738_v54 = vld.sshfl [vmem:[#allocation1] sm:$0xff pattern:$0x73625140]  ;;  %v739_v55 = vld.sshfl [vmem:[#allocation1 + $0x8] sm:$0xff pattern:$0x73625140]  ;;  %v2640_v38 = vpop.f32.mrf.mxu0 }
  0xc1   :  { %v740_v56 = vld.sshfl [vmem:[#allocation1 + $0x10] sm:$0xff pattern:$0x73625140]  ;;  %v741_v57 = vld.sshfl [vmem:[#allocation1 + $0x18] sm:$0xff pattern:$0x73625140]  ;;  %v2641_v46 = vadd.f32 %v2640_v38, %v9125_v37 }
  0xc2   :  { %745 = vst [vmem:[#allocation1] ss:$4 sm:$0xff] %v149_v49  ;;  %v191_v38 = vld [vmem:[%s12527_s0 + $0x38e] sm:$0xff] }
  0xc3   :  { %746 = vst [vmem:[#allocation1 + $0x1] ss:$4 sm:$0xff] %v151_v50 }
  0xc4   :  { %747 = vst [vmem:[#allocation1 + $0x2] ss:$4 sm:$0xff] %v153_v53  ;;  %v2729_v53 = vpop.f32.mrf.mxu1 }
  0xc5   :  { %748 = vst [vmem:[#allocation1 + $0x3] ss:$4 sm:$0xff] %v155_v58  ;;  %v2730_v58 = vadd.f32 %v2729_v53, %v2641_v46 }
  0xcc   :  { %v753_v11 = vld.sshfl [vmem:[#allocation1] sm:$0xff pattern:$0x73625140]  ;;  %v754_v12 = vld.sshfl [vmem:[#allocation1 + $0x8] sm:$0xff pattern:$0x73625140] }
  0xcd   :  { %v9095_v13 = vpack.c.bf16 %v753_v11, %v738_v54  ;;  %v9097_v14 = vpack.c.bf16 %v754_v12, %v739_v55  ;;  %v755_v15 = vld.sshfl [vmem:[#allocation1 + $0x10] sm:$0xff pattern:$0x73625140]  ;;  %v756_v18 = vld.sshfl [vmem:[#allocation1 + $0x18] sm:$0xff pattern:$0x73625140] }
  0xce   :  { %v9099_v19 = vpack.c.bf16 %v755_v15, %v740_v56  ;;  %v9101_v22 = vpack.c.bf16 %v756_v18, %v741_v57  ;;  %760 = vst [vmem:[#allocation1] ss:$4 sm:$0xff] %v157_v8  ;;  %v8635_v11 = vld [vmem:[#allocation3 + $0x46c] sm:$0xf0]  ;;  %v8505_v12 = vld [vmem:[#allocation3 + $0x64] sm:$0xf]  ;;  %v2818_v15 = vpop.f32.mrf.mxu2 }
  0xcf   :  { %12860 = vst [vmem:[#allocation29_spill] sm:$0xff] %v9095_v13  ;;  %2664 = vmatmul.bf16.gmra.mxu0 %v9095_v13  ;;  %2753 = vmatmul.bf16.gmra.mxu1 %v9097_v14 }
  0xd0   :  { %12861 = vst [vmem:[#allocation30_spill] sm:$0xff] %v9097_v14  ;;  %2842 = vmatmul.bf16.gmra.mxu2 %v9099_v19  ;;  %2931 = vmatmul.bf16.gmra.mxu3 %v9101_v22  ;;  %v8649_v14 = vld [vmem:[#allocation3 + $0x4e4] sm:$0xf] }
  0xd1   :  { %12862 = vst [vmem:[#allocation31_spill] sm:$0xff] %v9099_v19 }
  0xd2   :  { %12863 = vst [vmem:[#allocation32_spill] sm:$0xff] %v9101_v22 }
  0xd3   :  { %761 = vst [vmem:[#allocation1 + $0x1] ss:$4 sm:$0xff] %v159_v9  ;;  %v187_v9 = vld [vmem:[%s12527_s0 + $0x372] sm:$0xff] }
  0xd4   :  { %762 = vst [vmem:[#allocation1 + $0x2] ss:$4 sm:$0xff] %v161_v10  ;;  %v7949_v10 = vld [vmem:[#allocation3 + $0x460] sm:$0xf] }
  0xd5   :  { %763 = vst [vmem:[#allocation1 + $0x3] ss:$4 sm:$0xff] %v163_v23  ;;  %v7950_v18 = vor.u32 %v8635_v11, %v7949_v10  ;;  %v7439_v23 = vld [vmem:[#allocation3 + $0x70] sm:$0xf0] }
  0xd7   :  { %2991 = vmatpush.bf16.msrb.mxu0 %v7950_v18 }
  0xdc   :  { %v768_v29 = vld.sshfl [vmem:[#allocation1] sm:$0xff pattern:$0x73625140]  ;;  %v769_v30 = vld.sshfl [vmem:[#allocation1 + $0x8] sm:$0xff pattern:$0x73625140] }
  0xdd   :  { %v770_v33 = vld.sshfl [vmem:[#allocation1 + $0x10] sm:$0xff pattern:$0x73625140]  ;;  %v771_v34 = vld.sshfl [vmem:[#allocation1 + $0x18] sm:$0xff pattern:$0x73625140] }
  0xde   :  { %775 = vst [vmem:[#allocation1] ss:$4 sm:$0xff] %v165_v24  ;;  %v2819_v24 = vadd.f32 %v2818_v15, %v2730_v58 }
  0xdf   :  { %776 = vst [vmem:[#allocation1 + $0x1] ss:$4 sm:$0xff] %v167_v25  ;;  %v8077_v25 = vld [vmem:[#allocation3 + $0x560] sm:$0xf] }
  0xe0   :  { %777 = vst [vmem:[#allocation1 + $0x2] ss:$4 sm:$0xff] %v169_v26  ;;  %v8667_v26 = vld [vmem:[#allocation3 + $0x56c] sm:$0xf0] }
  0xe1   :  { %778 = vst [vmem:[#allocation1 + $0x3] ss:$4 sm:$0xff] %v171_v35  ;;  %v8078_v35 = vor.u32 %v8667_v26, %v8077_v25 }
  0xe3   :  { %3080 = vmatpush.bf16.msrb.mxu1 %v8078_v35  ;;  %v205_v35 = vld [vmem:[%s12527_s0 + $0x3f0] sm:$0xff] }
  0xe8   :  { %v783_v49 = vld.sshfl [vmem:[#allocation1] sm:$0xff pattern:$0x73625140]  ;;  %v784_v50 = vld.sshfl [vmem:[#allocation1 + $0x8] sm:$0xff pattern:$0x73625140] }
  0xe9   :  { %v9137_v54 = vpack.c.bf16 %v783_v49, %v768_v29  ;;  %v9139_v55 = vpack.c.bf16 %v784_v50, %v769_v30  ;;  %v785_v56 = vld.sshfl [vmem:[#allocation1 + $0x10] sm:$0xff pattern:$0x73625140]  ;;  %v786_v57 = vld.sshfl [vmem:[#allocation1 + $0x18] sm:$0xff pattern:$0x73625140]  ;;  %v9164_v29 = vpop.f32.mrf.mxu0  ;;  %v9166_v30 = vpop.f32.mrf.mxu1 }
  0xea   :  { %v9141_v59 = vpack.c.bf16 %v785_v56, %v770_v33  ;;  %v9143_v60 = vpack.c.bf16 %v786_v57, %v771_v34  ;;  %790 = vst [vmem:[#allocation1] ss:$4 sm:$0xff] %v173_v39  ;;  %v7442_v33 = vor.u32 %v8505_v12, %v7439_v23  ;;  %v2907_v34 = vpop.f32.mrf.mxu3  ;;  %v193_v39 = vld [vmem:[%s12527_s0 + $0x39c] sm:$0xff] }
  0xeb   :  { %12865 = vst [vmem:[#allocation34_spill] sm:$0xff] %v9137_v54  ;;  %2669 = vmatmul.bf16.gmra.mxu0 %v9137_v54  ;;  %2758 = vmatmul.bf16.gmra.mxu1 %v9139_v55  ;;  %v203_v23 = vld [vmem:[%s12527_s0 + $0x3e2] sm:$0xff] }
  0xec   :  { %12866 = vst [vmem:[#allocation35_spill] sm:$0xff] %v9139_v55  ;;  %2847 = vmatmul.bf16.gmra.mxu2 %v9141_v59  ;;  %2936 = vmatmul.bf16.gmra.mxu3 %v9143_v60  ;;  %v7631_v55 = vld [vmem:[#allocation3 + $0x1f0] sm:$0xf0] }
  0xed   :  { %12867 = vst [vmem:[#allocation36_spill] sm:$0xff] %v9141_v59  ;;  %3258 = vmatpush.bf16.msrb.mxu3 %v7442_v33  ;;  %v8553_v59 = vld [vmem:[#allocation3 + $0x1e4] sm:$0xf] }
  0xee   :  { %12868 = vst [vmem:[#allocation37_spill] sm:$0xff] %v9143_v60  ;;  %v7634_v19 = vor.u32 %v8553_v59, %v7631_v55  ;;  %v80_v55 = vld [vmem:[%s12527_s0 + $0x86] sm:$0x3f] }
  0xef   :  { %791 = vst [vmem:[#allocation1 + $0x1] ss:$4 sm:$0xff] %v175_v42  ;;  %v9177_v42 = vadd.f32 %v2907_v34, %v2819_v24 }
  0xf0   :  { %792 = vst [vmem:[#allocation1 + $0x2] ss:$4 sm:$0xff] %v177_v43 }
  0xf1   :  { %793 = vst [vmem:[#allocation1 + $0x3] ss:$4 sm:$0xff] %v179_v61  ;;  %v195_v61 = vld [vmem:[%s12527_s0 + $0x3aa] sm:$0xff] }
  0xf2   :  { %12869 = vst [vmem:[#allocation38_spill] sm:$0xff] %v9164_v29  ;;  %v9206_v12 = vpop.f32.mrf.mxu3 }
  0xf3   :  { %12870 = vst [vmem:[#allocation39_spill] sm:$0xff] %v9166_v30  ;;  %v243_v30 = vld [vmem:[%s12527_s0 + $0x4fa] sm:$0xff] }
  0xf4   :  { %12876 = vst [vmem:[#allocation45_spill] sm:$0xff] %v9206_v12 }
  0xf8   :  { %v798_v5 = vld.sshfl [vmem:[#allocation1] sm:$0xff pattern:$0x73625140]  ;;  %v799_v6 = vld.sshfl [vmem:[#allocation1 + $0x8] sm:$0xff pattern:$0x73625140] }
  0xf9   :  { %v800_v7 = vld.sshfl [vmem:[#allocation1 + $0x10] sm:$0xff pattern:$0x73625140]  ;;  %v801_v8 = vld.sshfl [vmem:[#allocation1 + $0x18] sm:$0xff pattern:$0x73625140] }
  0xfa   :  { %805 = vst [vmem:[#allocation1] ss:$4 sm:$0xff] %v181_v0  ;;  %v2645_v0 = vpop.f32.mrf.mxu0  ;;  %v2912_v34 = vpop.f32.mrf.mxu3 }
  0xfb   :  { %806 = vst [vmem:[#allocation1 + $0x1] ss:$4 sm:$0xff] %v183_v1  ;;  %v2646_v1 = vadd.f32 %v2645_v0, %v9125_v37 }
  0xfc   :  { %807 = vst [vmem:[#allocation1 + $0x2] ss:$4 sm:$0xff] %v185_v4  ;;  %v2734_v4 = vpop.f32.mrf.mxu1 }
  0xfd   :  { %808 = vst [vmem:[#allocation1 + $0x3] ss:$4 sm:$0xff] %v187_v9  ;;  %v201_v9 = vld [vmem:[%s12527_s0 + $0x3d4] sm:$0xff] }
 0x102   :  { %v9211_v26 = vpop.f32.mrf.mxu0 }
 0x103   :  { %12877 = vst [vmem:[#allocation46_spill] sm:$0xff] %v9211_v26 }
 0x104   :  { %v813_v43 = vld.sshfl [vmem:[#allocation1] sm:$0xff pattern:$0x73625140]  ;;  %v814_v46 = vld.sshfl [vmem:[#allocation1 + $0x8] sm:$0xff pattern:$0x73625140]  ;;  %v9213_v33 = vpop.f32.mrf.mxu1 }
 0x105   :  { %v9179_v49 = vpack.c.bf16 %v813_v43, %v798_v5  ;;  %v9181_v50 = vpack.c.bf16 %v814_v46, %v799_v6  ;;  %v815_v53 = vld.sshfl [vmem:[#allocation1 + $0x10] sm:$0xff pattern:$0x73625140]  ;;  %v816_v56 = vld.sshfl [vmem:[#allocation1 + $0x18] sm:$0xff pattern:$0x73625140]  ;;  %v2735_v5 = vadd.f32 %v2734_v4, %v2646_v1  ;;  %v9195_v6 = vpop.f32.mrf.mxu2 }
 0x106   :  { %v9183_v57 = vpack.c.bf16 %v815_v53, %v800_v7  ;;  %v9185_v58 = vpack.c.bf16 %v816_v56, %v801_v8  ;;  %820 = vst [vmem:[#allocation1] ss:$4 sm:$0xff] %v189_v36  ;;  %v197_v7 = vld [vmem:[%s12527_s0 + $0x3b8] sm:$0xff]  ;;  %v199_v8 = vld [vmem:[%s12527_s0 + $0x3c6] sm:$0xff] }
 0x107   :  { %12871 = vst [vmem:[#allocation40_spill] sm:$0xff] %v9179_v49  ;;  %2674 = vmatmul.bf16.gmra.mxu0 %v9179_v49  ;;  %2763 = vmatmul.bf16.gmra.mxu1 %v9181_v50  ;;  %v207_v36 = vld [vmem:[%s12527_s0 + $0x3fe] sm:$0xff] }
 0x108   :  { %12872 = vst [vmem:[#allocation41_spill] sm:$0xff] %v9181_v50  ;;  %2852 = vmatmul.bf16.gmra.mxu2 %v9183_v57  ;;  %2941 = vmatmul.bf16.gmra.mxu3 %v9185_v58 }
 0x109   :  { %12873 = vst [vmem:[#allocation42_spill] sm:$0xff] %v9183_v57 }
 0x10a   :  { %12874 = vst [vmem:[#allocation43_spill] sm:$0xff] %v9185_v58 }
 0x10b   :  { %821 = vst [vmem:[#allocation1 + $0x1] ss:$4 sm:$0xff] %v191_v38  ;;  %v209_v38 = vld [vmem:[%s12527_s0 + $0x40c] sm:$0xff] }
 0x10c   :  { %822 = vst [vmem:[#allocation1 + $0x2] ss:$4 sm:$0xff] %v193_v39 }
 0x10d   :  { %823 = vst [vmem:[#allocation1 + $0x3] ss:$4 sm:$0xff] %v195_v61  ;;  %v2823_v24 = vpop.f32.mrf.mxu2 }
 0x10e   :  { %12875 = vst [vmem:[#allocation44_spill] sm:$0xff] %v9195_v6  ;;  %v2824_v25 = vadd.f32 %v2823_v24, %v2735_v5  ;;  %v211_v5 = vld [vmem:[%s12527_s0 + $0x41a] sm:$0xff] }
 0x10f   :  { %12878 = vst [vmem:[#allocation47_spill] sm:$0xff] %v9213_v33 }
 0x110   :  { %v9224_v39 = vadd.f32 %v2912_v34, %v2824_v25  ;;  %v9253_v34 = vpop.f32.mrf.mxu3 }
 0x111   :  { %12884 = vst [vmem:[#allocation53_spill] sm:$0xff] %v9253_v34 }
 0x114   :  { %v828_v10 = vld.sshfl [vmem:[#allocation1] sm:$0xff pattern:$0x73625140]  ;;  %v829_v11 = vld.sshfl [vmem:[#allocation1 + $0x8] sm:$0xff pattern:$0x73625140] }
 0x115   :  { %v830_v15 = vld.sshfl [vmem:[#allocation1 + $0x10] sm:$0xff pattern:$0x73625140]  ;;  %v831_v18 = vld.sshfl [vmem:[#allocation1 + $0x18] sm:$0xff pattern:$0x73625140] }
 0x116   :  { %835 = vst [vmem:[#allocation1] ss:$4 sm:$0xff] %v197_v7  ;;  %v2650_v7 = vpop.f32.mrf.mxu0 }
 0x117   :  { %836 = vst [vmem:[#allocation1 + $0x1] ss:$4 sm:$0xff] %v199_v8  ;;  %v2651_v8 = vadd.f32 %v2650_v7, %v9125_v37  ;;  %v7423_v7 = vld [vmem:[#allocation3 + $0x50] sm:$0xf0] }
 0x118   :  { %837 = vst [vmem:[#allocation1 + $0x2] ss:$4 sm:$0xff] %v201_v9  ;;  %v2739_v9 = vpop.f32.mrf.mxu1  ;;  %v2917_v12 = vpop.f32.mrf.mxu3 }
 0x119   :  { %838 = vst [vmem:[#allocation1 + $0x3] ss:$4 sm:$0xff] %v203_v23  ;;  %v217_v23 = vld [vmem:[%s12527_s0 + $0x444] sm:$0xff] }
 0x11e   :  { %v9258_v34 = vpop.f32.mrf.mxu0 }
 0x11f   :  { %12885 = vst [vmem:[#allocation54_spill] sm:$0xff] %v9258_v34 }
 0x120   :  { %v843_v43 = vld.sshfl [vmem:[#allocation1] sm:$0xff pattern:$0x73625140]  ;;  %v844_v46 = vld.sshfl [vmem:[#allocation1 + $0x8] sm:$0xff pattern:$0x73625140]  ;;  %v9260_v33 = vpop.f32.mrf.mxu1 }
 0x121   :  { %v9226_v53 = vpack.c.bf16 %v843_v43, %v828_v10  ;;  %v9228_v56 = vpack.c.bf16 %v844_v46, %v829_v11  ;;  %v845_v61 = vld.sshfl [vmem:[#allocation1 + $0x10] sm:$0xff pattern:$0x73625140]  ;;  %v846_v0 = vld.sshfl [vmem:[#allocation1 + $0x18] sm:$0xff pattern:$0x73625140]  ;;  %v2740_v10 = vadd.f32 %v2739_v9, %v2651_v8  ;;  %v9242_v11 = vpop.f32.mrf.mxu2 }
 0x122   :  { %v9230_v1 = vpack.c.bf16 %v845_v61, %v830_v15  ;;  %v9232_v4 = vpack.c.bf16 %v846_v0, %v831_v18  ;;  %850 = vst [vmem:[#allocation1] ss:$4 sm:$0xff] %v205_v35  ;;  %v213_v15 = vld [vmem:[%s12527_s0 + $0x428] sm:$0xff]  ;;  %v215_v18 = vld [vmem:[%s12527_s0 + $0x436] sm:$0xff] }
 0x123   :  { %12879 = vst [vmem:[#allocation48_spill] sm:$0xff] %v9226_v53  ;;  %2679 = vmatmul.bf16.gmra.mxu0 %v9226_v53  ;;  %2768 = vmatmul.bf16.gmra.mxu1 %v9228_v56  ;;  %v7933_v43 = vld [vmem:[#allocation3 + $0x440] sm:$0xf]  ;;  %v8631_v46 = vld [vmem:[#allocation3 + $0x44c] sm:$0xf0] }
 0x124   :  { %12880 = vst [vmem:[#allocation49_spill] sm:$0xff] %v9228_v56  ;;  %2857 = vmatmul.bf16.gmra.mxu2 %v9230_v1  ;;  %2946 = vmatmul.bf16.gmra.mxu3 %v9232_v4  ;;  %v8501_v61 = vld [vmem:[#allocation3 + $0x44] sm:$0xf]  ;;  %v8061_v9 = vld [vmem:[#allocation3 + $0x540] sm:$0xf] }
 0x125   :  { %12881 = vst [vmem:[#allocation50_spill] sm:$0xff] %v9230_v1  ;;  %v7426_v26 = vor.u32 %v8501_v61, %v7423_v7 }
 0x126   :  { %12882 = vst [vmem:[#allocation51_spill] sm:$0xff] %v9232_v4 }
 0x127   :  { %851 = vst [vmem:[#allocation1 + $0x1] ss:$4 sm:$0xff] %v207_v36  ;;  %3259 = vmatpush.bf16.msrb.mxu3 %v7426_v26 }
 0x128   :  { %852 = vst [vmem:[#allocation1 + $0x2] ss:$4 sm:$0xff] %v209_v38  ;;  %v219_v38 = vld [vmem:[%s12527_s0 + $0x452] sm:$0xff]  ;;  %v2744_v26 = vpop.f32.mrf.mxu1 }
 0x129   :  { %853 = vst [vmem:[#allocation1 + $0x3] ss:$4 sm:$0xff] %v211_v5  ;;  %v2828_v0 = vpop.f32.mrf.mxu2  ;;  %v7934_v5 = vor.u32 %v8631_v46, %v7933_v43 }
 0x12a   :  { %12883 = vst [vmem:[#allocation52_spill] sm:$0xff] %v9242_v11  ;;  %v2829_v8 = vadd.f32 %v2828_v0, %v2740_v10  ;;  %v8663_v11 = vld [vmem:[#allocation3 + $0x54c] sm:$0xf0] }
 0x12b   :  { %12886 = vst [vmem:[#allocation55_spill] sm:$0xff] %v9260_v33  ;;  %v8062_v6 = vor.u32 %v8663_v11, %v8061_v9  ;;  %v225_v10 = vld [vmem:[%s12527_s0 + $0x47c] sm:$0xff]  ;;  %2992 = vmatpush.bf16.msrb.mxu0 %v7934_v5  ;;  %v227_v5 = vld [vmem:[%s12527_s0 + $0x48a] sm:$0xff] }
 0x12d   :  { %3081 = vmatpush.bf16.msrb.mxu1 %v8062_v6  ;;  %v2655_v6 = vpop.f32.mrf.mxu0 }
 0x130   :  { %v858_v24 = vld.sshfl [vmem:[#allocation1] sm:$0xff pattern:$0x73625140]  ;;  %v859_v25 = vld.sshfl [vmem:[#allocation1 + $0x8] sm:$0xff pattern:$0x73625140] }
 0x131   :  { %v860_v35 = vld.sshfl [vmem:[#allocation1 + $0x10] sm:$0xff pattern:$0x73625140]  ;;  %v861_v36 = vld.sshfl [vmem:[#allocation1 + $0x18] sm:$0xff pattern:$0x73625140] }
 0x132   :  { %865 = vst [vmem:[#allocation1] ss:$4 sm:$0xff] %v213_v15  ;;  %v221_v15 = vld [vmem:[%s12527_s0 + $0x460] sm:$0xff] }
 0x133   :  { %866 = vst [vmem:[#allocation1 + $0x1] ss:$4 sm:$0xff] %v215_v18  ;;  %v223_v18 = vld [vmem:[%s12527_s0 + $0x46e] sm:$0xff] }
 0x134   :  { %867 = vst [vmem:[#allocation1 + $0x2] ss:$4 sm:$0xff] %v217_v23  ;;  %v9271_v23 = vadd.f32 %v2917_v12, %v2829_v8  ;;  %v2656_v12 = vadd.f32 %v2655_v6, %v9125_v37  ;;  %v233_v8 = vld [vmem:[%s12527_s0 + $0x4b4] sm:$0xff] }
 0x135   :  { %868 = vst [vmem:[#allocation1 + $0x3] ss:$4 sm:$0xff] %v219_v38  ;;  %v9305_v6 = vpop.f32.mrf.mxu0 }
 0x136   :  { %12893 = vst [vmem:[#allocation62_spill] sm:$0xff] %v9305_v6 }
 0x13c   :  { %v873_v38 = vld.sshfl [vmem:[#allocation1] sm:$0xff pattern:$0x73625140]  ;;  %v874_v43 = vld.sshfl [vmem:[#allocation1 + $0x8] sm:$0xff pattern:$0x73625140] }
 0x13d   :  { %v9273_v11 = vpack.c.bf16 %v873_v38, %v858_v24  ;;  %v9275_v46 = vpack.c.bf16 %v874_v43, %v859_v25  ;;  %v875_v61 = vld.sshfl [vmem:[#allocation1 + $0x10] sm:$0xff pattern:$0x73625140]  ;;  %v876_v0 = vld.sshfl [vmem:[#allocation1 + $0x18] sm:$0xff pattern:$0x73625140]  ;;  %v2745_v24 = vadd.f32 %v2744_v26, %v2656_v12  ;;  %v9289_v25 = vpop.f32.mrf.mxu2  ;;  %v9307_v12 = vpop.f32.mrf.mxu1 }
 0x13e   :  { %v9277_v7 = vpack.c.bf16 %v875_v61, %v860_v35  ;;  %v9279_v9 = vpack.c.bf16 %v876_v0, %v861_v36  ;;  %880 = vst [vmem:[#allocation1] ss:$4 sm:$0xff] %v221_v15  ;;  %v229_v35 = vld [vmem:[%s12527_s0 + $0x498] sm:$0xff]  ;;  %v231_v36 = vld [vmem:[%s12527_s0 + $0x4a6] sm:$0xff] }
 0x13f   :  { %12887 = vst [vmem:[#allocation56_spill] sm:$0xff] %v9273_v11  ;;  %2684 = vmatmul.bf16.gmra.mxu0 %v9273_v11  ;;  %2773 = vmatmul.bf16.gmra.mxu1 %v9275_v46  ;;  %v235_v61 = vld [vmem:[%s12527_s0 + $0x4c2] sm:$0xff] }
 0x140   :  { %12888 = vst [vmem:[#allocation57_spill] sm:$0xff] %v9275_v46  ;;  %2862 = vmatmul.bf16.gmra.mxu2 %v9277_v7  ;;  %2951 = vmatmul.bf16.gmra.mxu3 %v9279_v9 }
 0x141   :  { %12889 = vst [vmem:[#allocation58_spill] sm:$0xff] %v9277_v7 }
 0x142   :  { %12890 = vst [vmem:[#allocation59_spill] sm:$0xff] %v9279_v9  ;;  %v8659_v9 = vld [vmem:[#allocation3 + $0x52c] sm:$0xf0] }
 0x143   :  { %881 = vst [vmem:[#allocation1 + $0x1] ss:$4 sm:$0xff] %v223_v18 }
 0x144   :  { %882 = vst [vmem:[#allocation1 + $0x2] ss:$4 sm:$0xff] %v225_v10  ;;  %v9300_v10 = vpop.f32.mrf.mxu3 }
 0x145   :  { %883 = vst [vmem:[#allocation1 + $0x3] ss:$4 sm:$0xff] %v227_v5  ;;  %v2833_v0 = vpop.f32.mrf.mxu2 }
 0x146   :  { %12891 = vst [vmem:[#allocation60_spill] sm:$0xff] %v9289_v25  ;;  %v2834_v5 = vadd.f32 %v2833_v0, %v2745_v24  ;;  %v239_v25 = vld [vmem:[%s12527_s0 + $0x4de] sm:$0xff] }
 0x147   :  { %12892 = vst [vmem:[#allocation61_spill] sm:$0xff] %v9300_v10  ;;  %v237_v10 = vld [vmem:[%s12527_s0 + $0x4d0] sm:$0xff] }
 0x148   :  { %12894 = vst [vmem:[#allocation63_spill] sm:$0xff] %v9307_v12 }
 0x14c   :  { %v888_v15 = vld.sshfl [vmem:[#allocation1] sm:$0xff pattern:$0x73625140]  ;;  %v889_v18 = vld.sshfl [vmem:[#allocation1 + $0x8] sm:$0xff pattern:$0x73625140]  ;;  %v2922_v26 = vpop.f32.mrf.mxu3 }
 0x14d   :  { %v890_v38 = vld.sshfl [vmem:[#allocation1 + $0x10] sm:$0xff pattern:$0x73625140]  ;;  %v891_v43 = vld.sshfl [vmem:[#allocation1 + $0x18] sm:$0xff pattern:$0x73625140] }
 0x14e   :  { %895 = vst [vmem:[#allocation1] ss:$4 sm:$0xff] %v229_v35  ;;  %v241_v35 = vld [vmem:[%s12527_s0 + $0x4ec] sm:$0xff] }
 0x14f   :  { %896 = vst [vmem:[#allocation1 + $0x1] ss:$4 sm:$0xff] %v231_v36  ;;  %v9318_v36 = vadd.f32 %v2922_v26, %v2834_v5  ;;  %v9336_v5 = vpop.f32.mrf.mxu2 }
 0x150   :  { %897 = vst [vmem:[#allocation1 + $0x2] ss:$4 sm:$0xff] %v233_v8 }
 0x151   :  { %898 = vst [vmem:[#allocation1 + $0x3] ss:$4 sm:$0xff] %v235_v61 }
 0x152   :  { %12899 = vst [vmem:[#allocation68_spill] sm:$0xff] %v9336_v5 }
 0x154   :  { %v9347_v26 = vpop.f32.mrf.mxu3 }
 0x155   :  { %12900 = vst [vmem:[#allocation69_spill] sm:$0xff] %v9347_v26 }
 0x157   :  { %v2838_v5 = vpop.f32.mrf.mxu2 }
 0x158   :  { %v903_v24 = vld.sshfl [vmem:[#allocation1] sm:$0xff pattern:$0x73625140]  ;;  %v904_v8 = vld.sshfl [vmem:[#allocation1 + $0x8] sm:$0xff pattern:$0x73625140] }
 0x159   :  { %v9320_v61 = vpack.c.bf16 %v903_v24, %v888_v15  ;;  %v9322_v0 = vpack.c.bf16 %v904_v8, %v889_v18  ;;  %v905_v12 = vld.sshfl [vmem:[#allocation1 + $0x10] sm:$0xff pattern:$0x73625140]  ;;  %v906_v6 = vld.sshfl [vmem:[#allocation1 + $0x18] sm:$0xff pattern:$0x73625140]  ;;  %v2660_v15 = vpop.f32.mrf.mxu0 }
 0x15a   :  { %v9324_v33 = vpack.c.bf16 %v905_v12, %v890_v38  ;;  %v9326_v34 = vpack.c.bf16 %v906_v6, %v891_v43  ;;  %910 = vst [vmem:[#allocation1] ss:$4 sm:$0xff] %v237_v10  ;;  %v2661_v18 = vadd.f32 %v2660_v15, %v9125_v37  ;;  %v2749_v38 = vpop.f32.mrf.mxu1  ;;  %v245_v10 = vld [vmem:[%s12527_s0 + $0x508] sm:$0xff]  ;;  %v251_v8 = vld [vmem:[%s12527_s0 + $0x532] sm:$0xff] }
 0x15b   :  { %12895 = vst [vmem:[#allocation64_spill] sm:$0xff] %v9320_v61  ;;  %2689 = vmatmul.bf16.gmra.mxu0 %v9320_v61  ;;  %2778 = vmatmul.bf16.gmra.mxu1 %v9322_v0  ;;  %v249_v6 = vld [vmem:[%s12527_s0 + $0x524] sm:$0xff] }
 0x15c   :  { %12896 = vst [vmem:[#allocation65_spill] sm:$0xff] %v9322_v0  ;;  %2867 = vmatmul.bf16.gmra.mxu2 %v9324_v33  ;;  %2956 = vmatmul.bf16.gmra.mxu3 %v9326_v34  ;;  %v2750_v43 = vadd.f32 %v2749_v38, %v2661_v18  ;;  %v7917_v15 = vld [vmem:[#allocation3 + $0x420] sm:$0xf]  ;;  %v8627_v18 = vld [vmem:[#allocation3 + $0x42c] sm:$0xf0]  ;;  %v2927_v4 = vpop.f32.mrf.mxu3 }
 0x15d   :  { %12897 = vst [vmem:[#allocation66_spill] sm:$0xff] %v9324_v33  ;;  %v8497_v38 = vld [vmem:[#allocation3 + $0x24] sm:$0xf]  ;;  %v7918_v29 = vor.u32 %v8627_v18, %v7917_v15  ;;  %v8045_v0 = vld [vmem:[#allocation3 + $0x520] sm:$0xf] }
 0x15e   :  { %12898 = vst [vmem:[#allocation67_spill] sm:$0xff] %v9326_v34  ;;  %v7407_v34 = vld [vmem:[#allocation3 + $0x30] sm:$0xf0]  ;;  %v2839_v33 = vadd.f32 %v2838_v5, %v2750_v43  ;;  %v8046_v1 = vor.u32 %v8659_v9, %v8045_v0 }
 0x15f   :  { %911 = vst [vmem:[#allocation1 + $0x1] ss:$4 sm:$0xff] %v239_v25  ;;  %v247_v25 = vld [vmem:[%s12527_s0 + $0x516] sm:$0xff]  ;;  %v7410_v46 = vor.u32 %v8497_v38, %v7407_v34  ;;  %2993 = vmatpush.bf16.msrb.mxu0 %v7918_v29  ;;  %v259_v29 = vld [vmem:[%s12527_s0 + $0x56a] sm:$0xff] }
 0x160   :  { %912 = vst [vmem:[#allocation1 + $0x2] ss:$4 sm:$0xff] %v241_v35  ;;  %v257_v43 = vld [vmem:[%s12527_s0 + $0x55c] sm:$0xff]  ;;  %v9365_v5 = vadd.f32 %v2927_v4, %v2839_v33  ;;  %3082 = vmatpush.bf16.msrb.mxu1 %v8046_v1 }
 0x161   :  { %913 = vst [vmem:[#allocation1 + $0x3] ss:$4 sm:$0xff] %v243_v30  ;;  %v9352_v26 = vpop.f32.mrf.mxu0  ;;  %3260 = vmatpush.bf16.msrb.mxu3 %v7410_v46 }
 0x162   :  { %12901 = vst [vmem:[#allocation70_spill] sm:$0xff] %v9352_v26  ;;  %v9354_v7 = vpop.f32.mrf.mxu1 }
 0x163   :  { %12902 = vst [vmem:[#allocation71_spill] sm:$0xff] %v9354_v7 }
 0x168   :  { %v918_v30 = vld.sshfl [vmem:[#allocation1] sm:$0xff pattern:$0x73625140]  ;;  %v919_v12 = vld.sshfl [vmem:[#allocation1 + $0x8] sm:$0xff pattern:$0x73625140] }
 0x169   :  { %v920_v35 = vld.sshfl [vmem:[#allocation1 + $0x10] sm:$0xff pattern:$0x73625140]  ;;  %v921_v24 = vld.sshfl [vmem:[#allocation1 + $0x18] sm:$0xff pattern:$0x73625140]  ;;  %v2665_v33 = vpop.f32.mrf.mxu0 }
 0x16a   :  { %925 = vst [vmem:[#allocation1] ss:$4 sm:$0xff] %v245_v10  ;;  %v253_v10 = vld [vmem:[%s12527_s0 + $0x540] sm:$0xff]  ;;  %v2666_v1 = vadd.f32 %v2665_v33, %v9125_v37  ;;  %v2754_v4 = vpop.f32.mrf.mxu1 }
 0x16b   :  { %926 = vst [vmem:[#allocation1 + $0x1] ss:$4 sm:$0xff] %v247_v25  ;;  %v255_v25 = vld [vmem:[%s12527_s0 + $0x54e] sm:$0xff] }
 0x16c   :  { %927 = vst [vmem:[#allocation1 + $0x2] ss:$4 sm:$0xff] %v249_v6  ;;  %v2755_v46 = vadd.f32 %v2754_v4, %v2666_v1 }
 0x16d   :  { %928 = vst [vmem:[#allocation1 + $0x3] ss:$4 sm:$0xff] %v251_v8 }
 0x171   :  { %v9399_v33 = vpop.f32.mrf.mxu0 }
 0x172   :  { %12909 = vst [vmem:[#allocation78_spill] sm:$0xff] %v9399_v33  ;;  %v9401_v1 = vpop.f32.mrf.mxu1 }
 0x173   :  { %12910 = vst [vmem:[#allocation79_spill] sm:$0xff] %v9401_v1 }
 0x174   :  { %v933_v6 = vld.sshfl [vmem:[#allocation1] sm:$0xff pattern:$0x73625140]  ;;  %v934_v8 = vld.sshfl [vmem:[#allocation1 + $0x8] sm:$0xff pattern:$0x73625140] }
 0x175   :  { %v9367_v34 = vpack.c.bf16 %v933_v6, %v918_v30  ;;  %v9369_v9 = vpack.c.bf16 %v934_v8, %v919_v12  ;;  %v935_v0 = vld.sshfl [vmem:[#allocation1 + $0x10] sm:$0xff pattern:$0x73625140]  ;;  %v936_v15 = vld.sshfl [vmem:[#allocation1 + $0x18] sm:$0xff pattern:$0x73625140]  ;;  %v9383_v30 = vpop.f32.mrf.mxu2 }
 0x176   :  { %v9371_v18 = vpack.c.bf16 %v935_v0, %v920_v35  ;;  %v9373_v38 = vpack.c.bf16 %v936_v15, %v921_v24  ;;  %940 = vst [vmem:[#allocation1] ss:$4 sm:$0xff] %v253_v10  ;;  %v261_v12 = vld [vmem:[%s12527_s0 + $0x578] sm:$0xff]  ;;  %v263_v35 = vld [vmem:[%s12527_s0 + $0x586] sm:$0xff] }
 0x177   :  { %12903 = vst [vmem:[#allocation72_spill] sm:$0xff] %v9367_v34  ;;  %2694 = vmatmul.bf16.gmra.mxu0 %v9367_v34  ;;  %2783 = vmatmul.bf16.gmra.mxu1 %v9369_v9  ;;  %v265_v24 = vld [vmem:[%s12527_s0 + $0x594] sm:$0xff]  ;;  %v267_v0 = vld [vmem:[%s12527_s0 + $0x5a2] sm:$0xff] }
 0x178   :  { %12904 = vst [vmem:[#allocation73_spill] sm:$0xff] %v9369_v9  ;;  %2872 = vmatmul.bf16.gmra.mxu2 %v9371_v18  ;;  %2961 = vmatmul.bf16.gmra.mxu3 %v9373_v38  ;;  %v8655_v9 = vld [vmem:[#allocation3 + $0x50c] sm:$0xf0] }
 0x179   :  { %12905 = vst [vmem:[#allocation74_spill] sm:$0xff] %v9371_v18  ;;  %v8029_v18 = vld [vmem:[#allocation3 + $0x500] sm:$0xf] }
 0x17a   :  { %12906 = vst [vmem:[#allocation75_spill] sm:$0xff] %v9373_v38  ;;  %v275_v38 = vld [vmem:[%s12527_s0 + $0x5da] sm:$0xff]  ;;  %v8030_v50 = vor.u32 %v8655_v9, %v8029_v18 }
 0x17b   :  { %941 = vst [vmem:[#allocation1 + $0x1] ss:$4 sm:$0xff] %v255_v25 }
 0x17c   :  { %942 = vst [vmem:[#allocation1 + $0x2] ss:$4 sm:$0xff] %v257_v43  ;;  %v9394_v43 = vpop.f32.mrf.mxu3  ;;  %3083 = vmatpush.bf16.msrb.mxu1 %v8030_v50 }
 0x17d   :  { %943 = vst [vmem:[#allocation1 + $0x3] ss:$4 sm:$0xff] %v259_v29  ;;  %v2843_v15 = vpop.f32.mrf.mxu2 }
 0x17e   :  { %12907 = vst [vmem:[#allocation76_spill] sm:$0xff] %v9383_v30  ;;  %v2844_v29 = vadd.f32 %v2843_v15, %v2755_v46  ;;  %v271_v30 = vld [vmem:[%s12527_s0 + $0x5be] sm:$0xff] }
 0x17f   :  { %12908 = vst [vmem:[#allocation77_spill] sm:$0xff] %v9394_v43  ;;  %v269_v43 = vld [vmem:[%s12527_s0 + $0x5b0] sm:$0xff] }
 0x184   :  { %v948_v10 = vld.sshfl [vmem:[#allocation1] sm:$0xff pattern:$0x73625140]  ;;  %v949_v25 = vld.sshfl [vmem:[#allocation1 + $0x8] sm:$0xff pattern:$0x73625140]  ;;  %v2932_v4 = vpop.f32.mrf.mxu3 }
 0x185   :  { %v950_v6 = vld.sshfl [vmem:[#allocation1 + $0x10] sm:$0xff pattern:$0x73625140]  ;;  %v951_v8 = vld.sshfl [vmem:[#allocation1 + $0x18] sm:$0xff pattern:$0x73625140] }
 0x186   :  { %955 = vst [vmem:[#allocation1] ss:$4 sm:$0xff] %v261_v12  ;;  %v273_v12 = vld [vmem:[%s12527_s0 + $0x5cc] sm:$0xff] }
 0x187   :  { %956 = vst [vmem:[#allocation1 + $0x1] ss:$4 sm:$0xff] %v263_v35  ;;  %v9412_v35 = vadd.f32 %v2932_v4, %v2844_v29  ;;  %v9430_v29 = vpop.f32.mrf.mxu2 }
 0x188   :  { %957 = vst [vmem:[#allocation1 + $0x2] ss:$4 sm:$0xff] %v265_v24 }
 0x189   :  { %958 = vst [vmem:[#allocation1 + $0x3] ss:$4 sm:$0xff] %v267_v0 }
 0x18a   :  { %12915 = vst [vmem:[#allocation84_spill] sm:$0xff] %v9430_v29 }
 0x18c   :  { %v9441_v4 = vpop.f32.mrf.mxu3 }
 0x18d   :  { %12916 = vst [vmem:[#allocation85_spill] sm:$0xff] %v9441_v4 }
 0x18f   :  { %v2848_v29 = vpop.f32.mrf.mxu2 }
 0x190   :  { %v963_v46 = vld.sshfl [vmem:[#allocation1] sm:$0xff pattern:$0x73625140]  ;;  %v964_v24 = vld.sshfl [vmem:[#allocation1 + $0x8] sm:$0xff pattern:$0x73625140] }
 0x191   :  { %v9414_v0 = vpack.c.bf16 %v963_v46, %v948_v10  ;;  %v9416_v15 = vpack.c.bf16 %v964_v24, %v949_v25  ;;  %v965_v1 = vld.sshfl [vmem:[#allocation1 + $0x10] sm:$0xff pattern:$0x73625140]  ;;  %v966_v33 = vld.sshfl [vmem:[#allocation1 + $0x18] sm:$0xff pattern:$0x73625140]  ;;  %v2670_v10 = vpop.f32.mrf.mxu0 }
 0x192   :  { %v9418_v7 = vpack.c.bf16 %v965_v1, %v950_v6  ;;  %v9420_v26 = vpack.c.bf16 %v966_v33, %v951_v8  ;;  %970 = vst [vmem:[#allocation1] ss:$4 sm:$0xff] %v269_v43  ;;  %v2671_v25 = vadd.f32 %v2670_v10, %v9125_v37  ;;  %v2759_v6 = vpop.f32.mrf.mxu1  ;;  %v277_v43 = vld [vmem:[%s12527_s0 + $0x5e8] sm:$0xff]  ;;  %v283_v24 = vld [vmem:[%s12527_s0 + $0x612] sm:$0xff] }
 0x193   :  { %12911 = vst [vmem:[#allocation80_spill] sm:$0xff] %v9414_v0  ;;  %2699 = vmatmul.bf16.gmra.mxu0 %v9414_v0  ;;  %2788 = vmatmul.bf16.gmra.mxu1 %v9416_v15  ;;  %v281_v33 = vld [vmem:[%s12527_s0 + $0x604] sm:$0xff] }
 0x194   :  { %12912 = vst [vmem:[#allocation81_spill] sm:$0xff] %v9416_v15  ;;  %2877 = vmatmul.bf16.gmra.mxu2 %v9418_v7  ;;  %2966 = vmatmul.bf16.gmra.mxu3 %v9420_v26  ;;  %v2760_v8 = vadd.f32 %v2759_v6, %v2671_v25  ;;  %v7901_v10 = vld [vmem:[#allocation3 + $0x400] sm:$0xf]  ;;  %v8623_v25 = vld [vmem:[#allocation3 + $0x40c] sm:$0xf0]  ;;  %v2937_v57 = vpop.f32.mrf.mxu3 }
 0x195   :  { %12913 = vst [vmem:[#allocation82_spill] sm:$0xff] %v9418_v7  ;;  %v8493_v6 = vld [vmem:[#allocation3 + $0x4] sm:$0xf]  ;;  %v7391_v7 = vld [vmem:[#allocation3 + $0x10] sm:$0xf0] }
 0x196   :  { %12914 = vst [vmem:[#allocation83_spill] sm:$0xff] %v9420_v26  ;;  %v7902_v26 = vor.u32 %v8623_v25, %v7901_v10  ;;  %v2849_v15 = vadd.f32 %v2848_v29, %v2760_v8  ;;  %v7394_v58 = vor.u32 %v8493_v6, %v7391_v7  ;;  %v289_v8 = vld [vmem:[%s12527_s0 + $0x63c] sm:$0xff] }
 0x197   :  { %971 = vst [vmem:[#allocation1 + $0x1] ss:$4 sm:$0xff] %v271_v30  ;;  %v279_v30 = vld [vmem:[%s12527_s0 + $0x5f6] sm:$0xff] }
 0x198   :  { %972 = vst [vmem:[#allocation1 + $0x2] ss:$4 sm:$0xff] %v273_v12  ;;  %2994 = vmatpush.bf16.msrb.mxu0 %v7902_v26  ;;  %v9459_v29 = vadd.f32 %v2937_v57, %v2849_v15  ;;  %3261 = vmatpush.bf16.msrb.mxu3 %v7394_v58  ;;  %v291_v26 = vld [vmem:[%s12527_s0 + $0x64a] sm:$0xff] }
 0x199   :  { %973 = vst [vmem:[#allocation1 + $0x3] ss:$4 sm:$0xff] %v275_v38  ;;  %v9446_v4 = vpop.f32.mrf.mxu0 }
 0x19a   :  { %12917 = vst [vmem:[#allocation86_spill] sm:$0xff] %v9446_v4  ;;  %v9448_v56 = vpop.f32.mrf.mxu1 }
 0x19b   :  { %12918 = vst [vmem:[#allocation87_spill] sm:$0xff] %v9448_v56 }
 0x19c   :  { %3343 = vmatpush.bf16.msra.mxu0 %v7634_v19 }
 0x1a0   :  { %v978_v38 = vld.sshfl [vmem:[#allocation1] sm:$0xff pattern:$0x73625140]  ;;  %v979_v1 = vld.sshfl [vmem:[#allocation1 + $0x8] sm:$0xff pattern:$0x73625140] }
 0x1a1   :  { %v980_v12 = vld.sshfl [vmem:[#allocation1 + $0x10] sm:$0xff pattern:$0x73625140]  ;;  %v981_v46 = vld.sshfl [vmem:[#allocation1 + $0x18] sm:$0xff pattern:$0x73625140]  ;;  %v2675_v50 = vpop.f32.mrf.mxu0 }
 0x1a2   :  { %985 = vst [vmem:[#allocation1] ss:$4 sm:$0xff] %v277_v43  ;;  %v285_v43 = vld [vmem:[%s12527_s0 + $0x620] sm:$0xff]  ;;  %v2676_v57 = vadd.f32 %v2675_v50, %v9125_v37  ;;  %v2764_v58 = vpop.f32.mrf.mxu1 }
 0x1a3   :  { %986 = vst [vmem:[#allocation1 + $0x1] ss:$4 sm:$0xff] %v279_v30  ;;  %v287_v30 = vld [vmem:[%s12527_s0 + $0x62e] sm:$0xff]  ;;  %v66_v50 = vld [vmem:[%s12527_s0 + $0x24] sm:$0x3f] }
 0x1a4   :  { %987 = vst [vmem:[#allocation1 + $0x2] ss:$4 sm:$0xff] %v281_v33  ;;  %v2765_v15 = vadd.f32 %v2764_v58, %v2676_v57  ;;  %v68_v57 = vld [vmem:[%s12527_s0 + $0x32] sm:$0x3f] }
 0x1a5   :  { %988 = vst [vmem:[#allocation1 + $0x3] ss:$4 sm:$0xff] %v283_v24 }
 0x1a6   :  { %585 = vst [vmem:[#allocation1 + $0x22] ss:$4 sm:$0xff] %v66_v50 }
 0x1a7   :  { %587 = vst [vmem:[#allocation1 + $0x23] ss:$4 sm:$0xff] %v68_v57 }
 0x1ac   :  { %v993_v33 = vld.sshfl [vmem:[#allocation1] sm:$0xff pattern:$0x73625140]  ;;  %v994_v24 = vld.sshfl [vmem:[#allocation1 + $0x8] sm:$0xff pattern:$0x73625140] }
 0x1ad   :  { %v9461_v7 = vpack.c.bf16 %v993_v33, %v978_v38  ;;  %v9463_v9 = vpack.c.bf16 %v994_v24, %v979_v1  ;;  %v995_v18 = vld.sshfl [vmem:[#allocation1 + $0x10] sm:$0xff pattern:$0x73625140]  ;;  %v996_v10 = vld.sshfl [vmem:[#allocation1 + $0x18] sm:$0xff pattern:$0x73625140]  ;;  %v9477_v38 = vpop.f32.mrf.mxu2  ;;  %v9479_v1 = vpop.f32.mrf.mxu3 }
 0x1ae   :  { %v9465_v25 = vpack.c.bf16 %v995_v18, %v980_v12  ;;  %v9467_v6 = vpack.c.bf16 %v996_v10, %v981_v46  ;;  %1000 = vst [vmem:[#allocation1] ss:$4 sm:$0xff] %v285_v43  ;;  %v293_v12 = vld [vmem:[%s12527_s0 + $0x658] sm:$0xff]  ;;  %v295_v46 = vld [vmem:[%s12527_s0 + $0x666] sm:$0xff] }
 0x1af   :  { %12919 = vst [vmem:[#allocation88_spill] sm:$0xff] %v9461_v7  ;;  %2704 = vmatmul.bf16.gmra.mxu0 %v9461_v7  ;;  %2793 = vmatmul.bf16.gmra.mxu1 %v9463_v9  ;;  %v297_v43 = vld [vmem:[%s12527_s0 + $0x674] sm:$0xff]  ;;  %v299_v18 = vld [vmem:[%s12527_s0 + $0x682] sm:$0xff] }
 0x1b0   :  { %12920 = vst [vmem:[#allocation89_spill] sm:$0xff] %v9463_v9  ;;  %2882 = vmatmul.bf16.gmra.mxu2 %v9465_v25  ;;  %2971 = vmatmul.bf16.gmra.mxu3 %v9467_v6  ;;  %v62_v10 = vld [vmem:[%s12527_s0 + $0x8] sm:$0x3f]  ;;  %v7887_v9 = vld [vmem:[#allocation3 + $0x3f0] sm:$0xf0] }
 0x1b1   :  { %12921 = vst [vmem:[#allocation90_spill] sm:$0xff] %v9465_v25  ;;  %v8617_v25 = vld [vmem:[#allocation3 + $0x3e4] sm:$0xf] }
 0x1b2   :  { %12922 = vst [vmem:[#allocation91_spill] sm:$0xff] %v9467_v6  ;;  %v307_v6 = vld [vmem:[%s12527_s0 + $0x6ba] sm:$0xff]  ;;  %v7890_v60 = vor.u32 %v8617_v25, %v7887_v9  ;;  %v8585_v9 = vld [vmem:[#allocation3 + $0x2e4] sm:$0xf] }
 0x1b3   :  { %1001 = vst [vmem:[#allocation1 + $0x1] ss:$4 sm:$0xff] %v287_v30  ;;  %v7759_v25 = vld [vmem:[#allocation3 + $0x2f0] sm:$0xf0] }
 0x1b4   :  { %1002 = vst [vmem:[#allocation1 + $0x2] ss:$4 sm:$0xff] %v289_v8  ;;  %3521 = vmatpush.bf16.msra.mxu2 %v7890_v60  ;;  %v7762_v59 = vor.u32 %v8585_v9, %v7759_v25  ;;  %v82_v60 = vld [vmem:[%s12527_s0 + $0x94] sm:$0x3f] }
 0x1b5   :  { %1003 = vst [vmem:[#allocation1 + $0x3] ss:$4 sm:$0xff] %v291_v26  ;;  %v64_v26 = vld [vmem:[%s12527_s0 + $0x16] sm:$0x3f]  ;;  %v2853_v58 = vpop.f32.mrf.mxu2 }
 0x1b6   :  { %12923 = vst [vmem:[#allocation92_spill] sm:$0xff] %v9477_v38  ;;  %3432 = vmatpush.bf16.msra.mxu1 %v7762_v59 }
 0x1b7   :  { %12924 = vst [vmem:[#allocation93_spill] sm:$0xff] %v9479_v1  ;;  %v301_v1 = vld [vmem:[%s12527_s0 + $0x690] sm:$0xff] }
 0x1b8   :  { %581 = vst [vmem:[#allocation1 + $0x20] ss:$4 sm:$0xff] %v62_v10  ;;  %v303_v10 = vld [vmem:[%s12527_s0 + $0x69e] sm:$0xff] }
 0x1b9   :  { %583 = vst [vmem:[#allocation1 + $0x21] ss:$4 sm:$0xff] %v64_v26  ;;  %v305_v26 = vld [vmem:[%s12527_s0 + $0x6ac] sm:$0xff] }
 0x1bc   :  { %v1008_v30 = vld.sshfl [vmem:[#allocation1] sm:$0xff pattern:$0x73625140]  ;;  %v1009_v8 = vld.sshfl [vmem:[#allocation1 + $0x8] sm:$0xff pattern:$0x73625140] }
 0x1bd   :  { %v1010_v33 = vld.sshfl [vmem:[#allocation1 + $0x10] sm:$0xff pattern:$0x73625140]  ;;  %v1011_v24 = vld.sshfl [vmem:[#allocation1 + $0x18] sm:$0xff pattern:$0x73625140] }
 0x1be   :  { %1015 = vst [vmem:[#allocation1] ss:$4 sm:$0xff] %v293_v12  ;;  %v2942_v12 = vpop.f32.mrf.mxu3 }
 0x1bf   :  { %1016 = vst [vmem:[#allocation1 + $0x1] ss:$4 sm:$0xff] %v295_v46  ;;  %v2854_v46 = vadd.f32 %v2853_v58, %v2765_v15 }
 0x1c0   :  { %1017 = vst [vmem:[#allocation1 + $0x2] ss:$4 sm:$0xff] %v297_v43  ;;  %v9505_v43 = vpop.f32.mrf.mxu0 }
 0x1c1   :  { %1018 = vst [vmem:[#allocation1 + $0x3] ss:$4 sm:$0xff] %v299_v18  ;;  %v9507_v18 = vpop.f32.mrf.mxu1  ;;  %v9518_v38 = vadd.f32 %v2942_v12, %v2854_v46 }
 0x1c2   :  { %12925 = vst [vmem:[#allocation94_spill] sm:$0xff] %v9505_v43 }
 0x1c3   :  { %12926 = vst [vmem:[#allocation95_spill] sm:$0xff] %v9507_v18 }
 0x1c8   :  { %v1023_v15 = vld.sshfl [vmem:[#allocation1] sm:$0xff pattern:$0x73625140]  ;;  %v1024_v58 = vld.sshfl [vmem:[#allocation1 + $0x8] sm:$0xff pattern:$0x73625140]  ;;  %v2680_v12 = vpop.f32.mrf.mxu0 }
 0x1c9   :  { %v9520_v43 = vpack.c.bf16 %v1023_v15, %v1008_v30  ;;  %v9522_v50 = vpack.c.bf16 %v1024_v58, %v1009_v8  ;;  %v1025_v57 = vld.sshfl [vmem:[#allocation1 + $0x10] sm:$0xff pattern:$0x73625140]  ;;  %v1026_v18 = vld.sshfl [vmem:[#allocation1 + $0x18] sm:$0xff pattern:$0x73625140]  ;;  %v9538_v8 = vpop.f32.mrf.mxu2  ;;  %v2769_v46 = vpop.f32.mrf.mxu1 }
 0x1ca   :  { %v9524_v56 = vpack.c.bf16 %v1025_v57, %v1010_v33  ;;  %v9526_v4 = vpack.c.bf16 %v1026_v18, %v1011_v24  ;;  %1030 = vst [vmem:[#allocation1] ss:$4 sm:$0xff] %v301_v1  ;;  %v70_v30 = vld [vmem:[%s12527_s0 + $0x40] sm:$0x3f]  ;;  %v9540_v33 = vpop.f32.mrf.mxu3  ;;  %v72_v1 = vld [vmem:[%s12527_s0 + $0x4e] sm:$0x3f] }
 0x1cb   :  { %12927 = vst [vmem:[#allocation96_spill] sm:$0xff] %v9520_v43  ;;  %2709 = vmatmul.bf16.gmra.mxu0 %v9520_v43  ;;  %2798 = vmatmul.bf16.gmra.mxu1 %v9522_v50  ;;  %v74_v24 = vld [vmem:[%s12527_s0 + $0x5c] sm:$0x3f]  ;;  %v9553_v15 = vld.sshfl [vmem:[#allocation1 + $0x30] sm:$0xff pattern:$0x73625140] }
 0x1cc   :  { %12928 = vst [vmem:[#allocation97_spill] sm:$0xff] %v9522_v50  ;;  %2887 = vmatmul.bf16.gmra.mxu2 %v9524_v56  ;;  %2976 = vmatmul.bf16.gmra.mxu3 %v9526_v4  ;;  %v9548_v18 = vld.sshfl [vmem:[#allocation1 + $0x20] sm:$0xff pattern:$0x73625140]  ;;  %v76_v58 = vld [vmem:[%s12527_s0 + $0x6a] sm:$0x3f] }
 0x1cd   :  { %12929 = vst [vmem:[#allocation98_spill] sm:$0xff] %v9524_v56 }
 0x1ce   :  { %12930 = vst [vmem:[#allocation99_spill] sm:$0xff] %v9526_v4 }
 0x1cf   :  { %1031 = vst [vmem:[#allocation1 + $0x1] ss:$4 sm:$0xff] %v303_v10  ;;  %v2681_v10 = vadd.f32 %v2680_v12, %v9125_v37  ;;  %v311_v12 = vld [vmem:[%s12527_s0 + $0x6d6] sm:$0xff] }
 0x1d0   :  { %1032 = vst [vmem:[#allocation1 + $0x2] ss:$4 sm:$0xff] %v305_v26  ;;  %v9551_v26 = vld.sshfl [vmem:[#allocation1 + $0x28] sm:$0xff pattern:$0x73625140]  ;;  %v9570_v56 = vpop.f32.mrf.mxu0 }
 0x1d1   :  { %12931 = vst [vmem:[#allocation100_spill] sm:$0xff] %v9538_v8  ;;  %v2770_v57 = vadd.f32 %v2769_v46, %v2681_v10  ;;  %v9572_v50 = vpop.f32.mrf.mxu1 }
 0x1d2   :  { %12932 = vst [vmem:[#allocation101_spill] sm:$0xff] %v9540_v33  ;;  %v313_v33 = vld [vmem:[%s12527_s0 + $0x6e4] sm:$0xff]  ;;  %v2947_v10 = vpop.f32.mrf.mxu3 }
 0x1d3   :  { %1033 = vst [vmem:[#allocation1 + $0x3] ss:$4 sm:$0xff] %v307_v6  ;;  %v309_v6 = vld [vmem:[%s12527_s0 + $0x6c8] sm:$0xff] }
 0x1d4   :  { %599 = vst [vmem:[#allocation1 + $0x20] ss:$4 sm:$0xff] %v70_v30  ;;  %v315_v30 = vld [vmem:[%s12527_s0 + $0x6f2] sm:$0xff] }
 0x1d5   :  { %600 = vst [vmem:[#allocation1 + $0x21] ss:$4 sm:$0xff] %v72_v1 }
 0x1d6   :  { %601 = vst [vmem:[#allocation1 + $0x22] ss:$4 sm:$0xff] %v74_v24  ;;  %v2858_v24 = vpop.f32.mrf.mxu2 }
 0x1d7   :  { %602 = vst [vmem:[#allocation1 + $0x23] ss:$4 sm:$0xff] %v76_v58  ;;  %v2859_v4 = vadd.f32 %v2858_v24, %v2770_v57  ;;  %v78_v57 = vld [vmem:[%s12527_s0 + $0x78] sm:$0x3f] }
 0x1d8   :  { %12933 = vst [vmem:[#allocation102_spill] sm:$0xff] %v9570_v56 }
 0x1d9   :  { %12934 = vst [vmem:[#allocation103_spill] sm:$0xff] %v9572_v50  ;;  %v9574_v22 = vadd.f32 %v2947_v10, %v2859_v4 }
 0x1da   :  { %v1038_v46 = vld.sshfl [vmem:[#allocation1] sm:$0xff pattern:$0x73625140]  ;;  %v1039_v1 = vld.sshfl [vmem:[#allocation1 + $0x8] sm:$0xff pattern:$0x73625140] }
 0x1db   :  { %v1040_v58 = vld.sshfl [vmem:[#allocation1 + $0x10] sm:$0xff pattern:$0x73625140]  ;;  %v1041_v8 = vld.sshfl [vmem:[#allocation1 + $0x18] sm:$0xff pattern:$0x73625140] }
 0x1dc   :  { %1045 = vst [vmem:[#allocation1] ss:$4 sm:$0xff] %v309_v6  ;;  %v8018_v6 = vor.u32 %v8649_v14, %v8015_v45  ;;  %v2685_v45 = vpop.f32.mrf.mxu0  ;;  %v2774_v14 = vpop.f32.mrf.mxu1 }
 0x1dd   :  { %1046 = vst [vmem:[#allocation1 + $0x1] ss:$4 sm:$0xff] %v311_v12  ;;  %v2686_v19 = vadd.f32 %v2685_v45, %v9125_v37  ;;  %v84_v12 = vld [vmem:[%s12527_s0 + $0xa2] sm:$0x3f] }
 0x1de   :  { %1047 = vst [vmem:[#allocation1 + $0x2] ss:$4 sm:$0xff] %v313_v33  ;;  %v607_v24 = vld.sshfl [vmem:[#allocation1 + $0x20] sm:$0xff pattern:$0x73625140]  ;;  %3610 = vmatpush.bf16.msra.mxu3 %v8018_v6  ;;  %v9582_v4 = vpop.f32.mrf.mxu2  ;;  %v9584_v33 = vpop.f32.mrf.mxu3 }
 0x1df   :  { %1048 = vst [vmem:[#allocation1 + $0x3] ss:$4 sm:$0xff] %v315_v30  ;;  %v608_v50 = vld.sshfl [vmem:[#allocation1 + $0x28] sm:$0xff pattern:$0x73625140]  ;;  %v2775_v6 = vadd.f32 %v2774_v14, %v2686_v19 }
 0x1e0   :  { %v609_v56 = vld.sshfl [vmem:[#allocation1 + $0x30] sm:$0xff pattern:$0x73625140]  ;;  %12935 = vst [vmem:[#allocation104_spill] sm:$0xff] %v9582_v4 }
 0x1e1   :  { %12936 = vst [vmem:[#allocation105_spill] sm:$0xff] %v9584_v33  ;;  %v90_v14 = vld [vmem:[%s12527_s0 + $0xcc] sm:$0x3f] }
 0x1e2   :  { %614 = vst [vmem:[#allocation1 + $0x20] ss:$4 sm:$0xff] %v78_v57 }
 0x1e3   :  { %615 = vst [vmem:[#allocation1 + $0x21] ss:$4 sm:$0xff] %v80_v55 }
 0x1e4   :  { %616 = vst [vmem:[#allocation1 + $0x22] ss:$4 sm:$0xff] %v82_v60  ;;  %v9607_v60 = vpop.f32.mrf.mxu1 }
 0x1e5   :  { %617 = vst [vmem:[#allocation1 + $0x23] ss:$4 sm:$0xff] %v84_v12  ;;  %v92_v12 = vld [vmem:[%s12527_s0 + $0xda] sm:$0x3f] }
 0x1e6   :  { %v1053_v30 = vld.sshfl [vmem:[#allocation1] sm:$0xff pattern:$0x73625140]  ;;  %v1054_v10 = vld.sshfl [vmem:[#allocation1 + $0x8] sm:$0xff pattern:$0x73625140]  ;;  %v2863_v55 = vpop.f32.mrf.mxu2 }
 0x1e7   :  { %v9593_v9 = vpack.c.bf16 %v1053_v30, %v1038_v46  ;;  %v9595_v25 = vpack.c.bf16 %v1054_v10, %v1039_v1  ;;  %v1055_v33 = vld.sshfl [vmem:[#allocation1 + $0x10] sm:$0xff pattern:$0x73625140]  ;;  %v1056_v4 = vld.sshfl [vmem:[#allocation1 + $0x18] sm:$0xff pattern:$0x73625140]  ;;  %v2952_v46 = vpop.f32.mrf.mxu3  ;;  %v2864_v59 = vadd.f32 %v2863_v55, %v2775_v6  ;;  %v9605_v1 = vpop.f32.mrf.mxu0 }
 0x1e8   :  { %v9597_v44 = vpack.c.bf16 %v1055_v33, %v1040_v58  ;;  %v9599_v57 = vpack.c.bf16 %v1056_v4, %v1041_v8  ;;  %12941 = vst [vmem:[#allocation110_spill] sm:$0xff] %v9605_v1  ;;  %v86_v8 = vld [vmem:[%s12527_s0 + $0xb0] sm:$0x3f]  ;;  %v88_v4 = vld [vmem:[%s12527_s0 + $0xbe] sm:$0x3f]  ;;  %v9635_v1 = vpack.c.bf16 %v609_v56, %v9553_v15 }
 0x1e9   :  { %12937 = vst [vmem:[#allocation106_spill] sm:$0xff] %v9593_v9  ;;  %2714 = vmatmul.bf16.gmra.mxu0 %v9593_v9  ;;  %2803 = vmatmul.bf16.gmra.mxu1 %v9595_v25  ;;  %v9609_v58 = vadd.f32 %v2952_v46, %v2864_v59  ;;  %v9629_v59 = vpack.c.bf16 %v607_v24, %v9548_v18  ;;  %v96_v18 = vld [vmem:[%s12527_s0 + $0xf6] sm:$0x3f]  ;;  %v98_v56 = vld [vmem:[%s12527_s0 + $0x104] sm:$0x3f] }
 0x1ea   :  { %12938 = vst [vmem:[#allocation107_spill] sm:$0xff] %v9595_v25  ;;  %2892 = vmatmul.bf16.gmra.mxu2 %v9597_v44  ;;  %2981 = vmatmul.bf16.gmra.mxu3 %v9599_v57  ;;  %v8549_v15 = vld [vmem:[#allocation3 + $0x1c4] sm:$0xf] }
 0x1eb   :  { %12939 = vst [vmem:[#allocation108_spill] sm:$0xff] %v9597_v44  ;;  %v7999_v44 = vld [vmem:[#allocation3 + $0x4d0] sm:$0xf0] }
 0x1ec   :  { %12940 = vst [vmem:[#allocation109_spill] sm:$0xff] %v9599_v57  ;;  %v622_v33 = vld.sshfl [vmem:[#allocation1 + $0x20] sm:$0xff pattern:$0x73625140]  ;;  %v2779_v46 = vpop.f32.mrf.mxu1  ;;  %v8645_v57 = vld [vmem:[#allocation3 + $0x4c4] sm:$0xf] }
 0x1ed   :  { %12942 = vst [vmem:[#allocation111_spill] sm:$0xff] %v9607_v60  ;;  %v623_v45 = vld.sshfl [vmem:[#allocation1 + $0x28] sm:$0xff pattern:$0x73625140]  ;;  %v9632_v60 = vpack.c.bf16 %v608_v50, %v9551_v26  ;;  %v7871_v26 = vld [vmem:[#allocation3 + $0x3d0] sm:$0xf0]  ;;  %v8002_v41 = vor.u32 %v8645_v57, %v7999_v44 }
 0x1ee   :  { %v624_v19 = vld.sshfl [vmem:[#allocation1 + $0x30] sm:$0xff pattern:$0x73625140]  ;;  %v9623_v30 = vpop.f32.mrf.mxu2  ;;  %12945 = vst [vmem:[#allocation114_spill] sm:$0xff] %v9629_v59  ;;  %v102_v44 = vld [vmem:[%s12527_s0 + $0x120] sm:$0x3f] }
 0x1ef   :  { %629 = vst [vmem:[#allocation1 + $0x20] ss:$4 sm:$0xff] %v86_v8  ;;  %v9625_v10 = vpop.f32.mrf.mxu3  ;;  %v2690_v6 = vpop.f32.mrf.mxu0  ;;  %v8613_v50 = vld [vmem:[#allocation3 + $0x3c4] sm:$0xf]  ;;  %3611 = vmatpush.bf16.msra.mxu3 %v8002_v41 }
 0x1f0   :  { %630 = vst [vmem:[#allocation1 + $0x21] ss:$4 sm:$0xff] %v88_v4  ;;  %v2691_v55 = vadd.f32 %v2690_v6, %v9125_v37  ;;  %v94_v4 = vld [vmem:[%s12527_s0 + $0xe8] sm:$0x3f]  ;;  %v100_v6 = vld [vmem:[%s12527_s0 + $0x112] sm:$0x3f] }
 0x1f1   :  { %12943 = vst [vmem:[#allocation112_spill] sm:$0xff] %v9623_v30  ;;  %v7615_v30 = vld [vmem:[#allocation3 + $0x1d0] sm:$0xf0]  ;;  %v104_v57 = vld [vmem:[%s12527_s0 + $0x12e] sm:$0x3f] }
 0x1f2   :  { %12944 = vst [vmem:[#allocation113_spill] sm:$0xff] %v9625_v10  ;;  %v2780_v8 = vadd.f32 %v2779_v46, %v2691_v55  ;;  %v7874_v55 = vor.u32 %v8613_v50, %v7871_v26 }
 0x1f3   :  { %631 = vst [vmem:[#allocation1 + $0x22] ss:$4 sm:$0xff] %v90_v14 }
 0x1f4   :  { %632 = vst [vmem:[#allocation1 + $0x23] ss:$4 sm:$0xff] %v92_v12  ;;  %3522 = vmatpush.bf16.msra.mxu2 %v7874_v55  ;;  %v9658_v17 = vpop.f32.mrf.mxu1 }
 0x1f5   :  { %12946 = vst [vmem:[#allocation115_spill] sm:$0xff] %v9632_v60 }
 0x1f6   :  { %12947 = vst [vmem:[#allocation116_spill] sm:$0xff] %v9635_v1  ;;  %v2868_v24 = vpop.f32.mrf.mxu2 }
 0x1f7   :  { %v2869_v46 = vadd.f32 %v2868_v24, %v2780_v8  ;;  %12949 = vst [vmem:[#allocation118_spill] sm:$0xff] %v9658_v17  ;;  %v7746_v8 = vor.u32 %v8581_v21, %v7743_v20 }
 0x1f9   :  { %2995 = vmatmul.bf16.vlgmr.msrb.gmra.mxu0 %v9629_v59  ;;  %3084 = vmatmul.bf16.vlgmr.msrb.gmra.mxu1 %v9632_v60  ;;  %v7618_v60 = vor.u32 %v8549_v15, %v7615_v30 }
 0x1fa   :  { %8171 = vmatmul.msk.bf16.vlgmr.msrb.gmra.mxu2 %vm2582_vm0, %v9635_v1  ;;  %3262 = vmatmul.bf16.vlgmr.msrb.gmra.mxu3 %v8915_v62  ;;  %v2957_v1 = vpop.f32.mrf.mxu3  ;;  %v9654_v62 = vpop.f32.mrf.mxu0 }
 0x1fb   :  { %v637_v14 = vld.sshfl [vmem:[#allocation1 + $0x20] sm:$0xff pattern:$0x73625140]  ;;  %v638_v12 = vld.sshfl [vmem:[#allocation1 + $0x28] sm:$0xff pattern:$0x73625140]  ;;  %v9656_v25 = vadd.f32 %v2957_v1, %v2869_v46  ;;  %3344 = vmatpush.bf16.msra.mxu0 %v7618_v60  ;;  %3433 = vmatpush.bf16.msra.mxu1 %v7746_v8 }
 0x1fc   :  { %v639_v10 = vld.sshfl [vmem:[#allocation1 + $0x30] sm:$0xff pattern:$0x73625140]  ;;  %12948 = vst [vmem:[#allocation117_spill] sm:$0xff] %v9654_v62  ;;  %v9660_v50 = vpack.c.bf16 %v637_v14, %v622_v33  ;;  %v110_v14 = vld [vmem:[%s12527_s0 + $0x158] sm:$0x3f] }
 0x1fd   :  { %644 = vst [vmem:[#allocation1 + $0x20] ss:$4 sm:$0xff] %v94_v4  ;;  %v9662_v4 = vpack.c.bf16 %v638_v12, %v623_v45  ;;  %v9666_v1 = vpack.c.bf16 %v639_v10, %v624_v19  ;;  %v106_v45 = vld [vmem:[%s12527_s0 + $0x13c] sm:$0x3f]  ;;  %v2784_v10 = vpop.f32.mrf.mxu1  ;;  %v112_v12 = vld [vmem:[%s12527_s0 + $0x166] sm:$0x3f] }
 0x1fe   :  { %645 = vst [vmem:[#allocation1 + $0x21] ss:$4 sm:$0xff] %v96_v18  ;;  %v9664_v30 = vpop.f32.mrf.mxu2  ;;  %v108_v18 = vld [vmem:[%s12527_s0 + $0x14a] sm:$0x3f] }
 0x1ff   :  { %646 = vst [vmem:[#allocation1 + $0x22] ss:$4 sm:$0xff] %v98_v56 }
 0x200   :  { %647 = vst [vmem:[#allocation1 + $0x23] ss:$4 sm:$0xff] %v100_v6 }
 0x201   :  { %12950 = vst [vmem:[#allocation119_spill] sm:$0xff] %v9660_v50 }
 0x202   :  { %12951 = vst [vmem:[#allocation120_spill] sm:$0xff] %v9662_v4  ;;  %v2695_v20 = vpop.f32.mrf.mxu0  ;;  %v9674_v60 = vpop.f32.mrf.mxu3 }
 0x203   :  { %12952 = vst [vmem:[#allocation121_spill] sm:$0xff] %v9664_v30  ;;  %v2696_v33 = vadd.f32 %v2695_v20, %v9125_v37  ;;  %v7983_v30 = vld [vmem:[#allocation3 + $0x4b0] sm:$0xf0] }
 0x204   :  { %12953 = vst [vmem:[#allocation122_spill] sm:$0xff] %v9666_v1 }
 0x205   :  { %12954 = vst [vmem:[#allocation123_spill] sm:$0xff] %v9674_v60  ;;  %v2785_v56 = vadd.f32 %v2784_v10, %v2696_v33  ;;  %v8641_v60 = vld [vmem:[#allocation3 + $0x4a4] sm:$0xf] }
 0x206   :  { %v2873_v26 = vpop.f32.mrf.mxu2 }
 0x207   :  { %v652_v21 = vld.sshfl [vmem:[#allocation1 + $0x20] sm:$0xff pattern:$0x73625140]  ;;  %v653_v41 = vld.sshfl [vmem:[#allocation1 + $0x28] sm:$0xff pattern:$0x73625140]  ;;  %v2874_v15 = vadd.f32 %v2873_v26, %v2785_v56 }
 0x208   :  { %v654_v19 = vld.sshfl [vmem:[#allocation1 + $0x30] sm:$0xff pattern:$0x73625140] }
 0x209   :  { %3000 = vmatmul.bf16.gmra.mxu0 %v9660_v50  ;;  %3089 = vmatmul.bf16.gmra.mxu1 %v9662_v4  ;;  %659 = vst [vmem:[#allocation1 + $0x20] ss:$4 sm:$0xff] %v102_v44  ;;  %v114_v44 = vld [vmem:[%s12527_s0 + $0x174] sm:$0x3f] }
 0x20a   :  { %8172 = vmatmul.msk.bf16.gmra.mxu2 %vm2582_vm0, %v9666_v1  ;;  %3267 = vmatmul.bf16.gmra.mxu3 %v8951_v27  ;;  %660 = vst [vmem:[#allocation1 + $0x21] ss:$4 sm:$0xff] %v104_v57  ;;  %v2962_v24 = vpop.f32.mrf.mxu3  ;;  %v9699_v57 = vpop.f32.mrf.mxu0  ;;  %v7727_v27 = vld [vmem:[#allocation3 + $0x2b0] sm:$0xf0] }
 0x20b   :  { %661 = vst [vmem:[#allocation1 + $0x22] ss:$4 sm:$0xff] %v106_v45  ;;  %v9694_v6 = vadd.f32 %v2962_v24, %v2874_v15  ;;  %v116_v45 = vld [vmem:[%s12527_s0 + $0x182] sm:$0x3f] }
 0x20c   :  { %662 = vst [vmem:[#allocation1 + $0x23] ss:$4 sm:$0xff] %v108_v18  ;;  %v9710_v18 = vpop.f32.mrf.mxu1 }
 0x20d   :  { %12955 = vst [vmem:[#allocation124_spill] sm:$0xff] %v9699_v57  ;;  %v7599_v57 = vld [vmem:[#allocation3 + $0x1b0] sm:$0xf0] }
 0x20e   :  { %12959 = vst [vmem:[#allocation128_spill] sm:$0xff] %v9710_v18 }
 0x212   :  { %v2700_v56 = vpop.f32.mrf.mxu0  ;;  %v9725_v24 = vpop.f32.mrf.mxu3 }
 0x213   :  { %v667_v55 = vld.sshfl [vmem:[#allocation1 + $0x20] sm:$0xff pattern:$0x73625140]  ;;  %v668_v46 = vld.sshfl [vmem:[#allocation1 + $0x28] sm:$0xff pattern:$0x73625140] }
 0x214   :  { %v669_v8 = vld.sshfl [vmem:[#allocation1 + $0x30] sm:$0xff pattern:$0x73625140]  ;;  %v9701_v20 = vpack.c.bf16 %v667_v55, %v652_v21  ;;  %v9703_v33 = vpack.c.bf16 %v668_v46, %v653_v41  ;;  %v9717_v21 = vpop.f32.mrf.mxu2  ;;  %12961 = vst [vmem:[#allocation130_spill] sm:$0xff] %v9725_v24  ;;  %v2789_v46 = vpop.f32.mrf.mxu1 }
 0x215   :  { %674 = vst [vmem:[#allocation1 + $0x20] ss:$4 sm:$0xff] %v110_v14  ;;  %v9708_v10 = vpack.c.bf16 %v669_v8, %v654_v19  ;;  %v118_v41 = vld [vmem:[%s12527_s0 + $0x190] sm:$0x3f]  ;;  %v120_v19 = vld [vmem:[%s12527_s0 + $0x19e] sm:$0x3f]  ;;  %v2701_v14 = vadd.f32 %v2700_v56, %v9125_v37 }
 0x216   :  { %12956 = vst [vmem:[#allocation125_spill] sm:$0xff] %v9701_v20  ;;  %v124_v8 = vld [vmem:[%s12527_s0 + $0x1ba] sm:$0x3f]  ;;  %v8545_v24 = vld [vmem:[#allocation3 + $0x1a4] sm:$0xf] }
 0x217   :  { %12957 = vst [vmem:[#allocation126_spill] sm:$0xff] %v9703_v33  ;;  %v7602_v62 = vor.u32 %v8545_v24, %v7599_v57 }
 0x218   :  { %12958 = vst [vmem:[#allocation127_spill] sm:$0xff] %v9708_v10 }
 0x219   :  { %675 = vst [vmem:[#allocation1 + $0x21] ss:$4 sm:$0xff] %v112_v12  ;;  %3005 = vmatmul.bf16.gmra.mxu0 %v9701_v20  ;;  %3094 = vmatmul.bf16.gmra.mxu1 %v9703_v33  ;;  %v122_v12 = vld [vmem:[%s12527_s0 + $0x1ac] sm:$0x3f] }
 0x21a   :  { %676 = vst [vmem:[#allocation1 + $0x22] ss:$4 sm:$0xff] %v114_v44  ;;  %8173 = vmatmul.msk.bf16.gmra.mxu2 %vm2582_vm0, %v9708_v10  ;;  %3272 = vmatmul.bf16.gmra.mxu3 %v8987_v47  ;;  %v2790_v44 = vadd.f32 %v2789_v46, %v2701_v14  ;;  %v7986_v47 = vor.u32 %v8641_v60, %v7983_v30  ;;  %v2967_v10 = vpop.f32.mrf.mxu3  ;;  %v8577_v33 = vld [vmem:[#allocation3 + $0x2a4] sm:$0xf]  ;;  %v9750_v46 = vpop.f32.mrf.mxu0 }
 0x21b   :  { %677 = vst [vmem:[#allocation1 + $0x23] ss:$4 sm:$0xff] %v116_v45  ;;  %v8609_v45 = vld [vmem:[#allocation3 + $0x3a4] sm:$0xf]  ;;  %v7730_v14 = vor.u32 %v8577_v33, %v7727_v27  ;;  %3345 = vmatpush.bf16.msra.mxu0 %v7602_v62  ;;  %v132_v27 = vld [vmem:[%s12527_s0 + $0x1f2] sm:$0x3f] }
 0x21c   :  { %12960 = vst [vmem:[#allocation129_spill] sm:$0xff] %v9717_v21  ;;  %v7855_v21 = vld [vmem:[#allocation3 + $0x3b0] sm:$0xf0]  ;;  %v2878_v18 = vpop.f32.mrf.mxu2  ;;  %3612 = vmatpush.bf16.msra.mxu3 %v7986_v47  ;;  %v9759_v62 = vpop.f32.mrf.mxu1  ;;  %v136_v33 = vld [vmem:[%s12527_s0 + $0x20e] sm:$0x3f] }
 0x21d   :  { %v7858_v56 = vor.u32 %v8609_v45, %v7855_v21  ;;  %v2879_v17 = vadd.f32 %v2878_v18, %v2790_v44  ;;  %3434 = vmatpush.bf16.msra.mxu1 %v7730_v14  ;;  %12964 = vst [vmem:[#allocation133_spill] sm:$0xff] %v9750_v46  ;;  %v138_v45 = vld [vmem:[%s12527_s0 + $0x21c] sm:$0x3f]  ;;  %v8605_v46 = vld [vmem:[#allocation3 + $0x384] sm:$0xf] }
 0x21e   :  { %12966 = vst [vmem:[#allocation135_spill] sm:$0xff] %v9759_v62 }
 0x21f   :  { %3523 = vmatpush.bf16.msra.mxu2 %v7858_v56  ;;  %v9741_v21 = vadd.f32 %v2967_v10, %v2879_v17  ;;  %v134_v17 = vld [vmem:[%s12527_s0 + $0x200] sm:$0x3f] }
 0x222   :  { %v682_v26 = vld.sshfl [vmem:[#allocation1 + $0x20] sm:$0xff pattern:$0x73625140]  ;;  %v683_v15 = vld.sshfl [vmem:[#allocation1 + $0x28] sm:$0xff pattern:$0x73625140] }
 0x223   :  { %v684_v55 = vld.sshfl [vmem:[#allocation1 + $0x30] sm:$0xff pattern:$0x73625140] }
 0x224   :  { %689 = vst [vmem:[#allocation1 + $0x20] ss:$4 sm:$0xff] %v118_v41  ;;  %v126_v41 = vld [vmem:[%s12527_s0 + $0x1c8] sm:$0x3f]  ;;  %v9763_v47 = vpop.f32.mrf.mxu2 }
 0x225   :  { %690 = vst [vmem:[#allocation1 + $0x21] ss:$4 sm:$0xff] %v120_v19  ;;  %v128_v19 = vld [vmem:[%s12527_s0 + $0x1d6] sm:$0x3f] }
 0x226   :  { %691 = vst [vmem:[#allocation1 + $0x22] ss:$4 sm:$0xff] %v122_v12  ;;  %v130_v12 = vld [vmem:[%s12527_s0 + $0x1e4] sm:$0x3f] }
 0x227   :  { %692 = vst [vmem:[#allocation1 + $0x23] ss:$4 sm:$0xff] %v124_v8 }
 0x228   :  { %12967 = vst [vmem:[#allocation136_spill] sm:$0xff] %v9763_v47  ;;  %v156_v47 = vld [vmem:[%s12527_s0 + $0x29a] sm:$0x3f] }
 0x22a   :  { %3277 = vmatmul.bf16.gmra.mxu3 %v9023_v16  ;;  %v8637_v16 = vld [vmem:[#allocation3 + $0x484] sm:$0xf] }
 0x22c   :  { %v2705_v10 = vpop.f32.mrf.mxu0 }
 0x22d   :  { %v2706_v44 = vadd.f32 %v2705_v10, %v9125_v37 }
 0x22e   :  { %v697_v18 = vld.sshfl [vmem:[#allocation1 + $0x20] sm:$0xff pattern:$0x73625140]  ;;  %v698_v57 = vld.sshfl [vmem:[#allocation1 + $0x28] sm:$0xff pattern:$0x73625140] }
 0x22f   :  { %v9743_v30 = vpack.c.bf16 %v697_v18, %v682_v26  ;;  %v9745_v60 = vpack.c.bf16 %v698_v57, %v683_v15  ;;  %v699_v24 = vld.sshfl [vmem:[#allocation1 + $0x30] sm:$0xff pattern:$0x73625140] }
 0x230   :  { %v9752_v8 = vpack.c.bf16 %v699_v24, %v684_v55  ;;  %704 = vst [vmem:[#allocation1 + $0x20] ss:$4 sm:$0xff] %v126_v41  ;;  %v9771_v55 = vpop.f32.mrf.mxu3  ;;  %v2794_v41 = vpop.f32.mrf.mxu1 }
 0x231   :  { %12962 = vst [vmem:[#allocation131_spill] sm:$0xff] %v9743_v30  ;;  %3010 = vmatmul.bf16.gmra.mxu0 %v9743_v30  ;;  %3099 = vmatmul.bf16.gmra.mxu1 %v9745_v60  ;;  %v2795_v14 = vadd.f32 %v2794_v41, %v2706_v44 }
 0x232   :  { %12963 = vst [vmem:[#allocation132_spill] sm:$0xff] %v9745_v60  ;;  %8174 = vmatmul.msk.bf16.gmra.mxu2 %vm2582_vm0, %v9752_v8 }
 0x233   :  { %12965 = vst [vmem:[#allocation134_spill] sm:$0xff] %v9752_v8  ;;  %v2883_v18 = vpop.f32.mrf.mxu2  ;;  %v7967_v8 = vld [vmem:[#allocation3 + $0x490] sm:$0xf0] }
 0x234   :  { %705 = vst [vmem:[#allocation1 + $0x21] ss:$4 sm:$0xff] %v128_v19  ;;  %v140_v19 = vld [vmem:[%s12527_s0 + $0x22a] sm:$0x3f]  ;;  %v2884_v57 = vadd.f32 %v2883_v18, %v2795_v14  ;;  %v9796_v14 = vpop.f32.mrf.mxu0  ;;  %v7970_v4 = vor.u32 %v8637_v16, %v7967_v8 }
 0x235   :  { %706 = vst [vmem:[#allocation1 + $0x22] ss:$4 sm:$0xff] %v130_v12  ;;  %v142_v12 = vld [vmem:[%s12527_s0 + $0x238] sm:$0x3f] }
 0x236   :  { %707 = vst [vmem:[#allocation1 + $0x23] ss:$4 sm:$0xff] %v132_v27  ;;  %v144_v27 = vld [vmem:[%s12527_s0 + $0x246] sm:$0x3f]  ;;  %3613 = vmatpush.bf16.msra.mxu3 %v7970_v4  ;;  %v164_v4 = vld [vmem:[%s12527_s0 + $0x2d2] sm:$0x3f] }
 0x237   :  { %12968 = vst [vmem:[#allocation137_spill] sm:$0xff] %v9771_v55 }
 0x238   :  { %v2972_v24 = vpop.f32.mrf.mxu3 }
 0x239   :  { %v9787_v10 = vadd.f32 %v2972_v24, %v2884_v57  ;;  %v148_v57 = vld [vmem:[%s12527_s0 + $0x262] sm:$0x3f] }
 0x23a   :  { %3282 = vmatmul.bf16.gmra.mxu3 %v9059_v40  ;;  %v152_v24 = vld [vmem:[%s12527_s0 + $0x27e] sm:$0x3f]  ;;  %v8541_v40 = vld [vmem:[#allocation3 + $0x184] sm:$0xf] }
 0x23d   :  { %v712_v26 = vld.sshfl [vmem:[#allocation1 + $0x20] sm:$0xff pattern:$0x73625140]  ;;  %v713_v15 = vld.sshfl [vmem:[#allocation1 + $0x28] sm:$0xff pattern:$0x73625140] }
 0x23e   :  { %v714_v56 = vld.sshfl [vmem:[#allocation1 + $0x30] sm:$0xff pattern:$0x73625140] }
 0x23f   :  { %719 = vst [vmem:[#allocation1 + $0x20] ss:$4 sm:$0xff] %v134_v17 }
 0x240   :  { %720 = vst [vmem:[#allocation1 + $0x21] ss:$4 sm:$0xff] %v136_v33 }
 0x241   :  { %721 = vst [vmem:[#allocation1 + $0x22] ss:$4 sm:$0xff] %v138_v45 }
 0x242   :  { %722 = vst [vmem:[#allocation1 + $0x23] ss:$4 sm:$0xff] %v140_v19  ;;  %v146_v19 = vld [vmem:[%s12527_s0 + $0x254] sm:$0x3f] }
 0x249   :  { %v727_v17 = vld.sshfl [vmem:[#allocation1 + $0x20] sm:$0xff pattern:$0x73625140]  ;;  %v728_v44 = vld.sshfl [vmem:[#allocation1 + $0x28] sm:$0xff pattern:$0x73625140] }
 0x24a   :  { %v9789_v33 = vpack.c.bf16 %v727_v17, %v712_v26  ;;  %v9791_v41 = vpack.c.bf16 %v728_v44, %v713_v15  ;;  %v729_v45 = vld.sshfl [vmem:[#allocation1 + $0x30] sm:$0xff pattern:$0x73625140]  ;;  %v9805_v26 = vpop.f32.mrf.mxu1  ;;  %3287 = vmatmul.bf16.gmra.mxu3 %v9095_v13  ;;  %v9810_v15 = vpop.f32.mrf.mxu2  ;;  %v7839_v13 = vld [vmem:[#allocation3 + $0x390] sm:$0xf0] }
 0x24b   :  { %v9798_v18 = vpack.c.bf16 %v729_v45, %v714_v56  ;;  %734 = vst [vmem:[#allocation1 + $0x20] ss:$4 sm:$0xff] %v142_v12  ;;  %v150_v56 = vld [vmem:[%s12527_s0 + $0x270] sm:$0x3f]  ;;  %v2710_v12 = vpop.f32.mrf.mxu0  ;;  %v9818_v44 = vpop.f32.mrf.mxu3 }
 0x24c   :  { %12969 = vst [vmem:[#allocation138_spill] sm:$0xff] %v9789_v33  ;;  %3015 = vmatmul.bf16.gmra.mxu0 %v9789_v33  ;;  %3104 = vmatmul.bf16.gmra.mxu1 %v9791_v41  ;;  %v2711_v45 = vadd.f32 %v2710_v12, %v9125_v37  ;;  %v7842_v12 = vor.u32 %v8605_v46, %v7839_v13 }
 0x24d   :  { %12970 = vst [vmem:[#allocation139_spill] sm:$0xff] %v9791_v41  ;;  %8175 = vmatmul.msk.bf16.gmra.mxu2 %vm2582_vm0, %v9798_v18  ;;  %v7583_v41 = vld [vmem:[#allocation3 + $0x190] sm:$0xf0] }
 0x24e   :  { %12971 = vst [vmem:[#allocation140_spill] sm:$0xff] %v9798_v18  ;;  %v7586_v1 = vor.u32 %v8541_v40, %v7583_v41  ;;  %3524 = vmatpush.bf16.msra.mxu2 %v7842_v12  ;;  %v170_v12 = vld [vmem:[%s12527_s0 + $0x2fc] sm:$0x3f] }
 0x24f   :  { %735 = vst [vmem:[#allocation1 + $0x21] ss:$4 sm:$0xff] %v144_v27 }
 0x250   :  { %12972 = vst [vmem:[#allocation141_spill] sm:$0xff] %v9805_v26  ;;  %v7711_v26 = vld [vmem:[#allocation3 + $0x290] sm:$0xf0]  ;;  %3346 = vmatpush.bf16.msra.mxu0 %v7586_v1 }
 0x251   :  { %736 = vst [vmem:[#allocation1 + $0x22] ss:$4 sm:$0xff] %v146_v19  ;;  %v154_v19 = vld [vmem:[%s12527_s0 + $0x28c] sm:$0x3f] }
 0x252   :  { %737 = vst [vmem:[#allocation1 + $0x23] ss:$4 sm:$0xff] %v148_v57  ;;  %v2799_v55 = vpop.f32.mrf.mxu1  ;;  %v2888_v18 = vpop.f32.mrf.mxu2 }
 0x253   :  { %12973 = vst [vmem:[#allocation142_spill] sm:$0xff] %v9810_v15  ;;  %v2800_v62 = vadd.f32 %v2799_v55, %v2711_v45  ;;  %v8573_v15 = vld [vmem:[#allocation3 + $0x284] sm:$0xf] }
 0x254   :  { %12974 = vst [vmem:[#allocation143_spill] sm:$0xff] %v9818_v44  ;;  %v2977_v44 = vpop.f32.mrf.mxu3  ;;  %v158_v55 = vld [vmem:[%s12527_s0 + $0x2a8] sm:$0x3f]  ;;  %v7714_v46 = vor.u32 %v8573_v15, %v7711_v26  ;;  %v166_v26 = vld [vmem:[%s12527_s0 + $0x2e0] sm:$0x3f] }
 0x255   :  { %v2889_v60 = vadd.f32 %v2888_v18, %v2800_v62  ;;  %v162_v18 = vld [vmem:[%s12527_s0 + $0x2c4] sm:$0x3f]  ;;  %v168_v15 = vld [vmem:[%s12527_s0 + $0x2ee] sm:$0x3f] }
 0x256   :  { %3435 = vmatpush.bf16.msra.mxu1 %v7714_v46 }
 0x257   :  { %v9834_v13 = vadd.f32 %v2977_v44, %v2889_v60 }
 0x259   :  { %v742_v27 = vld.sshfl [vmem:[#allocation1 + $0x20] sm:$0xff pattern:$0x73625140]  ;;  %v743_v17 = vld.sshfl [vmem:[#allocation1 + $0x28] sm:$0xff pattern:$0x73625140] }
 0x25a   :  { %v744_v57 = vld.sshfl [vmem:[#allocation1 + $0x30] sm:$0xff pattern:$0x73625140]  ;;  %3292 = vmatmul.bf16.gmra.mxu3 %v9137_v54  ;;  %v9856_v1 = vpop.f32.mrf.mxu2  ;;  %v180_v54 = vld [vmem:[%s12527_s0 + $0x342] sm:$0x3f] }
 0x25b   :  { %749 = vst [vmem:[#allocation1 + $0x20] ss:$4 sm:$0xff] %v150_v56  ;;  %v9843_v56 = vpop.f32.mrf.mxu0 }
 0x25c   :  { %750 = vst [vmem:[#allocation1 + $0x21] ss:$4 sm:$0xff] %v152_v24  ;;  %v9845_v24 = vpop.f32.mrf.mxu1 }
 0x25d   :  { %751 = vst [vmem:[#allocation1 + $0x22] ss:$4 sm:$0xff] %v154_v19  ;;  %v9864_v19 = vpop.f32.mrf.mxu3 }
 0x25e   :  { %752 = vst [vmem:[#allocation1 + $0x23] ss:$4 sm:$0xff] %v156_v47  ;;  %v160_v47 = vld [vmem:[%s12527_s0 + $0x2b6] sm:$0x3f] }
 0x265   :  { %v757_v62 = vld.sshfl [vmem:[#allocation1 + $0x20] sm:$0xff pattern:$0x73625140]  ;;  %v758_v40 = vld.sshfl [vmem:[#allocation1 + $0x28] sm:$0xff pattern:$0x73625140] }
 0x266   :  { %v9836_v16 = vpack.c.bf16 %v757_v62, %v742_v27  ;;  %v9838_v8 = vpack.c.bf16 %v758_v40, %v743_v17  ;;  %v759_v41 = vld.sshfl [vmem:[#allocation1 + $0x30] sm:$0xff pattern:$0x73625140]  ;;  %v2715_v27 = vpop.f32.mrf.mxu0  ;;  %v2804_v17 = vpop.f32.mrf.mxu1 }
 0x267   :  { %v9847_v60 = vpack.c.bf16 %v759_v41, %v744_v57  ;;  %764 = vst [vmem:[#allocation1 + $0x20] ss:$4 sm:$0xff] %v158_v55  ;;  %v2716_v57 = vadd.f32 %v2715_v27, %v9125_v37  ;;  %v174_v27 = vld [vmem:[%s12527_s0 + $0x318] sm:$0x3f] }
 0x268   :  { %12975 = vst [vmem:[#allocation144_spill] sm:$0xff] %v9836_v16  ;;  %3020 = vmatmul.bf16.gmra.mxu0 %v9836_v16  ;;  %3109 = vmatmul.bf16.gmra.mxu1 %v9838_v8 }
 0x269   :  { %12976 = vst [vmem:[#allocation145_spill] sm:$0xff] %v9838_v8  ;;  %8176 = vmatmul.msk.bf16.gmra.mxu2 %vm2582_vm0, %v9847_v60  ;;  %v2805_v46 = vadd.f32 %v2804_v17, %v2716_v57 }
 0x26a   :  { %12977 = vst [vmem:[#allocation146_spill] sm:$0xff] %v9847_v60  ;;  %3297 = vmatmul.bf16.gmra.mxu3 %v9179_v49  ;;  %v7951_v60 = vld [vmem:[#allocation3 + $0x470] sm:$0xf0] }
 0x26b   :  { %765 = vst [vmem:[#allocation1 + $0x21] ss:$4 sm:$0xff] %v160_v47  ;;  %v172_v47 = vld [vmem:[%s12527_s0 + $0x30a] sm:$0x3f] }
 0x26c   :  { %766 = vst [vmem:[#allocation1 + $0x22] ss:$4 sm:$0xff] %v162_v18 }
 0x26d   :  { %767 = vst [vmem:[#allocation1 + $0x23] ss:$4 sm:$0xff] %v164_v4  ;;  %v2893_v62 = vpop.f32.mrf.mxu2  ;;  %v2982_v4 = vpop.f32.mrf.mxu3 }
 0x26e   :  { %v2894_v40 = vadd.f32 %v2893_v62, %v2805_v46  ;;  %v9874_v41 = vpop.f32.mrf.mxu0  ;;  %v9876_v18 = vpop.f32.mrf.mxu1  ;;  %v178_v62 = vld [vmem:[%s12527_s0 + $0x334] sm:$0x3f] }
 0x26f   :  { %12978 = vst [vmem:[#allocation147_spill] sm:$0xff] %v9874_v41 }
 0x270   :  { %12979 = vst [vmem:[#allocation148_spill] sm:$0xff] %v9876_v18 }
 0x274   :  { %v772_v44 = vld.sshfl [vmem:[#allocation1 + $0x20] sm:$0xff pattern:$0x73625140]  ;;  %v773_v45 = vld.sshfl [vmem:[#allocation1 + $0x28] sm:$0xff pattern:$0x73625140] }
 0x275   :  { %v774_v55 = vld.sshfl [vmem:[#allocation1 + $0x30] sm:$0xff pattern:$0x73625140] }
 0x276   :  { %779 = vst [vmem:[#allocation1 + $0x20] ss:$4 sm:$0xff] %v166_v26  ;;  %v176_v26 = vld [vmem:[%s12527_s0 + $0x326] sm:$0x3f] }
 0x277   :  { %780 = vst [vmem:[#allocation1 + $0x21] ss:$4 sm:$0xff] %v168_v15  ;;  %v9884_v15 = vadd.f32 %v2982_v4, %v2894_v40  ;;  %v9904_v4 = vpop.f32.mrf.mxu2 }
 0x278   :  { %781 = vst [vmem:[#allocation1 + $0x22] ss:$4 sm:$0xff] %v170_v12 }
 0x279   :  { %782 = vst [vmem:[#allocation1 + $0x23] ss:$4 sm:$0xff] %v172_v47 }
 0x27a   :  { %12980 = vst [vmem:[#allocation149_spill] sm:$0xff] %v9884_v15  ;;  %3302 = vmatmul.bf16.gmra.mxu3 %v9226_v53 }
 0x27b   :  { %12984 = vst [vmem:[#allocation153_spill] sm:$0xff] %v9904_v4 }
 0x280   :  { %v787_v17 = vld.sshfl [vmem:[#allocation1 + $0x20] sm:$0xff pattern:$0x73625140]  ;;  %v788_v57 = vld.sshfl [vmem:[#allocation1 + $0x28] sm:$0xff pattern:$0x73625140] }
 0x281   :  { %v9886_v12 = vpack.c.bf16 %v787_v17, %v772_v44  ;;  %v9888_v47 = vpack.c.bf16 %v788_v57, %v773_v45  ;;  %v789_v46 = vld.sshfl [vmem:[#allocation1 + $0x30] sm:$0xff pattern:$0x73625140]  ;;  %v2996_v44 = vpop.f32.mrf.mxu0 }
 0x282   :  { %v9893_v49 = vpack.c.bf16 %v789_v46, %v774_v55  ;;  %794 = vst [vmem:[#allocation1 + $0x20] ss:$4 sm:$0xff] %v174_v27  ;;  %v2997_v45 = vadd.f32 %v2996_v44, %v9177_v42  ;;  %v3085_v55 = vpop.f32.mrf.mxu1  ;;  %v182_v27 = vld [vmem:[%s12527_s0 + $0x350] sm:$0x3f]  ;;  %v188_v46 = vld [vmem:[%s12527_s0 + $0x37a] sm:$0x3f] }
 0x283   :  { %12981 = vst [vmem:[#allocation150_spill] sm:$0xff] %v9886_v12  ;;  %3025 = vmatmul.bf16.gmra.mxu0 %v9886_v12  ;;  %3114 = vmatmul.bf16.gmra.mxu1 %v9888_v47  ;;  %v7823_v44 = vld [vmem:[#allocation3 + $0x370] sm:$0xf0] }
 0x284   :  { %12982 = vst [vmem:[#allocation151_spill] sm:$0xff] %v9888_v47  ;;  %8177 = vmatmul.msk.bf16.gmra.mxu2 %vm2582_vm0, %v9893_v49  ;;  %v3086_v40 = vadd.f32 %v3085_v55, %v2997_v45  ;;  %v8537_v45 = vld [vmem:[#allocation3 + $0x164] sm:$0xf]  ;;  %v3174_v55 = vpop.f32.mrf.mxu2 }
 0x285   :  { %12983 = vst [vmem:[#allocation152_spill] sm:$0xff] %v9893_v49  ;;  %v7567_v49 = vld [vmem:[#allocation3 + $0x170] sm:$0xf0]  ;;  %v8633_v47 = vld [vmem:[#allocation3 + $0x464] sm:$0xf] }
 0x286   :  { %795 = vst [vmem:[#allocation1 + $0x21] ss:$4 sm:$0xff] %v176_v26  ;;  %v184_v26 = vld [vmem:[%s12527_s0 + $0x35e] sm:$0x3f]  ;;  %v9918_v8 = vadd.f32 %v3174_v55, %v3086_v40  ;;  %v7570_v18 = vor.u32 %v8537_v45, %v7567_v49  ;;  %v7954_v41 = vor.u32 %v8633_v47, %v7951_v60  ;;  %v194_v45 = vld [vmem:[%s12527_s0 + $0x3a4] sm:$0x3f] }
 0x287   :  { %796 = vst [vmem:[#allocation1 + $0x22] ss:$4 sm:$0xff] %v178_v62  ;;  %v8601_v62 = vld [vmem:[#allocation3 + $0x364] sm:$0xf] }
 0x288   :  { %797 = vst [vmem:[#allocation1 + $0x23] ss:$4 sm:$0xff] %v180_v54  ;;  %v186_v54 = vld [vmem:[%s12527_s0 + $0x36c] sm:$0x3f]  ;;  %v7826_v53 = vor.u32 %v8601_v62, %v7823_v44  ;;  %3347 = vmatpush.bf16.msra.mxu0 %v7570_v18  ;;  %3614 = vmatpush.bf16.msra.mxu3 %v7954_v41 }
 0x289   :  { %12985 = vst [vmem:[#allocation154_spill] sm:$0xff] %v9918_v8  ;;  %v9920_v4 = vpop.f32.mrf.mxu0 }
 0x28a   :  { %12986 = vst [vmem:[#allocation155_spill] sm:$0xff] %v9920_v4  ;;  %v9922_v15 = vpop.f32.mrf.mxu1  ;;  %3525 = vmatpush.bf16.msra.mxu2 %v7826_v53  ;;  %3307 = vmatmul.bf16.gmra.mxu3 %v9273_v11  ;;  %v196_v53 = vld [vmem:[%s12527_s0 + $0x3b2] sm:$0x3f]  ;;  %v7935_v11 = vld [vmem:[#allocation3 + $0x450] sm:$0xf0] }
 0x28b   :  { %12987 = vst [vmem:[#allocation156_spill] sm:$0xff] %v9922_v15 }
 0x28f   :  { %v802_v17 = vld.sshfl [vmem:[#allocation1 + $0x20] sm:$0xff pattern:$0x73625140]  ;;  %v803_v57 = vld.sshfl [vmem:[#allocation1 + $0x28] sm:$0xff pattern:$0x73625140] }
 0x290   :  { %v804_v42 = vld.sshfl [vmem:[#allocation1 + $0x30] sm:$0xff pattern:$0x73625140] }
 0x291   :  { %809 = vst [vmem:[#allocation1 + $0x20] ss:$4 sm:$0xff] %v182_v27  ;;  %v8569_v27 = vld [vmem:[#allocation3 + $0x264] sm:$0xf]  ;;  %v3001_v41 = vpop.f32.mrf.mxu0 }
 0x292   :  { %810 = vst [vmem:[#allocation1 + $0x21] ss:$4 sm:$0xff] %v184_v26  ;;  %v7695_v26 = vld [vmem:[#allocation3 + $0x270] sm:$0xf0]  ;;  %v3002_v18 = vadd.f32 %v3001_v41, %v9224_v39  ;;  %v9959_v39 = vpop.f32.mrf.mxu3 }
 0x293   :  { %811 = vst [vmem:[#allocation1 + $0x22] ss:$4 sm:$0xff] %v186_v54  ;;  %v190_v54 = vld [vmem:[%s12527_s0 + $0x388] sm:$0x3f]  ;;  %v7698_v62 = vor.u32 %v8569_v27, %v7695_v26  ;;  %v198_v27 = vld [vmem:[%s12527_s0 + $0x3c0] sm:$0x3f] }
 0x294   :  { %812 = vst [vmem:[#allocation1 + $0x23] ss:$4 sm:$0xff] %v188_v46  ;;  %v192_v46 = vld [vmem:[%s12527_s0 + $0x396] sm:$0x3f]  ;;  %v200_v26 = vld [vmem:[%s12527_s0 + $0x3ce] sm:$0x3f] }
 0x295   :  { %3436 = vmatpush.bf16.msra.mxu1 %v7698_v62  ;;  %v202_v62 = vld [vmem:[%s12527_s0 + $0x3dc] sm:$0x3f] }
 0x29a   :  { %3312 = vmatmul.bf16.gmra.mxu3 %v9320_v61  ;;  %v9977_v8 = vpop.f32.mrf.mxu3  ;;  %v8629_v61 = vld [vmem:[#allocation3 + $0x444] sm:$0xf] }
 0x29b   :  { %v817_v40 = vld.sshfl [vmem:[#allocation1 + $0x20] sm:$0xff pattern:$0x73625140]  ;;  %v818_v44 = vld.sshfl [vmem:[#allocation1 + $0x28] sm:$0xff pattern:$0x73625140] }
 0x29c   :  { %v9931_v49 = vpack.c.bf16 %v817_v40, %v802_v17  ;;  %v9933_v60 = vpack.c.bf16 %v818_v44, %v803_v57  ;;  %v819_v47 = vld.sshfl [vmem:[#allocation1 + $0x30] sm:$0xff pattern:$0x73625140]  ;;  %v3090_v17 = vpop.f32.mrf.mxu1  ;;  %v204_v44 = vld [vmem:[%s12527_s0 + $0x3ea] sm:$0x3f] }
 0x29d   :  { %v9938_v55 = vpack.c.bf16 %v819_v47, %v804_v42  ;;  %824 = vst [vmem:[#allocation1 + $0x20] ss:$4 sm:$0xff] %v190_v54  ;;  %v3091_v57 = vadd.f32 %v3090_v17, %v3002_v18  ;;  %v9948_v42 = vpop.f32.mrf.mxu2  ;;  %v206_v18 = vld [vmem:[%s12527_s0 + $0x3f8] sm:$0x3f]  ;;  %v208_v17 = vld [vmem:[%s12527_s0 + $0x406] sm:$0x3f] }
 0x29e   :  { %12988 = vst [vmem:[#allocation157_spill] sm:$0xff] %v9931_v49  ;;  %3030 = vmatmul.bf16.gmra.mxu0 %v9931_v49  ;;  %3119 = vmatmul.bf16.gmra.mxu1 %v9933_v60 }
 0x29f   :  { %12989 = vst [vmem:[#allocation158_spill] sm:$0xff] %v9933_v60  ;;  %8178 = vmatmul.msk.bf16.gmra.mxu2 %vm2582_vm0, %v9938_v55  ;;  %v222_v60 = vld [vmem:[%s12527_s0 + $0x468] sm:$0x3f] }
 0x2a0   :  { %12990 = vst [vmem:[#allocation159_spill] sm:$0xff] %v9938_v55 }
 0x2a1   :  { %825 = vst [vmem:[#allocation1 + $0x21] ss:$4 sm:$0xff] %v192_v46 }
 0x2a2   :  { %826 = vst [vmem:[#allocation1 + $0x22] ss:$4 sm:$0xff] %v194_v45 }
 0x2a3   :  { %827 = vst [vmem:[#allocation1 + $0x23] ss:$4 sm:$0xff] %v196_v53  ;;  %v9967_v53 = vpop.f32.mrf.mxu0 }
 0x2a4   :  { %12991 = vst [vmem:[#allocation160_spill] sm:$0xff] %v9948_v42  ;;  %v9969_v41 = vpop.f32.mrf.mxu1  ;;  %v8533_v42 = vld [vmem:[#allocation3 + $0x144] sm:$0xf] }
 0x2a5   :  { %v3179_v47 = vpop.f32.mrf.mxu2  ;;  %12993 = vst [vmem:[#allocation162_spill] sm:$0xff] %v9967_v53  ;;  %v7807_v53 = vld [vmem:[#allocation3 + $0x350] sm:$0xf0] }
 0x2a6   :  { %v9965_v45 = vadd.f32 %v3179_v47, %v3091_v57  ;;  %12994 = vst [vmem:[#allocation163_spill] sm:$0xff] %v9969_v41  ;;  %v210_v47 = vld [vmem:[%s12527_s0 + $0x414] sm:$0x3f]  ;;  %v212_v41 = vld [vmem:[%s12527_s0 + $0x422] sm:$0x3f] }
 0x2a8   :  { %12992 = vst [vmem:[#allocation161_spill] sm:$0xff] %v9965_v45 }
 0x2aa   :  { %v832_v54 = vld.sshfl [vmem:[#allocation1 + $0x20] sm:$0xff pattern:$0x73625140]  ;;  %v833_v46 = vld.sshfl [vmem:[#allocation1 + $0x28] sm:$0xff pattern:$0x73625140]  ;;  %3317 = vmatmul.bf16.gmra.mxu3 %v9367_v34 }
 0x2ab   :  { %v834_v40 = vld.sshfl [vmem:[#allocation1 + $0x30] sm:$0xff pattern:$0x73625140]  ;;  %v7551_v34 = vld [vmem:[#allocation3 + $0x150] sm:$0xf0] }
 0x2ac   :  { %839 = vst [vmem:[#allocation1 + $0x20] ss:$4 sm:$0xff] %v198_v27 }
 0x2ad   :  { %840 = vst [vmem:[#allocation1 + $0x21] ss:$4 sm:$0xff] %v200_v26 }
 0x2ae   :  { %841 = vst [vmem:[#allocation1 + $0x22] ss:$4 sm:$0xff] %v202_v62 }
 0x2af   :  { %842 = vst [vmem:[#allocation1 + $0x23] ss:$4 sm:$0xff] %v204_v44 }
 0x2b6   :  { %v847_v27 = vld.sshfl [vmem:[#allocation1 + $0x20] sm:$0xff pattern:$0x73625140]  ;;  %v848_v26 = vld.sshfl [vmem:[#allocation1 + $0x28] sm:$0xff pattern:$0x73625140] }
 0x2b7   :  { %v9979_v62 = vpack.c.bf16 %v847_v27, %v832_v54  ;;  %v9981_v57 = vpack.c.bf16 %v848_v26, %v833_v46  ;;  %v849_v44 = vld.sshfl [vmem:[#allocation1 + $0x30] sm:$0xff pattern:$0x73625140]  ;;  %v3006_v54 = vpop.f32.mrf.mxu0  ;;  %v9997_v26 = vpop.f32.mrf.mxu3 }
 0x2b8   :  { %v9986_v45 = vpack.c.bf16 %v849_v44, %v834_v40  ;;  %854 = vst [vmem:[#allocation1 + $0x20] ss:$4 sm:$0xff] %v206_v18  ;;  %v3007_v46 = vadd.f32 %v3006_v54, %v9271_v23  ;;  %v3095_v40 = vpop.f32.mrf.mxu1  ;;  %v9999_v18 = vpop.f32.mrf.mxu2  ;;  %v216_v44 = vld [vmem:[%s12527_s0 + $0x43e] sm:$0x3f]  ;;  %v218_v23 = vld [vmem:[%s12527_s0 + $0x44c] sm:$0x3f] }
 0x2b9   :  { %12995 = vst [vmem:[#allocation164_spill] sm:$0xff] %v9979_v62  ;;  %3035 = vmatmul.bf16.gmra.mxu0 %v9979_v62  ;;  %3124 = vmatmul.bf16.gmra.mxu1 %v9981_v57 }
 0x2ba   :  { %12996 = vst [vmem:[#allocation165_spill] sm:$0xff] %v9981_v57  ;;  %8179 = vmatmul.msk.bf16.gmra.mxu2 %vm2582_vm0, %v9986_v45  ;;  %v3096_v27 = vadd.f32 %v3095_v40, %v3007_v46  ;;  %v220_v46 = vld [vmem:[%s12527_s0 + $0x45a] sm:$0x3f]  ;;  %3322 = vmatmul.bf16.gmra.mxu3 %v9414_v0  ;;  %v8625_v0 = vld [vmem:[#allocation3 + $0x424] sm:$0xf] }
 0x2bb   :  { %12997 = vst [vmem:[#allocation166_spill] sm:$0xff] %v9986_v45 }
 0x2bc   :  { %855 = vst [vmem:[#allocation1 + $0x21] ss:$4 sm:$0xff] %v208_v17  ;;  %v214_v17 = vld [vmem:[%s12527_s0 + $0x430] sm:$0x3f] }
 0x2bd   :  { %856 = vst [vmem:[#allocation1 + $0x22] ss:$4 sm:$0xff] %v210_v47 }
 0x2be   :  { %857 = vst [vmem:[#allocation1 + $0x23] ss:$4 sm:$0xff] %v212_v41 }
 0x2bf   :  { %12998 = vst [vmem:[#allocation167_spill] sm:$0xff] %v9999_v18  ;;  %v10013_v40 = vpop.f32.mrf.mxu3  ;;  %v8597_v18 = vld [vmem:[#allocation3 + $0x344] sm:$0xf]  ;;  %v10017_v57 = vpop.f32.mrf.mxu0 }
 0x2c0   :  { %v3184_v15 = vpop.f32.mrf.mxu2  ;;  %v7810_v4 = vor.u32 %v8597_v18, %v7807_v53  ;;  %13000 = vst [vmem:[#allocation169_spill] sm:$0xff] %v10017_v57  ;;  %v10019_v55 = vpop.f32.mrf.mxu1  ;;  %v224_v53 = vld [vmem:[%s12527_s0 + $0x476] sm:$0x3f] }
 0x2c1   :  { %v10015_v45 = vadd.f32 %v3184_v15, %v3096_v27  ;;  %13001 = vst [vmem:[#allocation170_spill] sm:$0xff] %v10019_v55  ;;  %v8529_v55 = vld [vmem:[#allocation3 + $0x124] sm:$0xf] }
 0x2c2   :  { %3526 = vmatpush.bf16.msra.mxu2 %v7810_v4  ;;  %v228_v4 = vld [vmem:[%s12527_s0 + $0x492] sm:$0x3f] }
 0x2c3   :  { %12999 = vst [vmem:[#allocation168_spill] sm:$0xff] %v10015_v45 }
 0x2c5   :  { %v862_v41 = vld.sshfl [vmem:[#allocation1 + $0x20] sm:$0xff pattern:$0x73625140]  ;;  %v863_v47 = vld.sshfl [vmem:[#allocation1 + $0x28] sm:$0xff pattern:$0x73625140] }
 0x2c6   :  { %v864_v54 = vld.sshfl [vmem:[#allocation1 + $0x30] sm:$0xff pattern:$0x73625140] }
 0x2c7   :  { %869 = vst [vmem:[#allocation1 + $0x20] ss:$4 sm:$0xff] %v214_v17  ;;  %v7554_v17 = vor.u32 %v8533_v42, %v7551_v34  ;;  %v226_v42 = vld [vmem:[%s12527_s0 + $0x484] sm:$0x3f] }
 0x2c8   :  { %870 = vst [vmem:[#allocation1 + $0x21] ss:$4 sm:$0xff] %v216_v44  ;;  %v7938_v44 = vor.u32 %v8629_v61, %v7935_v11 }
 0x2c9   :  { %871 = vst [vmem:[#allocation1 + $0x22] ss:$4 sm:$0xff] %v218_v23  ;;  %v8565_v23 = vld [vmem:[#allocation3 + $0x244] sm:$0xf]  ;;  %3348 = vmatpush.bf16.msra.mxu0 %v7554_v17  ;;  %v3100_v17 = vpop.f32.mrf.mxu1 }
 0x2ca   :  { %872 = vst [vmem:[#allocation1 + $0x23] ss:$4 sm:$0xff] %v220_v46  ;;  %v7679_v46 = vld [vmem:[#allocation3 + $0x250] sm:$0xf0]  ;;  %3615 = vmatpush.bf16.msra.mxu3 %v7938_v44 }
 0x2cb   :  { %v7682_v18 = vor.u32 %v8565_v23, %v7679_v46  ;;  %v10047_v23 = vpop.f32.mrf.mxu2  ;;  %v232_v46 = vld [vmem:[%s12527_s0 + $0x4ae] sm:$0x3f] }
 0x2cc   :  { %13005 = vst [vmem:[#allocation174_spill] sm:$0xff] %v10047_v23 }
 0x2cd   :  { %3437 = vmatpush.bf16.msra.mxu1 %v7682_v18 }
 0x2d1   :  { %v877_v15 = vld.sshfl [vmem:[#allocation1 + $0x20] sm:$0xff pattern:$0x73625140]  ;;  %v878_v27 = vld.sshfl [vmem:[#allocation1 + $0x28] sm:$0xff pattern:$0x73625140] }
 0x2d2   :  { %v10028_v34 = vpack.c.bf16 %v877_v15, %v862_v41  ;;  %v10030_v11 = vpack.c.bf16 %v878_v27, %v863_v47  ;;  %v879_v61 = vld.sshfl [vmem:[#allocation1 + $0x30] sm:$0xff pattern:$0x73625140]  ;;  %v3011_v41 = vpop.f32.mrf.mxu0  ;;  %v10044_v47 = vpop.f32.mrf.mxu3  ;;  %v234_v15 = vld [vmem:[%s12527_s0 + $0x4bc] sm:$0x3f]  ;;  %3327 = vmatmul.bf16.gmra.mxu3 %v9461_v7 }
 0x2d3   :  { %v10035_v45 = vpack.c.bf16 %v879_v61, %v864_v54  ;;  %884 = vst [vmem:[#allocation1 + $0x20] ss:$4 sm:$0xff] %v222_v60  ;;  %v3012_v54 = vadd.f32 %v3011_v41, %v9318_v36  ;;  %v230_v60 = vld [vmem:[%s12527_s0 + $0x4a0] sm:$0x3f]  ;;  %v236_v36 = vld [vmem:[%s12527_s0 + $0x4ca] sm:$0x3f] }
 0x2d4   :  { %13002 = vst [vmem:[#allocation171_spill] sm:$0xff] %v10028_v34  ;;  %3040 = vmatmul.bf16.gmra.mxu0 %v10028_v34  ;;  %3129 = vmatmul.bf16.gmra.mxu1 %v10030_v11  ;;  %v7535_v7 = vld [vmem:[#allocation3 + $0x130] sm:$0xf0] }
 0x2d5   :  { %13003 = vst [vmem:[#allocation172_spill] sm:$0xff] %v10030_v11  ;;  %8180 = vmatmul.msk.bf16.gmra.mxu2 %vm2582_vm0, %v10035_v45  ;;  %v3101_v44 = vadd.f32 %v3100_v17, %v3012_v54  ;;  %v10068_v54 = vpop.f32.mrf.mxu1  ;;  %v238_v17 = vld [vmem:[%s12527_s0 + $0x4d8] sm:$0x3f] }
 0x2d6   :  { %13004 = vst [vmem:[#allocation173_spill] sm:$0xff] %v10035_v45 }
 0x2d7   :  { %885 = vst [vmem:[#allocation1 + $0x21] ss:$4 sm:$0xff] %v224_v53 }
 0x2d8   :  { %886 = vst [vmem:[#allocation1 + $0x22] ss:$4 sm:$0xff] %v226_v42  ;;  %v3189_v42 = vpop.f32.mrf.mxu2 }
 0x2d9   :  { %887 = vst [vmem:[#allocation1 + $0x23] ss:$4 sm:$0xff] %v228_v4  ;;  %v10064_v4 = vadd.f32 %v3189_v42, %v3101_v44  ;;  %v242_v42 = vld [vmem:[%s12527_s0 + $0x4f4] sm:$0x3f] }
 0x2da   :  { %v10062_v61 = vpop.f32.mrf.mxu3  ;;  %v10066_v41 = vpop.f32.mrf.mxu0  ;;  %13008 = vst [vmem:[#allocation177_spill] sm:$0xff] %v10068_v54 }
 0x2db   :  { %13006 = vst [vmem:[#allocation175_spill] sm:$0xff] %v10064_v4 }
 0x2dc   :  { %13007 = vst [vmem:[#allocation176_spill] sm:$0xff] %v10066_v41  ;;  %v244_v41 = vld [vmem:[%s12527_s0 + $0x502] sm:$0x3f] }
 0x2e0   :  { %v892_v53 = vld.sshfl [vmem:[#allocation1 + $0x20] sm:$0xff pattern:$0x73625140]  ;;  %v893_v18 = vld.sshfl [vmem:[#allocation1 + $0x28] sm:$0xff pattern:$0x73625140] }
 0x2e1   :  { %v894_v27 = vld.sshfl [vmem:[#allocation1 + $0x30] sm:$0xff pattern:$0x73625140] }
 0x2e2   :  { %899 = vst [vmem:[#allocation1 + $0x20] ss:$4 sm:$0xff] %v230_v60  ;;  %v240_v60 = vld [vmem:[%s12527_s0 + $0x4e6] sm:$0x3f]  ;;  %v10085_v54 = vpop.f32.mrf.mxu3  ;;  %3332 = vmatmul.bf16.gmra.mxu3 %v9520_v43 }
 0x2e3   :  { %900 = vst [vmem:[#allocation1 + $0x21] ss:$4 sm:$0xff] %v232_v46 }
 0x2e4   :  { %901 = vst [vmem:[#allocation1 + $0x22] ss:$4 sm:$0xff] %v234_v15 }
 0x2e5   :  { %902 = vst [vmem:[#allocation1 + $0x23] ss:$4 sm:$0xff] %v236_v36 }
 0x2e6   :  { %13012 = vst [vmem:[#allocation181_spill] sm:$0xff] %v10085_v54  ;;  %v254_v54 = vld [vmem:[%s12527_s0 + $0x548] sm:$0x3f] }
 0x2ec   :  { %v907_v46 = vld.sshfl [vmem:[#allocation1 + $0x20] sm:$0xff pattern:$0x73625140]  ;;  %v908_v15 = vld.sshfl [vmem:[#allocation1 + $0x28] sm:$0xff pattern:$0x73625140] }
 0x2ed   :  { %v10076_v23 = vpack.c.bf16 %v907_v46, %v892_v53  ;;  %v10078_v36 = vpack.c.bf16 %v908_v15, %v893_v18  ;;  %v909_v44 = vld.sshfl [vmem:[#allocation1 + $0x30] sm:$0xff pattern:$0x73625140]  ;;  %v3016_v53 = vpop.f32.mrf.mxu0  ;;  %v10096_v15 = vpop.f32.mrf.mxu2 }
 0x2ee   :  { %v10083_v4 = vpack.c.bf16 %v909_v44, %v894_v27  ;;  %914 = vst [vmem:[#allocation1 + $0x20] ss:$4 sm:$0xff] %v238_v17  ;;  %v3017_v18 = vadd.f32 %v3016_v53, %v9365_v5  ;;  %v3105_v27 = vpop.f32.mrf.mxu1  ;;  %v246_v17 = vld [vmem:[%s12527_s0 + $0x510] sm:$0x3f] }
 0x2ef   :  { %13009 = vst [vmem:[#allocation178_spill] sm:$0xff] %v10076_v23  ;;  %3045 = vmatmul.bf16.gmra.mxu0 %v10076_v23  ;;  %3134 = vmatmul.bf16.gmra.mxu1 %v10078_v36  ;;  %v250_v5 = vld [vmem:[%s12527_s0 + $0x52c] sm:$0x3f] }
 0x2f0   :  { %13010 = vst [vmem:[#allocation179_spill] sm:$0xff] %v10078_v36  ;;  %8181 = vmatmul.msk.bf16.gmra.mxu2 %vm2582_vm0, %v10083_v4  ;;  %v3106_v46 = vadd.f32 %v3105_v27, %v3017_v18  ;;  %v252_v18 = vld [vmem:[%s12527_s0 + $0x53a] sm:$0x3f]  ;;  %v8593_v27 = vld [vmem:[#allocation3 + $0x324] sm:$0xf] }
 0x2f1   :  { %13011 = vst [vmem:[#allocation180_spill] sm:$0xff] %v10083_v4  ;;  %v7919_v4 = vld [vmem:[#allocation3 + $0x430] sm:$0xf0] }
 0x2f2   :  { %915 = vst [vmem:[#allocation1 + $0x21] ss:$4 sm:$0xff] %v240_v60  ;;  %v248_v60 = vld [vmem:[%s12527_s0 + $0x51e] sm:$0x3f] }
 0x2f3   :  { %916 = vst [vmem:[#allocation1 + $0x22] ss:$4 sm:$0xff] %v242_v42 }
 0x2f4   :  { %917 = vst [vmem:[#allocation1 + $0x23] ss:$4 sm:$0xff] %v244_v41  ;;  %v10104_v41 = vpop.f32.mrf.mxu3 }
 0x2f5   :  { %13013 = vst [vmem:[#allocation182_spill] sm:$0xff] %v10096_v15  ;;  %v7791_v15 = vld [vmem:[#allocation3 + $0x330] sm:$0xf0]  ;;  %v3194_v57 = vpop.f32.mrf.mxu2  ;;  %v10114_v45 = vpop.f32.mrf.mxu0 }
 0x2f6   :  { %13014 = vst [vmem:[#allocation183_spill] sm:$0xff] %v10104_v41  ;;  %v7794_v43 = vor.u32 %v8593_v27, %v7791_v15  ;;  %v10112_v36 = vadd.f32 %v3194_v57, %v3106_v46  ;;  %v10116_v11 = vpop.f32.mrf.mxu1  ;;  %v256_v15 = vld [vmem:[%s12527_s0 + $0x556] sm:$0x3f] }
 0x2f7   :  { %13016 = vst [vmem:[#allocation185_spill] sm:$0xff] %v10114_v45 }
 0x2f8   :  { %13015 = vst [vmem:[#allocation184_spill] sm:$0xff] %v10112_v36  ;;  %3527 = vmatpush.bf16.msra.mxu2 %v7794_v43  ;;  %v260_v43 = vld [vmem:[%s12527_s0 + $0x572] sm:$0x3f] }
 0x2f9   :  { %13017 = vst [vmem:[#allocation186_spill] sm:$0xff] %v10116_v11 }
 0x2fb   :  { %v922_v44 = vld.sshfl [vmem:[#allocation1 + $0x20] sm:$0xff pattern:$0x73625140]  ;;  %v923_v42 = vld.sshfl [vmem:[#allocation1 + $0x28] sm:$0xff pattern:$0x73625140] }
 0x2fc   :  { %v924_v53 = vld.sshfl [vmem:[#allocation1 + $0x30] sm:$0xff pattern:$0x73625140]  ;;  %v10118_v41 = vpop.f32.mrf.mxu3  ;;  %3337 = vmatmul.bf16.gmra.mxu3 %v9593_v9 }
 0x2fd   :  { %929 = vst [vmem:[#allocation1 + $0x20] ss:$4 sm:$0xff] %v246_v17  ;;  %v7538_v17 = vor.u32 %v8529_v55, %v7535_v7 }
 0x2fe   :  { %930 = vst [vmem:[#allocation1 + $0x21] ss:$4 sm:$0xff] %v248_v60  ;;  %v7922_v60 = vor.u32 %v8625_v0, %v7919_v4  ;;  %v258_v4 = vld [vmem:[%s12527_s0 + $0x564] sm:$0x3f] }
 0x2ff   :  { %931 = vst [vmem:[#allocation1 + $0x22] ss:$4 sm:$0xff] %v250_v5  ;;  %v8561_v5 = vld [vmem:[#allocation3 + $0x224] sm:$0xf]  ;;  %3349 = vmatpush.bf16.msra.mxu0 %v7538_v17 }
 0x300   :  { %932 = vst [vmem:[#allocation1 + $0x23] ss:$4 sm:$0xff] %v252_v18  ;;  %v7663_v18 = vld [vmem:[#allocation3 + $0x230] sm:$0xf0]  ;;  %3616 = vmatpush.bf16.msra.mxu3 %v7922_v60 }
 0x301   :  { %v7666_v57 = vor.u32 %v8561_v5, %v7663_v18  ;;  %v10146_v5 = vpop.f32.mrf.mxu2  ;;  %v264_v18 = vld [vmem:[%s12527_s0 + $0x58e] sm:$0x3f] }
 0x302   :  { %13022 = vst [vmem:[#allocation191_spill] sm:$0xff] %v10146_v5 }
 0x303   :  { %3438 = vmatpush.bf16.msra.mxu1 %v7666_v57 }
 0x304   :  { %v10144_v17 = vpop.f32.mrf.mxu3 }
 0x305   :  { %13021 = vst [vmem:[#allocation190_spill] sm:$0xff] %v10144_v17 }
 0x307   :  { %v937_v46 = vld.sshfl [vmem:[#allocation1 + $0x20] sm:$0xff pattern:$0x73625140]  ;;  %v938_v27 = vld.sshfl [vmem:[#allocation1 + $0x28] sm:$0xff pattern:$0x73625140] }
 0x308   :  { %v10127_v7 = vpack.c.bf16 %v937_v46, %v922_v44  ;;  %v10129_v0 = vpack.c.bf16 %v938_v27, %v923_v42  ;;  %v939_v55 = vld.sshfl [vmem:[#allocation1 + $0x30] sm:$0xff pattern:$0x73625140]  ;;  %v3021_v44 = vpop.f32.mrf.mxu0  ;;  %v268_v27 = vld [vmem:[%s12527_s0 + $0x5aa] sm:$0x3f] }
 0x309   :  { %v10134_v36 = vpack.c.bf16 %v939_v55, %v924_v53  ;;  %944 = vst [vmem:[#allocation1 + $0x20] ss:$4 sm:$0xff] %v254_v54  ;;  %v3022_v42 = vadd.f32 %v3021_v44, %v9412_v35  ;;  %v3110_v53 = vpop.f32.mrf.mxu1  ;;  %v262_v54 = vld [vmem:[%s12527_s0 + $0x580] sm:$0x3f] }
 0x30a   :  { %13018 = vst [vmem:[#allocation187_spill] sm:$0xff] %v10127_v7  ;;  %3050 = vmatmul.bf16.gmra.mxu0 %v10127_v7  ;;  %3139 = vmatmul.bf16.gmra.mxu1 %v10129_v0  ;;  %v266_v35 = vld [vmem:[%s12527_s0 + $0x59c] sm:$0x3f] }
 0x30b   :  { %13019 = vst [vmem:[#allocation188_spill] sm:$0xff] %v10129_v0  ;;  %8182 = vmatmul.msk.bf16.gmra.mxu2 %vm2582_vm0, %v10134_v36  ;;  %v3111_v60 = vadd.f32 %v3110_v53, %v3022_v42  ;;  %v270_v53 = vld [vmem:[%s12527_s0 + $0x5b8] sm:$0x3f] }
 0x30c   :  { %13020 = vst [vmem:[#allocation189_spill] sm:$0xff] %v10134_v36  ;;  %v10160_v55 = vpop.f32.mrf.mxu3  ;;  %v7903_v36 = vld [vmem:[#allocation3 + $0x410] sm:$0xf0] }
 0x30d   :  { %945 = vst [vmem:[#allocation1 + $0x21] ss:$4 sm:$0xff] %v256_v15 }
 0x30e   :  { %946 = vst [vmem:[#allocation1 + $0x22] ss:$4 sm:$0xff] %v258_v4  ;;  %v3199_v4 = vpop.f32.mrf.mxu2 }
 0x30f   :  { %947 = vst [vmem:[#allocation1 + $0x23] ss:$4 sm:$0xff] %v260_v43  ;;  %v10162_v43 = vadd.f32 %v3199_v4, %v3111_v60  ;;  %v274_v4 = vld [vmem:[%s12527_s0 + $0x5d4] sm:$0x3f] }
 0x310   :  { %13023 = vst [vmem:[#allocation192_spill] sm:$0xff] %v10160_v55  ;;  %v10164_v44 = vpop.f32.mrf.mxu0 }
 0x311   :  { %13024 = vst [vmem:[#allocation193_spill] sm:$0xff] %v10162_v43  ;;  %v10166_v42 = vpop.f32.mrf.mxu1 }
 0x312   :  { %13025 = vst [vmem:[#allocation194_spill] sm:$0xff] %v10164_v44 }
 0x313   :  { %13026 = vst [vmem:[#allocation195_spill] sm:$0xff] %v10166_v42  ;;  %v276_v42 = vld [vmem:[%s12527_s0 + $0x5e2] sm:$0x3f] }
 0x316   :  { %v952_v15 = vld.sshfl [vmem:[#allocation1 + $0x20] sm:$0xff pattern:$0x73625140]  ;;  %v953_v57 = vld.sshfl [vmem:[#allocation1 + $0x28] sm:$0xff pattern:$0x73625140] }
 0x317   :  { %v954_v46 = vld.sshfl [vmem:[#allocation1 + $0x30] sm:$0xff pattern:$0x73625140] }
 0x318   :  { %959 = vst [vmem:[#allocation1 + $0x20] ss:$4 sm:$0xff] %v262_v54  ;;  %v272_v54 = vld [vmem:[%s12527_s0 + $0x5c6] sm:$0x3f] }
 0x319   :  { %960 = vst [vmem:[#allocation1 + $0x21] ss:$4 sm:$0xff] %v264_v18 }
 0x31a   :  { %961 = vst [vmem:[#allocation1 + $0x22] ss:$4 sm:$0xff] %v266_v35 }
 0x31b   :  { %962 = vst [vmem:[#allocation1 + $0x23] ss:$4 sm:$0xff] %v268_v27 }
 0x322   :  { %v967_v18 = vld.sshfl [vmem:[#allocation1 + $0x20] sm:$0xff pattern:$0x73625140]  ;;  %v968_v35 = vld.sshfl [vmem:[#allocation1 + $0x28] sm:$0xff pattern:$0x73625140] }
 0x323   :  { %v10174_v27 = vpack.c.bf16 %v967_v18, %v952_v15  ;;  %v10176_v5 = vpack.c.bf16 %v968_v35, %v953_v57  ;;  %v969_v60 = vld.sshfl [vmem:[#allocation1 + $0x30] sm:$0xff pattern:$0x73625140]  ;;  %v10190_v15 = vpop.f32.mrf.mxu3  ;;  %v3026_v57 = vpop.f32.mrf.mxu0 }
 0x324   :  { %v10181_v43 = vpack.c.bf16 %v969_v60, %v954_v46  ;;  %974 = vst [vmem:[#allocation1 + $0x20] ss:$4 sm:$0xff] %v270_v53  ;;  %v3027_v46 = vadd.f32 %v3026_v57, %v9459_v29  ;;  %v3115_v18 = vpop.f32.mrf.mxu1  ;;  %v10193_v60 = vpop.f32.mrf.mxu2  ;;  %v278_v53 = vld [vmem:[%s12527_s0 + $0x5f0] sm:$0x3f]  ;;  %v284_v29 = vld [vmem:[%s12527_s0 + $0x61a] sm:$0x3f] }
 0x325   :  { %13027 = vst [vmem:[#allocation196_spill] sm:$0xff] %v10174_v27  ;;  %3055 = vmatmul.bf16.gmra.mxu0 %v10174_v27  ;;  %3144 = vmatmul.bf16.gmra.mxu1 %v10176_v5 }
 0x326   :  { %13028 = vst [vmem:[#allocation197_spill] sm:$0xff] %v10176_v5  ;;  %8183 = vmatmul.msk.bf16.gmra.mxu2 %vm2582_vm0, %v10181_v43  ;;  %v3116_v35 = vadd.f32 %v3115_v18, %v3027_v46  ;;  %v8589_v46 = vld [vmem:[#allocation3 + $0x304] sm:$0xf]  ;;  %v7775_v18 = vld [vmem:[#allocation3 + $0x310] sm:$0xf0] }
 0x327   :  { %13029 = vst [vmem:[#allocation198_spill] sm:$0xff] %v10181_v43  ;;  %v7778_v9 = vor.u32 %v8589_v46, %v7775_v18  ;;  %v7519_v43 = vld [vmem:[#allocation3 + $0x110] sm:$0xf0]  ;;  %v8621_v5 = vld [vmem:[#allocation3 + $0x404] sm:$0xf] }
 0x328   :  { %975 = vst [vmem:[#allocation1 + $0x21] ss:$4 sm:$0xff] %v272_v54  ;;  %v280_v54 = vld [vmem:[%s12527_s0 + $0x5fe] sm:$0x3f]  ;;  %v7906_v17 = vor.u32 %v8621_v5, %v7903_v36 }
 0x329   :  { %976 = vst [vmem:[#allocation1 + $0x22] ss:$4 sm:$0xff] %v274_v4  ;;  %3528 = vmatpush.bf16.msra.mxu2 %v7778_v9  ;;  %v292_v9 = vld [vmem:[%s12527_s0 + $0x652] sm:$0x3f] }
 0x32a   :  { %13030 = vst [vmem:[#allocation199_spill] sm:$0xff] %v10190_v15  ;;  %3617 = vmatpush.bf16.msra.mxu3 %v7906_v17 }
 0x32b   :  { %977 = vst [vmem:[#allocation1 + $0x23] ss:$4 sm:$0xff] %v276_v42  ;;  %v282_v42 = vld [vmem:[%s12527_s0 + $0x60c] sm:$0x3f]  ;;  %v10207_v57 = vpop.f32.mrf.mxu3  ;;  %v10211_v15 = vpop.f32.mrf.mxu0 }
 0x32c   :  { %13031 = vst [vmem:[#allocation200_spill] sm:$0xff] %v10193_v60  ;;  %v8525_v60 = vld [vmem:[#allocation3 + $0x104] sm:$0xf]  ;;  %v3204_v45 = vpop.f32.mrf.mxu2  ;;  %v10213_v55 = vpop.f32.mrf.mxu1 }
 0x32d   :  { %13032 = vst [vmem:[#allocation201_spill] sm:$0xff] %v10207_v57  ;;  %v10209_v0 = vadd.f32 %v3204_v45, %v3116_v35  ;;  %v8557_v57 = vld [vmem:[#allocation3 + $0x204] sm:$0xf]  ;;  %3618 = vmatmul.bf16.vlgmr.msra.gmra.mxu3 %v9629_v59  ;;  %v8524_v59 = vld [vmem:[#allocation3 + $0xf4] sm:$0xf0] }
 0x32e   :  { %13034 = vst [vmem:[#allocation203_spill] sm:$0xff] %v10211_v15 }
 0x32f   :  { %13033 = vst [vmem:[#allocation202_spill] sm:$0xff] %v10209_v0 }
 0x330   :  { %13035 = vst [vmem:[#allocation204_spill] sm:$0xff] %v10213_v55 }
 0x332   :  { %v982_v44 = vld.sshfl [vmem:[#allocation1 + $0x20] sm:$0xff pattern:$0x73625140]  ;;  %v983_v4 = vld.sshfl [vmem:[#allocation1 + $0x28] sm:$0xff pattern:$0x73625140] }
 0x333   :  { %v984_v11 = vld.sshfl [vmem:[#allocation1 + $0x30] sm:$0xff pattern:$0x73625140]  ;;  %v10221_v18 = vpop.f32.mrf.mxu3  ;;  %v3031_v17 = vpop.f32.mrf.mxu0 }
 0x334   :  { %989 = vst [vmem:[#allocation1 + $0x20] ss:$4 sm:$0xff] %v278_v53  ;;  %v7522_v53 = vor.u32 %v8525_v60, %v7519_v43  ;;  %v290_v60 = vld [vmem:[%s12527_s0 + $0x644] sm:$0x3f] }
 0x335   :  { %990 = vst [vmem:[#allocation1 + $0x21] ss:$4 sm:$0xff] %v280_v54  ;;  %v7647_v54 = vld [vmem:[#allocation3 + $0x210] sm:$0xf0] }
 0x336   :  { %991 = vst [vmem:[#allocation1 + $0x22] ss:$4 sm:$0xff] %v282_v42  ;;  %v286_v42 = vld [vmem:[%s12527_s0 + $0x628] sm:$0x3f]  ;;  %v7650_v46 = vor.u32 %v8557_v57, %v7647_v54  ;;  %3350 = vmatpush.bf16.msra.mxu0 %v7522_v53  ;;  %v10241_v57 = vpop.f32.mrf.mxu2  ;;  %v294_v54 = vld [vmem:[%s12527_s0 + $0x660] sm:$0x3f] }
 0x337   :  { %992 = vst [vmem:[#allocation1 + $0x23] ss:$4 sm:$0xff] %v284_v29  ;;  %v288_v29 = vld [vmem:[%s12527_s0 + $0x636] sm:$0x3f] }
 0x338   :  { %3439 = vmatpush.bf16.msra.mxu1 %v7650_v46  ;;  %13039 = vst [vmem:[#allocation208_spill] sm:$0xff] %v10241_v57 }
 0x33b   :  { %v10243_v53 = vpop.f32.mrf.mxu3 }
 0x33d   :  { %3623 = vmatmul.bf16.gmra.mxu3 %v9660_v50 }
 0x33e   :  { %v997_v45 = vld.sshfl [vmem:[#allocation1 + $0x20] sm:$0xff pattern:$0x73625140]  ;;  %v998_v35 = vld.sshfl [vmem:[#allocation1 + $0x28] sm:$0xff pattern:$0x73625140] }
 0x33f   :  { %v10223_v43 = vpack.c.bf16 %v997_v45, %v982_v44  ;;  %v10225_v36 = vpack.c.bf16 %v998_v35, %v983_v4  ;;  %v999_v5 = vld.sshfl [vmem:[#allocation1 + $0x30] sm:$0xff pattern:$0x73625140]  ;;  %v3120_v44 = vpop.f32.mrf.mxu1  ;;  %v300_v35 = vld [vmem:[%s12527_s0 + $0x68a] sm:$0x3f] }
 0x340   :  { %v10230_v0 = vpack.c.bf16 %v999_v5, %v984_v11  ;;  %1004 = vst [vmem:[#allocation1 + $0x20] ss:$4 sm:$0xff] %v286_v42  ;;  %v3032_v11 = vadd.f32 %v3031_v17, %v9518_v38  ;;  %v296_v42 = vld [vmem:[%s12527_s0 + $0x66e] sm:$0x3f]  ;;  %v298_v38 = vld [vmem:[%s12527_s0 + $0x67c] sm:$0x3f]  ;;  %v3209_v5 = vpop.f32.mrf.mxu2  ;;  %v10262_v17 = vpop.f32.mrf.mxu0 }
 0x341   :  { %13036 = vst [vmem:[#allocation205_spill] sm:$0xff] %v10223_v43  ;;  %3060 = vmatmul.bf16.gmra.mxu0 %v10223_v43  ;;  %3149 = vmatmul.bf16.gmra.mxu1 %v10225_v36 }
 0x342   :  { %13037 = vst [vmem:[#allocation206_spill] sm:$0xff] %v10225_v36  ;;  %8184 = vmatmul.msk.bf16.gmra.mxu2 %vm2582_vm0, %v10230_v0  ;;  %v3121_v4 = vadd.f32 %v3120_v44, %v3032_v11  ;;  %v302_v44 = vld [vmem:[%s12527_s0 + $0x698] sm:$0x3f]  ;;  %v7637_v36 = vld [vmem:[#allocation3 + $0x1e8] sm:$0xf] }
 0x343   :  { %13038 = vst [vmem:[#allocation207_spill] sm:$0xff] %v10230_v0  ;;  %v8143_v0 = vld [vmem:[#allocation3 + $0x5f0] sm:$0xf0] }
 0x344   :  { %1005 = vst [vmem:[#allocation1 + $0x21] ss:$4 sm:$0xff] %v288_v29 }
 0x345   :  { %1006 = vst [vmem:[#allocation1 + $0x22] ss:$4 sm:$0xff] %v290_v60  ;;  %v10257_v60 = vpop.f32.mrf.mxu3 }
 0x346   :  { %1007 = vst [vmem:[#allocation1 + $0x23] ss:$4 sm:$0xff] %v292_v9  ;;  %v10260_v9 = vadd.f32 %v3209_v5, %v3121_v4  ;;  %v306_v5 = vld [vmem:[%s12527_s0 + $0x6b4] sm:$0x3f] }
 0x347   :  { %13040 = vst [vmem:[#allocation209_spill] sm:$0xff] %v10257_v60  ;;  %v10264_v11 = vpop.f32.mrf.mxu1  ;;  %v8685_v60 = vld [vmem:[#allocation3 + $0x604] sm:$0xf] }
 0x348   :  { %13041 = vst [vmem:[#allocation210_spill] sm:$0xff] %v10260_v9 }
 0x349   :  { %13042 = vst [vmem:[#allocation211_spill] sm:$0xff] %v10262_v17 }
 0x34a   :  { %13043 = vst [vmem:[#allocation212_spill] sm:$0xff] %v10264_v11  ;;  %v308_v11 = vld [vmem:[%s12527_s0 + $0x6c2] sm:$0x3f] }
 0x34d   :  { %v1012_v29 = vld.sshfl [vmem:[#allocation1 + $0x20] sm:$0xff pattern:$0x73625140]  ;;  %v1013_v46 = vld.sshfl [vmem:[#allocation1 + $0x28] sm:$0xff pattern:$0x73625140]  ;;  %3628 = vmatmul.bf16.gmra.mxu3 %v9701_v20 }
 0x34e   :  { %v1014_v45 = vld.sshfl [vmem:[#allocation1 + $0x30] sm:$0xff pattern:$0x73625140] }
 0x34f   :  { %1019 = vst [vmem:[#allocation1 + $0x20] ss:$4 sm:$0xff] %v294_v54  ;;  %v304_v54 = vld [vmem:[%s12527_s0 + $0x6a6] sm:$0x3f] }
 0x350   :  { %1020 = vst [vmem:[#allocation1 + $0x21] ss:$4 sm:$0xff] %v296_v42 }
 0x351   :  { %1021 = vst [vmem:[#allocation1 + $0x22] ss:$4 sm:$0xff] %v298_v38 }
 0x352   :  { %1022 = vst [vmem:[#allocation1 + $0x23] ss:$4 sm:$0xff] %v300_v35 }
 0x359   :  { %v1027_v42 = vld.sshfl [vmem:[#allocation1 + $0x20] sm:$0xff pattern:$0x73625140]  ;;  %v1028_v38 = vld.sshfl [vmem:[#allocation1 + $0x28] sm:$0xff pattern:$0x73625140] }
 0x35a   :  { %v10272_v35 = vpack.c.bf16 %v1027_v42, %v1012_v29  ;;  %v10274_v57 = vpack.c.bf16 %v1028_v38, %v1013_v46  ;;  %v1029_v4 = vld.sshfl [vmem:[#allocation1 + $0x30] sm:$0xff pattern:$0x73625140]  ;;  %v10288_v29 = vpop.f32.mrf.mxu2  ;;  %v10290_v46 = vpop.f32.mrf.mxu3 }
 0x35b   :  { %v10279_v9 = vpack.c.bf16 %v1029_v4, %v1014_v45  ;;  %1034 = vst [vmem:[#allocation1 + $0x20] ss:$4 sm:$0xff] %v302_v44  ;;  %v3036_v45 = vpop.f32.mrf.mxu0  ;;  %v3125_v42 = vpop.f32.mrf.mxu1  ;;  %v310_v44 = vld [vmem:[%s12527_s0 + $0x6d0] sm:$0x3f] }
 0x35c   :  { %13044 = vst [vmem:[#allocation213_spill] sm:$0xff] %v10272_v35  ;;  %3065 = vmatmul.bf16.gmra.mxu0 %v10272_v35  ;;  %3154 = vmatmul.bf16.gmra.mxu1 %v10274_v57  ;;  %v3037_v38 = vadd.f32 %v3036_v45, %v9574_v22 }
 0x35d   :  { %13045 = vst [vmem:[#allocation214_spill] sm:$0xff] %v10274_v57  ;;  %8185 = vmatmul.msk.bf16.gmra.mxu2 %vm2582_vm0, %v10279_v9  ;;  %3633 = vmatmul.bf16.gmra.mxu3 %v9743_v30  ;;  %v7461_v30 = vld [vmem:[#allocation3 + $0x88] sm:$0xf] }
 0x35e   :  { %13046 = vst [vmem:[#allocation215_spill] sm:$0xff] %v10279_v9  ;;  %v3126_v4 = vadd.f32 %v3125_v42, %v3037_v38  ;;  %v7509_v38 = vld [vmem:[#allocation3 + $0xe8] sm:$0xf]  ;;  %v8681_v9 = vld [vmem:[#allocation3 + $0x5e4] sm:$0xf] }
 0x35f   :  { %1035 = vst [vmem:[#allocation1 + $0x21] ss:$4 sm:$0xff] %v304_v54  ;;  %v312_v54 = vld [vmem:[%s12527_s0 + $0x6de] sm:$0x3f]  ;;  %v7510_v57 = vor.u32 %v8524_v59, %v7509_v38 }
 0x360   :  { %1036 = vst [vmem:[#allocation1 + $0x22] ss:$4 sm:$0xff] %v306_v5  ;;  %v314_v5 = vld [vmem:[%s12527_s0 + $0x6ec] sm:$0x3f] }
 0x361   :  { %13047 = vst [vmem:[#allocation216_spill] sm:$0xff] %v10288_v29  ;;  %3877 = vmatpush.bf16.msrb.mxu2 %v7510_v57 }
 0x362   :  { %13048 = vst [vmem:[#allocation217_spill] sm:$0xff] %v10290_v46  ;;  %v3214_v22 = vpop.f32.mrf.mxu2  ;;  %v10305_v45 = vpop.f32.mrf.mxu3  ;;  %v8146_v46 = vor.u32 %v8681_v9, %v8143_v0 }
 0x363   :  { %1037 = vst [vmem:[#allocation1 + $0x23] ss:$4 sm:$0xff] %v308_v11  ;;  %v316_v11 = vld [vmem:[%s12527_s0 + $0x6fa] sm:$0x3f]  ;;  %v10308_v55 = vadd.f32 %v3214_v22, %v3126_v4  ;;  %v10310_v15 = vpop.f32.mrf.mxu0  ;;  %v10312_v50 = vpop.f32.mrf.mxu1 }
 0x364   :  { %13049 = vst [vmem:[#allocation218_spill] sm:$0xff] %v10305_v45  ;;  %v8556_v45 = vld [vmem:[#allocation3 + $0x1f4] sm:$0xf0]  ;;  %3699 = vmatpush.bf16.msrb.mxu0 %v8146_v46  ;;  %v8159_v4 = vld [vmem:[#allocation3 + $0x610] sm:$0xf0] }
 0x365   :  { %13050 = vst [vmem:[#allocation219_spill] sm:$0xff] %v10308_v55  ;;  %v7638_v20 = vor.u32 %v8556_v45, %v7637_v36  ;;  %v8162_v22 = vor.u32 %v8685_v60, %v8159_v4 }
 0x366   :  { %13051 = vst [vmem:[#allocation220_spill] sm:$0xff] %v10310_v15 }
 0x367   :  { %13052 = vst [vmem:[#allocation221_spill] sm:$0xff] %v10312_v50  ;;  %3966 = vmatpush.bf16.msrb.mxu3 %v7638_v20  ;;  %3795 = vmatpush.bf16.msrb.mxu1 %v8162_v22 }
 0x36a   :  { %v1042_v29 = vld.sshfl [vmem:[#allocation1 + $0x20] sm:$0xff pattern:$0x73625140]  ;;  %v1043_v17 = vld.sshfl [vmem:[#allocation1 + $0x28] sm:$0xff pattern:$0x73625140]  ;;  %v10314_v55 = vpop.f32.mrf.mxu2 }
 0x36b   :  { %v1044_v42 = vld.sshfl [vmem:[#allocation1 + $0x30] sm:$0xff pattern:$0x73625140]  ;;  %13053 = vst [vmem:[#allocation222_spill] sm:$0xff] %v10314_v55  ;;  %v3130_v59 = vpop.f32.mrf.mxu1 }
 0x36c   :  { %1049 = vst [vmem:[#allocation1 + $0x20] ss:$4 sm:$0xff] %v310_v44  ;;  %v10316_v44 = vpop.f32.mrf.mxu3 }
 0x36d   :  { %1050 = vst [vmem:[#allocation1 + $0x21] ss:$4 sm:$0xff] %v312_v54  ;;  %v3041_v54 = vpop.f32.mrf.mxu0  ;;  %3638 = vmatmul.bf16.gmra.mxu3 %v9789_v33 }
 0x36e   :  { %1051 = vst [vmem:[#allocation1 + $0x22] ss:$4 sm:$0xff] %v314_v5  ;;  %v3042_v38 = vadd.f32 %v3041_v54, %v9609_v58 }
 0x36f   :  { %1052 = vst [vmem:[#allocation1 + $0x23] ss:$4 sm:$0xff] %v316_v11 }
 0x370   :  { %v3131_v9 = vadd.f32 %v3130_v59, %v3042_v38  ;;  %v7493_v38 = vld [vmem:[#allocation3 + $0xc8] sm:$0xf] }
 0x372   :  { %v3219_v20 = vpop.f32.mrf.mxu2 }
 0x373   :  { %v10332_v58 = vadd.f32 %v3219_v20, %v3131_v9 }
 0x374   :  { %v10329_v60 = vpop.f32.mrf.mxu3 }
 0x375   :  { %13057 = vst [vmem:[#allocation226_spill] sm:$0xff] %v10332_v58  ;;  %v8127_v58 = vld [vmem:[#allocation3 + $0x5d0] sm:$0xf0] }
 0x376   :  { %v1057_v5 = vld.sshfl [vmem:[#allocation1 + $0x20] sm:$0xff pattern:$0x73625140]  ;;  %v1058_v0 = vld.sshfl [vmem:[#allocation1 + $0x28] sm:$0xff pattern:$0x73625140] }
 0x377   :  { %v10319_v11 = vpack.c.bf16 %v1057_v5, %v1042_v29  ;;  %v10321_v36 = vpack.c.bf16 %v1058_v0, %v1043_v17  ;;  %v1059_v57 = vld.sshfl [vmem:[#allocation1 + $0x30] sm:$0xff pattern:$0x73625140]  ;;  %v10334_v29 = vpop.f32.mrf.mxu0  ;;  %v10336_v17 = vpop.f32.mrf.mxu1  ;;  %v8520_v5 = vld [vmem:[#allocation3 + $0xd4] sm:$0xf0] }
 0x378   :  { %v10323_v46 = vpack.c.bf16 %v1059_v57, %v1044_v42  ;;  %13058 = vst [vmem:[#allocation227_spill] sm:$0xff] %v10334_v29  ;;  %v8677_v0 = vld [vmem:[#allocation3 + $0x5c4] sm:$0xf]  ;;  %v7494_v20 = vor.u32 %v8520_v5, %v7493_v38 }
 0x379   :  { %13054 = vst [vmem:[#allocation223_spill] sm:$0xff] %v10319_v11  ;;  %3070 = vmatmul.bf16.gmra.mxu0 %v10319_v11  ;;  %3159 = vmatmul.bf16.gmra.mxu1 %v10321_v36 }
 0x37a   :  { %13055 = vst [vmem:[#allocation224_spill] sm:$0xff] %v10321_v36  ;;  %8186 = vmatmul.msk.bf16.gmra.mxu2 %vm2582_vm0, %v10323_v46  ;;  %v10338_v45 = vpop.f32.mrf.mxu2 }
 0x37b   :  { %13056 = vst [vmem:[#allocation225_spill] sm:$0xff] %v10323_v46  ;;  %3878 = vmatpush.bf16.msrb.mxu2 %v7494_v20 }
 0x37c   :  { %13059 = vst [vmem:[#allocation228_spill] sm:$0xff] %v10336_v17  ;;  %v10340_v42 = vpop.f32.mrf.mxu3 }
 0x37d   :  { %13060 = vst [vmem:[#allocation229_spill] sm:$0xff] %v10338_v45  ;;  %v7621_v45 = vld [vmem:[#allocation3 + $0x1c8] sm:$0xf]  ;;  %3643 = vmatmul.bf16.gmra.mxu3 %v9836_v16 }
 0x37f   :  { %v3046_v4 = vpop.f32.mrf.mxu0  ;;  %v3135_v54 = vpop.f32.mrf.mxu1 }
 0x380   :  { %v3047_v22 = vadd.f32 %v3046_v4, %v9656_v25  ;;  %v8552_v25 = vld [vmem:[#allocation3 + $0x1d4] sm:$0xf0] }
 0x382   :  { %v3136_v59 = vadd.f32 %v3135_v54, %v3047_v22  ;;  %v3224_v9 = vpop.f32.mrf.mxu2  ;;  %v8130_v22 = vor.u32 %v8677_v0, %v8127_v58  ;;  %v7622_v54 = vor.u32 %v8552_v25, %v7621_v45  ;;  %v8516_v25 = vld [vmem:[#allocation3 + $0xb4] sm:$0xf0] }
 0x384   :  { %v10346_v57 = vpop.f32.mrf.mxu3  ;;  %v10349_v4 = vadd.f32 %v3224_v9, %v3136_v59  ;;  %3700 = vmatpush.bf16.msrb.mxu0 %v8130_v22  ;;  %3967 = vmatpush.bf16.msrb.mxu3 %v7622_v54  ;;  %v8673_v22 = vld [vmem:[#allocation3 + $0x5a4] sm:$0xf] }
 0x386   :  { %13061 = vst [vmem:[#allocation230_spill] sm:$0xff] %v10349_v4 }
 0x387   :  { %v10351_v17 = vpop.f32.mrf.mxu0  ;;  %v10353_v29 = vpop.f32.mrf.mxu1 }
 0x388   :  { %13062 = vst [vmem:[#allocation231_spill] sm:$0xff] %v10351_v17 }
 0x389   :  { %3351 = vmatmul.bf16.vlgmr.msra.gmra.mxu0 %v8917_v63  ;;  %3440 = vmatmul.bf16.vlgmr.msra.gmra.mxu1 %v8919_v2  ;;  %13063 = vst [vmem:[#allocation232_spill] sm:$0xff] %v10353_v29 }
 0x38a   :  { %3529 = vmatmul.bf16.vlgmr.msra.gmra.mxu2 %v8921_v3  ;;  %v10357_v50 = vpop.f32.mrf.mxu2 }
 0x38b   :  { %13064 = vst [vmem:[#allocation233_spill] sm:$0xff] %v10357_v50 }
 0x38c   :  { %v10355_v55 = vpop.f32.mrf.mxu3 }
 0x38d   :  { %3648 = vmatmul.bf16.gmra.mxu3 %v9886_v12 }
 0x38f   :  { %v3051_v15 = vpop.f32.mrf.mxu0  ;;  %v3140_v5 = vpop.f32.mrf.mxu1 }
 0x390   :  { %v3052_v38 = vadd.f32 %v3051_v15, %v9694_v6  ;;  %v7477_v15 = vld [vmem:[#allocation3 + $0xa8] sm:$0xf] }
 0x392   :  { %v3141_v58 = vadd.f32 %v3140_v5, %v3052_v38  ;;  %v3229_v59 = vpop.f32.mrf.mxu2  ;;  %v7478_v5 = vor.u32 %v8516_v25, %v7477_v15  ;;  %v13071_v15 = vld [vmem:[#allocation23_spill] sm:$0xff]  ;;  %v13072_v25 = vld [vmem:[#allocation24_spill] sm:$0xff] }
 0x394   :  { %v10363_v45 = vpop.f32.mrf.mxu3  ;;  %v10366_v0 = vadd.f32 %v3229_v59, %v3141_v58  ;;  %v8111_v58 = vld [vmem:[#allocation3 + $0x5b0] sm:$0xf0]  ;;  %v7605_v59 = vld [vmem:[#allocation3 + $0x1a8] sm:$0xf]  ;;  %3879 = vmatpush.bf16.msrb.mxu2 %v7478_v5 }
 0x396   :  { %13065 = vst [vmem:[#allocation234_spill] sm:$0xff] %v10366_v0  ;;  %v8548_v0 = vld [vmem:[#allocation3 + $0x1b4] sm:$0xf0] }
 0x397   :  { %v10370_v20 = vpop.f32.mrf.mxu0  ;;  %v10372_v6 = vpop.f32.mrf.mxu1 }
 0x398   :  { %13066 = vst [vmem:[#allocation235_spill] sm:$0xff] %v10370_v20  ;;  %v7606_v20 = vor.u32 %v8548_v0, %v7605_v59  ;;  %v13078_v59 = vld [vmem:[#allocation27_spill] sm:$0xff] }
 0x399   :  { %3356 = vmatmul.bf16.gmra.mxu0 %v8953_v28  ;;  %3445 = vmatmul.bf16.gmra.mxu1 %v8955_v31  ;;  %13067 = vst [vmem:[#allocation236_spill] sm:$0xff] %v10372_v6  ;;  %v8114_v6 = vor.u32 %v8673_v22, %v8111_v58  ;;  %v13077_v58 = vld [vmem:[#allocation26_spill] sm:$0xff] }
 0x39a   :  { %3534 = vmatmul.bf16.gmra.mxu2 %v8957_v32  ;;  %v10380_v38 = vpop.f32.mrf.mxu2  ;;  %3968 = vmatpush.bf16.msrb.mxu3 %v7606_v20 }
 0x39b   :  { %13068 = vst [vmem:[#allocation237_spill] sm:$0xff] %v10380_v38  ;;  %3701 = vmatpush.bf16.msrb.mxu0 %v8114_v6  ;;  %v13070_v38 = vld [vmem:[#allocation22_spill] sm:$0xff]  ;;  %v13076_v6 = vld [vmem:[#allocation141_spill] sm:$0xff] }
 0x39c   :  { %v10368_v9 = vpop.f32.mrf.mxu3 }
 0x39d   :  { %3653 = vmatmul.bf16.gmra.mxu3 %v9931_v49  ;;  %v13080_v49 = vld [vmem:[#allocation28_spill] sm:$0xff] }
 0x3a2   :  { %v3056_v4 = vpop.f32.mrf.mxu0  ;;  %v3145_v29 = vpop.f32.mrf.mxu1 }
 0x3a3   :  { %v3057_v50 = vadd.f32 %v3056_v4, %v9741_v21 }
 0x3a4   :  { %v10377_v54 = vpop.f32.mrf.mxu3 }
 0x3a5   :  { %v3146_v17 = vadd.f32 %v3145_v29, %v3057_v50 }
 0x3a9   :  { %3361 = vmatmul.bf16.gmra.mxu0 %v8989_v48  ;;  %3450 = vmatmul.bf16.gmra.mxu1 %v8991_v51  ;;  %v3234_v33 = vpop.f32.mrf.mxu2 }
 0x3aa   :  { %3539 = vmatmul.bf16.gmra.mxu2 %v8993_v52  ;;  %v10385_v12 = vadd.f32 %v3234_v33, %v3146_v17  ;;  %v10393_v20 = vpop.f32.mrf.mxu0  ;;  %v10395_v21 = vpop.f32.mrf.mxu1  ;;  %v2708_v33 = vadd.f32 %v9796_v14, %v9125_v37  ;;  %v8095_v14 = vld [vmem:[#allocation3 + $0x590] sm:$0xf0] }
 0x3ab   :  { %13073 = vst [vmem:[#allocation239_spill] sm:$0xff] %v10393_v20  ;;  %v13079_v20 = vld [vmem:[#allocation142_spill] sm:$0xff] }
 0x3ac   :  { %v10383_v16 = vpop.f32.mrf.mxu3  ;;  %13069 = vst [vmem:[#allocation238_spill] sm:$0xff] %v10385_v12  ;;  %v2797_v22 = vadd.f32 %v13076_v6, %v2708_v33  ;;  %v7589_v33 = vld [vmem:[#allocation3 + $0x188] sm:$0xf] }
 0x3ad   :  { %13074 = vst [vmem:[#allocation240_spill] sm:$0xff] %v10395_v21  ;;  %3658 = vmatmul.bf16.gmra.mxu3 %v9979_v62 }
 0x3ae   :  { %v2886_v21 = vadd.f32 %v13079_v20, %v2797_v22 }
 0x3b1   :  { %v10399_v29 = vpop.f32.mrf.mxu2 }
 0x3b2   :  { %13075 = vst [vmem:[#allocation241_spill] sm:$0xff] %v10399_v29  ;;  %v8512_v29 = vld [vmem:[#allocation3 + $0x94] sm:$0xf0] }
 0x3b4   :  { %v10390_v0 = vpop.f32.mrf.mxu3 }
 0x3b9   :  { %3366 = vmatmul.bf16.gmra.mxu0 %v13070_v38  ;;  %3455 = vmatmul.bf16.gmra.mxu1 %v13071_v15 }
 0x3ba   :  { %3544 = vmatmul.bf16.gmra.mxu2 %v13072_v25  ;;  %v8669_v25 = vld [vmem:[#allocation3 + $0x584] sm:$0xf] }
 0x3bb   :  { %v8098_v6 = vor.u32 %v8669_v25, %v8095_v14  ;;  %v13082_v14 = vld [vmem:[#allocation30_spill] sm:$0xff] }
 0x3bc   :  { %v10397_v50 = vpop.f32.mrf.mxu3 }
 0x3bd   :  { %3702 = vmatpush.bf16.msrb.mxu0 %v8098_v6  ;;  %3663 = vmatmul.bf16.gmra.mxu3 %v10028_v34 }
 0x3be   :  { %v3061_v17 = vpop.f32.mrf.mxu0  ;;  %v3150_v5 = vpop.f32.mrf.mxu1 }
 0x3bf   :  { %v3062_v4 = vadd.f32 %v3061_v17, %v9787_v10  ;;  %v7462_v10 = vor.u32 %v8512_v29, %v7461_v30  ;;  %v8544_v17 = vld [vmem:[#allocation3 + $0x194] sm:$0xf0] }
 0x3c0   :  { %v7590_v52 = vor.u32 %v8544_v17, %v7589_v33 }
 0x3c1   :  { %v3151_v12 = vadd.f32 %v3150_v5, %v3062_v4  ;;  %3880 = vmatpush.bf16.msrb.mxu2 %v7462_v10  ;;  %v13081_v4 = vld [vmem:[#allocation143_spill] sm:$0xff] }
 0x3c2   :  { %v2975_v5 = vadd.f32 %v13081_v4, %v2886_v21  ;;  %3969 = vmatpush.bf16.msrb.mxu3 %v7590_v52  ;;  %v13083_v10 = vld [vmem:[#allocation31_spill] sm:$0xff]  ;;  %v13084_v21 = vld [vmem:[#allocation32_spill] sm:$0xff] }
 0x3c4   :  { %v10409_v15 = vpop.f32.mrf.mxu3 }
 0x3c5   :  { %v3239_v51 = vpop.f32.mrf.mxu2 }
 0x3c6   :  { %v3240_v20 = vadd.f32 %v3239_v51, %v3151_v12  ;;  %v3063_v22 = vpop.f32.mrf.mxu0  ;;  %v2713_v12 = vadd.f32 %v9843_v56, %v9125_v37 }
 0x3c8   :  { %v5355_v30 = vmul.f32 0.2, %v3240_v20  ;;  %vm5227_vm1 = vcmp.gt.f32.partialorder %v3240_v20, 0.0  ;;  %v2802_v33 = vadd.f32 %v9845_v24, %v2713_v12  ;;  %v13088_v24 = vld [vmem:[#allocation37_spill] sm:$0xff]  ;;  %v8508_v12 = vld [vmem:[#allocation3 + $0x74] sm:$0xf0] }
 0x3c9   :  { %3371 = vmatmul.bf16.gmra.mxu0 %v13077_v58  ;;  %3460 = vmatmul.bf16.gmra.mxu1 %v13078_v59  ;;  %v3152_v59 = vpop.f32.mrf.mxu1 }
 0x3ca   :  { %3549 = vmatmul.bf16.gmra.mxu2 %v13080_v49  ;;  %v3064_v49 = vadd.f32 %v3063_v22, %v2975_v5  ;;  %v5483_v51 = vsel %vm5227_vm1, %v3240_v20, %v5355_v30  ;;  %v2891_v6 = vadd.f32 %v9856_v1, %v2802_v33  ;;  %v8665_v1 = vld [vmem:[#allocation3 + $0x564] sm:$0xf]  ;;  %v8540_v33 = vld [vmem:[#allocation3 + $0x174] sm:$0xf0] }
 0x3cc   :  { %v10413_v32 = vpop.f32.mrf.mxu3  ;;  %v3153_v31 = vadd.f32 %v3152_v59, %v3064_v49  ;;  %v2980_v5 = vadd.f32 %v9864_v19, %v2891_v6 }
 0x3cd   :  { %v3241_v62 = vpop.f32.mrf.mxu2  ;;  %3668 = vmatmul.bf16.gmra.mxu3 %v10076_v23 }
 0x3ce   :  { %v3242_v29 = vadd.f32 %v3241_v62, %v3153_v31 }
 0x3d0   :  { %vm5231_vm2 = vcmp.gt.f32.partialorder %v3242_v29, 0.0  ;;  %v5359_v25 = vmul.f32 0.2, %v3242_v29 }
 0x3d2   :  { %v5487_v52 = vsel %vm5231_vm2, %v3242_v29, %v5359_v25 }
 0x3d3   :  { %v10421_v49 = vpack.c.bf16 %v5487_v52, %v5483_v51  ;;  %v13086_v51 = vld [vmem:[#allocation35_spill] sm:$0xff]  ;;  %v13087_v52 = vld [vmem:[#allocation36_spill] sm:$0xff] }
 0x3d4   :  { %v10423_v59 = vpop.f32.mrf.mxu3 }
 0x3d5   :  { %13085 = vst [vmem:[#allocation141_spill] sm:$0xff] %v10421_v49 }
 0x3d9   :  { %3376 = vmatmul.bf16.gmra.mxu0 %v13082_v14  ;;  %3465 = vmatmul.bf16.gmra.mxu1 %v13083_v10  ;;  %v3066_v31 = vpop.f32.mrf.mxu0  ;;  %v3155_v62 = vpop.f32.mrf.mxu1  ;;  %v7557_v10 = vld [vmem:[#allocation3 + $0x148] sm:$0xf] }
 0x3da   :  { %3554 = vmatmul.bf16.gmra.mxu2 %v13084_v21  ;;  %v3067_v17 = vadd.f32 %v3066_v31, %v9834_v13  ;;  %v7445_v13 = vld [vmem:[#allocation3 + $0x68] sm:$0xf]  ;;  %v8079_v31 = vld [vmem:[#allocation3 + $0x570] sm:$0xf0] }
 0x3db   :  { %v7446_v19 = vor.u32 %v8508_v12, %v7445_v13  ;;  %v13089_v13 = vld [vmem:[#allocation147_spill] sm:$0xff] }
 0x3dc   :  { %v3156_v4 = vadd.f32 %v3155_v62, %v3067_v17  ;;  %v10429_v22 = vpop.f32.mrf.mxu3  ;;  %v7573_v62 = vld [vmem:[#allocation3 + $0x168] sm:$0xf]  ;;  %v8082_v17 = vor.u32 %v8665_v1, %v8079_v31  ;;  %v2718_v12 = vadd.f32 %v13089_v13, %v9125_v37  ;;  %v13097_v37 = vld [vmem:[#allocation49_spill] sm:$0xff]  ;;  %v8063_v21 = vld [vmem:[#allocation3 + $0x550] sm:$0xf0] }
 0x3dd   :  { %v7574_v6 = vor.u32 %v8540_v33, %v7573_v62  ;;  %3881 = vmatpush.bf16.msrb.mxu2 %v7446_v19  ;;  %v13091_v62 = vld [vmem:[#allocation148_spill] sm:$0xff]  ;;  %3673 = vmatmul.bf16.gmra.mxu3 %v10127_v7  ;;  %v13098_v7 = vld [vmem:[#allocation50_spill] sm:$0xff] }
 0x3de   :  { %3703 = vmatpush.bf16.msrb.mxu0 %v8082_v17  ;;  %v2807_v33 = vadd.f32 %v13091_v62, %v2718_v12  ;;  %v13093_v17 = vld [vmem:[#allocation153_spill] sm:$0xff] }
 0x3df   :  { %3970 = vmatpush.bf16.msrb.mxu3 %v7574_v6 }
 0x3e0   :  { %v3244_v20 = vpop.f32.mrf.mxu2  ;;  %v2896_v6 = vadd.f32 %v13093_v17, %v2807_v33 }
 0x3e1   :  { %v3245_v30 = vadd.f32 %v3244_v20, %v3156_v4  ;;  %v3068_v56 = vpop.f32.mrf.mxu0  ;;  %v3157_v25 = vpop.f32.mrf.mxu1 }
 0x3e2   :  { %v3069_v29 = vadd.f32 %v3068_v56, %v2980_v5 }
 0x3e3   :  { %v5363_v20 = vmul.f32 0.2, %v3245_v30  ;;  %vm5235_vm3 = vcmp.gt.f32.partialorder %v3245_v30, 0.0 }
 0x3e4   :  { %v3158_v49 = vadd.f32 %v3157_v25, %v3069_v29  ;;  %v10435_v5 = vpop.f32.mrf.mxu3 }
 0x3e5   :  { %v5491_v25 = vsel %vm5235_vm3, %v3245_v30, %v5363_v20  ;;  %v13095_v30 = vld [vmem:[#allocation42_spill] sm:$0xff]  ;;  %v13096_v20 = vld [vmem:[#allocation43_spill] sm:$0xff] }
 0x3e8   :  { %v3246_v4 = vpop.f32.mrf.mxu2 }
 0x3e9   :  { %3381 = vmatmul.bf16.gmra.mxu0 %v13086_v51  ;;  %3470 = vmatmul.bf16.gmra.mxu1 %v13087_v52  ;;  %v3247_v56 = vadd.f32 %v3246_v4, %v3158_v49  ;;  %v13094_v52 = vld [vmem:[#allocation41_spill] sm:$0xff] }
 0x3ea   :  { %3559 = vmatmul.bf16.gmra.mxu2 %v13088_v24  ;;  %v13092_v24 = vld [vmem:[#allocation149_spill] sm:$0xff] }
 0x3eb   :  { %vm5239_vm4 = vcmp.gt.f32.partialorder %v3247_v56, 0.0  ;;  %v5367_v29 = vmul.f32 0.2, %v3247_v56 }
 0x3ec   :  { %v10441_v1 = vpop.f32.mrf.mxu3 }
 0x3ed   :  { %v5495_v34 = vsel %vm5239_vm4, %v3247_v56, %v5367_v29  ;;  %3678 = vmatmul.bf16.gmra.mxu3 %v10174_v27 }
 0x3ee   :  { %v10439_v23 = vpack.c.bf16 %v5495_v34, %v5491_v25  ;;  %v2985_v34 = vadd.f32 %v9959_v39, %v2896_v6 }
 0x3f0   :  { %13090 = vst [vmem:[#allocation142_spill] sm:$0xff] %v10439_v23 }
 0x3f4   :  { %v10451_v29 = vpop.f32.mrf.mxu3 }
 0x3f6   :  { %v3071_v31 = vpop.f32.mrf.mxu0  ;;  %v3160_v19 = vpop.f32.mrf.mxu1 }
 0x3f7   :  { %v3072_v49 = vadd.f32 %v3071_v31, %v13092_v24  ;;  %v10456_v31 = vld [vmem:[%s12529_s2] sm:$0xf] }
 0x3f9   :  { %v3161_v4 = vadd.f32 %v3160_v19, %v3072_v49  ;;  %3386 = vmatmul.bf16.gmra.mxu0 %v13094_v52  ;;  %3475 = vmatmul.bf16.gmra.mxu1 %v13095_v30  ;;  %v10459_v19 = vperm.slane %v10456_v31, 1 }
 0x3fa   :  { %3564 = vmatmul.bf16.gmra.mxu2 %v13096_v20  ;;  %v8661_v20 = vld [vmem:[#allocation3 + $0x544] sm:$0xf] }
 0x3fb   :  { %v3264_v33 = vadd.f32 %v9977_v8, %v10459_v19  ;;  %v8504_v8 = vld [vmem:[#allocation3 + $0x54] sm:$0xf0] }
 0x3fc   :  { %v10463_v49 = vpop.f32.mrf.mxu3 }
 0x3fd   :  { %v3249_v56 = vpop.f32.mrf.mxu2  ;;  %3683 = vmatmul.bf16.gmra.mxu3 %v10223_v43 }
 0x3fe   :  { %v3250_v25 = vadd.f32 %v3249_v56, %v3161_v4  ;;  %v3073_v13 = vpop.f32.mrf.mxu0  ;;  %v3162_v12 = vpop.f32.mrf.mxu1 }
 0x3ff   :  { %v3074_v24 = vadd.f32 %v3073_v13, %v2985_v34 }
 0x400   :  { %v5371_v17 = vmul.f32 0.2, %v3250_v25  ;;  %vm5243_vm5 = vcmp.gt.f32.partialorder %v3250_v25, 0.0 }
 0x401   :  { %v3163_v62 = vadd.f32 %v3162_v12, %v3074_v24  ;;  %v13099_v12 = vld [vmem:[#allocation51_spill] sm:$0xff]  ;;  %v7429_v24 = vld [vmem:[#allocation3 + $0x48] sm:$0xf] }
 0x402   :  { %v5499_v30 = vsel %vm5243_vm5, %v3250_v25, %v5371_v17 }
 0x405   :  { %v3251_v39 = vpop.f32.mrf.mxu2 }
 0x406   :  { %v3252_v6 = vadd.f32 %v3251_v39, %v3163_v62  ;;  %v3352_v4 = vpop.f32.mrf.mxu0  ;;  %v3441_v56 = vpop.f32.mrf.mxu1  ;;  %v7430_v39 = vor.u32 %v8504_v8, %v7429_v24  ;;  %v13101_v8 = vld [vmem:[#allocation57_spill] sm:$0xff] }
 0x407   :  { %v3353_v34 = vadd.f32 %v3352_v4, %v3264_v33  ;;  %v8536_v33 = vld [vmem:[#allocation3 + $0x154] sm:$0xf0] }
 0x408   :  { %vm5247_vm6 = vcmp.gt.f32.partialorder %v3252_v6, 0.0  ;;  %v5375_v13 = vmul.f32 0.2, %v3252_v6  ;;  %3882 = vmatpush.bf16.msrb.mxu2 %v7430_v39 }
 0x409   :  { %v3442_v23 = vadd.f32 %v3441_v56, %v3353_v34  ;;  %3391 = vmatmul.bf16.gmra.mxu0 %v13097_v37  ;;  %3480 = vmatmul.bf16.gmra.mxu1 %v13098_v7  ;;  %v8066_v56 = vor.u32 %v8661_v20, %v8063_v21  ;;  %v7558_v34 = vor.u32 %v8536_v33, %v7557_v10 }
 0x40a   :  { %3569 = vmatmul.bf16.gmra.mxu2 %v13099_v12  ;;  %v5503_v62 = vsel %vm5247_vm6, %v3252_v6, %v5375_v13  ;;  %v3266_v7 = vadd.f32 %v9997_v26, %v10459_v19  ;;  %v10473_v12 = vpop.f32.mrf.mxu3  ;;  %v3269_v10 = vadd.f32 %v10013_v40, %v10459_v19  ;;  %v3271_v40 = vadd.f32 %v10044_v47, %v10459_v19 }
 0x40b   :  { %v10469_v4 = vpack.c.bf16 %v5503_v62, %v5499_v30  ;;  %3704 = vmatpush.bf16.msrb.mxu0 %v8066_v56  ;;  %3971 = vmatpush.bf16.msrb.mxu3 %v7558_v34  ;;  %v3274_v34 = vadd.f32 %v10062_v61, %v10459_v19 }
 0x40d   :  { %13100 = vst [vmem:[#allocation143_spill] sm:$0xff] %v10469_v4  ;;  %v3530_v3 = vpop.f32.mrf.mxu2 }
 0x40e   :  { %v3531_v2 = vadd.f32 %v3530_v3, %v3442_v23  ;;  %v3354_v46 = vpop.f32.mrf.mxu0  ;;  %v3443_v27 = vpop.f32.mrf.mxu1 }
 0x40f   :  { %v3355_v25 = vadd.f32 %v3354_v46, %v3266_v7  ;;  %v13102_v7 = vld [vmem:[#allocation58_spill] sm:$0xff] }
 0x410   :  { %v10476_v17 = vadd.f32 %v10435_v5, %v3531_v2  ;;  %v13103_v2 = vld [vmem:[#allocation59_spill] sm:$0xff] }
 0x411   :  { %v3444_v30 = vadd.f32 %v3443_v27, %v3355_v25 }
 0x412   :  { %v3631_v20 = vpop.f32.mrf.mxu3  ;;  %3688 = vmatmul.bf16.gmra.mxu3 %v10272_v35 }
 0x415   :  { %v3532_v21 = vpop.f32.mrf.mxu2 }
 0x416   :  { %v3533_v26 = vadd.f32 %v3532_v21, %v3444_v30  ;;  %v3357_v6 = vpop.f32.mrf.mxu0  ;;  %v3446_v13 = vpop.f32.mrf.mxu1 }
 0x417   :  { %v3358_v24 = vadd.f32 %v3357_v6, %v3269_v10 }
 0x418   :  { %v10481_v3 = vadd.f32 %v10441_v1, %v3533_v26 }
 0x419   :  { %v3447_v23 = vadd.f32 %v3446_v13, %v3358_v24  ;;  %3396 = vmatmul.bf16.gmra.mxu0 %v13101_v8  ;;  %3485 = vmatmul.bf16.gmra.mxu1 %v13102_v7  ;;  %v13104_v24 = vld [vmem:[#allocation65_spill] sm:$0xff] }
 0x41a   :  { %3574 = vmatmul.bf16.gmra.mxu2 %v13103_v2  ;;  %v3634_v46 = vpop.f32.mrf.mxu3  ;;  %v13113_v2 = vld [vmem:[#allocation81_spill] sm:$0xff] }
 0x41d   :  { %v3535_v27 = vpop.f32.mrf.mxu2 }
 0x41e   :  { %v3536_v5 = vadd.f32 %v3535_v27, %v3447_v23  ;;  %v3359_v62 = vpop.f32.mrf.mxu0  ;;  %v3448_v39 = vpop.f32.mrf.mxu1  ;;  %v13105_v23 = vld [vmem:[#allocation66_spill] sm:$0xff]  ;;  %v8500_v27 = vld [vmem:[#allocation3 + $0x34] sm:$0xf0] }
 0x41f   :  { %v3360_v33 = vadd.f32 %v3359_v62, %v3271_v40  ;;  %v7413_v40 = vld [vmem:[#allocation3 + $0x28] sm:$0xf]  ;;  %v8047_v62 = vld [vmem:[#allocation3 + $0x530] sm:$0xf0] }
 0x420   :  { %v10490_v1 = vadd.f32 %v10451_v29, %v3536_v5  ;;  %v13106_v29 = vld [vmem:[#allocation67_spill] sm:$0xff]  ;;  %v8657_v5 = vld [vmem:[#allocation3 + $0x524] sm:$0xf]  ;;  %v7414_v61 = vor.u32 %v8500_v27, %v7413_v40 }
 0x421   :  { %v3449_v56 = vadd.f32 %v3448_v39, %v3360_v33  ;;  %v7541_v39 = vld [vmem:[#allocation3 + $0x128] sm:$0xf]  ;;  %v8532_v33 = vld [vmem:[#allocation3 + $0x134] sm:$0xf0]  ;;  %v13108_v27 = vld [vmem:[#allocation183_spill] sm:$0xff] }
 0x422   :  { %v3636_v30 = vpop.f32.mrf.mxu3  ;;  %3883 = vmatpush.bf16.msrb.mxu2 %v7414_v61  ;;  %3693 = vmatmul.bf16.gmra.mxu3 %v10319_v11 }
 0x425   :  { %v3537_v25 = vpop.f32.mrf.mxu2 }
 0x426   :  { %v3538_v10 = vadd.f32 %v3537_v25, %v3449_v56  ;;  %v3362_v21 = vpop.f32.mrf.mxu0  ;;  %v3451_v26 = vpop.f32.mrf.mxu1  ;;  %v8050_v56 = vor.u32 %v8657_v5, %v8047_v62  ;;  %v3279_v5 = vadd.f32 %v13108_v27, %v10459_v19  ;;  %v13112_v27 = vld [vmem:[#allocation190_spill] sm:$0xff] }
 0x427   :  { %v3363_v6 = vadd.f32 %v3362_v21, %v3274_v34  ;;  %v7542_v34 = vor.u32 %v8532_v33, %v7541_v39 }
 0x428   :  { %v10495_v47 = vadd.f32 %v10463_v49, %v3538_v10  ;;  %v13107_v49 = vld [vmem:[#allocation181_spill] sm:$0xff]  ;;  %3705 = vmatpush.bf16.msrb.mxu0 %v8050_v56  ;;  %v13110_v56 = vld [vmem:[#allocation74_spill] sm:$0xff] }
 0x429   :  { %v3452_v13 = vadd.f32 %v3451_v26, %v3363_v6  ;;  %3401 = vmatmul.bf16.gmra.mxu0 %v13104_v24  ;;  %3490 = vmatmul.bf16.gmra.mxu1 %v13105_v23  ;;  %v3276_v25 = vadd.f32 %v13107_v49, %v10459_v19 }
 0x42a   :  { %3579 = vmatmul.bf16.gmra.mxu2 %v13106_v29  ;;  %v3639_v21 = vpop.f32.mrf.mxu3  ;;  %3972 = vmatpush.bf16.msrb.mxu3 %v7542_v34  ;;  %v13111_v34 = vld [vmem:[#allocation75_spill] sm:$0xff] }
 0x42d   :  { %v3540_v10 = vpop.f32.mrf.mxu2 }
 0x42e   :  { %v3541_v26 = vadd.f32 %v3540_v10, %v3452_v13  ;;  %v3364_v6 = vpop.f32.mrf.mxu0  ;;  %v3453_v4 = vpop.f32.mrf.mxu1  ;;  %v13109_v10 = vld [vmem:[#allocation73_spill] sm:$0xff] }
 0x42f   :  { %v3365_v43 = vadd.f32 %v3364_v6, %v3276_v25 }
 0x430   :  { %v10504_v35 = vadd.f32 %v10473_v12, %v3541_v26 }
 0x431   :  { %v3454_v40 = vadd.f32 %v3453_v4, %v3365_v43  ;;  %v3281_v43 = vadd.f32 %v10118_v41, %v10459_v19 }
 0x432   :  { %v3641_v39 = vpop.f32.mrf.mxu3 }
 0x435   :  { %v3542_v62 = vpop.f32.mrf.mxu2 }
 0x436   :  { %v3543_v33 = vadd.f32 %v3542_v62, %v3454_v40  ;;  %v3367_v49 = vpop.f32.mrf.mxu0  ;;  %v3456_v29 = vpop.f32.mrf.mxu1 }
 0x437   :  { %v3368_v61 = vadd.f32 %v3367_v49, %v3279_v5  ;;  %v3284_v5 = vadd.f32 %v13112_v27, %v10459_v19  ;;  %v8528_v27 = vld [vmem:[#allocation3 + $0x114] sm:$0xf0] }
 0x438   :  { %v10508_v23 = vadd.f32 %v3631_v20, %v3543_v33 }
 0x439   :  { %v3457_v13 = vadd.f32 %v3456_v29, %v3368_v61  ;;  %3406 = vmatmul.bf16.gmra.mxu0 %v13109_v10  ;;  %3495 = vmatmul.bf16.gmra.mxu1 %v13110_v56 }
 0x43a   :  { %3584 = vmatmul.bf16.gmra.mxu2 %v13111_v34  ;;  %v3644_v4 = vpop.f32.mrf.mxu3 }
 0x43d   :  { %v3545_v12 = vpop.f32.mrf.mxu2 }
 0x43e   :  { %v3546_v25 = vadd.f32 %v3545_v12, %v3457_v13  ;;  %v3369_v26 = vpop.f32.mrf.mxu0  ;;  %v3458_v6 = vpop.f32.mrf.mxu1  ;;  %v13114_v13 = vld [vmem:[#allocation82_spill] sm:$0xff]  ;;  %v8496_v12 = vld [vmem:[#allocation3 + $0x14] sm:$0xf0] }
 0x43f   :  { %v3370_v40 = vadd.f32 %v3369_v26, %v3281_v43  ;;  %v13115_v43 = vld [vmem:[#allocation83_spill] sm:$0xff] }
 0x440   :  { %v10516_v20 = vadd.f32 %v3634_v46, %v3546_v25  ;;  %v7397_v46 = vld [vmem:[#allocation3 + $0x8] sm:$0xf]  ;;  %v8653_v25 = vld [vmem:[#allocation3 + $0x504] sm:$0xf] }
 0x441   :  { %v3459_v29 = vadd.f32 %v3458_v6, %v3370_v40  ;;  %v7398_v26 = vor.u32 %v8496_v12, %v7397_v46  ;;  %v8031_v6 = vld [vmem:[#allocation3 + $0x510] sm:$0xf0]  ;;  %v7525_v40 = vld [vmem:[#allocation3 + $0x108] sm:$0xf] }
 0x442   :  { %v3646_v33 = vpop.f32.mrf.mxu3  ;;  %v13117_v12 = vld [vmem:[#allocation199_spill] sm:$0xff] }
 0x443   :  { %3884 = vmatpush.bf16.msrb.mxu2 %v7398_v26 }
 0x445   :  { %v3547_v62 = vpop.f32.mrf.mxu2 }
 0x446   :  { %v3548_v49 = vadd.f32 %v3547_v62, %v3459_v29  ;;  %v3372_v61 = vpop.f32.mrf.mxu0  ;;  %v3461_v11 = vpop.f32.mrf.mxu1  ;;  %v8034_v29 = vor.u32 %v8653_v25, %v8031_v6  ;;  %v7526_v62 = vor.u32 %v8528_v27, %v7525_v40  ;;  %v3289_v25 = vadd.f32 %v13117_v12, %v10459_v19 }
 0x447   :  { %v3373_v34 = vadd.f32 %v3372_v61, %v3284_v5  ;;  %v13116_v5 = vld [vmem:[#allocation192_spill] sm:$0xff] }
 0x448   :  { %v10520_v56 = vadd.f32 %v3636_v30, %v3548_v49  ;;  %v3286_v30 = vadd.f32 %v13116_v5, %v10459_v19  ;;  %3706 = vmatpush.bf16.msrb.mxu0 %v8034_v29  ;;  %3973 = vmatpush.bf16.msrb.mxu3 %v7526_v62  ;;  %v13118_v62 = vld [vmem:[#allocation89_spill] sm:$0xff] }
 0x449   :  { %v3462_v41 = vadd.f32 %v3461_v11, %v3373_v34  ;;  %3411 = vmatmul.bf16.gmra.mxu0 %v13113_v2  ;;  %3500 = vmatmul.bf16.gmra.mxu1 %v13114_v13 }
 0x44a   :  { %3589 = vmatmul.bf16.gmra.mxu2 %v13115_v43  ;;  %v10527_v11 = vpop.f32.mrf.mxu3 }
 0x44b   :  { %3974 = vmatmul.bf16.vlgmr.msrb.gmra.mxu3 %v8917_v63 }
 0x44d   :  { %v3550_v49 = vpop.f32.mrf.mxu2 }
 0x44e   :  { %v3551_v34 = vadd.f32 %v3550_v49, %v3462_v41  ;;  %v3374_v61 = vpop.f32.mrf.mxu0  ;;  %v3463_v13 = vpop.f32.mrf.mxu1 }
 0x44f   :  { %v3375_v43 = vadd.f32 %v3374_v61, %v3286_v30 }
 0x450   :  { %v10529_v7 = vadd.f32 %v3639_v21, %v3551_v34  ;;  %v13119_v21 = vld [vmem:[#allocation90_spill] sm:$0xff] }
 0x451   :  { %v3464_v46 = vadd.f32 %v3463_v13, %v3375_v43  ;;  %v13120_v13 = vld [vmem:[#allocation91_spill] sm:$0xff]  ;;  %v13121_v43 = vld [vmem:[#allocation201_spill] sm:$0xff] }
 0x452   :  { %v10534_v40 = vpop.f32.mrf.mxu3  ;;  %v3291_v30 = vadd.f32 %v13121_v43, %v10459_v19 }
 0x455   :  { %v3552_v6 = vpop.f32.mrf.mxu2 }
 0x456   :  { %v3553_v26 = vadd.f32 %v3552_v6, %v3464_v46  ;;  %v3377_v27 = vpop.f32.mrf.mxu0  ;;  %v3466_v5 = vpop.f32.mrf.mxu1 }
 0x457   :  { %v3378_v41 = vadd.f32 %v3377_v27, %v3289_v25 }
 0x458   :  { %v10536_v49 = vadd.f32 %v3641_v39, %v3553_v26  ;;  %v3294_v26 = vadd.f32 %v10221_v18, %v10459_v19 }
 0x459   :  { %v3467_v29 = vadd.f32 %v3466_v5, %v3378_v41  ;;  %3416 = vmatmul.bf16.gmra.mxu0 %v13118_v62  ;;  %3505 = vmatmul.bf16.gmra.mxu1 %v13119_v21 }
 0x45a   :  { %3594 = vmatmul.bf16.gmra.mxu2 %v13120_v13  ;;  %v10543_v61 = vpop.f32.mrf.mxu3 }
 0x45b   :  { %3979 = vmatmul.bf16.gmra.mxu3 %v8953_v28  ;;  %v8149_v28 = vld [vmem:[#allocation3 + $0x5e8] sm:$0xf] }
 0x45d   :  { %v3555_v34 = vpop.f32.mrf.mxu2 }
 0x45e   :  { %v3556_v12 = vadd.f32 %v3555_v34, %v3467_v29  ;;  %v3379_v46 = vpop.f32.mrf.mxu0  ;;  %v3468_v6 = vpop.f32.mrf.mxu1  ;;  %v13123_v34 = vld [vmem:[#allocation97_spill] sm:$0xff] }
 0x45f   :  { %v3380_v63 = vadd.f32 %v3379_v46, %v3291_v30  ;;  %v8021_v30 = vld [vmem:[#allocation3 + $0x4e8] sm:$0xf] }
 0x460   :  { %v10545_v25 = vadd.f32 %v3644_v4, %v3556_v12  ;;  %v13124_v4 = vld [vmem:[#allocation98_spill] sm:$0xff]  ;;  %v8652_v12 = vld [vmem:[#allocation3 + $0x4f4] sm:$0xf0] }
 0x461   :  { %v3469_v39 = vadd.f32 %v3468_v6, %v3380_v63  ;;  %v13125_v63 = vld [vmem:[#allocation99_spill] sm:$0xff]  ;;  %v7765_v46 = vld [vmem:[#allocation3 + $0x2e8] sm:$0xf]  ;;  %v8022_v18 = vor.u32 %v8652_v12, %v8021_v30  ;;  %v8588_v6 = vld [vmem:[#allocation3 + $0x2f4] sm:$0xf0] }
 0x462   :  { %13122 = vst [vmem:[#allocation147_spill] sm:$0xff] %v10545_v25  ;;  %v10550_v5 = vpop.f32.mrf.mxu3  ;;  %v8684_v25 = vld [vmem:[#allocation3 + $0x5f4] sm:$0xf0]  ;;  %v7893_v12 = vld [vmem:[#allocation3 + $0x3e8] sm:$0xf] }
 0x463   :  { %4233 = vmatpush.bf16.msra.mxu2 %v8022_v18 }
 0x465   :  { %v3557_v27 = vpop.f32.mrf.mxu2 }
 0x466   :  { %v3558_v41 = vadd.f32 %v3557_v27, %v3469_v39  ;;  %v3382_v43 = vpop.f32.mrf.mxu0  ;;  %v3471_v13 = vpop.f32.mrf.mxu1  ;;  %v7766_v39 = vor.u32 %v8588_v6, %v7765_v46  ;;  %v8150_v27 = vor.u32 %v8684_v25, %v8149_v28 }
 0x467   :  { %v3383_v21 = vadd.f32 %v3382_v43, %v3294_v26 }
 0x468   :  { %v10552_v36 = vadd.f32 %v3646_v33, %v3558_v41  ;;  %v3296_v33 = vadd.f32 %v10243_v53, %v10459_v19  ;;  %4055 = vmatpush.bf16.msra.mxu0 %v7766_v39  ;;  %4322 = vmatpush.bf16.msra.mxu3 %v8150_v27  ;;  %v13126_v53 = vld [vmem:[#allocation209_spill] sm:$0xff] }
 0x469   :  { %v3472_v29 = vadd.f32 %v3471_v13, %v3383_v21  ;;  %3421 = vmatmul.bf16.gmra.mxu0 %v13123_v34  ;;  %3510 = vmatmul.bf16.gmra.mxu1 %v13124_v4  ;;  %v8620_v4 = vld [vmem:[#allocation3 + $0x3f4] sm:$0xf0]  ;;  %v3299_v25 = vadd.f32 %v13126_v53, %v10459_v19 }
 0x46a   :  { %3599 = vmatmul.bf16.gmra.mxu2 %v13125_v63  ;;  %v10559_v21 = vpop.f32.mrf.mxu3  ;;  %v7894_v28 = vor.u32 %v8620_v4, %v7893_v12  ;;  %v13129_v4 = vld [vmem:[#allocation108_spill] sm:$0xff] }
 0x46b   :  { %3984 = vmatmul.bf16.gmra.mxu3 %v8989_v48 }
 0x46c   :  { %4144 = vmatpush.bf16.msra.mxu1 %v7894_v28 }
 0x46d   :  { %v3560_v26 = vpop.f32.mrf.mxu2 }
 0x46e   :  { %v3561_v13 = vadd.f32 %v3560_v26, %v3472_v29  ;;  %v3384_v41 = vpop.f32.mrf.mxu0  ;;  %v3473_v43 = vpop.f32.mrf.mxu1 }
 0x46f   :  { %v3385_v63 = vadd.f32 %v3384_v41, %v3296_v33  ;;  %v13131_v41 = vld [vmem:[#allocation217_spill] sm:$0xff] }
 0x470   :  { %v10562_v30 = vadd.f32 %v10527_v11, %v3561_v13  ;;  %v13128_v13 = vld [vmem:[#allocation107_spill] sm:$0xff] }
 0x471   :  { %v3474_v46 = vadd.f32 %v3473_v43, %v3385_v63  ;;  %v13130_v63 = vld [vmem:[#allocation109_spill] sm:$0xff]  ;;  %v3301_v43 = vadd.f32 %v13131_v41, %v10459_v19 }
 0x472   :  { %v10567_v29 = vpop.f32.mrf.mxu3 }
 0x475   :  { %v3562_v18 = vpop.f32.mrf.mxu2 }
 0x476   :  { %v3563_v6 = vadd.f32 %v3562_v18, %v3474_v46  ;;  %v3387_v39 = vpop.f32.mrf.mxu0  ;;  %v3476_v27 = vpop.f32.mrf.mxu1 }
 0x477   :  { %v3388_v33 = vadd.f32 %v3387_v39, %v3299_v25  ;;  %v13133_v39 = vld [vmem:[#allocation218_spill] sm:$0xff] }
 0x478   :  { %v10570_v11 = vadd.f32 %v10534_v40, %v3563_v6 }
 0x479   :  { %v3477_v26 = vadd.f32 %v3476_v27, %v3388_v33  ;;  %3426 = vmatmul.bf16.gmra.mxu0 %v13128_v13  ;;  %3515 = vmatmul.bf16.gmra.mxu1 %v13129_v4  ;;  %v3304_v27 = vadd.f32 %v13133_v39, %v10459_v19 }
 0x47a   :  { %13127 = vst [vmem:[#allocation148_spill] sm:$0xff] %v10570_v11  ;;  %3604 = vmatmul.bf16.gmra.mxu2 %v13130_v63  ;;  %v10577_v28 = vpop.f32.mrf.mxu3 }
 0x47b   :  { %3989 = vmatmul.bf16.gmra.mxu3 %v13070_v38  ;;  %v8584_v38 = vld [vmem:[#allocation3 + $0x2d4] sm:$0xf0] }
 0x47d   :  { %v3565_v12 = vpop.f32.mrf.mxu2 }
 0x47e   :  { %v3566_v46 = vadd.f32 %v3565_v12, %v3477_v26  ;;  %v3389_v53 = vpop.f32.mrf.mxu0  ;;  %v3478_v18 = vpop.f32.mrf.mxu1  ;;  %v13135_v12 = vld [vmem:[#allocation115_spill] sm:$0xff] }
 0x47f   :  { %v3390_v25 = vadd.f32 %v3389_v53, %v3301_v43  ;;  %v8005_v53 = vld [vmem:[#allocation3 + $0x4c8] sm:$0xf] }
 0x480   :  { %v10580_v40 = vadd.f32 %v10543_v61, %v3566_v46  ;;  %v13136_v61 = vld [vmem:[#allocation116_spill] sm:$0xff]  ;;  %v13137_v46 = vld [vmem:[#allocation9_spill] sm:$0xff] }
 0x481   :  { %v3479_v6 = vadd.f32 %v3478_v18, %v3390_v25  ;;  %v8648_v18 = vld [vmem:[#allocation3 + $0x4d4] sm:$0xf0]  ;;  %v7749_v25 = vld [vmem:[#allocation3 + $0x2c8] sm:$0xf] }
 0x482   :  { %13132 = vst [vmem:[#allocation149_spill] sm:$0xff] %v10580_v40  ;;  %v10585_v48 = vpop.f32.mrf.mxu3  ;;  %v8006_v39 = vor.u32 %v8648_v18, %v8005_v53  ;;  %v7750_v40 = vor.u32 %v8584_v38, %v7749_v25  ;;  %v7877_v18 = vld [vmem:[#allocation3 + $0x3c8] sm:$0xf] }
 0x484   :  { %4234 = vmatpush.bf16.msra.mxu2 %v8006_v39  ;;  %4056 = vmatpush.bf16.msra.mxu0 %v7750_v40 }
 0x485   :  { %v3567_v33 = vpop.f32.mrf.mxu2 }
 0x486   :  { %v3568_v41 = vadd.f32 %v3567_v33, %v3479_v6  ;;  %v3392_v63 = vpop.f32.mrf.mxu0  ;;  %v3481_v4 = vpop.f32.mrf.mxu1  ;;  %v8133_v6 = vld [vmem:[#allocation3 + $0x5c8] sm:$0xf]  ;;  %v8680_v33 = vld [vmem:[#allocation3 + $0x5d4] sm:$0xf0] }
 0x487   :  { %v3393_v11 = vadd.f32 %v3392_v63, %v3304_v27  ;;  %v8134_v63 = vor.u32 %v8680_v33, %v8133_v6 }
 0x488   :  { %v10588_v26 = vadd.f32 %v10550_v5, %v3568_v41  ;;  %v3306_v5 = vadd.f32 %v10316_v44, %v10459_v19  ;;  %v3309_v44 = vadd.f32 %v10329_v60, %v10459_v19  ;;  %v3311_v60 = vadd.f32 %v10340_v42, %v10459_v19 }
 0x489   :  { %v3482_v43 = vadd.f32 %v3481_v4, %v3393_v11  ;;  %3707 = vmatmul.bf16.vlgmr.msrb.gmra.mxu0 %v13135_v12  ;;  %8187 = vmatmul.msk.bf16.vlgmr.msrb.gmra.mxu1 %vm2582_vm0, %v13136_v61 }
 0x48a   :  { %13134 = vst [vmem:[#allocation153_spill] sm:$0xff] %v10588_v26  ;;  %3885 = vmatmul.bf16.vlgmr.msrb.gmra.mxu2 %v13137_v46  ;;  %v10596_v4 = vpop.f32.mrf.mxu3  ;;  %4323 = vmatpush.bf16.msra.mxu3 %v8134_v63  ;;  %v8616_v26 = vld [vmem:[#allocation3 + $0x3d4] sm:$0xf0] }
 0x48b   :  { %v7878_v25 = vor.u32 %v8616_v26, %v7877_v18  ;;  %3994 = vmatmul.bf16.gmra.mxu3 %v13077_v58  ;;  %v13139_v26 = vld [vmem:[#allocation122_spill] sm:$0xff] }
 0x48d   :  { %v3570_v11 = vpop.f32.mrf.mxu2  ;;  %4145 = vmatpush.bf16.msra.mxu1 %v7878_v25 }
 0x48e   :  { %v3571_v27 = vadd.f32 %v3570_v11, %v3482_v43  ;;  %v3394_v41 = vpop.f32.mrf.mxu0  ;;  %v3483_v61 = vpop.f32.mrf.mxu1  ;;  %v13138_v11 = vld [vmem:[#allocation120_spill] sm:$0xff] }
 0x48f   :  { %v3395_v46 = vadd.f32 %v3394_v41, %v3306_v5 }
 0x490   :  { %v10599_v53 = vadd.f32 %v10559_v21, %v3571_v27 }
 0x491   :  { %v3484_v38 = vadd.f32 %v3483_v61, %v3395_v46  ;;  %v13140_v61 = vld [vmem:[#allocation13_spill] sm:$0xff] }
 0x492   :  { %v10604_v43 = vpop.f32.mrf.mxu3 }
 0x495   :  { %v3572_v39 = vpop.f32.mrf.mxu2 }
 0x496   :  { %v3573_v6 = vadd.f32 %v3572_v39, %v3484_v38  ;;  %v3397_v40 = vpop.f32.mrf.mxu0  ;;  %v3486_v33 = vpop.f32.mrf.mxu1  ;;  %v3314_v39 = vadd.f32 %v10346_v57, %v10459_v19  ;;  %v8644_v57 = vld [vmem:[#allocation3 + $0x4b4] sm:$0xf0] }
 0x497   :  { %v3398_v63 = vadd.f32 %v3397_v40, %v3309_v44 }
 0x498   :  { %v10607_v21 = vadd.f32 %v10567_v29, %v3573_v6 }
 0x499   :  { %v3487_v5 = vadd.f32 %v3486_v33, %v3398_v63  ;;  %3712 = vmatmul.bf16.gmra.mxu0 %v13138_v11  ;;  %8188 = vmatmul.msk.bf16.gmra.mxu1 %vm2582_vm0, %v13139_v26  ;;  %v8612_v26 = vld [vmem:[#allocation3 + $0x3b4] sm:$0xf0] }
 0x49a   :  { %3890 = vmatmul.bf16.gmra.mxu2 %v13140_v61  ;;  %v10615_v27 = vpop.f32.mrf.mxu3 }
 0x49b   :  { %3999 = vmatmul.bf16.gmra.mxu3 %v13082_v14  ;;  %v8580_v14 = vld [vmem:[#allocation3 + $0x2b4] sm:$0xf0] }
 0x49d   :  { %v3575_v46 = vpop.f32.mrf.mxu2 }
 0x49e   :  { %v3576_v41 = vadd.f32 %v3575_v46, %v3487_v5  ;;  %v3399_v18 = vpop.f32.mrf.mxu0  ;;  %v3488_v38 = vpop.f32.mrf.mxu1  ;;  %v13141_v46 = vld [vmem:[#allocation126_spill] sm:$0xff] }
 0x49f   :  { %v3400_v25 = vadd.f32 %v3399_v18, %v3311_v60  ;;  %v7989_v18 = vld [vmem:[#allocation3 + $0x4a8] sm:$0xf] }
 0x4a0   :  { %v10618_v29 = vadd.f32 %v10577_v28, %v3576_v41  ;;  %v13142_v28 = vld [vmem:[#allocation127_spill] sm:$0xff]  ;;  %v13143_v41 = vld [vmem:[#allocation17_spill] sm:$0xff] }
 0x4a1   :  { %v3489_v44 = vadd.f32 %v3488_v38, %v3400_v25  ;;  %v7733_v38 = vld [vmem:[#allocation3 + $0x2a8] sm:$0xf]  ;;  %v7990_v25 = vor.u32 %v8644_v57, %v7989_v18 }
 0x4a2   :  { %v10623_v40 = vpop.f32.mrf.mxu3  ;;  %v7734_v61 = vor.u32 %v8580_v14, %v7733_v38  ;;  %v7861_v57 = vld [vmem:[#allocation3 + $0x3a8] sm:$0xf] }
 0x4a3   :  { %4235 = vmatpush.bf16.msra.mxu2 %v7990_v25  ;;  %v7862_v38 = vor.u32 %v8612_v26, %v7861_v57  ;;  %v13145_v26 = vld [vmem:[#allocation134_spill] sm:$0xff] }
 0x4a4   :  { %4057 = vmatpush.bf16.msra.mxu0 %v7734_v61 }
 0x4a5   :  { %v3577_v6 = vpop.f32.mrf.mxu2  ;;  %4146 = vmatpush.bf16.msra.mxu1 %v7862_v38 }
 0x4a6   :  { %v3578_v42 = vadd.f32 %v3577_v6, %v3489_v44  ;;  %v3402_v33 = vpop.f32.mrf.mxu0  ;;  %v3491_v63 = vpop.f32.mrf.mxu1  ;;  %v8117_v44 = vld [vmem:[#allocation3 + $0x5a8] sm:$0xf]  ;;  %v8676_v6 = vld [vmem:[#allocation3 + $0x5b4] sm:$0xf0] }
 0x4a7   :  { %v3403_v58 = vadd.f32 %v3402_v33, %v3314_v39  ;;  %v8118_v39 = vor.u32 %v8676_v6, %v8117_v44 }
 0x4a8   :  { %v10626_v5 = vadd.f32 %v10585_v48, %v3578_v42  ;;  %v3316_v48 = vadd.f32 %v10355_v55, %v10459_v19  ;;  %v3319_v55 = vadd.f32 %v10363_v45, %v10459_v19  ;;  %v3321_v45 = vadd.f32 %v10368_v9, %v10459_v19 }
 0x4a9   :  { %v3492_v60 = vadd.f32 %v3491_v63, %v3403_v58  ;;  %3717 = vmatmul.bf16.gmra.mxu0 %v13141_v46  ;;  %8189 = vmatmul.msk.bf16.gmra.mxu1 %vm2582_vm0, %v13142_v28 }
 0x4aa   :  { %3895 = vmatmul.bf16.gmra.mxu2 %v13143_v41  ;;  %v10634_v42 = vpop.f32.mrf.mxu3  ;;  %4324 = vmatpush.bf16.msra.mxu3 %v8118_v39 }
 0x4ab   :  { %4004 = vmatmul.bf16.gmra.mxu3 %v13086_v51 }
 0x4ad   :  { %v3580_v58 = vpop.f32.mrf.mxu2 }
 0x4ae   :  { %v3581_v33 = vadd.f32 %v3580_v58, %v3492_v60  ;;  %v3404_v63 = vpop.f32.mrf.mxu0  ;;  %v3493_v28 = vpop.f32.mrf.mxu1  ;;  %v13144_v58 = vld [vmem:[#allocation132_spill] sm:$0xff] }
 0x4af   :  { %v3405_v41 = vadd.f32 %v3404_v63, %v3316_v48 }
 0x4b0   :  { %v10637_v18 = vadd.f32 %v10596_v4, %v3581_v33 }
 0x4b1   :  { %v3494_v14 = vadd.f32 %v3493_v28, %v3405_v41  ;;  %v13146_v28 = vld [vmem:[#allocation21_spill] sm:$0xff] }
 0x4b2   :  { %v10642_v60 = vpop.f32.mrf.mxu3 }
 0x4b5   :  { %v3582_v25 = vpop.f32.mrf.mxu2 }
 0x4b6   :  { %v3583_v44 = vadd.f32 %v3582_v25, %v3494_v14  ;;  %v3407_v61 = vpop.f32.mrf.mxu0  ;;  %v3496_v6 = vpop.f32.mrf.mxu1  ;;  %v3324_v25 = vadd.f32 %v10377_v54, %v10459_v19  ;;  %v8640_v54 = vld [vmem:[#allocation3 + $0x494] sm:$0xf0] }
 0x4b7   :  { %v3408_v39 = vadd.f32 %v3407_v61, %v3319_v55 }
 0x4b8   :  { %v10645_v4 = vadd.f32 %v10604_v43, %v3583_v44 }
 0x4b9   :  { %v3497_v48 = vadd.f32 %v3496_v6, %v3408_v39  ;;  %3722 = vmatmul.bf16.gmra.mxu0 %v13144_v58  ;;  %8190 = vmatmul.msk.bf16.gmra.mxu1 %vm2582_vm0, %v13145_v26  ;;  %v8608_v26 = vld [vmem:[#allocation3 + $0x394] sm:$0xf0] }
 0x4ba   :  { %3900 = vmatmul.bf16.gmra.mxu2 %v13146_v28  ;;  %v10653_v33 = vpop.f32.mrf.mxu3 }
 0x4bb   :  { %4009 = vmatmul.bf16.gmra.mxu3 %v13094_v52  ;;  %v8576_v52 = vld [vmem:[#allocation3 + $0x294] sm:$0xf0] }
 0x4bd   :  { %v3585_v41 = vpop.f32.mrf.mxu2 }
 0x4be   :  { %v3586_v63 = vadd.f32 %v3585_v41, %v3497_v48  ;;  %v3409_v57 = vpop.f32.mrf.mxu0  ;;  %v3498_v14 = vpop.f32.mrf.mxu1  ;;  %v13147_v41 = vld [vmem:[#allocation139_spill] sm:$0xff] }
 0x4bf   :  { %v3410_v38 = vadd.f32 %v3409_v57, %v3321_v45  ;;  %v7973_v57 = vld [vmem:[#allocation3 + $0x488] sm:$0xf] }
 0x4c0   :  { %v10656_v43 = vadd.f32 %v10615_v27, %v3586_v63  ;;  %v13148_v27 = vld [vmem:[#allocation140_spill] sm:$0xff]  ;;  %v13149_v63 = vld [vmem:[#allocation25_spill] sm:$0xff] }
 0x4c1   :  { %v3499_v55 = vadd.f32 %v3498_v14, %v3410_v38  ;;  %v7717_v14 = vld [vmem:[#allocation3 + $0x288] sm:$0xf]  ;;  %v7974_v38 = vor.u32 %v8640_v54, %v7973_v57 }
 0x4c2   :  { %v10661_v61 = vpop.f32.mrf.mxu3  ;;  %v7718_v28 = vor.u32 %v8576_v52, %v7717_v14  ;;  %v7845_v54 = vld [vmem:[#allocation3 + $0x388] sm:$0xf] }
 0x4c3   :  { %4236 = vmatpush.bf16.msra.mxu2 %v7974_v38  ;;  %v7846_v14 = vor.u32 %v8608_v26, %v7845_v54  ;;  %v13152_v26 = vld [vmem:[#allocation146_spill] sm:$0xff] }
 0x4c4   :  { %4058 = vmatpush.bf16.msra.mxu0 %v7718_v28 }
 0x4c5   :  { %v3587_v44 = vpop.f32.mrf.mxu2  ;;  %4147 = vmatpush.bf16.msra.mxu1 %v7846_v14 }
 0x4c6   :  { %v3588_v9 = vadd.f32 %v3587_v44, %v3499_v55  ;;  %v3412_v6 = vpop.f32.mrf.mxu0  ;;  %v3501_v39 = vpop.f32.mrf.mxu1  ;;  %v8101_v55 = vld [vmem:[#allocation3 + $0x588] sm:$0xf]  ;;  %v8672_v44 = vld [vmem:[#allocation3 + $0x594] sm:$0xf0] }
 0x4c7   :  { %v3413_v51 = vadd.f32 %v3412_v6, %v3324_v25  ;;  %v8102_v25 = vor.u32 %v8672_v44, %v8101_v55 }
 0x4c8   :  { %v10664_v48 = vadd.f32 %v10623_v40, %v3588_v9  ;;  %v3326_v40 = vadd.f32 %v10383_v16, %v10459_v19  ;;  %v3329_v16 = vadd.f32 %v10390_v0, %v10459_v19  ;;  %v3331_v0 = vadd.f32 %v10397_v50, %v10459_v19 }
 0x4c9   :  { %v3502_v45 = vadd.f32 %v3501_v39, %v3413_v51  ;;  %3727 = vmatmul.bf16.gmra.mxu0 %v13147_v41  ;;  %8191 = vmatmul.msk.bf16.gmra.mxu1 %vm2582_vm0, %v13148_v27 }
 0x4ca   :  { %3905 = vmatmul.bf16.gmra.mxu2 %v13149_v63  ;;  %v10672_v9 = vpop.f32.mrf.mxu3  ;;  %4325 = vmatpush.bf16.msra.mxu3 %v8102_v25 }
 0x4cb   :  { %4014 = vmatmul.bf16.gmra.mxu3 %v13097_v37 }
 0x4cd   :  { %v3590_v51 = vpop.f32.mrf.mxu2 }
 0x4ce   :  { %v3591_v6 = vadd.f32 %v3590_v51, %v3502_v45  ;;  %v3414_v39 = vpop.f32.mrf.mxu0  ;;  %v3503_v27 = vpop.f32.mrf.mxu1  ;;  %v13151_v51 = vld [vmem:[#allocation145_spill] sm:$0xff] }
 0x4cf   :  { %v3415_v63 = vadd.f32 %v3414_v39, %v3326_v40 }
 0x4d0   :  { %v10675_v57 = vadd.f32 %v10634_v42, %v3591_v6 }
 0x4d1   :  { %v3504_v52 = vadd.f32 %v3503_v27, %v3415_v63  ;;  %v13153_v27 = vld [vmem:[#allocation29_spill] sm:$0xff] }
 0x4d2   :  { %v10680_v45 = vpop.f32.mrf.mxu3 }
 0x4d5   :  { %v3592_v38 = vpop.f32.mrf.mxu2 }
 0x4d6   :  { %v3593_v55 = vadd.f32 %v3592_v38, %v3504_v52  ;;  %v3417_v28 = vpop.f32.mrf.mxu0  ;;  %v3506_v44 = vpop.f32.mrf.mxu1  ;;  %v3334_v38 = vadd.f32 %v10409_v15, %v10459_v19  ;;  %v3336_v15 = vadd.f32 %v10413_v32, %v10459_v19  ;;  %v7829_v32 = vld [vmem:[#allocation3 + $0x368] sm:$0xf] }
 0x4d7   :  { %v3418_v25 = vadd.f32 %v3417_v28, %v3329_v16 }
 0x4d8   :  { %v10683_v42 = vadd.f32 %v10642_v60, %v3593_v55 }
 0x4d9   :  { %v3507_v40 = vadd.f32 %v3506_v44, %v3418_v25  ;;  %3732 = vmatmul.bf16.gmra.mxu0 %v13151_v51  ;;  %8192 = vmatmul.msk.bf16.gmra.mxu1 %vm2582_vm0, %v13152_v26 }
 0x4da   :  { %13150 = vst [vmem:[#allocation181_spill] sm:$0xff] %v10683_v42  ;;  %3910 = vmatmul.bf16.gmra.mxu2 %v13153_v27  ;;  %v10691_v6 = vpop.f32.mrf.mxu3 }
 0x4db   :  { %4019 = vmatmul.bf16.gmra.mxu3 %v13101_v8  ;;  %v8668_v8 = vld [vmem:[#allocation3 + $0x574] sm:$0xf0] }
 0x4dd   :  { %v3595_v63 = vpop.f32.mrf.mxu2 }
 0x4de   :  { %v3596_v39 = vadd.f32 %v3595_v63, %v3507_v40  ;;  %v3419_v54 = vpop.f32.mrf.mxu0  ;;  %v3508_v52 = vpop.f32.mrf.mxu1  ;;  %v13156_v63 = vld [vmem:[#allocation151_spill] sm:$0xff] }
 0x4df   :  { %v3420_v14 = vadd.f32 %v3419_v54, %v3331_v0 }
 0x4e0   :  { %v10694_v60 = vadd.f32 %v10653_v33, %v3596_v39  ;;  %v13157_v33 = vld [vmem:[#allocation152_spill] sm:$0xff]  ;;  %v13158_v39 = vld [vmem:[#allocation34_spill] sm:$0xff] }
 0x4e1   :  { %v3509_v16 = vadd.f32 %v3508_v52, %v3420_v14  ;;  %v7957_v52 = vld [vmem:[#allocation3 + $0x468] sm:$0xf]  ;;  %v8636_v14 = vld [vmem:[#allocation3 + $0x474] sm:$0xf0] }
 0x4e2   :  { %13154 = vst [vmem:[#allocation183_spill] sm:$0xff] %v10694_v60  ;;  %v10699_v28 = vpop.f32.mrf.mxu3 }
 0x4e5   :  { %v3597_v55 = vpop.f32.mrf.mxu2 }
 0x4e6   :  { %v3598_v50 = vadd.f32 %v3597_v55, %v3509_v16  ;;  %v3422_v44 = vpop.f32.mrf.mxu0  ;;  %v3511_v25 = vpop.f32.mrf.mxu1  ;;  %v7701_v16 = vld [vmem:[#allocation3 + $0x268] sm:$0xf] }
 0x4e7   :  { %v3423_v37 = vadd.f32 %v3422_v44, %v3334_v38  ;;  %v8572_v44 = vld [vmem:[#allocation3 + $0x274] sm:$0xf0] }
 0x4e8   :  { %v10702_v40 = vadd.f32 %v10661_v61, %v3598_v50 }
 0x4e9   :  { %v3512_v0 = vadd.f32 %v3511_v25, %v3423_v37  ;;  %3737 = vmatmul.bf16.gmra.mxu0 %v13156_v63  ;;  %8193 = vmatmul.msk.bf16.gmra.mxu1 %vm2582_vm0, %v13157_v33  ;;  %v7958_v37 = vor.u32 %v8636_v14, %v7957_v52  ;;  %v8085_v25 = vld [vmem:[#allocation3 + $0x568] sm:$0xf]  ;;  %v7702_v33 = vor.u32 %v8572_v44, %v7701_v16 }
 0x4ea   :  { %13155 = vst [vmem:[#allocation190_spill] sm:$0xff] %v10702_v40  ;;  %3915 = vmatmul.bf16.gmra.mxu2 %v13158_v39  ;;  %v10710_v55 = vpop.f32.mrf.mxu3  ;;  %v8086_v26 = vor.u32 %v8668_v8, %v8085_v25  ;;  %v8604_v40 = vld [vmem:[#allocation3 + $0x374] sm:$0xf0] }
 0x4eb   :  { %4237 = vmatpush.bf16.msra.mxu2 %v7958_v37  ;;  %4059 = vmatpush.bf16.msra.mxu0 %v7702_v33  ;;  %v7830_v42 = vor.u32 %v8604_v40, %v7829_v32  ;;  %v13159_v33 = vld [vmem:[#allocation158_spill] sm:$0xff] }
 0x4ec   :  { %4326 = vmatpush.bf16.msra.mxu3 %v8086_v26  ;;  %v13160_v26 = vld [vmem:[#allocation159_spill] sm:$0xff] }
 0x4ed   :  { %v3600_v54 = vpop.f32.mrf.mxu2  ;;  %4024 = vmatmul.bf16.gmra.mxu3 %v13104_v24  ;;  %4148 = vmatpush.bf16.msra.mxu1 %v7830_v42  ;;  %v13161_v42 = vld [vmem:[#allocation40_spill] sm:$0xff]  ;;  %v7813_v24 = vld [vmem:[#allocation3 + $0x348] sm:$0xf] }
 0x4ee   :  { %v3601_v38 = vadd.f32 %v3600_v54, %v3512_v0  ;;  %v3424_v61 = vpop.f32.mrf.mxu0  ;;  %v3513_v50 = vpop.f32.mrf.mxu1  ;;  %v3339_v0 = vadd.f32 %v10423_v59, %v10459_v19  ;;  %v3341_v59 = vadd.f32 %v10429_v22, %v10459_v19 }
 0x4ef   :  { %v3425_v27 = vadd.f32 %v3424_v61, %v3336_v15 }
 0x4f0   :  { %v10713_v39 = vadd.f32 %v10672_v9, %v3601_v38 }
 0x4f1   :  { %v3514_v60 = vadd.f32 %v3513_v50, %v3425_v27 }
 0x4f2   :  { %v10718_v15 = vpop.f32.mrf.mxu3 }
 0x4f5   :  { %v3602_v54 = vpop.f32.mrf.mxu2 }
 0x4f6   :  { %v3603_v8 = vadd.f32 %v3602_v54, %v3514_v60  ;;  %v3427_v52 = vpop.f32.mrf.mxu0  ;;  %v3516_v9 = vpop.f32.mrf.mxu1 }
 0x4f7   :  { %v3428_v14 = vadd.f32 %v3427_v52, %v3339_v0 }
 0x4f8   :  { %v10721_v16 = vadd.f32 %v10680_v45, %v3603_v8 }
 0x4f9   :  { %v3517_v27 = vadd.f32 %v3516_v9, %v3428_v14  ;;  %3742 = vmatmul.bf16.gmra.mxu0 %v13159_v33  ;;  %8194 = vmatmul.msk.bf16.gmra.mxu1 %vm2582_vm0, %v13160_v26  ;;  %v13162_v9 = vld [vmem:[#allocation165_spill] sm:$0xff]  ;;  %v13163_v14 = vld [vmem:[#allocation166_spill] sm:$0xff] }
 0x4fa   :  { %3920 = vmatmul.bf16.gmra.mxu2 %v13161_v42  ;;  %v10729_v38 = vpop.f32.mrf.mxu3 }
 0x4fd   :  { %v3605_v40 = vpop.f32.mrf.mxu2  ;;  %4029 = vmatmul.bf16.gmra.mxu3 %v13109_v10 }
 0x4fe   :  { %v3606_v60 = vadd.f32 %v3605_v40, %v3517_v27  ;;  %v3429_v61 = vpop.f32.mrf.mxu0  ;;  %v3518_v50 = vpop.f32.mrf.mxu1  ;;  %v10746_v27 = vperm.slane %v10456_v31, 2  ;;  %v8632_v40 = vld [vmem:[#allocation3 + $0x454] sm:$0xf0] }
 0x4ff   :  { %v3430_v37 = vadd.f32 %v3429_v61, %v3341_v59  ;;  %v7941_v59 = vld [vmem:[#allocation3 + $0x448] sm:$0xf]  ;;  %v8568_v61 = vld [vmem:[#allocation3 + $0x254] sm:$0xf0] }
 0x500   :  { %v10732_v45 = vadd.f32 %v10691_v6, %v3606_v60  ;;  %v13164_v6 = vld [vmem:[#allocation48_spill] sm:$0xff]  ;;  %v7685_v60 = vld [vmem:[#allocation3 + $0x248] sm:$0xf] }
 0x501   :  { %v3519_v44 = vadd.f32 %v3518_v50, %v3430_v37  ;;  %v7686_v37 = vor.u32 %v8568_v61, %v7685_v60 }
 0x502   :  { %v10735_v32 = vpop.f32.mrf.mxu3 }
 0x503   :  { %4060 = vmatpush.bf16.msra.mxu0 %v7686_v37 }
 0x505   :  { %v3607_v25 = vpop.f32.mrf.mxu2 }
 0x506   :  { %v3608_v0 = vadd.f32 %v3607_v25, %v3519_v44  ;;  %v3708_v54 = vpop.f32.mrf.mxu0  ;;  %v3797_v8 = vpop.f32.mrf.mxu1  ;;  %v8664_v44 = vld [vmem:[#allocation3 + $0x554] sm:$0xf0] }
 0x507   :  { %v3709_v22 = vadd.f32 %v3708_v54, %v10476_v17  ;;  %v7942_v17 = vor.u32 %v8632_v40, %v7941_v59  ;;  %v8600_v59 = vld [vmem:[#allocation3 + $0x354] sm:$0xf0] }
 0x508   :  { %v10739_v19 = vadd.f32 %v10699_v28, %v3608_v0  ;;  %v8069_v28 = vld [vmem:[#allocation3 + $0x548] sm:$0xf]  ;;  %v7814_v61 = vor.u32 %v8600_v59, %v7813_v24  ;;  %v13167_v59 = vld [vmem:[#allocation173_spill] sm:$0xff] }
 0x509   :  { %v3798_v52 = vadd.f32 %v3797_v8, %v3709_v22  ;;  %3747 = vmatmul.bf16.gmra.mxu0 %v13162_v9  ;;  %8195 = vmatmul.msk.bf16.gmra.mxu1 %vm2582_vm0, %v13163_v14  ;;  %v8070_v22 = vor.u32 %v8664_v44, %v8069_v28  ;;  %v8522_v14 = vld [vmem:[#allocation3 + $0xec] sm:$0xf] }
 0x50a   :  { %3925 = vmatmul.bf16.gmra.mxu2 %v13164_v6  ;;  %v10748_v25 = vpop.f32.mrf.mxu3  ;;  %4149 = vmatpush.bf16.msra.mxu1 %v7814_v61 }
 0x50b   :  { %4238 = vmatpush.bf16.msra.mxu2 %v7942_v17  ;;  %4327 = vmatpush.bf16.msra.mxu3 %v8070_v22  ;;  %v5252_v40 = vmul.f32 0.2, %v3798_v52  ;;  %vm5124_vm7 = vcmp.gt.f32.partialorder %v3798_v52, 0.0  ;;  %v13166_v22 = vld [vmem:[#allocation172_spill] sm:$0xff] }
 0x50d   :  { %v3886_v50 = vpop.f32.mrf.mxu2  ;;  %4034 = vmatmul.bf16.gmra.mxu3 %v13113_v2  ;;  %v5380_v28 = vsel %vm5124_vm7, %v3798_v52, %v5252_v40  ;;  %v13168_v52 = vld [vmem:[#allocation56_spill] sm:$0xff] }
 0x50e   :  { %v3887_v0 = vadd.f32 %v3886_v50, %v10746_v27  ;;  %v3710_v54 = vpop.f32.mrf.mxu0  ;;  %v3799_v8 = vpop.f32.mrf.mxu1 }
 0x50f   :  { %v3711_v10 = vadd.f32 %v3710_v54, %v10481_v3 }
 0x510   :  { %v10753_v31 = vadd.f32 %v10710_v55, %v3887_v0 }
 0x511   :  { %v3800_v60 = vadd.f32 %v3799_v8, %v3711_v10 }
 0x512   :  { %v10756_v17 = vpop.f32.mrf.mxu3 }
 0x513   :  { %vm5128_vm8 = vcmp.gt.f32.partialorder %v3800_v60, 0.0  ;;  %v5256_v50 = vmul.f32 0.2, %v3800_v60 }
 0x515   :  { %v5384_v44 = vsel %vm5128_vm8, %v3800_v60, %v5256_v50  ;;  %v3888_v3 = vpop.f32.mrf.mxu2 }
 0x516   :  { %v10758_v37 = vpack.c.bf16 %v5384_v44, %v5380_v28  ;;  %v3889_v55 = vadd.f32 %v3888_v3, %v10746_v27  ;;  %v3713_v0 = vpop.f32.mrf.mxu0  ;;  %v3802_v54 = vpop.f32.mrf.mxu1 }
 0x517   :  { %v3714_v10 = vadd.f32 %v3713_v0, %v10490_v1 }
 0x518   :  { %13165 = vst [vmem:[#allocation192_spill] sm:$0xff] %v10758_v37  ;;  %v10763_v24 = vadd.f32 %v10718_v15, %v3889_v55 }
 0x519   :  { %v3803_v8 = vadd.f32 %v3802_v54, %v3714_v10  ;;  %3752 = vmatmul.bf16.gmra.mxu0 %v13166_v22  ;;  %8196 = vmatmul.msk.bf16.gmra.mxu1 %vm2582_vm0, %v13167_v59  ;;  %v7797_v59 = vld [vmem:[#allocation3 + $0x328] sm:$0xf] }
 0x51a   :  { %3930 = vmatmul.bf16.gmra.mxu2 %v13168_v52  ;;  %v10769_v60 = vpop.f32.mrf.mxu3 }
 0x51b   :  { %v5260_v44 = vmul.f32 0.2, %v3803_v8  ;;  %vm5132_vm9 = vcmp.gt.f32.partialorder %v3803_v8, 0.0 }
 0x51d   :  { %v3891_v40 = vpop.f32.mrf.mxu2  ;;  %4039 = vmatmul.bf16.gmra.mxu3 %v13118_v62  ;;  %v5388_v10 = vsel %vm5132_vm9, %v3803_v8, %v5260_v44  ;;  %v13172_v62 = vld [vmem:[#allocation64_spill] sm:$0xff]  ;;  %v7925_v8 = vld [vmem:[#allocation3 + $0x428] sm:$0xf] }
 0x51e   :  { %v3892_v61 = vadd.f32 %v3891_v40, %v10746_v27  ;;  %v3715_v50 = vpop.f32.mrf.mxu0  ;;  %v3804_v28 = vpop.f32.mrf.mxu1  ;;  %v8628_v44 = vld [vmem:[#allocation3 + $0x434] sm:$0xf0] }
 0x51f   :  { %v3716_v1 = vadd.f32 %v3715_v50, %v10495_v47 }
 0x520   :  { %v10774_v15 = vadd.f32 %v10729_v38, %v3892_v61 }
 0x521   :  { %v3805_v3 = vadd.f32 %v3804_v28, %v3716_v1  ;;  %v13170_v28 = vld [vmem:[#allocation179_spill] sm:$0xff]  ;;  %v13171_v1 = vld [vmem:[#allocation180_spill] sm:$0xff] }
 0x522   :  { %v10777_v54 = vpop.f32.mrf.mxu3 }
 0x523   :  { %vm5136_vm10 = vcmp.gt.f32.partialorder %v3805_v3, 0.0  ;;  %v5264_v55 = vmul.f32 0.2, %v3805_v3 }
 0x525   :  { %v3893_v0 = vpop.f32.mrf.mxu2  ;;  %v5392_v37 = vsel %vm5136_vm10, %v3805_v3, %v5264_v55  ;;  %v7669_v3 = vld [vmem:[#allocation3 + $0x228] sm:$0xf]  ;;  %v8564_v55 = vld [vmem:[#allocation3 + $0x234] sm:$0xf0] }
 0x526   :  { %v3894_v40 = vadd.f32 %v3893_v0, %v10746_v27  ;;  %v3718_v2 = vpop.f32.mrf.mxu0  ;;  %v3807_v52 = vpop.f32.mrf.mxu1  ;;  %v10780_v47 = vpack.c.bf16 %v5392_v37, %v5388_v10  ;;  %v7926_v37 = vor.u32 %v8628_v44, %v7925_v8  ;;  %v7670_v10 = vor.u32 %v8564_v55, %v7669_v3  ;;  %v8596_v8 = vld [vmem:[#allocation3 + $0x334] sm:$0xf0] }
 0x527   :  { %v3719_v38 = vadd.f32 %v3718_v2, %v10504_v35  ;;  %v8660_v35 = vld [vmem:[#allocation3 + $0x534] sm:$0xf0]  ;;  %v7798_v55 = vor.u32 %v8596_v8, %v7797_v59  ;;  %v13175_v8 = vld [vmem:[#allocation189_spill] sm:$0xff] }
 0x528   :  { %13169 = vst [vmem:[#allocation199_spill] sm:$0xff] %v10780_v47  ;;  %v10784_v61 = vadd.f32 %v10735_v32, %v3894_v40  ;;  %v8053_v47 = vld [vmem:[#allocation3 + $0x528] sm:$0xf]  ;;  %4239 = vmatpush.bf16.msra.mxu2 %v7926_v37  ;;  %4061 = vmatpush.bf16.msra.mxu0 %v7670_v10 }
 0x529   :  { %v3808_v50 = vadd.f32 %v3807_v52, %v3719_v38  ;;  %3757 = vmatmul.bf16.gmra.mxu0 %v13170_v28  ;;  %8197 = vmatmul.msk.bf16.gmra.mxu1 %vm2582_vm0, %v13171_v1  ;;  %v8054_v38 = vor.u32 %v8660_v35, %v8053_v47 }
 0x52a   :  { %3935 = vmatmul.bf16.gmra.mxu2 %v13172_v62  ;;  %v10790_v2 = vpop.f32.mrf.mxu3  ;;  %4150 = vmatpush.bf16.msra.mxu1 %v7798_v55  ;;  %v13176_v55 = vld [vmem:[#allocation72_spill] sm:$0xff] }
 0x52b   :  { %4328 = vmatpush.bf16.msra.mxu3 %v8054_v38  ;;  %v5268_v44 = vmul.f32 0.2, %v3808_v50  ;;  %vm5140_vm11 = vcmp.gt.f32.partialorder %v3808_v50, 0.0  ;;  %v13174_v38 = vld [vmem:[#allocation188_spill] sm:$0xff] }
 0x52d   :  { %v3896_v0 = vpop.f32.mrf.mxu2  ;;  %4044 = vmatmul.bf16.gmra.mxu3 %v13123_v34 }
 0x52e   :  { %v3897_v32 = vadd.f32 %v3896_v0, %v10746_v27  ;;  %v3720_v52 = vpop.f32.mrf.mxu0  ;;  %v3809_v40 = vpop.f32.mrf.mxu1 }
 0x52f   :  { %v3721_v1 = vadd.f32 %v3720_v52, %v10508_v23  ;;  %v5396_v23 = vsel %vm5140_vm11, %v3808_v50, %v5268_v44 }
 0x530   :  { %v10795_v62 = vadd.f32 %v10748_v25, %v3897_v32 }
 0x531   :  { %v3810_v3 = vadd.f32 %v3809_v40, %v3721_v1 }
 0x532   :  { %v10798_v35 = vpop.f32.mrf.mxu3 }
 0x533   :  { %vm5144_vm12 = vcmp.gt.f32.partialorder %v3810_v3, 0.0  ;;  %v5272_v0 = vmul.f32 0.2, %v3810_v3 }
 0x535   :  { %v3898_v47 = vpop.f32.mrf.mxu2  ;;  %v5400_v37 = vsel %vm5144_vm12, %v3810_v3, %v5272_v0 }
 0x536   :  { %v3899_v25 = vadd.f32 %v3898_v47, %v10746_v27  ;;  %v3723_v10 = vpop.f32.mrf.mxu0  ;;  %v3812_v32 = vpop.f32.mrf.mxu1  ;;  %v10801_v52 = vpack.c.bf16 %v5400_v37, %v5396_v23 }
 0x537   :  { %v3724_v1 = vadd.f32 %v3723_v10, %v10516_v20 }
 0x538   :  { %13173 = vst [vmem:[#allocation201_spill] sm:$0xff] %v10801_v52  ;;  %v10805_v59 = vadd.f32 %v10756_v17, %v3899_v25 }
 0x539   :  { %v3813_v40 = vadd.f32 %v3812_v32, %v3724_v1  ;;  %3762 = vmatmul.bf16.gmra.mxu0 %v13174_v38  ;;  %8198 = vmatmul.msk.bf16.gmra.mxu1 %vm2582_vm0, %v13175_v8  ;;  %v7781_v8 = vld [vmem:[#allocation3 + $0x308] sm:$0xf] }
 0x53a   :  { %3940 = vmatmul.bf16.gmra.mxu2 %v13176_v55  ;;  %v10811_v44 = vpop.f32.mrf.mxu3 }
 0x53b   :  { %v5276_v23 = vmul.f32 0.2, %v3813_v40  ;;  %vm5148_vm13 = vcmp.gt.f32.partialorder %v3813_v40, 0.0 }
 0x53d   :  { %v3901_v50 = vpop.f32.mrf.mxu2  ;;  %4049 = vmatmul.bf16.gmra.mxu3 %v13128_v13  ;;  %v5404_v1 = vsel %vm5148_vm13, %v3813_v40, %v5276_v23  ;;  %v13180_v13 = vld [vmem:[#allocation80_spill] sm:$0xff]  ;;  %v7909_v40 = vld [vmem:[#allocation3 + $0x408] sm:$0xf] }
 0x53e   :  { %v3902_v3 = vadd.f32 %v3901_v50, %v10746_v27  ;;  %v3725_v0 = vpop.f32.mrf.mxu0  ;;  %v3814_v47 = vpop.f32.mrf.mxu1  ;;  %v8624_v23 = vld [vmem:[#allocation3 + $0x414] sm:$0xf0] }
 0x53f   :  { %v3726_v20 = vadd.f32 %v3725_v0, %v10520_v56 }
 0x540   :  { %v10816_v17 = vadd.f32 %v10769_v60, %v3902_v3 }
 0x541   :  { %v3815_v37 = vadd.f32 %v3814_v47, %v3726_v20  ;;  %v13178_v47 = vld [vmem:[#allocation197_spill] sm:$0xff]  ;;  %v13179_v20 = vld [vmem:[#allocation198_spill] sm:$0xff] }
 0x542   :  { %v10819_v32 = vpop.f32.mrf.mxu3 }
 0x543   :  { %vm5152_vm14 = vcmp.gt.f32.partialorder %v3815_v37, 0.0  ;;  %v5280_v25 = vmul.f32 0.2, %v3815_v37 }
 0x545   :  { %v3903_v10 = vpop.f32.mrf.mxu2  ;;  %v5408_v52 = vsel %vm5152_vm14, %v3815_v37, %v5280_v25  ;;  %v7653_v37 = vld [vmem:[#allocation3 + $0x208] sm:$0xf]  ;;  %v8560_v25 = vld [vmem:[#allocation3 + $0x214] sm:$0xf0] }
 0x546   :  { %v3904_v50 = vadd.f32 %v3903_v10, %v10746_v27  ;;  %v3728_v34 = vpop.f32.mrf.mxu0  ;;  %v3817_v55 = vpop.f32.mrf.mxu1  ;;  %v10822_v56 = vpack.c.bf16 %v5408_v52, %v5404_v1  ;;  %v7910_v52 = vor.u32 %v8624_v23, %v7909_v40  ;;  %v7654_v1 = vor.u32 %v8560_v25, %v7653_v37  ;;  %v8592_v40 = vld [vmem:[#allocation3 + $0x314] sm:$0xf0] }
 0x547   :  { %v3729_v60 = vadd.f32 %v3728_v34, %v10529_v7  ;;  %v8656_v7 = vld [vmem:[#allocation3 + $0x514] sm:$0xf0]  ;;  %v7782_v25 = vor.u32 %v8592_v40, %v7781_v8  ;;  %v13184_v40 = vld [vmem:[#allocation207_spill] sm:$0xff] }
 0x548   :  { %13177 = vst [vmem:[#allocation209_spill] sm:$0xff] %v10822_v56  ;;  %v10826_v3 = vadd.f32 %v10777_v54, %v3904_v50  ;;  %v8037_v56 = vld [vmem:[#allocation3 + $0x508] sm:$0xf]  ;;  %4240 = vmatpush.bf16.msra.mxu2 %v7910_v52  ;;  %4062 = vmatpush.bf16.msra.mxu0 %v7654_v1 }
 0x549   :  { %v3818_v0 = vadd.f32 %v3817_v55, %v3729_v60  ;;  %3767 = vmatmul.bf16.gmra.mxu0 %v13178_v47  ;;  %8199 = vmatmul.msk.bf16.gmra.mxu1 %vm2582_vm0, %v13179_v20  ;;  %v8038_v60 = vor.u32 %v8656_v7, %v8037_v56 }
 0x54a   :  { %3945 = vmatmul.bf16.gmra.mxu2 %v13180_v13  ;;  %v10832_v34 = vpop.f32.mrf.mxu3  ;;  %4151 = vmatpush.bf16.msra.mxu1 %v7782_v25  ;;  %v13185_v25 = vld [vmem:[#allocation88_spill] sm:$0xff] }
 0x54b   :  { %4329 = vmatpush.bf16.msra.mxu3 %v8038_v60  ;;  %v5284_v23 = vmul.f32 0.2, %v3818_v0  ;;  %vm5156_vm15 = vcmp.gt.f32.partialorder %v3818_v0, 0.0  ;;  %v13183_v60 = vld [vmem:[#allocation206_spill] sm:$0xff] }
 0x54d   :  { %v3906_v10 = vpop.f32.mrf.mxu2 }
 0x54e   :  { %v3907_v54 = vadd.f32 %v3906_v10, %v10746_v27  ;;  %v3730_v55 = vpop.f32.mrf.mxu0  ;;  %v3819_v50 = vpop.f32.mrf.mxu1  ;;  %4330 = vmatmul.bf16.vlgmr.msra.gmra.mxu3 %v13135_v12 }
 0x54f   :  { %v3731_v20 = vadd.f32 %v3730_v55, %v10536_v49  ;;  %v5412_v49 = vsel %vm5156_vm15, %v3818_v0, %v5284_v23  ;;  %v13182_v55 = vld [vmem:[#allocation147_spill] sm:$0xff] }
 0x550   :  { %v10837_v13 = vadd.f32 %v10790_v2, %v3907_v54 }
 0x551   :  { %v3820_v37 = vadd.f32 %v3819_v50, %v3731_v20 }
 0x552   :  { %v10840_v10 = vpop.f32.mrf.mxu3 }
 0x553   :  { %vm5160_vm1 = vcmp.gt.f32.partialorder %v3820_v37, 0.0  ;;  %v5288_v6 = vmul.f32 0.2, %v3820_v37 }
 0x555   :  { %v3908_v56 = vpop.f32.mrf.mxu2  ;;  %v5416_v52 = vsel %vm5160_vm1, %v3820_v37, %v5288_v6 }
 0x556   :  { %v3909_v2 = vadd.f32 %v3908_v56, %v10746_v27  ;;  %v3733_v1 = vpop.f32.mrf.mxu0  ;;  %v3822_v7 = vpop.f32.mrf.mxu1  ;;  %v10843_v54 = vpack.c.bf16 %v5416_v52, %v5412_v49 }
 0x557   :  { %v3734_v20 = vadd.f32 %v3733_v1, %v13182_v55 }
 0x558   :  { %13181 = vst [vmem:[#allocation217_spill] sm:$0xff] %v10843_v54  ;;  %v10847_v8 = vadd.f32 %v10798_v35, %v3909_v2 }
 0x559   :  { %v3823_v50 = vadd.f32 %v3822_v7, %v3734_v20  ;;  %3772 = vmatmul.bf16.gmra.mxu0 %v13183_v60  ;;  %8200 = vmatmul.msk.bf16.gmra.mxu1 %vm2582_vm0, %v13184_v40  ;;  %v13190_v40 = vld [vmem:[#allocation148_spill] sm:$0xff] }
 0x55a   :  { %3950 = vmatmul.bf16.gmra.mxu2 %v13185_v25  ;;  %v10853_v0 = vpop.f32.mrf.mxu3 }
 0x55b   :  { %v5292_v52 = vmul.f32 0.2, %v3823_v50  ;;  %vm5164_vm2 = vcmp.gt.f32.partialorder %v3823_v50, 0.0 }
 0x55d   :  { %v3911_v6 = vpop.f32.mrf.mxu2  ;;  %v5420_v20 = vsel %vm5164_vm2, %v3823_v50, %v5292_v52  ;;  %v8554_v50 = vld [vmem:[#allocation3 + $0x1ec] sm:$0xf]  ;;  %v7639_v52 = vld [vmem:[#allocation3 + $0x1f8] sm:$0xf0] }
 0x55e   :  { %v3912_v23 = vadd.f32 %v3911_v6, %v10746_v27  ;;  %v3735_v37 = vpop.f32.mrf.mxu0  ;;  %v3824_v56 = vpop.f32.mrf.mxu1  ;;  %4335 = vmatmul.bf16.gmra.mxu3 %v13138_v11  ;;  %v13189_v11 = vld [vmem:[#allocation96_spill] sm:$0xff] }
 0x55f   :  { %v3736_v49 = vadd.f32 %v3735_v37, %v10552_v36 }
 0x560   :  { %v10858_v35 = vadd.f32 %v10811_v44, %v3912_v23 }
 0x561   :  { %v3825_v2 = vadd.f32 %v3824_v56, %v3736_v49  ;;  %v13187_v56 = vld [vmem:[#allocation214_spill] sm:$0xff]  ;;  %v13188_v49 = vld [vmem:[#allocation215_spill] sm:$0xff] }
 0x562   :  { %v10861_v55 = vpop.f32.mrf.mxu3 }
 0x563   :  { %vm5168_vm3 = vcmp.gt.f32.partialorder %v3825_v2, 0.0  ;;  %v5296_v1 = vmul.f32 0.2, %v3825_v2 }
 0x565   :  { %v3913_v7 = vpop.f32.mrf.mxu2  ;;  %v5424_v54 = vsel %vm5168_vm3, %v3825_v2, %v5296_v1  ;;  %v8165_v2 = vld [vmem:[#allocation3 + $0x608] sm:$0xf]  ;;  %v8688_v1 = vld [vmem:[#allocation3 + $0x614] sm:$0xf0] }
 0x566   :  { %v3914_v6 = vadd.f32 %v3913_v7, %v10746_v27  ;;  %v3738_v12 = vpop.f32.mrf.mxu0  ;;  %v3827_v25 = vpop.f32.mrf.mxu1  ;;  %v10864_v36 = vpack.c.bf16 %v5424_v54, %v5420_v20  ;;  %v7642_v54 = vor.u32 %v8554_v50, %v7639_v52  ;;  %v8166_v20 = vor.u32 %v8688_v1, %v8165_v2  ;;  %v7511_v50 = vld [vmem:[#allocation3 + $0xf8] sm:$0xf0] }
 0x567   :  { %v3739_v44 = vadd.f32 %v3738_v12, %v10562_v30  ;;  %v7767_v30 = vld [vmem:[#allocation3 + $0x2f8] sm:$0xf0]  ;;  %v7514_v1 = vor.u32 %v8522_v14, %v7511_v50  ;;  %v13194_v50 = vld [vmem:[#allocation225_spill] sm:$0xff] }
 0x568   :  { %13186 = vst [vmem:[#allocation218_spill] sm:$0xff] %v10864_v36  ;;  %v10868_v23 = vadd.f32 %v10819_v32, %v3914_v6  ;;  %v8586_v36 = vld [vmem:[#allocation3 + $0x2ec] sm:$0xf]  ;;  %4589 = vmatpush.bf16.msrb.mxu2 %v7642_v54  ;;  %4418 = vmatpush.bf16.msrb.mxu0 %v8166_v20 }
 0x569   :  { %v3828_v37 = vadd.f32 %v3827_v25, %v3739_v44  ;;  %3777 = vmatmul.bf16.gmra.mxu0 %v13187_v56  ;;  %8201 = vmatmul.msk.bf16.gmra.mxu1 %vm2582_vm0, %v13188_v49  ;;  %v7770_v44 = vor.u32 %v8586_v36, %v7767_v30 }
 0x56a   :  { %3955 = vmatmul.bf16.gmra.mxu2 %v13189_v11  ;;  %v10874_v12 = vpop.f32.mrf.mxu3  ;;  %4500 = vmatpush.bf16.msrb.mxu1 %v7514_v1  ;;  %v13195_v1 = vld [vmem:[#allocation106_spill] sm:$0xff] }
 0x56b   :  { %4678 = vmatpush.bf16.msrb.mxu3 %v7770_v44  ;;  %v5300_v52 = vmul.f32 0.2, %v3828_v37  ;;  %vm5172_vm4 = vcmp.gt.f32.partialorder %v3828_v37, 0.0  ;;  %v13193_v44 = vld [vmem:[#allocation224_spill] sm:$0xff] }
 0x56d   :  { %v3916_v7 = vpop.f32.mrf.mxu2 }
 0x56e   :  { %v3917_v32 = vadd.f32 %v3916_v7, %v10746_v27  ;;  %v3740_v25 = vpop.f32.mrf.mxu0  ;;  %v3829_v6 = vpop.f32.mrf.mxu1  ;;  %4340 = vmatmul.bf16.gmra.mxu3 %v13141_v46 }
 0x56f   :  { %v3741_v49 = vadd.f32 %v3740_v25, %v13190_v40  ;;  %v5428_v40 = vsel %vm5172_vm4, %v3828_v37, %v5300_v52  ;;  %v13192_v25 = vld [vmem:[#allocation149_spill] sm:$0xff] }
 0x570   :  { %v10879_v11 = vadd.f32 %v10832_v34, %v3917_v32 }
 0x571   :  { %v3830_v2 = vadd.f32 %v3829_v6, %v3741_v49 }
 0x572   :  { %v10882_v7 = vpop.f32.mrf.mxu3 }
 0x573   :  { %vm5176_vm5 = vcmp.gt.f32.partialorder %v3830_v2, 0.0  ;;  %v5304_v42 = vmul.f32 0.2, %v3830_v2 }
 0x575   :  { %v3918_v36 = vpop.f32.mrf.mxu2  ;;  %v5432_v54 = vsel %vm5176_vm5, %v3830_v2, %v5304_v42 }
 0x576   :  { %v3919_v34 = vadd.f32 %v3918_v36, %v10746_v27  ;;  %v3743_v20 = vpop.f32.mrf.mxu0  ;;  %v3832_v30 = vpop.f32.mrf.mxu1  ;;  %v10885_v32 = vpack.c.bf16 %v5432_v54, %v5428_v40  ;;  %v13196_v40 = vld [vmem:[#allocation153_spill] sm:$0xff] }
 0x577   :  { %v3744_v49 = vadd.f32 %v3743_v20, %v13192_v25 }
 0x578   :  { %13191 = vst [vmem:[#allocation147_spill] sm:$0xff] %v10885_v32  ;;  %v10889_v14 = vadd.f32 %v10840_v10, %v3919_v34 }
 0x579   :  { %v3833_v6 = vadd.f32 %v3832_v30, %v3744_v49  ;;  %3782 = vmatmul.bf16.gmra.mxu0 %v13193_v44  ;;  %8202 = vmatmul.msk.bf16.gmra.mxu1 %vm2582_vm0, %v13194_v50 }
 0x57a   :  { %3960 = vmatmul.bf16.gmra.mxu2 %v13195_v1  ;;  %v10895_v37 = vpop.f32.mrf.mxu3 }
 0x57b   :  { %v5308_v34 = vmul.f32 0.2, %v3833_v6  ;;  %vm5180_vm6 = vcmp.gt.f32.partialorder %v3833_v6, 0.0 }
 0x57d   :  { %v3921_v42 = vpop.f32.mrf.mxu2  ;;  %v5436_v32 = vsel %vm5180_vm6, %v3833_v6, %v5308_v34  ;;  %v8550_v6 = vld [vmem:[#allocation3 + $0x1cc] sm:$0xf]  ;;  %v7623_v34 = vld [vmem:[#allocation3 + $0x1d8] sm:$0xf0] }
 0x57e   :  { %v3922_v52 = vadd.f32 %v3921_v42, %v10746_v27  ;;  %v3745_v2 = vpop.f32.mrf.mxu0  ;;  %v3834_v36 = vpop.f32.mrf.mxu1  ;;  %4345 = vmatmul.bf16.gmra.mxu3 %v13144_v58  ;;  %v13201_v58 = vld [vmem:[#allocation114_spill] sm:$0xff]  ;;  %v7626_v26 = vor.u32 %v8550_v6, %v7623_v34 }
 0x57f   :  { %v3746_v54 = vadd.f32 %v3745_v2, %v13196_v40  ;;  %v13199_v40 = vld [vmem:[#allocation11_spill] sm:$0xff] }
 0x580   :  { %v10900_v10 = vadd.f32 %v10853_v0, %v3922_v52  ;;  %4590 = vmatpush.bf16.msrb.mxu2 %v7626_v26 }
 0x581   :  { %v3835_v20 = vadd.f32 %v3834_v36, %v3746_v54  ;;  %v13200_v54 = vld [vmem:[#allocation12_spill] sm:$0xff] }
 0x582   :  { %v10903_v49 = vpop.f32.mrf.mxu3 }
 0x583   :  { %vm5184_vm7 = vcmp.gt.f32.partialorder %v3835_v20, 0.0  ;;  %v5312_v30 = vmul.f32 0.2, %v3835_v20 }
 0x585   :  { %v3923_v25 = vpop.f32.mrf.mxu2  ;;  %v5440_v46 = vsel %vm5184_vm7, %v3835_v20, %v5312_v30  ;;  %v8582_v20 = vld [vmem:[#allocation3 + $0x2cc] sm:$0xf]  ;;  %v7751_v30 = vld [vmem:[#allocation3 + $0x2d8] sm:$0xf0] }
 0x586   :  { %v3924_v42 = vadd.f32 %v3923_v25, %v10746_v27  ;;  %v3748_v1 = vpop.f32.mrf.mxu0  ;;  %v3837_v50 = vpop.f32.mrf.mxu1  ;;  %v10906_v2 = vpack.c.bf16 %v5440_v46, %v5436_v32  ;;  %v7754_v46 = vor.u32 %v8582_v20, %v7751_v30 }
 0x587   :  { %v3749_v0 = vadd.f32 %v3748_v1, %v10599_v53 }
 0x588   :  { %13197 = vst [vmem:[#allocation148_spill] sm:$0xff] %v10906_v2  ;;  %v10910_v52 = vadd.f32 %v10861_v55, %v3924_v42  ;;  %4679 = vmatpush.bf16.msrb.mxu3 %v7754_v46  ;;  %v7495_v2 = vld [vmem:[#allocation3 + $0xd8] sm:$0xf0] }
 0x589   :  { %v3838_v36 = vadd.f32 %v3837_v50, %v3749_v0  ;;  %4063 = vmatmul.bf16.vlgmr.msra.gmra.mxu0 %v13199_v40  ;;  %4152 = vmatmul.bf16.vlgmr.msra.gmra.mxu1 %v13200_v54  ;;  %v8518_v0 = vld [vmem:[#allocation3 + $0xcc] sm:$0xf] }
 0x58a   :  { %13198 = vst [vmem:[#allocation149_spill] sm:$0xff] %v10910_v52  ;;  %4241 = vmatmul.bf16.vlgmr.msra.gmra.mxu2 %v13201_v58  ;;  %v10915_v32 = vpop.f32.mrf.mxu3  ;;  %v7498_v52 = vor.u32 %v8518_v0, %v7495_v2 }
 0x58b   :  { %v5316_v58 = vmul.f32 0.2, %v3838_v36  ;;  %vm5188_vm8 = vcmp.gt.f32.partialorder %v3838_v36, 0.0 }
 0x58c   :  { %4501 = vmatpush.bf16.msrb.mxu1 %v7498_v52  ;;  %v13203_v52 = vld [vmem:[#allocation15_spill] sm:$0xff] }
 0x58d   :  { %v3926_v25 = vpop.f32.mrf.mxu2 }
 0x58e   :  { %v3927_v53 = vadd.f32 %v3926_v25, %v10746_v27  ;;  %v3750_v55 = vpop.f32.mrf.mxu0  ;;  %v3839_v1 = vpop.f32.mrf.mxu1  ;;  %4350 = vmatmul.bf16.gmra.mxu3 %v13147_v41 }
 0x58f   :  { %v3751_v50 = vadd.f32 %v3750_v55, %v10607_v21  ;;  %v5444_v21 = vsel %vm5188_vm8, %v3838_v36, %v5316_v58 }
 0x590   :  { %v10920_v42 = vadd.f32 %v10874_v12, %v3927_v53 }
 0x591   :  { %v3840_v54 = vadd.f32 %v3839_v1, %v3751_v50  ;;  %v13204_v1 = vld [vmem:[#allocation16_spill] sm:$0xff]  ;;  %v13205_v50 = vld [vmem:[#allocation119_spill] sm:$0xff] }
 0x592   :  { %v10923_v20 = vpop.f32.mrf.mxu3 }
 0x593   :  { %vm5192_vm9 = vcmp.gt.f32.partialorder %v3840_v54, 0.0  ;;  %v5320_v6 = vmul.f32 0.2, %v3840_v54 }
 0x595   :  { %v3928_v34 = vpop.f32.mrf.mxu2  ;;  %v5448_v26 = vsel %vm5192_vm9, %v3840_v54, %v5320_v6 }
 0x596   :  { %v3929_v30 = vadd.f32 %v3928_v34, %v10746_v27  ;;  %v3753_v12 = vpop.f32.mrf.mxu0  ;;  %v3842_v25 = vpop.f32.mrf.mxu1  ;;  %v10926_v46 = vpack.c.bf16 %v5448_v26, %v5444_v21 }
 0x597   :  { %v3754_v53 = vadd.f32 %v3753_v12, %v10618_v29 }
 0x598   :  { %13202 = vst [vmem:[#allocation153_spill] sm:$0xff] %v10926_v46  ;;  %v10930_v2 = vadd.f32 %v10882_v7, %v3929_v30 }
 0x599   :  { %v3843_v55 = vadd.f32 %v3842_v25, %v3754_v53  ;;  %4068 = vmatmul.bf16.gmra.mxu0 %v13203_v52  ;;  %4157 = vmatmul.bf16.gmra.mxu1 %v13204_v1 }
 0x59a   :  { %4246 = vmatmul.bf16.gmra.mxu2 %v13205_v50  ;;  %v10935_v36 = vpop.f32.mrf.mxu3 }
 0x59b   :  { %v5324_v7 = vmul.f32 0.2, %v3843_v55  ;;  %vm5196_vm10 = vcmp.gt.f32.partialorder %v3843_v55, 0.0 }
 0x59d   :  { %v3931_v58 = vpop.f32.mrf.mxu2  ;;  %v5452_v25 = vsel %vm5196_vm10, %v3843_v55, %v5324_v7  ;;  %v8546_v55 = vld [vmem:[#allocation3 + $0x1ac] sm:$0xf]  ;;  %v7607_v7 = vld [vmem:[#allocation3 + $0x1b8] sm:$0xf0] }
 0x59e   :  { %v3932_v54 = vadd.f32 %v3931_v58, %v10746_v27  ;;  %v3755_v0 = vpop.f32.mrf.mxu0  ;;  %v3844_v6 = vpop.f32.mrf.mxu1  ;;  %4355 = vmatmul.bf16.gmra.mxu3 %v13151_v51  ;;  %v13209_v51 = vld [vmem:[#allocation125_spill] sm:$0xff]  ;;  %v7610_v50 = vor.u32 %v8546_v55, %v7607_v7 }
 0x59f   :  { %v3756_v34 = vadd.f32 %v3755_v0, %v10626_v5 }
 0x5a0   :  { %v10940_v29 = vadd.f32 %v10895_v37, %v3932_v54  ;;  %4591 = vmatpush.bf16.msrb.mxu2 %v7610_v50 }
 0x5a1   :  { %v3845_v21 = vadd.f32 %v3844_v6, %v3756_v34  ;;  %v13207_v6 = vld [vmem:[#allocation19_spill] sm:$0xff]  ;;  %v13208_v34 = vld [vmem:[#allocation20_spill] sm:$0xff] }
 0x5a2   :  { %v10943_v12 = vpop.f32.mrf.mxu3 }
 0x5a3   :  { %vm5200_vm11 = vcmp.gt.f32.partialorder %v3845_v21, 0.0  ;;  %v5328_v26 = vmul.f32 0.2, %v3845_v21 }
 0x5a5   :  { %v3933_v30 = vpop.f32.mrf.mxu2  ;;  %v5456_v53 = vsel %vm5200_vm11, %v3845_v21, %v5328_v26  ;;  %v8578_v21 = vld [vmem:[#allocation3 + $0x2ac] sm:$0xf]  ;;  %v7735_v26 = vld [vmem:[#allocation3 + $0x2b8] sm:$0xf0] }
 0x5a6   :  { %v3934_v58 = vadd.f32 %v3933_v30, %v10746_v27  ;;  %v3758_v46 = vpop.f32.mrf.mxu0  ;;  %v3847_v41 = vpop.f32.mrf.mxu1  ;;  %v10946_v5 = vpack.c.bf16 %v5456_v53, %v5452_v25  ;;  %v7738_v25 = vor.u32 %v8578_v21, %v7735_v26 }
 0x5a7   :  { %v3759_v37 = vadd.f32 %v3758_v46, %v10637_v18 }
 0x5a8   :  { %13206 = vst [vmem:[#allocation11_spill] sm:$0xff] %v10946_v5  ;;  %v10950_v54 = vadd.f32 %v10903_v49, %v3934_v58  ;;  %4680 = vmatpush.bf16.msrb.mxu3 %v7738_v25  ;;  %v7479_v5 = vld [vmem:[#allocation3 + $0xb8] sm:$0xf0] }
 0x5a9   :  { %v3848_v0 = vadd.f32 %v3847_v41, %v3759_v37  ;;  %4073 = vmatmul.bf16.gmra.mxu0 %v13207_v6  ;;  %4162 = vmatmul.bf16.gmra.mxu1 %v13208_v34  ;;  %v8514_v37 = vld [vmem:[#allocation3 + $0xac] sm:$0xf] }
 0x5aa   :  { %4251 = vmatmul.bf16.gmra.mxu2 %v13209_v51  ;;  %v10955_v53 = vpop.f32.mrf.mxu3  ;;  %v7482_v1 = vor.u32 %v8514_v37, %v7479_v5 }
 0x5ab   :  { %v5332_v51 = vmul.f32 0.2, %v3848_v0  ;;  %vm5204_vm12 = vcmp.gt.f32.partialorder %v3848_v0, 0.0 }
 0x5ac   :  { %4502 = vmatpush.bf16.msrb.mxu1 %v7482_v1  ;;  %v13211_v1 = vld [vmem:[#allocation23_spill] sm:$0xff] }
 0x5ad   :  { %v3936_v30 = vpop.f32.mrf.mxu2 }
 0x5ae   :  { %v3937_v18 = vadd.f32 %v3936_v30, %v10746_v27  ;;  %v3760_v49 = vpop.f32.mrf.mxu0  ;;  %v3849_v46 = vpop.f32.mrf.mxu1  ;;  %4360 = vmatmul.bf16.gmra.mxu3 %v13156_v63 }
 0x5af   :  { %v3761_v41 = vadd.f32 %v3760_v49, %v10645_v4  ;;  %v5460_v4 = vsel %vm5204_vm12, %v3848_v0, %v5332_v51 }
 0x5b0   :  { %v10960_v58 = vadd.f32 %v10915_v32, %v3937_v18 }
 0x5b1   :  { %v3850_v34 = vadd.f32 %v3849_v46, %v3761_v41  ;;  %v13212_v46 = vld [vmem:[#allocation24_spill] sm:$0xff]  ;;  %v13213_v41 = vld [vmem:[#allocation131_spill] sm:$0xff] }
 0x5b2   :  { %v10963_v21 = vpop.f32.mrf.mxu3 }
 0x5b3   :  { %vm5208_vm13 = vcmp.gt.f32.partialorder %v3850_v34, 0.0  ;;  %v5336_v55 = vmul.f32 0.2, %v3850_v34 }
 0x5b5   :  { %v3938_v7 = vpop.f32.mrf.mxu2  ;;  %v5464_v50 = vsel %vm5208_vm13, %v3850_v34, %v5336_v55 }
 0x5b6   :  { %v3939_v26 = vadd.f32 %v3938_v7, %v10746_v27  ;;  %v3763_v32 = vpop.f32.mrf.mxu0  ;;  %v3852_v30 = vpop.f32.mrf.mxu1  ;;  %v10966_v25 = vpack.c.bf16 %v5464_v50, %v5460_v4 }
 0x5b7   :  { %v3764_v18 = vadd.f32 %v3763_v32, %v10656_v43 }
 0x5b8   :  { %13210 = vst [vmem:[#allocation15_spill] sm:$0xff] %v10966_v25  ;;  %v10970_v5 = vadd.f32 %v10923_v20, %v3939_v26 }
 0x5b9   :  { %v3853_v49 = vadd.f32 %v3852_v30, %v3764_v18  ;;  %4078 = vmatmul.bf16.gmra.mxu0 %v13211_v1  ;;  %4167 = vmatmul.bf16.gmra.mxu1 %v13212_v46 }
 0x5ba   :  { %4256 = vmatmul.bf16.gmra.mxu2 %v13213_v41  ;;  %v10975_v0 = vpop.f32.mrf.mxu3 }
 0x5bb   :  { %v5340_v20 = vmul.f32 0.2, %v3853_v49  ;;  %vm5212_vm14 = vcmp.gt.f32.partialorder %v3853_v49, 0.0 }
 0x5bd   :  { %v3941_v51 = vpop.f32.mrf.mxu2  ;;  %v5468_v30 = vsel %vm5212_vm14, %v3853_v49, %v5340_v20  ;;  %v8542_v49 = vld [vmem:[#allocation3 + $0x18c] sm:$0xf]  ;;  %v7591_v20 = vld [vmem:[#allocation3 + $0x198] sm:$0xf0] }
 0x5be   :  { %v3942_v34 = vadd.f32 %v3941_v51, %v10746_v27  ;;  %v3765_v37 = vpop.f32.mrf.mxu0  ;;  %v3854_v55 = vpop.f32.mrf.mxu1  ;;  %4365 = vmatmul.bf16.gmra.mxu3 %v13159_v33  ;;  %v13218_v33 = vld [vmem:[#allocation138_spill] sm:$0xff]  ;;  %v7594_v41 = vor.u32 %v8542_v49, %v7591_v20 }
 0x5bf   :  { %v3766_v7 = vadd.f32 %v3765_v37, %v10664_v48 }
 0x5c0   :  { %v10980_v43 = vadd.f32 %v10935_v36, %v3942_v34  ;;  %4592 = vmatpush.bf16.msrb.mxu2 %v7594_v41 }
 0x5c1   :  { %v3855_v4 = vadd.f32 %v3854_v55, %v3766_v7  ;;  %v13216_v55 = vld [vmem:[#allocation27_spill] sm:$0xff]  ;;  %v13217_v7 = vld [vmem:[#allocation28_spill] sm:$0xff] }
 0x5c2   :  { %v10983_v32 = vpop.f32.mrf.mxu3 }
 0x5c3   :  { %vm5216_vm15 = vcmp.gt.f32.partialorder %v3855_v4, 0.0  ;;  %v5344_v50 = vmul.f32 0.2, %v3855_v4 }
 0x5c5   :  { %v3943_v26 = vpop.f32.mrf.mxu2  ;;  %v5472_v18 = vsel %vm5216_vm15, %v3855_v4, %v5344_v50  ;;  %v8574_v4 = vld [vmem:[#allocation3 + $0x28c] sm:$0xf]  ;;  %v7719_v50 = vld [vmem:[#allocation3 + $0x298] sm:$0xf0] }
 0x5c6   :  { %v3944_v51 = vadd.f32 %v3943_v26, %v10746_v27  ;;  %v3768_v25 = vpop.f32.mrf.mxu0  ;;  %v3857_v63 = vpop.f32.mrf.mxu1  ;;  %v10986_v48 = vpack.c.bf16 %v5472_v18, %v5468_v30  ;;  %v7722_v30 = vor.u32 %v8574_v4, %v7719_v50 }
 0x5c7   :  { %v3769_v36 = vadd.f32 %v3768_v25, %v10675_v57 }
 0x5c8   :  { %13214 = vst [vmem:[#allocation19_spill] sm:$0xff] %v10986_v48  ;;  %v10990_v34 = vadd.f32 %v10943_v12, %v3944_v51  ;;  %4681 = vmatpush.bf16.msrb.mxu3 %v7722_v30  ;;  %v8510_v48 = vld [vmem:[#allocation3 + $0x8c] sm:$0xf] }
 0x5c9   :  { %v3858_v37 = vadd.f32 %v3857_v63, %v3769_v36  ;;  %4083 = vmatmul.bf16.gmra.mxu0 %v13216_v55  ;;  %4172 = vmatmul.bf16.gmra.mxu1 %v13217_v7  ;;  %v13219_v63 = vld [vmem:[#allocation181_spill] sm:$0xff] }
 0x5ca   :  { %13215 = vst [vmem:[#allocation23_spill] sm:$0xff] %v10990_v34  ;;  %4261 = vmatmul.bf16.gmra.mxu2 %v13218_v33  ;;  %v10995_v18 = vpop.f32.mrf.mxu3  ;;  %v7463_v33 = vld [vmem:[#allocation3 + $0x98] sm:$0xf0] }
 0x5cb   :  { %v5348_v7 = vmul.f32 0.2, %v3858_v37  ;;  %v7466_v34 = vor.u32 %v8510_v48, %v7463_v33  ;;  %vm5220_vm1 = vcmp.gt.f32.partialorder %v3858_v37, 0.0 }
 0x5cd   :  { %v3946_v26 = vpop.f32.mrf.mxu2  ;;  %4503 = vmatpush.bf16.msrb.mxu1 %v7466_v34  ;;  %v5476_v50 = vsel %vm5220_vm1, %v3858_v37, %v5348_v7  ;;  %v13222_v34 = vld [vmem:[#allocation31_spill] sm:$0xff] }
 0x5ce   :  { %v3947_v57 = vadd.f32 %v3946_v26, %v10746_v27  ;;  %v3770_v12 = vpop.f32.mrf.mxu0  ;;  %v3859_v25 = vpop.f32.mrf.mxu1  ;;  %4370 = vmatmul.bf16.gmra.mxu3 %v13162_v9 }
 0x5cf   :  { %v3771_v51 = vadd.f32 %v3770_v12, %v13219_v63  ;;  %v13221_v12 = vld [vmem:[#allocation183_spill] sm:$0xff]  ;;  %v13223_v63 = vld [vmem:[#allocation32_spill] sm:$0xff] }
 0x5d0   :  { %v11000_v36 = vadd.f32 %v10955_v53, %v3947_v57 }
 0x5d1   :  { %v3860_v46 = vadd.f32 %v3859_v25, %v3771_v51  ;;  %v13224_v51 = vld [vmem:[#allocation144_spill] sm:$0xff] }
 0x5d2   :  { %v11003_v4 = vpop.f32.mrf.mxu3 }
 0x5d3   :  { %vm5224_vm2 = vcmp.gt.f32.partialorder %v3860_v46, 0.0  ;;  %v5352_v49 = vmul.f32 0.2, %v3860_v46 }
 0x5d5   :  { %v3948_v20 = vpop.f32.mrf.mxu2  ;;  %v5480_v41 = vsel %vm5224_vm2, %v3860_v46, %v5352_v49 }
 0x5d6   :  { %v3949_v26 = vadd.f32 %v3948_v20, %v10746_v27  ;;  %v3773_v53 = vpop.f32.mrf.mxu0  ;;  %v3862_v30 = vpop.f32.mrf.mxu1  ;;  %v11006_v57 = vpack.c.bf16 %v5480_v41, %v5476_v50  ;;  %v13225_v50 = vld [vmem:[#allocation190_spill] sm:$0xff] }
 0x5d7   :  { %v3774_v25 = vadd.f32 %v3773_v53, %v13221_v12 }
 0x5d8   :  { %13220 = vst [vmem:[#allocation27_spill] sm:$0xff] %v11006_v57  ;;  %v11010_v33 = vadd.f32 %v10963_v21, %v3949_v26 }
 0x5d9   :  { %v3863_v48 = vadd.f32 %v3862_v30, %v3774_v25  ;;  %4088 = vmatmul.bf16.gmra.mxu0 %v13222_v34  ;;  %4177 = vmatmul.bf16.gmra.mxu1 %v13223_v63 }
 0x5da   :  { %4266 = vmatmul.bf16.gmra.mxu2 %v13224_v51  ;;  %v11015_v46 = vpop.f32.mrf.mxu3 }
 0x5db   :  { %v5356_v21 = vmul.f32 0.2, %v3863_v48  ;;  %vm5228_vm3 = vcmp.gt.f32.partialorder %v3863_v48, 0.0 }
 0x5dd   :  { %v3951_v37 = vpop.f32.mrf.mxu2  ;;  %v5484_v57 = vsel %vm5228_vm3, %v3863_v48, %v5356_v21  ;;  %v8538_v48 = vld [vmem:[#allocation3 + $0x16c] sm:$0xf]  ;;  %v7575_v21 = vld [vmem:[#allocation3 + $0x178] sm:$0xf0] }
 0x5de   :  { %v3952_v7 = vadd.f32 %v3951_v37, %v10746_v27  ;;  %v3775_v49 = vpop.f32.mrf.mxu0  ;;  %v3864_v20 = vpop.f32.mrf.mxu1  ;;  %4375 = vmatmul.bf16.gmra.mxu3 %v13166_v22  ;;  %v13230_v22 = vld [vmem:[#allocation150_spill] sm:$0xff] }
 0x5df   :  { %v3776_v41 = vadd.f32 %v3775_v49, %v13225_v50  ;;  %v13228_v50 = vld [vmem:[#allocation36_spill] sm:$0xff] }
 0x5e0   :  { %v11020_v53 = vadd.f32 %v10975_v0, %v3952_v7 }
 0x5e1   :  { %v3865_v26 = vadd.f32 %v3864_v20, %v3776_v41  ;;  %v13229_v41 = vld [vmem:[#allocation37_spill] sm:$0xff] }
 0x5e2   :  { %13226 = vst [vmem:[#allocation181_spill] sm:$0xff] %v11020_v53  ;;  %v11023_v25 = vpop.f32.mrf.mxu3 }
 0x5e3   :  { %vm5232_vm4 = vcmp.gt.f32.partialorder %v3865_v26, 0.0  ;;  %v5360_v30 = vmul.f32 0.2, %v3865_v26 }
 0x5e5   :  { %v3953_v12 = vpop.f32.mrf.mxu2  ;;  %v5488_v9 = vsel %vm5232_vm4, %v3865_v26, %v5360_v30  ;;  %v8570_v26 = vld [vmem:[#allocation3 + $0x26c] sm:$0xf]  ;;  %v7578_v30 = vor.u32 %v8538_v48, %v7575_v21 }
 0x5e6   :  { %v3954_v37 = vadd.f32 %v3953_v12, %v10746_v27  ;;  %v3778_v51 = vpop.f32.mrf.mxu0  ;;  %v3867_v63 = vpop.f32.mrf.mxu1  ;;  %v11026_v49 = vpack.c.bf16 %v5488_v9, %v5484_v57  ;;  %v7703_v12 = vld [vmem:[#allocation3 + $0x278] sm:$0xf0] }
 0x5e7   :  { %v3779_v0 = vadd.f32 %v3778_v51, %v10713_v39  ;;  %v7706_v53 = vor.u32 %v8570_v26, %v7703_v12  ;;  %4593 = vmatpush.bf16.msrb.mxu2 %v7578_v30 }
 0x5e8   :  { %13227 = vst [vmem:[#allocation183_spill] sm:$0xff] %v11026_v49  ;;  %v11030_v7 = vadd.f32 %v10983_v32, %v3954_v37  ;;  %v7447_v49 = vld [vmem:[#allocation3 + $0x78] sm:$0xf0] }
 0x5e9   :  { %v3868_v20 = vadd.f32 %v3867_v63, %v3779_v0  ;;  %4093 = vmatmul.bf16.gmra.mxu0 %v13228_v50  ;;  %4182 = vmatmul.bf16.gmra.mxu1 %v13229_v41  ;;  %v8506_v0 = vld [vmem:[#allocation3 + $0x6c] sm:$0xf] }
 0x5ea   :  { %4271 = vmatmul.bf16.gmra.mxu2 %v13230_v22  ;;  %v11035_v57 = vpop.f32.mrf.mxu3  ;;  %4682 = vmatpush.bf16.msrb.mxu3 %v7706_v53  ;;  %v7450_v21 = vor.u32 %v8506_v0, %v7447_v49  ;;  %v13232_v0 = vld [vmem:[#allocation42_spill] sm:$0xff] }
 0x5eb   :  { %v5364_v22 = vmul.f32 0.2, %v3868_v20  ;;  %vm5236_vm5 = vcmp.gt.f32.partialorder %v3868_v20, 0.0 }
 0x5ec   :  { %4504 = vmatpush.bf16.msrb.mxu1 %v7450_v21  ;;  %v13233_v21 = vld [vmem:[#allocation43_spill] sm:$0xff] }
 0x5ed   :  { %v3956_v9 = vpop.f32.mrf.mxu2  ;;  %v5492_v53 = vsel %vm5236_vm5, %v3868_v20, %v5364_v22 }
 0x5ee   :  { %v3957_v39 = vadd.f32 %v3956_v9, %v10746_v27  ;;  %v3780_v32 = vpop.f32.mrf.mxu0  ;;  %v3869_v63 = vpop.f32.mrf.mxu1  ;;  %4380 = vmatmul.bf16.gmra.mxu3 %v13170_v28  ;;  %v13234_v28 = vld [vmem:[#allocation157_spill] sm:$0xff] }
 0x5ef   :  { %v3781_v51 = vadd.f32 %v3780_v32, %v10721_v16 }
 0x5f0   :  { %v11040_v37 = vadd.f32 %v10995_v18, %v3957_v39 }
 0x5f1   :  { %v3870_v48 = vadd.f32 %v3869_v63, %v3781_v51 }
 0x5f2   :  { %v11043_v12 = vpop.f32.mrf.mxu3 }
 0x5f3   :  { %vm5240_vm6 = vcmp.gt.f32.partialorder %v3870_v48, 0.0  ;;  %v5368_v26 = vmul.f32 0.2, %v3870_v48 }
 0x5f5   :  { %v3958_v30 = vpop.f32.mrf.mxu2  ;;  %v5496_v9 = vsel %vm5240_vm6, %v3870_v48, %v5368_v26 }
 0x5f6   :  { %v3959_v16 = vadd.f32 %v3958_v30, %v10746_v27  ;;  %v3783_v18 = vpop.f32.mrf.mxu0  ;;  %v3872_v39 = vpop.f32.mrf.mxu1  ;;  %v11046_v32 = vpack.c.bf16 %v5496_v9, %v5492_v53 }
 0x5f7   :  { %v3784_v63 = vadd.f32 %v3783_v18, %v10732_v45 }
 0x5f8   :  { %13231 = vst [vmem:[#allocation31_spill] sm:$0xff] %v11046_v32  ;;  %v11050_v49 = vadd.f32 %v11003_v4, %v3959_v16 }
 0x5f9   :  { %v3873_v51 = vadd.f32 %v3872_v39, %v3784_v63  ;;  %4098 = vmatmul.bf16.gmra.mxu0 %v13232_v0  ;;  %4187 = vmatmul.bf16.gmra.mxu1 %v13233_v21 }
 0x5fa   :  { %4276 = vmatmul.bf16.gmra.mxu2 %v13234_v28  ;;  %v11055_v20 = vpop.f32.mrf.mxu3 }
 0x5fb   :  { %v5372_v4 = vmul.f32 0.2, %v3873_v51  ;;  %vm5244_vm7 = vcmp.gt.f32.partialorder %v3873_v51, 0.0 }
 0x5fd   :  { %v3961_v22 = vpop.f32.mrf.mxu2  ;;  %v5500_v63 = vsel %vm5244_vm7, %v3873_v51, %v5372_v4  ;;  %v8534_v51 = vld [vmem:[#allocation3 + $0x14c] sm:$0xf]  ;;  %v7559_v4 = vld [vmem:[#allocation3 + $0x158] sm:$0xf0] }
 0x5fe   :  { %v3962_v48 = vadd.f32 %v3961_v22, %v10746_v27  ;;  %v3785_v26 = vpop.f32.mrf.mxu0  ;;  %v3874_v30 = vpop.f32.mrf.mxu1  ;;  %4385 = vmatmul.bf16.gmra.mxu3 %v13174_v38 }
 0x5ff   :  { %v3786_v53 = vadd.f32 %v3785_v26, %v10739_v19  ;;  %v13236_v26 = vld [vmem:[#allocation50_spill] sm:$0xff] }
 0x600   :  { %v11060_v45 = vadd.f32 %v11015_v46, %v3962_v48 }
 0x601   :  { %v3875_v9 = vadd.f32 %v3874_v30, %v3786_v53  ;;  %v13237_v30 = vld [vmem:[#allocation51_spill] sm:$0xff]  ;;  %v13238_v53 = vld [vmem:[#allocation164_spill] sm:$0xff] }
 0x602   :  { %v4338_v39 = vpop.f32.mrf.mxu3 }
 0x603   :  { %vm5248_vm8 = vcmp.gt.f32.partialorder %v3875_v9, 0.0  ;;  %v5376_v16 = vmul.f32 0.2, %v3875_v9 }
 0x605   :  { %v3963_v18 = vpop.f32.mrf.mxu2  ;;  %v5504_v32 = vsel %vm5248_vm8, %v3875_v9, %v5376_v16  ;;  %v8566_v9 = vld [vmem:[#allocation3 + $0x24c] sm:$0xf]  ;;  %v7687_v16 = vld [vmem:[#allocation3 + $0x258] sm:$0xf0] }
 0x606   :  { %v3964_v22 = vadd.f32 %v3963_v18, %v10746_v27  ;;  %v4064_v28 = vpop.f32.mrf.mxu0  ;;  %v4153_v21 = vpop.f32.mrf.mxu1  ;;  %v11064_v41 = vpack.c.bf16 %v5504_v32, %v5500_v63  ;;  %v7562_v27 = vor.u32 %v8534_v51, %v7559_v4  ;;  %v7690_v18 = vor.u32 %v8566_v9, %v7687_v16 }
 0x607   :  { %v4065_v19 = vadd.f32 %v4064_v28, %v10753_v31 }
 0x608   :  { %13235 = vst [vmem:[#allocation190_spill] sm:$0xff] %v11064_v41  ;;  %v11068_v46 = vadd.f32 %v11023_v25, %v3964_v22  ;;  %4594 = vmatpush.bf16.msrb.mxu2 %v7562_v27  ;;  %4683 = vmatpush.bf16.msrb.mxu3 %v7690_v18  ;;  %v7431_v41 = vld [vmem:[#allocation3 + $0x58] sm:$0xf0] }
 0x609   :  { %v4154_v48 = vadd.f32 %v4153_v21, %v4065_v19  ;;  %4103 = vmatmul.bf16.gmra.mxu0 %v13236_v26  ;;  %4192 = vmatmul.bf16.gmra.mxu1 %v13237_v30  ;;  %v8502_v19 = vld [vmem:[#allocation3 + $0x4c] sm:$0xf] }
 0x60a   :  { %4281 = vmatmul.bf16.gmra.mxu2 %v13238_v53  ;;  %v4341_v63 = vpop.f32.mrf.mxu3  ;;  %v7434_v53 = vor.u32 %v8502_v19, %v7431_v41 }
 0x60c   :  { %4505 = vmatpush.bf16.msrb.mxu1 %v7434_v53 }
 0x60d   :  { %v4242_v32 = vpop.f32.mrf.mxu2 }
 0x60e   :  { %v4243_v31 = vadd.f32 %v4242_v32, %v4154_v48  ;;  %v4066_v28 = vpop.f32.mrf.mxu0  ;;  %v4155_v25 = vpop.f32.mrf.mxu1  ;;  %4390 = vmatmul.bf16.gmra.mxu3 %v13178_v47  ;;  %v13240_v32 = vld [vmem:[#allocation59_spill] sm:$0xff] }
 0x60f   :  { %v4067_v21 = vadd.f32 %v4066_v28, %v10763_v24 }
 0x610   :  { %v11075_v22 = vadd.f32 %v11035_v57, %v4243_v31  ;;  %v13239_v57 = vld [vmem:[#allocation58_spill] sm:$0xff]  ;;  %v13241_v31 = vld [vmem:[#allocation171_spill] sm:$0xff] }
 0x611   :  { %v4156_v38 = vadd.f32 %v4155_v25, %v4067_v21 }
 0x612   :  { %v4343_v4 = vpop.f32.mrf.mxu3 }
 0x615   :  { %v4244_v51 = vpop.f32.mrf.mxu2 }
 0x616   :  { %v4245_v9 = vadd.f32 %v4244_v51, %v4156_v38  ;;  %v4069_v27 = vpop.f32.mrf.mxu0  ;;  %v4158_v48 = vpop.f32.mrf.mxu1 }
 0x617   :  { %v4070_v16 = vadd.f32 %v4069_v27, %v10774_v15 }
 0x618   :  { %v11080_v18 = vadd.f32 %v11043_v12, %v4245_v9 }
 0x619   :  { %v4159_v24 = vadd.f32 %v4158_v48, %v4070_v16  ;;  %4108 = vmatmul.bf16.gmra.mxu0 %v13239_v57  ;;  %4197 = vmatmul.bf16.gmra.mxu1 %v13240_v32 }
 0x61a   :  { %4286 = vmatmul.bf16.gmra.mxu2 %v13241_v31  ;;  %v4346_v53 = vpop.f32.mrf.mxu3  ;;  %v13243_v31 = vld [vmem:[#allocation67_spill] sm:$0xff] }
 0x61d   :  { %v4247_v41 = vpop.f32.mrf.mxu2 }
 0x61e   :  { %v4248_v28 = vadd.f32 %v4247_v41, %v4159_v24  ;;  %v4071_v25 = vpop.f32.mrf.mxu0  ;;  %v4160_v21 = vpop.f32.mrf.mxu1  ;;  %4395 = vmatmul.bf16.gmra.mxu3 %v13183_v60  ;;  %v13242_v41 = vld [vmem:[#allocation66_spill] sm:$0xff] }
 0x61f   :  { %v4072_v38 = vadd.f32 %v4071_v25, %v10784_v61  ;;  %v13244_v61 = vld [vmem:[#allocation178_spill] sm:$0xff] }
 0x620   :  { %v11087_v19 = vadd.f32 %v11055_v20, %v4248_v28  ;;  %v8530_v20 = vld [vmem:[#allocation3 + $0x12c] sm:$0xf]  ;;  %v7543_v28 = vld [vmem:[#allocation3 + $0x138] sm:$0xf0] }
 0x621   :  { %v4161_v15 = vadd.f32 %v4160_v21, %v4072_v38  ;;  %v8562_v25 = vld [vmem:[#allocation3 + $0x22c] sm:$0xf]  ;;  %v7546_v21 = vor.u32 %v8530_v20, %v7543_v28  ;;  %v7671_v38 = vld [vmem:[#allocation3 + $0x238] sm:$0xf0] }
 0x622   :  { %v4348_v51 = vpop.f32.mrf.mxu3  ;;  %v7674_v60 = vor.u32 %v8562_v25, %v7671_v38 }
 0x623   :  { %4595 = vmatpush.bf16.msrb.mxu2 %v7546_v21 }
 0x624   :  { %4684 = vmatpush.bf16.msrb.mxu3 %v7674_v60 }
 0x625   :  { %v4249_v12 = vpop.f32.mrf.mxu2 }
 0x626   :  { %v4250_v9 = vadd.f32 %v4249_v12, %v4161_v15  ;;  %v4074_v27 = vpop.f32.mrf.mxu0  ;;  %v4163_v48 = vpop.f32.mrf.mxu1 }
 0x627   :  { %v4075_v16 = vadd.f32 %v4074_v27, %v10795_v62 }
 0x628   :  { %v11091_v47 = vadd.f32 %v4338_v39, %v4250_v9 }
 0x629   :  { %v4164_v24 = vadd.f32 %v4163_v48, %v4075_v16  ;;  %4113 = vmatmul.bf16.gmra.mxu0 %v13242_v41  ;;  %4202 = vmatmul.bf16.gmra.mxu1 %v13243_v31  ;;  %v8498_v48 = vld [vmem:[#allocation3 + $0x2c] sm:$0xf]  ;;  %v7415_v16 = vld [vmem:[#allocation3 + $0x38] sm:$0xf0] }
 0x62a   :  { %4291 = vmatmul.bf16.gmra.mxu2 %v13244_v61  ;;  %v4351_v12 = vpop.f32.mrf.mxu3  ;;  %v7418_v31 = vor.u32 %v8498_v48, %v7415_v16 }
 0x62c   :  { %4506 = vmatpush.bf16.msrb.mxu1 %v7418_v31 }
 0x62d   :  { %v4252_v15 = vpop.f32.mrf.mxu2 }
 0x62e   :  { %v4253_v32 = vadd.f32 %v4252_v15, %v4164_v24  ;;  %v4076_v62 = vpop.f32.mrf.mxu0  ;;  %v4165_v39 = vpop.f32.mrf.mxu1  ;;  %4400 = vmatmul.bf16.gmra.mxu3 %v13187_v56 }
 0x62f   :  { %v4077_v9 = vadd.f32 %v4076_v62, %v10805_v59  ;;  %v13245_v59 = vld [vmem:[#allocation74_spill] sm:$0xff] }
 0x630   :  { %v11097_v27 = vadd.f32 %v4341_v63, %v4253_v32  ;;  %v13246_v63 = vld [vmem:[#allocation75_spill] sm:$0xff] }
 0x631   :  { %v4166_v61 = vadd.f32 %v4165_v39, %v4077_v9  ;;  %v13247_v32 = vld [vmem:[#allocation187_spill] sm:$0xff] }
 0x632   :  { %v4353_v28 = vpop.f32.mrf.mxu3 }
 0x635   :  { %v4254_v20 = vpop.f32.mrf.mxu2 }
 0x636   :  { %v4255_v25 = vadd.f32 %v4254_v20, %v4166_v61  ;;  %v4079_v21 = vpop.f32.mrf.mxu0  ;;  %v4168_v38 = vpop.f32.mrf.mxu1 }
 0x637   :  { %v4080_v24 = vadd.f32 %v4079_v21, %v10816_v17 }
 0x638   :  { %v11101_v15 = vadd.f32 %v4343_v4, %v4255_v25 }
 0x639   :  { %v4169_v60 = vadd.f32 %v4168_v38, %v4080_v24  ;;  %4118 = vmatmul.bf16.gmra.mxu0 %v13245_v59  ;;  %4207 = vmatmul.bf16.gmra.mxu1 %v13246_v63 }
 0x63a   :  { %4296 = vmatmul.bf16.gmra.mxu2 %v13247_v32  ;;  %v4356_v31 = vpop.f32.mrf.mxu3 }
 0x63d   :  { %v4257_v62 = vpop.f32.mrf.mxu2 }
 0x63e   :  { %v4258_v39 = vadd.f32 %v4257_v62, %v4169_v60  ;;  %v4081_v9 = vpop.f32.mrf.mxu0  ;;  %v4170_v48 = vpop.f32.mrf.mxu1  ;;  %4405 = vmatmul.bf16.gmra.mxu3 %v13193_v44  ;;  %v13248_v60 = vld [vmem:[#allocation82_spill] sm:$0xff]  ;;  %v13249_v62 = vld [vmem:[#allocation83_spill] sm:$0xff] }
 0x63f   :  { %v4082_v61 = vadd.f32 %v4081_v9, %v10826_v3  ;;  %v13250_v3 = vld [vmem:[#allocation196_spill] sm:$0xff]  ;;  %v8558_v9 = vld [vmem:[#allocation3 + $0x20c] sm:$0xf] }
 0x640   :  { %v11107_v16 = vadd.f32 %v4346_v53, %v4258_v39  ;;  %v8526_v53 = vld [vmem:[#allocation3 + $0x10c] sm:$0xf]  ;;  %v7527_v39 = vld [vmem:[#allocation3 + $0x118] sm:$0xf0] }
 0x641   :  { %v4171_v20 = vadd.f32 %v4170_v48, %v4082_v61  ;;  %v7530_v48 = vor.u32 %v8526_v53, %v7527_v39  ;;  %v7655_v61 = vld [vmem:[#allocation3 + $0x218] sm:$0xf0] }
 0x642   :  { %v4358_v4 = vpop.f32.mrf.mxu3  ;;  %v7658_v44 = vor.u32 %v8558_v9, %v7655_v61 }
 0x643   :  { %4596 = vmatpush.bf16.msrb.mxu2 %v7530_v48 }
 0x644   :  { %4685 = vmatpush.bf16.msrb.mxu3 %v7658_v44 }
 0x645   :  { %v4259_v17 = vpop.f32.mrf.mxu2 }
 0x646   :  { %v4260_v25 = vadd.f32 %v4259_v17, %v4171_v20  ;;  %v4084_v21 = vpop.f32.mrf.mxu0  ;;  %v4173_v38 = vpop.f32.mrf.mxu1 }
 0x647   :  { %v4085_v24 = vadd.f32 %v4084_v21, %v10837_v13 }
 0x648   :  { %v11111_v56 = vadd.f32 %v4348_v51, %v4260_v25 }
 0x649   :  { %v4174_v32 = vadd.f32 %v4173_v38, %v4085_v24  ;;  %4123 = vmatmul.bf16.gmra.mxu0 %v13248_v60  ;;  %4212 = vmatmul.bf16.gmra.mxu1 %v13249_v62  ;;  %v8494_v38 = vld [vmem:[#allocation3 + $0xc] sm:$0xf]  ;;  %v7399_v24 = vld [vmem:[#allocation3 + $0x18] sm:$0xf0] }
 0x64a   :  { %4301 = vmatmul.bf16.gmra.mxu2 %v13250_v3  ;;  %v4361_v17 = vpop.f32.mrf.mxu3  ;;  %v7402_v62 = vor.u32 %v8494_v38, %v7399_v24 }
 0x64c   :  { %4507 = vmatpush.bf16.msrb.mxu1 %v7402_v62 }
 0x64d   :  { %v4262_v20 = vpop.f32.mrf.mxu2 }
 0x64e   :  { %v4263_v63 = vadd.f32 %v4262_v20, %v4174_v32  ;;  %v4086_v13 = vpop.f32.mrf.mxu0  ;;  %v4175_v51 = vpop.f32.mrf.mxu1  ;;  %4686 = vmatmul.bf16.vlgmr.msrb.gmra.mxu3 %v13199_v40 }
 0x64f   :  { %v4087_v25 = vadd.f32 %v4086_v13, %v10847_v8  ;;  %v13251_v8 = vld [vmem:[#allocation90_spill] sm:$0xff] }
 0x650   :  { %v11117_v21 = vadd.f32 %v4351_v12, %v4263_v63  ;;  %v13252_v12 = vld [vmem:[#allocation91_spill] sm:$0xff]  ;;  %v13253_v63 = vld [vmem:[#allocation205_spill] sm:$0xff] }
 0x651   :  { %v4176_v3 = vadd.f32 %v4175_v51, %v4087_v25 }
 0x652   :  { %v4363_v39 = vpop.f32.mrf.mxu3 }
 0x655   :  { %v4264_v53 = vpop.f32.mrf.mxu2 }
 0x656   :  { %v4265_v9 = vadd.f32 %v4264_v53, %v4176_v3  ;;  %v4089_v48 = vpop.f32.mrf.mxu0  ;;  %v4178_v61 = vpop.f32.mrf.mxu1 }
 0x657   :  { %v4090_v32 = vadd.f32 %v4089_v48, %v10858_v35 }
 0x658   :  { %v11121_v20 = vadd.f32 %v4353_v28, %v4265_v9 }
 0x659   :  { %v4179_v44 = vadd.f32 %v4178_v61, %v4090_v32  ;;  %4128 = vmatmul.bf16.gmra.mxu0 %v13251_v8  ;;  %4217 = vmatmul.bf16.gmra.mxu1 %v13252_v12 }
 0x65a   :  { %4306 = vmatmul.bf16.gmra.mxu2 %v13253_v63  ;;  %v4366_v62 = vpop.f32.mrf.mxu3 }
 0x65d   :  { %v4267_v13 = vpop.f32.mrf.mxu2 }
 0x65e   :  { %v4268_v51 = vadd.f32 %v4267_v13, %v4179_v44  ;;  %v4091_v40 = vpop.f32.mrf.mxu0  ;;  %v4180_v25 = vpop.f32.mrf.mxu1  ;;  %4691 = vmatmul.bf16.gmra.mxu3 %v13203_v52  ;;  %v13254_v44 = vld [vmem:[#allocation98_spill] sm:$0xff]  ;;  %v13255_v13 = vld [vmem:[#allocation99_spill] sm:$0xff] }
 0x65f   :  { %v4092_v3 = vadd.f32 %v4091_v40, %v10868_v23  ;;  %v13256_v23 = vld [vmem:[#allocation213_spill] sm:$0xff]  ;;  %v8618_v40 = vld [vmem:[#allocation3 + $0x3ec] sm:$0xf] }
 0x660   :  { %v11127_v38 = vadd.f32 %v4356_v31, %v4268_v51  ;;  %v8682_v31 = vld [vmem:[#allocation3 + $0x5ec] sm:$0xf]  ;;  %v8151_v51 = vld [vmem:[#allocation3 + $0x5f8] sm:$0xf0] }
 0x661   :  { %v4181_v24 = vadd.f32 %v4180_v25, %v4092_v3  ;;  %v8154_v52 = vor.u32 %v8682_v31, %v8151_v51  ;;  %v7895_v25 = vld [vmem:[#allocation3 + $0x3f8] sm:$0xf0]  ;;  %v8686_v3 = vld [vmem:[#allocation3 + $0x60c] sm:$0xf] }
 0x662   :  { %v4368_v28 = vpop.f32.mrf.mxu3 }
 0x663   :  { %4945 = vmatpush.bf16.msra.mxu2 %v8154_v52 }
 0x665   :  { %v4269_v35 = vpop.f32.mrf.mxu2 }
 0x666   :  { %v4270_v53 = vadd.f32 %v4269_v35, %v4181_v24  ;;  %v4094_v9 = vpop.f32.mrf.mxu0  ;;  %v4183_v48 = vpop.f32.mrf.mxu1  ;;  %v8167_v24 = vld [vmem:[#allocation3 + $0x618] sm:$0xf0]  ;;  %v7898_v35 = vor.u32 %v8618_v40, %v7895_v25 }
 0x667   :  { %v4095_v61 = vadd.f32 %v4094_v9, %v10879_v11  ;;  %v8170_v12 = vor.u32 %v8686_v3, %v8167_v24 }
 0x668   :  { %v11131_v32 = vadd.f32 %v4358_v4, %v4270_v53  ;;  %4767 = vmatpush.bf16.msra.mxu0 %v7898_v35  ;;  %v13259_v35 = vld [vmem:[#allocation223_spill] sm:$0xff] }
 0x669   :  { %v4184_v63 = vadd.f32 %v4183_v48, %v4095_v61  ;;  %4133 = vmatmul.bf16.gmra.mxu0 %v13254_v44  ;;  %4222 = vmatmul.bf16.gmra.mxu1 %v13255_v13  ;;  %v8023_v13 = vld [vmem:[#allocation3 + $0x4f8] sm:$0xf0] }
 0x66a   :  { %4311 = vmatmul.bf16.gmra.mxu2 %v13256_v23  ;;  %v4371_v11 = vpop.f32.mrf.mxu3  ;;  %5041 = vmatpush.bf16.msra.mxu3 %v8170_v12  ;;  %v8650_v23 = vld [vmem:[#allocation3 + $0x4ec] sm:$0xf] }
 0x66b   :  { %v8026_v51 = vor.u32 %v8650_v23, %v8023_v13 }
 0x66d   :  { %v4272_v30 = vpop.f32.mrf.mxu2  ;;  %4856 = vmatpush.bf16.msra.mxu1 %v8026_v51 }
 0x66e   :  { %v4273_v4 = vadd.f32 %v4272_v30, %v4184_v63  ;;  %v4096_v53 = vpop.f32.mrf.mxu0  ;;  %v4185_v9 = vpop.f32.mrf.mxu1  ;;  %4696 = vmatmul.bf16.gmra.mxu3 %v13207_v6 }
 0x66f   :  { %v4097_v48 = vadd.f32 %v4096_v53, %v10889_v14  ;;  %v13257_v14 = vld [vmem:[#allocation108_spill] sm:$0xff] }
 0x670   :  { %v11137_v61 = vadd.f32 %v4361_v17, %v4273_v4  ;;  %v13258_v17 = vld [vmem:[#allocation109_spill] sm:$0xff] }
 0x671   :  { %v4186_v31 = vadd.f32 %v4185_v9, %v4097_v48  ;;  %v13260_v9 = vld [vmem:[#allocation149_spill] sm:$0xff] }
 0x672   :  { %v4373_v25 = vpop.f32.mrf.mxu3 }
 0x675   :  { %v4274_v40 = vpop.f32.mrf.mxu2 }
 0x676   :  { %v4275_v52 = vadd.f32 %v4274_v40, %v4186_v31  ;;  %v4099_v3 = vpop.f32.mrf.mxu0  ;;  %v4188_v30 = vpop.f32.mrf.mxu1 }
 0x677   :  { %v4100_v63 = vadd.f32 %v4099_v3, %v10900_v10 }
 0x678   :  { %v11141_v24 = vadd.f32 %v4363_v39, %v4275_v52 }
 0x679   :  { %v4189_v12 = vadd.f32 %v4188_v30, %v4100_v63  ;;  %4138 = vmatmul.bf16.gmra.mxu0 %v13257_v14  ;;  %4227 = vmatmul.bf16.gmra.mxu1 %v13258_v17 }
 0x67a   :  { %4316 = vmatmul.bf16.gmra.mxu2 %v13259_v35  ;;  %v4376_v23 = vpop.f32.mrf.mxu3 }
 0x67d   :  { %v4277_v13 = vpop.f32.mrf.mxu2 }
 0x67e   :  { %v4278_v4 = vadd.f32 %v4277_v13, %v4189_v12  ;;  %v4101_v6 = vpop.f32.mrf.mxu0  ;;  %v4190_v53 = vpop.f32.mrf.mxu1  ;;  %4701 = vmatmul.bf16.gmra.mxu3 %v13211_v1  ;;  %v13261_v12 = vld [vmem:[#allocation116_spill] sm:$0xff]  ;;  %v13262_v13 = vld [vmem:[#allocation9_spill] sm:$0xff]  ;;  %v8614_v1 = vld [vmem:[#allocation3 + $0x3cc] sm:$0xf] }
 0x67f   :  { %v4102_v48 = vadd.f32 %v4101_v6, %v13260_v9  ;;  %v8135_v6 = vld [vmem:[#allocation3 + $0x5d8] sm:$0xf0] }
 0x680   :  { %v11147_v31 = vadd.f32 %v4366_v62, %v4278_v4  ;;  %v13263_v62 = vld [vmem:[#allocation10_spill] sm:$0xff]  ;;  %v7879_v9 = vld [vmem:[#allocation3 + $0x3d8] sm:$0xf0] }
 0x681   :  { %v4191_v51 = vadd.f32 %v4190_v53, %v4102_v48  ;;  %v8678_v4 = vld [vmem:[#allocation3 + $0x5cc] sm:$0xf]  ;;  %v7882_v48 = vor.u32 %v8614_v1, %v7879_v9 }
 0x682   :  { %v4378_v39 = vpop.f32.mrf.mxu3  ;;  %v8138_v53 = vor.u32 %v8678_v4, %v8135_v6 }
 0x683   :  { %4768 = vmatpush.bf16.msra.mxu0 %v7882_v48 }
 0x684   :  { %4946 = vmatpush.bf16.msra.mxu2 %v8138_v53 }
 0x685   :  { %v4279_v10 = vpop.f32.mrf.mxu2 }
 0x686   :  { %v4280_v40 = vadd.f32 %v4279_v10, %v4191_v51  ;;  %v4104_v52 = vpop.f32.mrf.mxu0  ;;  %v4193_v3 = vpop.f32.mrf.mxu1 }
 0x687   :  { %v4105_v30 = vadd.f32 %v4104_v52, %v10920_v42 }
 0x688   :  { %v11151_v63 = vadd.f32 %v4368_v28, %v4280_v40 }
 0x689   :  { %v4194_v35 = vadd.f32 %v4193_v3, %v4105_v30  ;;  %8203 = vmatmul.msk.bf16.vlgmr.msrb.gmra.mxu0 %vm2582_vm0, %v13261_v12  ;;  %4508 = vmatmul.bf16.vlgmr.msrb.gmra.mxu1 %v13262_v13  ;;  %v8646_v30 = vld [vmem:[#allocation3 + $0x4cc] sm:$0xf]  ;;  %v8007_v13 = vld [vmem:[#allocation3 + $0x4d8] sm:$0xf0] }
 0x68a   :  { %4597 = vmatmul.bf16.vlgmr.msrb.gmra.mxu2 %v13263_v62  ;;  %v4381_v10 = vpop.f32.mrf.mxu3  ;;  %v8010_v17 = vor.u32 %v8646_v30, %v8007_v13 }
 0x68c   :  { %4857 = vmatpush.bf16.msra.mxu1 %v8010_v17 }
 0x68d   :  { %v4282_v51 = vpop.f32.mrf.mxu2 }
 0x68e   :  { %v4283_v42 = vadd.f32 %v4282_v51, %v4194_v35  ;;  %v4106_v28 = vpop.f32.mrf.mxu0  ;;  %v4195_v40 = vpop.f32.mrf.mxu1  ;;  %4706 = vmatmul.bf16.gmra.mxu3 %v13216_v55 }
 0x68f   :  { %v4107_v52 = vadd.f32 %v4106_v28, %v10930_v2  ;;  %v13264_v2 = vld [vmem:[#allocation122_spill] sm:$0xff] }
 0x690   :  { %v11158_v3 = vadd.f32 %v4371_v11, %v4283_v42  ;;  %v13265_v11 = vld [vmem:[#allocation13_spill] sm:$0xff]  ;;  %v13266_v42 = vld [vmem:[#allocation14_spill] sm:$0xff] }
 0x691   :  { %v4196_v62 = vadd.f32 %v4195_v40, %v4107_v52 }
 0x692   :  { %v4383_v6 = vpop.f32.mrf.mxu3 }
 0x695   :  { %v4284_v4 = vpop.f32.mrf.mxu2 }
 0x696   :  { %v4285_v1 = vadd.f32 %v4284_v4, %v4196_v62  ;;  %v4109_v53 = vpop.f32.mrf.mxu0  ;;  %v4198_v9 = vpop.f32.mrf.mxu1 }
 0x697   :  { %v4110_v35 = vadd.f32 %v4109_v53, %v10940_v29 }
 0x698   :  { %v11162_v51 = vadd.f32 %v4373_v25, %v4285_v1 }
 0x699   :  { %v4199_v48 = vadd.f32 %v4198_v9, %v4110_v35  ;;  %8204 = vmatmul.msk.bf16.gmra.mxu0 %vm2582_vm0, %v13264_v2  ;;  %4513 = vmatmul.bf16.gmra.mxu1 %v13265_v11 }
 0x69a   :  { %4602 = vmatmul.bf16.gmra.mxu2 %v13266_v42  ;;  %v4386_v28 = vpop.f32.mrf.mxu3  ;;  %v13268_v42 = vld [vmem:[#allocation17_spill] sm:$0xff] }
 0x69d   :  { %v4287_v17 = vpop.f32.mrf.mxu2 }
 0x69e   :  { %v4288_v55 = vadd.f32 %v4287_v17, %v4199_v48  ;;  %v4111_v40 = vpop.f32.mrf.mxu0  ;;  %v4200_v52 = vpop.f32.mrf.mxu1  ;;  %4711 = vmatmul.bf16.gmra.mxu3 %v13222_v34  ;;  %v13267_v48 = vld [vmem:[#allocation127_spill] sm:$0xff]  ;;  %v8119_v17 = vld [vmem:[#allocation3 + $0x5b8] sm:$0xf0]  ;;  %v8610_v34 = vld [vmem:[#allocation3 + $0x3ac] sm:$0xf] }
 0x69f   :  { %v4112_v30 = vadd.f32 %v4111_v40, %v10950_v54  ;;  %v13269_v54 = vld [vmem:[#allocation18_spill] sm:$0xff]  ;;  %v7863_v40 = vld [vmem:[#allocation3 + $0x3b8] sm:$0xf0] }
 0x6a0   :  { %v11169_v13 = vadd.f32 %v4376_v23, %v4288_v55  ;;  %v8674_v23 = vld [vmem:[#allocation3 + $0x5ac] sm:$0xf] }
 0x6a1   :  { %v4201_v29 = vadd.f32 %v4200_v52, %v4112_v30  ;;  %v8122_v55 = vor.u32 %v8674_v23, %v8119_v17  ;;  %v7866_v52 = vor.u32 %v8610_v34, %v7863_v40 }
 0x6a2   :  { %v4388_v62 = vpop.f32.mrf.mxu3 }
 0x6a3   :  { %4947 = vmatpush.bf16.msra.mxu2 %v8122_v55  ;;  %4769 = vmatpush.bf16.msra.mxu0 %v7866_v52 }
 0x6a5   :  { %v4289_v25 = vpop.f32.mrf.mxu2 }
 0x6a6   :  { %v4290_v4 = vadd.f32 %v4289_v25, %v4201_v29  ;;  %v4114_v1 = vpop.f32.mrf.mxu0  ;;  %v4203_v53 = vpop.f32.mrf.mxu1 }
 0x6a7   :  { %v4115_v9 = vadd.f32 %v4114_v1, %v10960_v58 }
 0x6a8   :  { %v11173_v35 = vadd.f32 %v4378_v39, %v4290_v4 }
 0x6a9   :  { %v4204_v11 = vadd.f32 %v4203_v53, %v4115_v9  ;;  %8205 = vmatmul.msk.bf16.gmra.mxu0 %vm2582_vm0, %v13267_v48  ;;  %4518 = vmatmul.bf16.gmra.mxu1 %v13268_v42  ;;  %v8642_v53 = vld [vmem:[#allocation3 + $0x4ac] sm:$0xf]  ;;  %v7991_v9 = vld [vmem:[#allocation3 + $0x4b8] sm:$0xf0] }
 0x6aa   :  { %4607 = vmatmul.bf16.gmra.mxu2 %v13269_v54  ;;  %v4391_v29 = vpop.f32.mrf.mxu3  ;;  %v7994_v54 = vor.u32 %v8642_v53, %v7991_v9  ;;  %v13273_v9 = vld [vmem:[#allocation23_spill] sm:$0xff] }
 0x6ac   :  { %4858 = vmatpush.bf16.msra.mxu1 %v7994_v54 }
 0x6ad   :  { %v4292_v30 = vpop.f32.mrf.mxu2 }
 0x6ae   :  { %v4293_v58 = vadd.f32 %v4292_v30, %v4204_v11  ;;  %v4116_v39 = vpop.f32.mrf.mxu0  ;;  %v4205_v25 = vpop.f32.mrf.mxu1  ;;  %4716 = vmatmul.bf16.gmra.mxu3 %v13228_v50 }
 0x6af   :  { %v4117_v4 = vadd.f32 %v4116_v39, %v10970_v5  ;;  %v13270_v5 = vld [vmem:[#allocation134_spill] sm:$0xff] }
 0x6b0   :  { %v11180_v1 = vadd.f32 %v4381_v10, %v4293_v58  ;;  %v13271_v10 = vld [vmem:[#allocation21_spill] sm:$0xff]  ;;  %v13272_v58 = vld [vmem:[#allocation22_spill] sm:$0xff] }
 0x6b1   :  { %v4206_v42 = vadd.f32 %v4205_v25, %v4117_v4 }
 0x6b2   :  { %v4393_v17 = vpop.f32.mrf.mxu3 }
 0x6b5   :  { %v4294_v23 = vpop.f32.mrf.mxu2 }
 0x6b6   :  { %v4295_v34 = vadd.f32 %v4294_v23, %v4206_v42  ;;  %v4119_v55 = vpop.f32.mrf.mxu0  ;;  %v4208_v40 = vpop.f32.mrf.mxu1 }
 0x6b7   :  { %v4120_v11 = vadd.f32 %v4119_v55, %v10980_v43 }
 0x6b8   :  { %v11184_v30 = vadd.f32 %v4383_v6, %v4295_v34 }
 0x6b9   :  { %v4209_v52 = vadd.f32 %v4208_v40, %v4120_v11  ;;  %8206 = vmatmul.msk.bf16.gmra.mxu0 %vm2582_vm0, %v13270_v5  ;;  %4523 = vmatmul.bf16.gmra.mxu1 %v13271_v10 }
 0x6ba   :  { %4612 = vmatmul.bf16.gmra.mxu2 %v13272_v58  ;;  %v4396_v25 = vpop.f32.mrf.mxu3 }
 0x6bd   :  { %v4297_v39 = vpop.f32.mrf.mxu2 }
 0x6be   :  { %v4298_v50 = vadd.f32 %v4297_v39, %v4209_v52  ;;  %v4121_v4 = vpop.f32.mrf.mxu0  ;;  %v4210_v53 = vpop.f32.mrf.mxu1  ;;  %4721 = vmatmul.bf16.gmra.mxu3 %v13232_v0  ;;  %v13276_v52 = vld [vmem:[#allocation140_spill] sm:$0xff]  ;;  %v13277_v39 = vld [vmem:[#allocation25_spill] sm:$0xff]  ;;  %v8606_v0 = vld [vmem:[#allocation3 + $0x38c] sm:$0xf] }
 0x6bf   :  { %v4122_v42 = vadd.f32 %v4121_v4, %v13273_v9  ;;  %v8103_v4 = vld [vmem:[#allocation3 + $0x598] sm:$0xf0] }
 0x6c0   :  { %v11191_v54 = vadd.f32 %v4386_v28, %v4298_v50  ;;  %v13278_v28 = vld [vmem:[#allocation26_spill] sm:$0xff]  ;;  %v7847_v9 = vld [vmem:[#allocation3 + $0x398] sm:$0xf0] }
 0x6c1   :  { %v4211_v43 = vadd.f32 %v4210_v53, %v4122_v42  ;;  %v8670_v50 = vld [vmem:[#allocation3 + $0x58c] sm:$0xf]  ;;  %v7850_v42 = vor.u32 %v8606_v0, %v7847_v9 }
 0x6c2   :  { %13274 = vst [vmem:[#allocation36_spill] sm:$0xff] %v11191_v54  ;;  %v4398_v23 = vpop.f32.mrf.mxu3  ;;  %v8106_v53 = vor.u32 %v8670_v50, %v8103_v4 }
 0x6c3   :  { %4770 = vmatpush.bf16.msra.mxu0 %v7850_v42 }
 0x6c4   :  { %4948 = vmatpush.bf16.msra.mxu2 %v8106_v53 }
 0x6c5   :  { %v4299_v6 = vpop.f32.mrf.mxu2 }
 0x6c6   :  { %v4300_v34 = vadd.f32 %v4299_v6, %v4211_v43  ;;  %v4124_v55 = vpop.f32.mrf.mxu0  ;;  %v4213_v40 = vpop.f32.mrf.mxu1 }
 0x6c7   :  { %v4125_v11 = vadd.f32 %v4124_v55, %v11000_v36 }
 0x6c8   :  { %v11195_v10 = vadd.f32 %v4388_v62, %v4300_v34 }
 0x6c9   :  { %v4214_v58 = vadd.f32 %v4213_v40, %v4125_v11  ;;  %8207 = vmatmul.msk.bf16.gmra.mxu0 %vm2582_vm0, %v13276_v52  ;;  %4528 = vmatmul.bf16.gmra.mxu1 %v13277_v39  ;;  %v8638_v11 = vld [vmem:[#allocation3 + $0x48c] sm:$0xf]  ;;  %v7975_v39 = vld [vmem:[#allocation3 + $0x498] sm:$0xf0] }
 0x6ca   :  { %13275 = vst [vmem:[#allocation42_spill] sm:$0xff] %v11195_v10  ;;  %4617 = vmatmul.bf16.gmra.mxu2 %v13278_v28  ;;  %v4401_v6 = vpop.f32.mrf.mxu3  ;;  %v7978_v10 = vor.u32 %v8638_v11, %v7975_v39 }
 0x6cc   :  { %4859 = vmatpush.bf16.msra.mxu1 %v7978_v10 }
 0x6cd   :  { %v4302_v43 = vpop.f32.mrf.mxu2 }
 0x6ce   :  { %v4303_v36 = vadd.f32 %v4302_v43, %v4214_v58  ;;  %v4126_v62 = vpop.f32.mrf.mxu0  ;;  %v4215_v34 = vpop.f32.mrf.mxu1  ;;  %4726 = vmatmul.bf16.gmra.mxu3 %v13236_v26  ;;  %v13279_v58 = vld [vmem:[#allocation181_spill] sm:$0xff] }
 0x6cf   :  { %v4127_v55 = vadd.f32 %v4126_v62, %v11010_v33  ;;  %v13280_v33 = vld [vmem:[#allocation146_spill] sm:$0xff] }
 0x6d0   :  { %v11202_v40 = vadd.f32 %v4391_v29, %v4303_v36  ;;  %v13281_v29 = vld [vmem:[#allocation29_spill] sm:$0xff]  ;;  %v13282_v36 = vld [vmem:[#allocation30_spill] sm:$0xff] }
 0x6d1   :  { %v4216_v28 = vadd.f32 %v4215_v34, %v4127_v55 }
 0x6d2   :  { %v4403_v4 = vpop.f32.mrf.mxu3 }
 0x6d5   :  { %v4304_v50 = vpop.f32.mrf.mxu2 }
 0x6d6   :  { %v4305_v0 = vadd.f32 %v4304_v50, %v4216_v28  ;;  %v4129_v53 = vpop.f32.mrf.mxu0  ;;  %v4218_v9 = vpop.f32.mrf.mxu1 }
 0x6d7   :  { %v4130_v43 = vadd.f32 %v4129_v53, %v13279_v58 }
 0x6d8   :  { %v11206_v54 = vadd.f32 %v4393_v17, %v4305_v0 }
 0x6d9   :  { %v4219_v42 = vadd.f32 %v4218_v9, %v4130_v43  ;;  %8208 = vmatmul.msk.bf16.gmra.mxu0 %vm2582_vm0, %v13280_v33  ;;  %4533 = vmatmul.bf16.gmra.mxu1 %v13281_v29 }
 0x6da   :  { %4622 = vmatmul.bf16.gmra.mxu2 %v13282_v36  ;;  %v4406_v62 = vpop.f32.mrf.mxu3  ;;  %v13284_v36 = vld [vmem:[#allocation34_spill] sm:$0xff] }
 0x6dd   :  { %v4307_v10 = vpop.f32.mrf.mxu2 }
 0x6de   :  { %v4308_v26 = vadd.f32 %v4307_v10, %v4219_v42  ;;  %v4131_v34 = vpop.f32.mrf.mxu0  ;;  %v4220_v55 = vpop.f32.mrf.mxu1  ;;  %4731 = vmatmul.bf16.gmra.mxu3 %v13239_v57  ;;  %v13283_v42 = vld [vmem:[#allocation152_spill] sm:$0xff]  ;;  %v8602_v57 = vld [vmem:[#allocation3 + $0x36c] sm:$0xf] }
 0x6df   :  { %v4132_v11 = vadd.f32 %v4131_v34, %v11030_v7  ;;  %v13285_v7 = vld [vmem:[#allocation35_spill] sm:$0xff]  ;;  %v8087_v10 = vld [vmem:[#allocation3 + $0x578] sm:$0xf0] }
 0x6e0   :  { %v11213_v39 = vadd.f32 %v4396_v25, %v4308_v26  ;;  %v8666_v25 = vld [vmem:[#allocation3 + $0x56c] sm:$0xf]  ;;  %v7831_v34 = vld [vmem:[#allocation3 + $0x378] sm:$0xf0] }
 0x6e1   :  { %v4221_v28 = vadd.f32 %v4220_v55, %v4132_v11  ;;  %v8090_v26 = vor.u32 %v8666_v25, %v8087_v10  ;;  %v7834_v11 = vor.u32 %v8602_v57, %v7831_v34 }
 0x6e2   :  { %v4408_v50 = vpop.f32.mrf.mxu3 }
 0x6e3   :  { %4949 = vmatpush.bf16.msra.mxu2 %v8090_v26  ;;  %4771 = vmatpush.bf16.msra.mxu0 %v7834_v11  ;;  %v13287_v11 = vld [vmem:[#allocation40_spill] sm:$0xff] }
 0x6e5   :  { %v4309_v17 = vpop.f32.mrf.mxu2 }
 0x6e6   :  { %v4310_v0 = vadd.f32 %v4309_v17, %v4221_v28  ;;  %v4134_v53 = vpop.f32.mrf.mxu0  ;;  %v4223_v9 = vpop.f32.mrf.mxu1 }
 0x6e7   :  { %v4135_v58 = vadd.f32 %v4134_v53, %v11040_v37 }
 0x6e8   :  { %v11217_v43 = vadd.f32 %v4398_v23, %v4310_v0 }
 0x6e9   :  { %v4224_v29 = vadd.f32 %v4223_v9, %v4135_v58  ;;  %8209 = vmatmul.msk.bf16.gmra.mxu0 %vm2582_vm0, %v13283_v42  ;;  %4538 = vmatmul.bf16.gmra.mxu1 %v13284_v36  ;;  %v8634_v9 = vld [vmem:[#allocation3 + $0x46c] sm:$0xf]  ;;  %v7959_v58 = vld [vmem:[#allocation3 + $0x478] sm:$0xf0] }
 0x6ea   :  { %4627 = vmatmul.bf16.gmra.mxu2 %v13285_v7  ;;  %v11223_v28 = vpop.f32.mrf.mxu3  ;;  %v7962_v7 = vor.u32 %v8634_v9, %v7959_v58 }
 0x6ec   :  { %4860 = vmatpush.bf16.msra.mxu1 %v7962_v7 }
 0x6ed   :  { %v4312_v55 = vpop.f32.mrf.mxu2 }
 0x6ee   :  { %v4313_v37 = vadd.f32 %v4312_v55, %v4224_v29  ;;  %v4136_v23 = vpop.f32.mrf.mxu0  ;;  %v4225_v17 = vpop.f32.mrf.mxu1  ;;  %4736 = vmatmul.bf16.gmra.mxu3 %v13242_v41 }
 0x6ef   :  { %v4137_v0 = vadd.f32 %v4136_v23, %v11050_v49 }
 0x6f0   :  { %v11226_v53 = vadd.f32 %v4401_v6, %v4313_v37  ;;  %v13286_v6 = vld [vmem:[#allocation159_spill] sm:$0xff]  ;;  %v13288_v37 = vld [vmem:[#allocation41_spill] sm:$0xff] }
 0x6f1   :  { %v4226_v36 = vadd.f32 %v4225_v17, %v4137_v0 }
 0x6f2   :  { %v11229_v10 = vpop.f32.mrf.mxu3 }
 0x6f5   :  { %v4314_v25 = vpop.f32.mrf.mxu2 }
 0x6f6   :  { %v4315_v57 = vadd.f32 %v4314_v25, %v4226_v36  ;;  %v4139_v29 = vpop.f32.mrf.mxu0  ;;  %v4228_v34 = vpop.f32.mrf.mxu1 }
 0x6f7   :  { %v4140_v26 = vadd.f32 %v4139_v29, %v11060_v45  ;;  %v8772_v29 = vld [vmem:[%s12529_s2] sm:$0xf] }
 0x6f8   :  { %v11232_v55 = vadd.f32 %v4403_v4, %v4315_v57 }
 0x6f9   :  { %v4229_v49 = vadd.f32 %v4228_v34, %v4140_v26  ;;  %8210 = vmatmul.msk.bf16.gmra.mxu0 %vm2582_vm0, %v13286_v6  ;;  %4543 = vmatmul.bf16.gmra.mxu1 %v13287_v11  ;;  %v11249_v34 = vperm.slane %v8772_v29, 3 }
 0x6fa   :  { %4632 = vmatmul.bf16.gmra.mxu2 %v13288_v37  ;;  %v11238_v41 = vpop.f32.mrf.mxu3  ;;  %v13292_v37 = vld [vmem:[#allocation49_spill] sm:$0xff] }
 0x6fd   :  { %v4317_v23 = vpop.f32.mrf.mxu2 }
 0x6fe   :  { %v4318_v17 = vadd.f32 %v4317_v23, %v4229_v49  ;;  %v4141_v0 = vpop.f32.mrf.mxu0  ;;  %v4230_v9 = vpop.f32.mrf.mxu1  ;;  %4741 = vmatmul.bf16.gmra.mxu3 %v13245_v59  ;;  %v13291_v59 = vld [vmem:[#allocation48_spill] sm:$0xff]  ;;  %v8662_v23 = vld [vmem:[#allocation3 + $0x54c] sm:$0xf] }
 0x6ff   :  { %v4142_v58 = vadd.f32 %v4141_v0, %v11068_v46  ;;  %v8598_v0 = vld [vmem:[#allocation3 + $0x34c] sm:$0xf] }
 0x700   :  { %v11241_v36 = vadd.f32 %v4406_v62, %v4318_v17  ;;  %v13290_v62 = vld [vmem:[#allocation166_spill] sm:$0xff]  ;;  %v8071_v17 = vld [vmem:[#allocation3 + $0x558] sm:$0xf0] }
 0x701   :  { %v4231_v45 = vadd.f32 %v4230_v9, %v4142_v58  ;;  %v8074_v9 = vor.u32 %v8662_v23, %v8071_v17  ;;  %v7815_v58 = vld [vmem:[#allocation3 + $0x358] sm:$0xf0] }
 0x702   :  { %v11244_v7 = vpop.f32.mrf.mxu3 }
 0x703   :  { %4950 = vmatpush.bf16.msra.mxu2 %v8074_v9 }
 0x705   :  { %v4319_v4 = vpop.f32.mrf.mxu2 }
 0x706   :  { %v4320_v25 = vadd.f32 %v4319_v4, %v4231_v45  ;;  %v4420_v57 = vpop.f32.mrf.mxu0  ;;  %v4509_v26 = vpop.f32.mrf.mxu1  ;;  %v7818_v45 = vor.u32 %v8598_v0, %v7815_v58 }
 0x707   :  { %v4421_v49 = vadd.f32 %v4420_v57, %v11075_v22  ;;  %v4510_v11 = vadd.f32 %v4509_v26, %v11249_v34 }
 0x708   :  { %v11252_v46 = vadd.f32 %v4408_v50, %v4320_v25  ;;  %4772 = vmatpush.bf16.msra.mxu0 %v7818_v45 }
 0x709   :  { %8211 = vmatmul.msk.bf16.gmra.mxu0 %vm2582_vm0, %v13290_v62  ;;  %4548 = vmatmul.bf16.gmra.mxu1 %v13291_v59  ;;  %v5253_v29 = vmul.f32 0.2, %v4421_v49  ;;  %vm5125_vm9 = vcmp.gt.f32.partialorder %v4421_v49, 0.0 }
 0x70a   :  { %13289 = vst [vmem:[#allocation50_spill] sm:$0xff] %v11252_v46  ;;  %4637 = vmatmul.bf16.gmra.mxu2 %v13292_v37  ;;  %v11259_v22 = vpop.f32.mrf.mxu3  ;;  %v8630_v37 = vld [vmem:[#allocation3 + $0x44c] sm:$0xf]  ;;  %v7943_v46 = vld [vmem:[#allocation3 + $0x458] sm:$0xf0] }
 0x70b   :  { %v7946_v17 = vor.u32 %v8630_v37, %v7943_v46  ;;  %v5381_v0 = vsel %vm5125_vm9, %v4421_v49, %v5253_v29  ;;  %v13295_v49 = vld [vmem:[#allocation173_spill] sm:$0xff]  ;;  %v13296_v46 = vld [vmem:[#allocation56_spill] sm:$0xff] }
 0x70c   :  { %v13297_v29 = vld [vmem:[#allocation57_spill] sm:$0xff] }
 0x70d   :  { %v4598_v4 = vpop.f32.mrf.mxu2  ;;  %4861 = vmatpush.bf16.msra.mxu1 %v7946_v17 }
 0x70e   :  { %v4599_v50 = vadd.f32 %v4598_v4, %v4510_v11  ;;  %v4422_v25 = vpop.f32.mrf.mxu0  ;;  %v4511_v57 = vpop.f32.mrf.mxu1  ;;  %4746 = vmatmul.bf16.gmra.mxu3 %v13248_v60 }
 0x70f   :  { %v4423_v59 = vadd.f32 %v4422_v25, %v11080_v18  ;;  %v4512_v58 = vadd.f32 %v4511_v57, %v11249_v34 }
 0x710   :  { %v11263_v26 = vadd.f32 %v11223_v28, %v4599_v50 }
 0x711   :  { %vm5129_vm10 = vcmp.gt.f32.partialorder %v4423_v59, 0.0  ;;  %v5257_v23 = vmul.f32 0.2, %v4423_v59 }
 0x712   :  { %13293 = vst [vmem:[#allocation58_spill] sm:$0xff] %v11263_v26  ;;  %v11269_v18 = vpop.f32.mrf.mxu3 }
 0x713   :  { %v5385_v9 = vsel %vm5129_vm10, %v4423_v59, %v5257_v23 }
 0x714   :  { %v11266_v11 = vpack.c.bf16 %v5385_v9, %v5381_v0 }
 0x715   :  { %v4600_v45 = vpop.f32.mrf.mxu2 }
 0x716   :  { %13294 = vst [vmem:[#allocation66_spill] sm:$0xff] %v11266_v11  ;;  %v4601_v4 = vadd.f32 %v4600_v45, %v4512_v58  ;;  %v4425_v28 = vpop.f32.mrf.mxu0  ;;  %v4514_v50 = vpop.f32.mrf.mxu1 }
 0x717   :  { %v4426_v25 = vadd.f32 %v4425_v28, %v11087_v19  ;;  %v4515_v60 = vadd.f32 %v4514_v50, %v11249_v34 }
 0x718   :  { %v11273_v26 = vadd.f32 %v11229_v10, %v4601_v4 }
 0x719   :  { %8212 = vmatmul.msk.bf16.gmra.mxu0 %vm2582_vm0, %v13295_v49  ;;  %4553 = vmatmul.bf16.gmra.mxu1 %v13296_v46  ;;  %v5261_v0 = vmul.f32 0.2, %v4426_v25  ;;  %vm5133_vm11 = vcmp.gt.f32.partialorder %v4426_v25, 0.0 }
 0x71a   :  { %4642 = vmatmul.bf16.gmra.mxu2 %v13297_v29  ;;  %v11280_v59 = vpop.f32.mrf.mxu3 }
 0x71b   :  { %v5389_v58 = vsel %vm5133_vm11, %v4426_v25, %v5261_v0  ;;  %v8055_v0 = vld [vmem:[#allocation3 + $0x538] sm:$0xf0] }
 0x71d   :  { %v4603_v57 = vpop.f32.mrf.mxu2 }
 0x71e   :  { %v4604_v37 = vadd.f32 %v4603_v57, %v4515_v60  ;;  %v4427_v23 = vpop.f32.mrf.mxu0  ;;  %v4516_v17 = vpop.f32.mrf.mxu1  ;;  %4751 = vmatmul.bf16.gmra.mxu3 %v13251_v8  ;;  %v13300_v8 = vld [vmem:[#allocation64_spill] sm:$0xff] }
 0x71f   :  { %v4428_v19 = vadd.f32 %v4427_v23, %v11091_v47  ;;  %v4517_v4 = vadd.f32 %v4516_v17, %v11249_v34  ;;  %v13301_v23 = vld [vmem:[#allocation65_spill] sm:$0xff]  ;;  %v8658_v17 = vld [vmem:[#allocation3 + $0x52c] sm:$0xf] }
 0x720   :  { %v11284_v10 = vadd.f32 %v11238_v41, %v4604_v37  ;;  %v13299_v37 = vld [vmem:[#allocation180_spill] sm:$0xff] }
 0x721   :  { %vm5137_vm12 = vcmp.gt.f32.partialorder %v4428_v19, 0.0  ;;  %v5265_v9 = vmul.f32 0.2, %v4428_v19 }
 0x722   :  { %v11290_v46 = vpop.f32.mrf.mxu3 }
 0x723   :  { %v5393_v45 = vsel %vm5137_vm12, %v4428_v19, %v5265_v9  ;;  %v8594_v19 = vld [vmem:[#allocation3 + $0x32c] sm:$0xf]  ;;  %v8058_v9 = vor.u32 %v8658_v17, %v8055_v0 }
 0x724   :  { %v11288_v28 = vpack.c.bf16 %v5393_v45, %v5389_v58  ;;  %v7799_v58 = vld [vmem:[#allocation3 + $0x338] sm:$0xf0] }
 0x725   :  { %v4605_v50 = vpop.f32.mrf.mxu2  ;;  %v7802_v45 = vor.u32 %v8594_v19, %v7799_v58  ;;  %4951 = vmatpush.bf16.msra.mxu2 %v8058_v9 }
 0x726   :  { %13298 = vst [vmem:[#allocation74_spill] sm:$0xff] %v11288_v28  ;;  %v4606_v60 = vadd.f32 %v4605_v50, %v4517_v4  ;;  %v4430_v29 = vpop.f32.mrf.mxu0  ;;  %v4519_v47 = vpop.f32.mrf.mxu1  ;;  %v7927_v28 = vld [vmem:[#allocation3 + $0x438] sm:$0xf0] }
 0x727   :  { %v4431_v57 = vadd.f32 %v4430_v29, %v11097_v27  ;;  %v4520_v25 = vadd.f32 %v4519_v47, %v11249_v34  ;;  %4773 = vmatpush.bf16.msra.mxu0 %v7802_v45 }
 0x728   :  { %v11294_v41 = vadd.f32 %v11244_v7, %v4606_v60 }
 0x729   :  { %8213 = vmatmul.msk.bf16.gmra.mxu0 %vm2582_vm0, %v13299_v37  ;;  %4558 = vmatmul.bf16.gmra.mxu1 %v13300_v8  ;;  %v5269_v29 = vmul.f32 0.2, %v4431_v57  ;;  %vm5141_vm13 = vcmp.gt.f32.partialorder %v4431_v57, 0.0 }
 0x72a   :  { %4647 = vmatmul.bf16.gmra.mxu2 %v13301_v23  ;;  %v11301_v27 = vpop.f32.mrf.mxu3  ;;  %v8626_v23 = vld [vmem:[#allocation3 + $0x42c] sm:$0xf] }
 0x72b   :  { %v7930_v0 = vor.u32 %v8626_v23, %v7927_v28  ;;  %v5397_v19 = vsel %vm5141_vm13, %v4431_v57, %v5269_v29  ;;  %v13303_v28 = vld [vmem:[#allocation189_spill] sm:$0xff] }
 0x72d   :  { %v4608_v4 = vpop.f32.mrf.mxu2  ;;  %4862 = vmatpush.bf16.msra.mxu1 %v7930_v0 }
 0x72e   :  { %v4609_v7 = vadd.f32 %v4608_v4, %v4520_v25  ;;  %v4432_v50 = vpop.f32.mrf.mxu0  ;;  %v4521_v60 = vpop.f32.mrf.mxu1  ;;  %4756 = vmatmul.bf16.gmra.mxu3 %v13254_v44  ;;  %v13304_v44 = vld [vmem:[#allocation72_spill] sm:$0xff] }
 0x72f   :  { %v4433_v8 = vadd.f32 %v4432_v50, %v11101_v15  ;;  %v4522_v9 = vadd.f32 %v4521_v60, %v11249_v34  ;;  %v13305_v60 = vld [vmem:[#allocation73_spill] sm:$0xff] }
 0x730   :  { %v11305_v47 = vadd.f32 %v11259_v22, %v4609_v7 }
 0x731   :  { %vm5145_vm14 = vcmp.gt.f32.partialorder %v4433_v8, 0.0  ;;  %v5273_v17 = vmul.f32 0.2, %v4433_v8 }
 0x732   :  { %v11311_v15 = vpop.f32.mrf.mxu3 }
 0x733   :  { %v5401_v25 = vsel %vm5145_vm14, %v4433_v8, %v5273_v17 }
 0x734   :  { %v11309_v58 = vpack.c.bf16 %v5401_v25, %v5397_v19 }
 0x735   :  { %v4610_v45 = vpop.f32.mrf.mxu2 }
 0x736   :  { %13302 = vst [vmem:[#allocation82_spill] sm:$0xff] %v11309_v58  ;;  %v4611_v4 = vadd.f32 %v4610_v45, %v4522_v9  ;;  %v4435_v22 = vpop.f32.mrf.mxu0  ;;  %v4524_v7 = vpop.f32.mrf.mxu1  ;;  %v8720_v58 = vld [vmem:[#allocation5 + $0xf4] sm:$0xf0] }
 0x737   :  { %v4436_v50 = vadd.f32 %v4435_v22, %v11107_v16  ;;  %v4525_v57 = vadd.f32 %v4524_v7, %v11249_v34 }
 0x738   :  { %v11315_v11 = vadd.f32 %v11269_v18, %v4611_v4 }
 0x739   :  { %8214 = vmatmul.msk.bf16.gmra.mxu0 %vm2582_vm0, %v13303_v28  ;;  %4563 = vmatmul.bf16.gmra.mxu1 %v13304_v44  ;;  %v5277_v19 = vmul.f32 0.2, %v4436_v50  ;;  %vm5149_vm15 = vcmp.gt.f32.partialorder %v4436_v50, 0.0 }
 0x73a   :  { %4652 = vmatmul.bf16.gmra.mxu2 %v13305_v60  ;;  %v11322_v8 = vpop.f32.mrf.mxu3 }
 0x73b   :  { %v5405_v9 = vsel %vm5149_vm15, %v4436_v50, %v5277_v19  ;;  %v8039_v19 = vld [vmem:[#allocation3 + $0x518] sm:$0xf0] }
 0x73d   :  { %v4613_v29 = vpop.f32.mrf.mxu2 }
 0x73e   :  { %v4614_v23 = vadd.f32 %v4613_v29, %v4525_v57  ;;  %v4437_v17 = vpop.f32.mrf.mxu0  ;;  %v4526_v0 = vpop.f32.mrf.mxu1  ;;  %4761 = vmatmul.bf16.gmra.mxu3 %v13257_v14  ;;  %v13308_v14 = vld [vmem:[#allocation80_spill] sm:$0xff] }
 0x73f   :  { %v4438_v16 = vadd.f32 %v4437_v17, %v11111_v56  ;;  %v4527_v4 = vadd.f32 %v4526_v0, %v11249_v34  ;;  %v13309_v17 = vld [vmem:[#allocation81_spill] sm:$0xff]  ;;  %v8654_v0 = vld [vmem:[#allocation3 + $0x50c] sm:$0xf] }
 0x740   :  { %v11326_v18 = vadd.f32 %v11280_v59, %v4614_v23  ;;  %v13307_v23 = vld [vmem:[#allocation198_spill] sm:$0xff] }
 0x741   :  { %vm5153_vm1 = vcmp.gt.f32.partialorder %v4438_v16, 0.0  ;;  %v5281_v25 = vmul.f32 0.2, %v4438_v16 }
 0x742   :  { %v11332_v44 = vpop.f32.mrf.mxu3 }
 0x743   :  { %v5409_v45 = vsel %vm5153_vm1, %v4438_v16, %v5281_v25  ;;  %v8590_v16 = vld [vmem:[#allocation3 + $0x30c] sm:$0xf]  ;;  %v8042_v25 = vor.u32 %v8654_v0, %v8039_v19 }
 0x744   :  { %v11330_v22 = vpack.c.bf16 %v5409_v45, %v5405_v9  ;;  %v7783_v9 = vld [vmem:[#allocation3 + $0x318] sm:$0xf0] }
 0x745   :  { %v4615_v7 = vpop.f32.mrf.mxu2  ;;  %v7786_v45 = vor.u32 %v8590_v16, %v7783_v9  ;;  %4952 = vmatpush.bf16.msra.mxu2 %v8042_v25 }
 0x746   :  { %13306 = vst [vmem:[#allocation90_spill] sm:$0xff] %v11330_v22  ;;  %v4616_v57 = vadd.f32 %v4615_v7, %v4527_v4  ;;  %v4440_v60 = vpop.f32.mrf.mxu0  ;;  %v4529_v56 = vpop.f32.mrf.mxu1  ;;  %v7911_v22 = vld [vmem:[#allocation3 + $0x418] sm:$0xf0] }
 0x747   :  { %v4441_v29 = vadd.f32 %v4440_v60, %v11117_v21  ;;  %v4530_v50 = vadd.f32 %v4529_v56, %v11249_v34  ;;  %4774 = vmatpush.bf16.msra.mxu0 %v7786_v45 }
 0x748   :  { %v11336_v59 = vadd.f32 %v11290_v46, %v4616_v57 }
 0x749   :  { %8215 = vmatmul.msk.bf16.gmra.mxu0 %vm2582_vm0, %v13307_v23  ;;  %4568 = vmatmul.bf16.gmra.mxu1 %v13308_v14  ;;  %v5285_v60 = vmul.f32 0.2, %v4441_v29  ;;  %vm5157_vm2 = vcmp.gt.f32.partialorder %v4441_v29, 0.0 }
 0x74a   :  { %4657 = vmatmul.bf16.gmra.mxu2 %v13309_v17  ;;  %v11343_v21 = vpop.f32.mrf.mxu3  ;;  %v8622_v17 = vld [vmem:[#allocation3 + $0x40c] sm:$0xf] }
 0x74b   :  { %v7914_v19 = vor.u32 %v8622_v17, %v7911_v22  ;;  %v13311_v17 = vld [vmem:[#allocation207_spill] sm:$0xff] }
 0x74d   :  { %v4618_v4 = vpop.f32.mrf.mxu2  ;;  %4863 = vmatpush.bf16.msra.mxu1 %v7914_v19 }
 0x74e   :  { %v4619_v46 = vadd.f32 %v4618_v4, %v4530_v50  ;;  %v4442_v7 = vpop.f32.mrf.mxu0  ;;  %v4531_v57 = vpop.f32.mrf.mxu1  ;;  %8219 = vmatmul.msk.bf16.vlgmr.msra.gmra.mxu3 %vm2582_vm0, %v13261_v12  ;;  %v5413_v50 = vsel %vm5157_vm2, %v4441_v29, %v5285_v60  ;;  %v13312_v12 = vld [vmem:[#allocation88_spill] sm:$0xff] }
 0x74f   :  { %v4443_v14 = vadd.f32 %v4442_v7, %v11121_v20  ;;  %v4532_v25 = vadd.f32 %v4531_v57, %v11249_v34  ;;  %v13313_v57 = vld [vmem:[#allocation89_spill] sm:$0xff] }
 0x750   :  { %v11347_v56 = vadd.f32 %v11301_v27, %v4619_v46 }
 0x751   :  { %vm5161_vm3 = vcmp.gt.f32.partialorder %v4443_v14, 0.0  ;;  %v5289_v0 = vmul.f32 0.2, %v4443_v14 }
 0x752   :  { %v11354_v45 = vpop.f32.mrf.mxu3 }
 0x753   :  { %v5417_v16 = vsel %vm5161_vm3, %v4443_v14, %v5289_v0 }
 0x754   :  { %v11352_v9 = vpack.c.bf16 %v5417_v16, %v5413_v50 }
 0x755   :  { %v4620_v20 = vpop.f32.mrf.mxu2 }
 0x756   :  { %13310 = vst [vmem:[#allocation98_spill] sm:$0xff] %v11352_v9  ;;  %v4621_v27 = vadd.f32 %v4620_v20, %v4532_v25  ;;  %v4445_v4 = vpop.f32.mrf.mxu0  ;;  %v4534_v46 = vpop.f32.mrf.mxu1 }
 0x757   :  { %v4446_v7 = vadd.f32 %v4445_v4, %v11127_v38  ;;  %v4535_v29 = vadd.f32 %v4534_v46, %v11249_v34 }
 0x758   :  { %v11358_v22 = vadd.f32 %v11311_v15, %v4621_v27 }
 0x759   :  { %8216 = vmatmul.msk.bf16.gmra.mxu0 %vm2582_vm0, %v13311_v17  ;;  %4573 = vmatmul.bf16.gmra.mxu1 %v13312_v12  ;;  %v5293_v16 = vmul.f32 0.2, %v4446_v7  ;;  %vm5165_vm4 = vcmp.gt.f32.partialorder %v4446_v7, 0.0 }
 0x75a   :  { %4662 = vmatmul.bf16.gmra.mxu2 %v13313_v57  ;;  %v11365_v14 = vpop.f32.mrf.mxu3 }
 0x75b   :  { %v5421_v20 = vsel %vm5165_vm4, %v4446_v7, %v5293_v16  ;;  %v8421_v16 = vld [vmem:[#allocation5 + $0x170] sm:$0xf] }
 0x75d   :  { %v4623_v60 = vpop.f32.mrf.mxu2 }
 0x75e   :  { %v4624_v0 = vadd.f32 %v4623_v60, %v4535_v29  ;;  %v4447_v19 = vpop.f32.mrf.mxu0  ;;  %v4536_v50 = vpop.f32.mrf.mxu1  ;;  %8220 = vmatmul.msk.bf16.gmra.mxu3 %vm2582_vm0, %v13264_v2  ;;  %v13316_v2 = vld [vmem:[#allocation96_spill] sm:$0xff] }
 0x75f   :  { %v4448_v38 = vadd.f32 %v4447_v19, %v11131_v32  ;;  %v4537_v4 = vadd.f32 %v4536_v50, %v11249_v34  ;;  %v13315_v19 = vld [vmem:[#allocation215_spill] sm:$0xff]  ;;  %v13317_v50 = vld [vmem:[#allocation97_spill] sm:$0xff] }
 0x760   :  { %v11369_v15 = vadd.f32 %v11322_v8, %v4624_v0 }
 0x761   :  { %vm5169_vm5 = vcmp.gt.f32.partialorder %v4448_v38, 0.0  ;;  %v5297_v25 = vmul.f32 0.2, %v4448_v38 }
 0x762   :  { %v11376_v29 = vpop.f32.mrf.mxu3 }
 0x763   :  { %v5425_v27 = vsel %vm5169_vm5, %v4448_v38, %v5297_v25  ;;  %v8736_v38 = vld [vmem:[#allocation5 + $0x174] sm:$0xf0]  ;;  %v8293_v25 = vld [vmem:[#allocation5 + $0x70] sm:$0xf] }
 0x764   :  { %v11374_v46 = vpack.c.bf16 %v5425_v27, %v5421_v20  ;;  %v8422_v20 = vor.u32 %v8736_v38, %v8421_v16  ;;  %v8704_v27 = vld [vmem:[#allocation5 + $0x74] sm:$0xf0]  ;;  %v8357_v38 = vld [vmem:[#allocation5 + $0xf0] sm:$0xf] }
 0x765   :  { %v4625_v12 = vpop.f32.mrf.mxu2 }
 0x766   :  { %13314 = vst [vmem:[#allocation108_spill] sm:$0xff] %v11374_v46  ;;  %v4626_v57 = vadd.f32 %v4625_v12, %v4537_v4  ;;  %v4450_v32 = vpop.f32.mrf.mxu0  ;;  %v4539_v60 = vpop.f32.mrf.mxu1  ;;  %v8485_v4 = vld [vmem:[#allocation5 + $0x1f0] sm:$0xf]  ;;  %v8752_v12 = vld [vmem:[#allocation5 + $0x1f4] sm:$0xf0]  ;;  %6139 = vmatpush.bf16.msrb.mxu2 %v8422_v20 }
 0x767   :  { %v4451_v8 = vadd.f32 %v4450_v32, %v11137_v61  ;;  %v4540_v7 = vadd.f32 %v4539_v60, %v11249_v34  ;;  %v8294_v61 = vor.u32 %v8704_v27, %v8293_v25  ;;  %v8486_v32 = vor.u32 %v8752_v12, %v8485_v4 }
 0x768   :  { %v11380_v0 = vadd.f32 %v11332_v44, %v4626_v57  ;;  %v8358_v27 = vor.u32 %v8720_v58, %v8357_v38 }
 0x769   :  { %8217 = vmatmul.msk.bf16.gmra.mxu0 %vm2582_vm0, %v13315_v19  ;;  %4578 = vmatmul.bf16.gmra.mxu1 %v13316_v2  ;;  %v5301_v60 = vmul.f32 0.2, %v4451_v8  ;;  %vm5173_vm6 = vcmp.gt.f32.partialorder %v4451_v8, 0.0 }
 0x76a   :  { %4667 = vmatmul.bf16.gmra.mxu2 %v13317_v50  ;;  %v11387_v57 = vpop.f32.mrf.mxu3  ;;  %5961 = vmatpush.bf16.msrb.mxu0 %v8294_v61 }
 0x76b   :  { %6228 = vmatpush.bf16.msrb.mxu3 %v8486_v32  ;;  %6050 = vmatpush.bf16.msrb.mxu1 %v8358_v27 }
 0x76d   :  { %v4628_v44 = vpop.f32.mrf.mxu2 }
 0x76e   :  { %v4629_v46 = vadd.f32 %v4628_v44, %v4540_v7  ;;  %v4452_v9 = vpop.f32.mrf.mxu0  ;;  %v4541_v2 = vpop.f32.mrf.mxu1  ;;  %8221 = vmatmul.msk.bf16.gmra.mxu3 %vm2582_vm0, %v13267_v48  ;;  %v5429_v7 = vsel %vm5173_vm6, %v4451_v8, %v5301_v60  ;;  %v13319_v44 = vld [vmem:[#allocation225_spill] sm:$0xff]  ;;  %v13320_v48 = vld [vmem:[#allocation106_spill] sm:$0xff] }
 0x76f   :  { %v4453_v50 = vadd.f32 %v4452_v9, %v11141_v24  ;;  %v4542_v4 = vadd.f32 %v4541_v2, %v11249_v34  ;;  %v13321_v2 = vld [vmem:[#allocation107_spill] sm:$0xff] }
 0x770   :  { %v11391_v16 = vadd.f32 %v11343_v21, %v4629_v46 }
 0x771   :  { %vm5177_vm7 = vcmp.gt.f32.partialorder %v4453_v50, 0.0  ;;  %v5305_v25 = vmul.f32 0.2, %v4453_v50 }
 0x772   :  { %v11398_v9 = vpop.f32.mrf.mxu3 }
 0x773   :  { %v5433_v20 = vsel %vm5177_vm7, %v4453_v50, %v5305_v25 }
 0x774   :  { %v11396_v12 = vpack.c.bf16 %v5433_v20, %v5429_v7 }
 0x775   :  { %v4630_v24 = vpop.f32.mrf.mxu2 }
 0x776   :  { %13318 = vst [vmem:[#allocation149_spill] sm:$0xff] %v11396_v12  ;;  %v4631_v21 = vadd.f32 %v4630_v24, %v4542_v4  ;;  %v4455_v46 = vpop.f32.mrf.mxu0  ;;  %v4544_v61 = vpop.f32.mrf.mxu1 }
 0x777   :  { %v4456_v32 = vadd.f32 %v4455_v46, %v11147_v31  ;;  %v4545_v8 = vadd.f32 %v4544_v61, %v11249_v34 }
 0x778   :  { %v11402_v58 = vadd.f32 %v11354_v45, %v4631_v21 }
 0x779   :  { %8218 = vmatmul.msk.bf16.gmra.mxu0 %vm2582_vm0, %v13319_v44  ;;  %4583 = vmatmul.bf16.gmra.mxu1 %v13320_v48  ;;  %v5309_v7 = vmul.f32 0.2, %v4456_v32  ;;  %vm5181_vm8 = vcmp.gt.f32.partialorder %v4456_v32, 0.0 }
 0x77a   :  { %4672 = vmatmul.bf16.gmra.mxu2 %v13321_v2  ;;  %v11409_v50 = vpop.f32.mrf.mxu3 }
 0x77b   :  { %v5437_v4 = vsel %vm5181_vm8, %v4456_v32, %v5309_v7  ;;  %v8734_v7 = vld [vmem:[#allocation5 + $0x164] sm:$0xf0] }
 0x77d   :  { %v4633_v60 = vpop.f32.mrf.mxu2 }
 0x77e   :  { %v4634_v38 = vadd.f32 %v4633_v60, %v4545_v8  ;;  %v4457_v25 = vpop.f32.mrf.mxu0  ;;  %v4546_v27 = vpop.f32.mrf.mxu1  ;;  %8222 = vmatmul.msk.bf16.gmra.mxu3 %vm2582_vm0, %v13270_v5  ;;  %v13324_v5 = vld [vmem:[#allocation114_spill] sm:$0xff] }
 0x77f   :  { %v4458_v31 = vadd.f32 %v4457_v25, %v11151_v63  ;;  %v4547_v21 = vadd.f32 %v4546_v27, %v11249_v34  ;;  %v13325_v25 = vld [vmem:[#allocation115_spill] sm:$0xff]  ;;  %v8413_v27 = vld [vmem:[#allocation5 + $0x160] sm:$0xf] }
 0x780   :  { %v11413_v45 = vadd.f32 %v11365_v14, %v4634_v38  ;;  %v13323_v38 = vld [vmem:[#allocation12_spill] sm:$0xff] }
 0x781   :  { %vm5185_vm9 = vcmp.gt.f32.partialorder %v4458_v31, 0.0  ;;  %v5313_v20 = vmul.f32 0.2, %v4458_v31 }
 0x782   :  { %v11420_v48 = vpop.f32.mrf.mxu3 }
 0x783   :  { %v5441_v24 = vsel %vm5185_vm9, %v4458_v31, %v5313_v20  ;;  %v8285_v31 = vld [vmem:[#allocation5 + $0x60] sm:$0xf]  ;;  %v8414_v20 = vor.u32 %v8734_v7, %v8413_v27 }
 0x784   :  { %v11418_v46 = vpack.c.bf16 %v5441_v24, %v5437_v4  ;;  %v8702_v4 = vld [vmem:[#allocation5 + $0x64] sm:$0xf0]  ;;  %v8477_v24 = vld [vmem:[#allocation5 + $0x1e0] sm:$0xf] }
 0x785   :  { %v4635_v61 = vpop.f32.mrf.mxu2  ;;  %6140 = vmatpush.bf16.msrb.mxu2 %v8414_v20  ;;  %v8349_v7 = vld [vmem:[#allocation5 + $0xe0] sm:$0xf] }
 0x786   :  { %13322 = vst [vmem:[#allocation116_spill] sm:$0xff] %v11418_v46  ;;  %v4636_v8 = vadd.f32 %v4635_v61, %v4547_v21  ;;  %v4460_v63 = vpop.f32.mrf.mxu0  ;;  %v4549_v2 = vpop.f32.mrf.mxu1  ;;  %v8750_v21 = vld [vmem:[#allocation5 + $0x1e4] sm:$0xf0]  ;;  %v8286_v61 = vor.u32 %v8702_v4, %v8285_v31 }
 0x787   :  { %v4461_v14 = vadd.f32 %v4460_v63, %v11158_v3  ;;  %v4550_v32 = vadd.f32 %v4549_v2, %v11249_v34  ;;  %v8478_v3 = vor.u32 %v8750_v21, %v8477_v24  ;;  %v8718_v46 = vld [vmem:[#allocation5 + $0xe4] sm:$0xf0] }
 0x788   :  { %v11424_v60 = vadd.f32 %v11376_v29, %v4636_v8  ;;  %5962 = vmatpush.bf16.msrb.mxu0 %v8286_v61  ;;  %v8350_v4 = vor.u32 %v8718_v46, %v8349_v7 }
 0x789   :  { %4775 = vmatmul.bf16.vlgmr.msra.gmra.mxu0 %v13323_v38  ;;  %4864 = vmatmul.bf16.vlgmr.msra.gmra.mxu1 %v13324_v5  ;;  %v5317_v2 = vmul.f32 0.2, %v4461_v14  ;;  %vm5189_vm10 = vcmp.gt.f32.partialorder %v4461_v14, 0.0 }
 0x78a   :  { %4953 = vmatmul.bf16.vlgmr.msra.gmra.mxu2 %v13325_v25  ;;  %v11430_v29 = vpop.f32.mrf.mxu3  ;;  %6229 = vmatpush.bf16.msrb.mxu3 %v8478_v3 }
 0x78b   :  { %6051 = vmatpush.bf16.msrb.mxu1 %v8350_v4 }
 0x78d   :  { %v4638_v63 = vpop.f32.mrf.mxu2 }
 0x78e   :  { %v4639_v8 = vadd.f32 %v4638_v63, %v4550_v32  ;;  %v4462_v38 = vpop.f32.mrf.mxu0  ;;  %v4551_v5 = vpop.f32.mrf.mxu1  ;;  %8223 = vmatmul.msk.bf16.gmra.mxu3 %vm2582_vm0, %v13276_v52  ;;  %v5445_v32 = vsel %vm5189_vm10, %v4461_v14, %v5317_v2  ;;  %v13328_v52 = vld [vmem:[#allocation119_spill] sm:$0xff] }
 0x78f   :  { %v4463_v25 = vadd.f32 %v4462_v38, %v11162_v51  ;;  %v4552_v24 = vadd.f32 %v4551_v5, %v11249_v34  ;;  %v13327_v38 = vld [vmem:[#allocation16_spill] sm:$0xff] }
 0x790   :  { %v11434_v27 = vadd.f32 %v11387_v57, %v4639_v8  ;;  %v13329_v5 = vld [vmem:[#allocation120_spill] sm:$0xff] }
 0x791   :  { %vm5193_vm11 = vcmp.gt.f32.partialorder %v4463_v25, 0.0  ;;  %v5321_v31 = vmul.f32 0.2, %v4463_v25 }
 0x792   :  { %v11441_v61 = vpop.f32.mrf.mxu3 }
 0x793   :  { %v5449_v20 = vsel %vm5193_vm11, %v4463_v25, %v5321_v31 }
 0x794   :  { %v11439_v21 = vpack.c.bf16 %v5449_v20, %v5445_v32 }
 0x795   :  { %v4640_v51 = vpop.f32.mrf.mxu2 }
 0x796   :  { %13326 = vst [vmem:[#allocation9_spill] sm:$0xff] %v11439_v21  ;;  %v4641_v57 = vadd.f32 %v4640_v51, %v4552_v24  ;;  %v4465_v3 = vpop.f32.mrf.mxu0  ;;  %v4554_v63 = vpop.f32.mrf.mxu1 }
 0x797   :  { %v4466_v8 = vadd.f32 %v4465_v3, %v11169_v13  ;;  %v4555_v14 = vadd.f32 %v4554_v63, %v11249_v34 }
 0x798   :  { %v11445_v46 = vadd.f32 %v11398_v9, %v4641_v57 }
 0x799   :  { %4780 = vmatmul.bf16.gmra.mxu0 %v13327_v38  ;;  %4869 = vmatmul.bf16.gmra.mxu1 %v13328_v52  ;;  %v5325_v32 = vmul.f32 0.2, %v4466_v8  ;;  %vm5197_vm12 = vcmp.gt.f32.partialorder %v4466_v8, 0.0 }
 0x79a   :  { %4958 = vmatmul.bf16.gmra.mxu2 %v13329_v5  ;;  %v11451_v25 = vpop.f32.mrf.mxu3 }
 0x79b   :  { %v5453_v24 = vsel %vm5197_vm12, %v4466_v8, %v5325_v32  ;;  %v8277_v32 = vld [vmem:[#allocation5 + $0x50] sm:$0xf] }
 0x79d   :  { %v4643_v2 = vpop.f32.mrf.mxu2 }
 0x79e   :  { %v4644_v7 = vadd.f32 %v4643_v2, %v4555_v14  ;;  %v4467_v31 = vpop.f32.mrf.mxu0  ;;  %v4556_v4 = vpop.f32.mrf.mxu1  ;;  %8224 = vmatmul.msk.bf16.gmra.mxu3 %vm2582_vm0, %v13280_v33  ;;  %v13330_v2 = vld [vmem:[#allocation20_spill] sm:$0xff]  ;;  %v13331_v33 = vld [vmem:[#allocation125_spill] sm:$0xff] }
 0x79f   :  { %v4468_v13 = vadd.f32 %v4467_v31, %v11173_v35  ;;  %v4557_v57 = vadd.f32 %v4556_v4, %v11249_v34  ;;  %v8405_v31 = vld [vmem:[#allocation5 + $0x150] sm:$0xf]  ;;  %v8732_v4 = vld [vmem:[#allocation5 + $0x154] sm:$0xf0] }
 0x7a0   :  { %v11455_v9 = vadd.f32 %v11409_v50, %v4644_v7  ;;  %v13332_v7 = vld [vmem:[#allocation126_spill] sm:$0xff] }
 0x7a1   :  { %vm5201_vm13 = vcmp.gt.f32.partialorder %v4468_v13, 0.0  ;;  %v5329_v20 = vmul.f32 0.2, %v4468_v13 }
 0x7a2   :  { %v11462_v38 = vpop.f32.mrf.mxu3 }
 0x7a3   :  { %v5457_v51 = vsel %vm5201_vm13, %v4468_v13, %v5329_v20  ;;  %v8406_v13 = vor.u32 %v8732_v4, %v8405_v31  ;;  %v8700_v20 = vld [vmem:[#allocation5 + $0x54] sm:$0xf0]  ;;  %v8341_v31 = vld [vmem:[#allocation5 + $0xd0] sm:$0xf] }
 0x7a4   :  { %v11460_v3 = vpack.c.bf16 %v5457_v51, %v5453_v24  ;;  %v8469_v24 = vld [vmem:[#allocation5 + $0x1d0] sm:$0xf]  ;;  %v8748_v51 = vld [vmem:[#allocation5 + $0x1d4] sm:$0xf0] }
 0x7a5   :  { %v4645_v63 = vpop.f32.mrf.mxu2  ;;  %6141 = vmatpush.bf16.msrb.mxu2 %v8406_v13  ;;  %v8716_v4 = vld [vmem:[#allocation5 + $0xd4] sm:$0xf0] }
 0x7a6   :  { %v4646_v52 = vadd.f32 %v4645_v63, %v4557_v57  ;;  %v4470_v35 = vpop.f32.mrf.mxu0  ;;  %v4559_v14 = vpop.f32.mrf.mxu1  ;;  %v8278_v57 = vor.u32 %v8700_v20, %v8277_v32  ;;  %v8342_v20 = vor.u32 %v8716_v4, %v8341_v31  ;;  %v13335_v4 = vld [vmem:[#allocation24_spill] sm:$0xff] }
 0x7a7   :  { %v4471_v50 = vadd.f32 %v4470_v35, %v11180_v1  ;;  %v4560_v8 = vadd.f32 %v4559_v14, %v11249_v34  ;;  %v8470_v1 = vor.u32 %v8748_v51, %v8469_v24 }
 0x7a8   :  { %v11466_v5 = vadd.f32 %v11420_v48, %v4646_v52  ;;  %5963 = vmatpush.bf16.msrb.mxu0 %v8278_v57  ;;  %6052 = vmatpush.bf16.msrb.mxu1 %v8342_v20 }
 0x7a9   :  { %4785 = vmatmul.bf16.gmra.mxu0 %v13330_v2  ;;  %4874 = vmatmul.bf16.gmra.mxu1 %v13331_v33  ;;  %v5333_v14 = vmul.f32 0.2, %v4471_v50  ;;  %vm5205_vm14 = vcmp.gt.f32.partialorder %v4471_v50, 0.0 }
 0x7aa   :  { %4963 = vmatmul.bf16.gmra.mxu2 %v13332_v7  ;;  %v11472_v48 = vpop.f32.mrf.mxu3  ;;  %6230 = vmatpush.bf16.msrb.mxu3 %v8470_v1 }
 0x7ad   :  { %v4648_v63 = vpop.f32.mrf.mxu2 }
 0x7ae   :  { %v4649_v52 = vadd.f32 %v4648_v63, %v4560_v8  ;;  %v4472_v35 = vpop.f32.mrf.mxu0  ;;  %v4561_v2 = vpop.f32.mrf.mxu1  ;;  %8225 = vmatmul.msk.bf16.gmra.mxu3 %vm2582_vm0, %v13283_v42  ;;  %v5461_v8 = vsel %vm5205_vm14, %v4471_v50, %v5333_v14  ;;  %v13336_v42 = vld [vmem:[#allocation131_spill] sm:$0xff] }
 0x7af   :  { %v4473_v33 = vadd.f32 %v4472_v35, %v11184_v30  ;;  %v4562_v24 = vadd.f32 %v4561_v2, %v11249_v34  ;;  %v13337_v2 = vld [vmem:[#allocation132_spill] sm:$0xff] }
 0x7b0   :  { %v11476_v7 = vadd.f32 %v11430_v29, %v4649_v52  ;;  %v13334_v52 = vld [vmem:[#allocation36_spill] sm:$0xff] }
 0x7b1   :  { %vm5209_vm15 = vcmp.gt.f32.partialorder %v4473_v33, 0.0  ;;  %v5337_v32 = vmul.f32 0.2, %v4473_v33 }
 0x7b2   :  { %v11483_v57 = vpop.f32.mrf.mxu3 }
 0x7b3   :  { %v5465_v13 = vsel %vm5209_vm15, %v4473_v33, %v5337_v32 }
 0x7b4   :  { %v11481_v51 = vpack.c.bf16 %v5465_v13, %v5461_v8 }
 0x7b5   :  { %v4650_v30 = vpop.f32.mrf.mxu2 }
 0x7b6   :  { %13333 = vst [vmem:[#allocation10_spill] sm:$0xff] %v11481_v51  ;;  %v4651_v29 = vadd.f32 %v4650_v30, %v4562_v24  ;;  %v4475_v1 = vpop.f32.mrf.mxu0  ;;  %v4564_v63 = vpop.f32.mrf.mxu1  ;;  %v13338_v24 = vld [vmem:[#allocation42_spill] sm:$0xff] }
 0x7b7   :  { %v4476_v35 = vadd.f32 %v4475_v1, %v13334_v52  ;;  %v4565_v50 = vadd.f32 %v4564_v63, %v11249_v34  ;;  %v8714_v51 = vld [vmem:[#allocation5 + $0xc4] sm:$0xf0] }
 0x7b8   :  { %v11487_v31 = vadd.f32 %v11441_v61, %v4651_v29 }
 0x7b9   :  { %4790 = vmatmul.bf16.gmra.mxu0 %v13335_v4  ;;  %4879 = vmatmul.bf16.gmra.mxu1 %v13336_v42  ;;  %v5341_v13 = vmul.f32 0.2, %v4476_v35  ;;  %vm5213_vm1 = vcmp.gt.f32.partialorder %v4476_v35, 0.0 }
 0x7ba   :  { %4968 = vmatmul.bf16.gmra.mxu2 %v13337_v2  ;;  %v11493_v33 = vpop.f32.mrf.mxu3 }
 0x7bb   :  { %v5469_v1 = vsel %vm5213_vm1, %v4476_v35, %v5341_v13  ;;  %v8397_v13 = vld [vmem:[#allocation5 + $0x140] sm:$0xf] }
 0x7bd   :  { %v4653_v14 = vpop.f32.mrf.mxu2 }
 0x7be   :  { %v4654_v32 = vadd.f32 %v4653_v14, %v4565_v50  ;;  %v4477_v20 = vpop.f32.mrf.mxu0  ;;  %v4566_v8 = vpop.f32.mrf.mxu1  ;;  %8226 = vmatmul.msk.bf16.gmra.mxu3 %vm2582_vm0, %v13286_v6  ;;  %v13341_v6 = vld [vmem:[#allocation138_spill] sm:$0xff] }
 0x7bf   :  { %v4478_v30 = vadd.f32 %v4477_v20, %v13338_v24  ;;  %v4567_v52 = vadd.f32 %v4566_v8, %v11249_v34  ;;  %v13340_v24 = vld [vmem:[#allocation28_spill] sm:$0xff]  ;;  %v13342_v8 = vld [vmem:[#allocation139_spill] sm:$0xff] }
 0x7c0   :  { %v11497_v61 = vadd.f32 %v11451_v25, %v4654_v32 }
 0x7c1   :  { %vm5217_vm2 = vcmp.gt.f32.partialorder %v4478_v30, 0.0  ;;  %v5345_v29 = vmul.f32 0.2, %v4478_v30 }
 0x7c2   :  { %v11504_v50 = vpop.f32.mrf.mxu3 }
 0x7c3   :  { %v5473_v63 = vsel %vm5217_vm2, %v4478_v30, %v5345_v29  ;;  %v8730_v30 = vld [vmem:[#allocation5 + $0x144] sm:$0xf0]  ;;  %v8269_v29 = vld [vmem:[#allocation5 + $0x40] sm:$0xf] }
 0x7c4   :  { %v11502_v4 = vpack.c.bf16 %v5473_v63, %v5469_v1  ;;  %v8398_v1 = vor.u32 %v8730_v30, %v8397_v13  ;;  %v8698_v63 = vld [vmem:[#allocation5 + $0x44] sm:$0xf0]  ;;  %v8333_v30 = vld [vmem:[#allocation5 + $0xc0] sm:$0xf] }
 0x7c5   :  { %v4655_v42 = vpop.f32.mrf.mxu2 }
 0x7c6   :  { %13339 = vst [vmem:[#allocation122_spill] sm:$0xff] %v11502_v4  ;;  %v4656_v2 = vadd.f32 %v4655_v42, %v4567_v52  ;;  %v4480_v14 = vpop.f32.mrf.mxu0  ;;  %v4569_v20 = vpop.f32.mrf.mxu1  ;;  %v8461_v52 = vld [vmem:[#allocation5 + $0x1c0] sm:$0xf]  ;;  %v8746_v42 = vld [vmem:[#allocation5 + $0x1c4] sm:$0xf0]  ;;  %v8270_v4 = vor.u32 %v8698_v63, %v8269_v29  ;;  %6142 = vmatpush.bf16.msrb.mxu2 %v8398_v1  ;;  %v8334_v63 = vor.u32 %v8714_v51, %v8333_v30 }
 0x7c7   :  { %v4481_v25 = vadd.f32 %v4480_v14, %v11202_v40  ;;  %v4570_v35 = vadd.f32 %v4569_v20, %v11249_v34  ;;  %v8462_v40 = vor.u32 %v8746_v42, %v8461_v52 }
 0x7c8   :  { %v11508_v32 = vadd.f32 %v11462_v38, %v4656_v2  ;;  %5964 = vmatpush.bf16.msrb.mxu0 %v8270_v4  ;;  %6053 = vmatpush.bf16.msrb.mxu1 %v8334_v63 }
 0x7c9   :  { %4795 = vmatmul.bf16.gmra.mxu0 %v13340_v24  ;;  %4884 = vmatmul.bf16.gmra.mxu1 %v13341_v6  ;;  %v5349_v20 = vmul.f32 0.2, %v4481_v25  ;;  %vm5221_vm3 = vcmp.gt.f32.partialorder %v4481_v25, 0.0 }
 0x7ca   :  { %4973 = vmatmul.bf16.gmra.mxu2 %v13342_v8  ;;  %v11514_v38 = vpop.f32.mrf.mxu3  ;;  %6231 = vmatpush.bf16.msrb.mxu3 %v8462_v40 }
 0x7cd   :  { %v4658_v14 = vpop.f32.mrf.mxu2 }
 0x7ce   :  { %v4659_v2 = vadd.f32 %v4658_v14, %v4570_v35  ;;  %v4482_v24 = vpop.f32.mrf.mxu0  ;;  %v4571_v6 = vpop.f32.mrf.mxu1  ;;  %8227 = vmatmul.msk.bf16.gmra.mxu3 %vm2582_vm0, %v13290_v62  ;;  %v5477_v35 = vsel %vm5221_vm3, %v4481_v25, %v5349_v20  ;;  %v13344_v62 = vld [vmem:[#allocation144_spill] sm:$0xff] }
 0x7cf   :  { %v4483_v8 = vadd.f32 %v4482_v24, %v11206_v54  ;;  %v4572_v4 = vadd.f32 %v4571_v6, %v11249_v34  ;;  %v13343_v24 = vld [vmem:[#allocation32_spill] sm:$0xff]  ;;  %v13345_v6 = vld [vmem:[#allocation145_spill] sm:$0xff] }
 0x7d0   :  { %v11518_v13 = vadd.f32 %v11472_v48, %v4659_v2 }
 0x7d1   :  { %vm5225_vm4 = vcmp.gt.f32.partialorder %v4483_v8, 0.0  ;;  %v5353_v29 = vmul.f32 0.2, %v4483_v8 }
 0x7d2   :  { %v11525_v42 = vpop.f32.mrf.mxu3 }
 0x7d3   :  { %v5481_v1 = vsel %vm5225_vm4, %v4483_v8, %v5353_v29 }
 0x7d4   :  { %v11523_v52 = vpack.c.bf16 %v5481_v1, %v5477_v35 }
 0x7d5   :  { %v4660_v54 = vpop.f32.mrf.mxu2 }
 0x7d6   :  { %v4661_v48 = vadd.f32 %v4660_v54, %v4572_v4  ;;  %v4485_v40 = vpop.f32.mrf.mxu0  ;;  %v4574_v14 = vpop.f32.mrf.mxu1 }
 0x7d7   :  { %v4486_v2 = vadd.f32 %v4485_v40, %v11213_v39  ;;  %v4575_v25 = vadd.f32 %v4574_v14, %v11249_v34 }
 0x7d8   :  { %v11529_v51 = vadd.f32 %v11483_v57, %v4661_v48 }
 0x7d9   :  { %4800 = vmatmul.bf16.gmra.mxu0 %v13343_v24  ;;  %4889 = vmatmul.bf16.gmra.mxu1 %v13344_v62  ;;  %v5357_v35 = vmul.f32 0.2, %v4486_v2  ;;  %vm5229_vm5 = vcmp.gt.f32.partialorder %v4486_v2, 0.0 }
 0x7da   :  { %4978 = vmatmul.bf16.gmra.mxu2 %v13345_v6  ;;  %v11535_v8 = vpop.f32.mrf.mxu3 }
 0x7db   :  { %v5485_v4 = vsel %vm5229_vm5, %v4486_v2, %v5357_v35  ;;  %v8261_v35 = vld [vmem:[#allocation5 + $0x30] sm:$0xf] }
 0x7dd   :  { %v4663_v20 = vpop.f32.mrf.mxu2 }
 0x7de   :  { %v4664_v30 = vadd.f32 %v4663_v20, %v4575_v25  ;;  %v4487_v29 = vpop.f32.mrf.mxu0  ;;  %v4576_v63 = vpop.f32.mrf.mxu1  ;;  %8228 = vmatmul.msk.bf16.gmra.mxu3 %vm2582_vm0, %v13295_v49  ;;  %v13346_v20 = vld [vmem:[#allocation37_spill] sm:$0xff]  ;;  %v13347_v49 = vld [vmem:[#allocation150_spill] sm:$0xff] }
 0x7df   :  { %v4488_v39 = vadd.f32 %v4487_v29, %v11217_v43  ;;  %v4577_v48 = vadd.f32 %v4576_v63, %v11249_v34  ;;  %v8389_v29 = vld [vmem:[#allocation5 + $0x130] sm:$0xf]  ;;  %v8728_v63 = vld [vmem:[#allocation5 + $0x134] sm:$0xf0] }
 0x7e0   :  { %v11539_v57 = vadd.f32 %v11493_v33, %v4664_v30  ;;  %v13348_v30 = vld [vmem:[#allocation151_spill] sm:$0xff] }
 0x7e1   :  { %vm5233_vm6 = vcmp.gt.f32.partialorder %v4488_v39, 0.0  ;;  %v5361_v1 = vmul.f32 0.2, %v4488_v39 }
 0x7e2   :  { %v11546_v24 = vpop.f32.mrf.mxu3 }
 0x7e3   :  { %v5489_v54 = vsel %vm5233_vm6, %v4488_v39, %v5361_v1  ;;  %v8390_v39 = vor.u32 %v8728_v63, %v8389_v29  ;;  %v8696_v1 = vld [vmem:[#allocation5 + $0x34] sm:$0xf0] }
 0x7e4   :  { %v11544_v40 = vpack.c.bf16 %v5489_v54, %v5485_v4  ;;  %v8453_v4 = vld [vmem:[#allocation5 + $0x1b0] sm:$0xf]  ;;  %v8744_v54 = vld [vmem:[#allocation5 + $0x1b4] sm:$0xf0] }
 0x7e5   :  { %v4665_v14 = vpop.f32.mrf.mxu2  ;;  %6143 = vmatpush.bf16.msrb.mxu2 %v8390_v39  ;;  %v8325_v39 = vld [vmem:[#allocation5 + $0xb0] sm:$0xf] }
 0x7e6   :  { %v4666_v62 = vadd.f32 %v4665_v14, %v4577_v48  ;;  %v4490_v43 = vpop.f32.mrf.mxu0  ;;  %v4579_v25 = vpop.f32.mrf.mxu1  ;;  %v8262_v48 = vor.u32 %v8696_v1, %v8261_v35  ;;  %v8712_v1 = vld [vmem:[#allocation5 + $0xb4] sm:$0xf0] }
 0x7e7   :  { %v4491_v33 = vadd.f32 %v4490_v43, %v11226_v53  ;;  %v4580_v2 = vadd.f32 %v4579_v25, %v11249_v34  ;;  %v8454_v53 = vor.u32 %v8744_v54, %v8453_v4 }
 0x7e8   :  { %v11550_v6 = vadd.f32 %v11504_v50, %v4666_v62  ;;  %5965 = vmatpush.bf16.msrb.mxu0 %v8262_v48  ;;  %v8326_v48 = vor.u32 %v8712_v1, %v8325_v39 }
 0x7e9   :  { %4805 = vmatmul.bf16.gmra.mxu0 %v13346_v20  ;;  %4894 = vmatmul.bf16.gmra.mxu1 %v13347_v49  ;;  %v5365_v25 = vmul.f32 0.2, %v4491_v33  ;;  %vm5237_vm7 = vcmp.gt.f32.partialorder %v4491_v33, 0.0 }
 0x7ea   :  { %4983 = vmatmul.bf16.gmra.mxu2 %v13348_v30  ;;  %v11556_v50 = vpop.f32.mrf.mxu3  ;;  %6232 = vmatpush.bf16.msrb.mxu3 %v8454_v53 }
 0x7eb   :  { %v5493_v63 = vsel %vm5237_vm7, %v4491_v33, %v5365_v25  ;;  %6054 = vmatpush.bf16.msrb.mxu1 %v8326_v48  ;;  %v13349_v33 = vld [vmem:[#allocation43_spill] sm:$0xff]  ;;  %v13351_v25 = vld [vmem:[#allocation158_spill] sm:$0xff] }
 0x7ed   :  { %v4668_v14 = vpop.f32.mrf.mxu2 }
 0x7ee   :  { %v4669_v62 = vadd.f32 %v4668_v14, %v4580_v2  ;;  %v4492_v43 = vpop.f32.mrf.mxu0  ;;  %v4581_v20 = vpop.f32.mrf.mxu1  ;;  %8229 = vmatmul.msk.bf16.gmra.mxu3 %vm2582_vm0, %v13299_v37 }
 0x7ef   :  { %v4493_v49 = vadd.f32 %v4492_v43, %v11232_v55  ;;  %v4582_v2 = vadd.f32 %v4581_v20, %v11249_v34  ;;  %v13350_v43 = vld [vmem:[#allocation157_spill] sm:$0xff] }
 0x7f0   :  { %v11560_v30 = vadd.f32 %v11514_v38, %v4669_v62 }
 0x7f1   :  { %vm5241_vm8 = vcmp.gt.f32.partialorder %v4493_v49, 0.0  ;;  %v5369_v29 = vmul.f32 0.2, %v4493_v49 }
 0x7f2   :  { %v11567_v55 = vpop.f32.mrf.mxu3 }
 0x7f3   :  { %v5497_v35 = vsel %vm5241_vm8, %v4493_v49, %v5369_v29 }
 0x7f4   :  { %v11565_v4 = vpack.c.bf16 %v5497_v35, %v5493_v63 }
 0x7f5   :  { %v4670_v54 = vpop.f32.mrf.mxu2 }
 0x7f6   :  { %v4671_v53 = vadd.f32 %v4670_v54, %v4582_v2  ;;  %v4495_v38 = vpop.f32.mrf.mxu0  ;;  %v4584_v14 = vpop.f32.mrf.mxu1 }
 0x7f7   :  { %v4496_v62 = vadd.f32 %v4495_v38, %v11241_v36  ;;  %v4585_v20 = vadd.f32 %v4584_v14, %v11249_v34  ;;  %v13352_v36 = vld [vmem:[#allocation50_spill] sm:$0xff] }
 0x7f8   :  { %v11571_v37 = vadd.f32 %v11525_v42, %v4671_v53 }
 0x7f9   :  { %4810 = vmatmul.bf16.gmra.mxu0 %v13349_v33  ;;  %4899 = vmatmul.bf16.gmra.mxu1 %v13350_v43  ;;  %v5373_v39 = vmul.f32 0.2, %v4496_v62  ;;  %vm5245_vm9 = vcmp.gt.f32.partialorder %v4496_v62, 0.0 }
 0x7fa   :  { %4988 = vmatmul.bf16.gmra.mxu2 %v13351_v25  ;;  %v11577_v29 = vpop.f32.mrf.mxu3 }
 0x7fb   :  { %v5501_v48 = vsel %vm5245_vm9, %v4496_v62, %v5373_v39  ;;  %v13357_v62 = vld [vmem:[#allocation165_spill] sm:$0xff] }
 0x7fc   :  { %v8253_v39 = vld [vmem:[#allocation5 + $0x20] sm:$0xf] }
 0x7fd   :  { %v4673_v49 = vpop.f32.mrf.mxu2 }
 0x7fe   :  { %v4674_v63 = vadd.f32 %v4673_v49, %v4585_v20  ;;  %v4497_v35 = vpop.f32.mrf.mxu0  ;;  %v4586_v2 = vpop.f32.mrf.mxu1  ;;  %8230 = vmatmul.msk.bf16.gmra.mxu3 %vm2582_vm0, %v13303_v28  ;;  %v13356_v28 = vld [vmem:[#allocation164_spill] sm:$0xff] }
 0x7ff   :  { %v4498_v1 = vadd.f32 %v4497_v35, %v13352_v36  ;;  %v4587_v38 = vadd.f32 %v4586_v2, %v11249_v34  ;;  %v13355_v36 = vld [vmem:[#allocation51_spill] sm:$0xff]  ;;  %v8381_v34 = vld [vmem:[#allocation5 + $0x120] sm:$0xf]  ;;  %v8726_v2 = vld [vmem:[#allocation5 + $0x124] sm:$0xf0] }
 0x800   :  { %v11581_v42 = vadd.f32 %v11535_v8, %v4674_v63  ;;  %v13354_v63 = vld [vmem:[#allocation58_spill] sm:$0xff] }
 0x801   :  { %vm5249_vm10 = vcmp.gt.f32.partialorder %v4498_v1, 0.0  ;;  %v5377_v54 = vmul.f32 0.2, %v4498_v1 }
 0x802   :  { %v11588_v43 = vpop.f32.mrf.mxu3 }
 0x803   :  { %v5505_v53 = vsel %vm5249_vm10, %v4498_v1, %v5377_v54  ;;  %v8382_v1 = vor.u32 %v8726_v2, %v8381_v34  ;;  %v8694_v54 = vld [vmem:[#allocation5 + $0x24] sm:$0xf0]  ;;  %v8317_v34 = vld [vmem:[#allocation5 + $0xa0] sm:$0xf] }
 0x804   :  { %v11586_v14 = vpack.c.bf16 %v5505_v53, %v5501_v48  ;;  %v8445_v48 = vld [vmem:[#allocation5 + $0x1a0] sm:$0xf]  ;;  %v8742_v53 = vld [vmem:[#allocation5 + $0x1a4] sm:$0xf0] }
 0x805   :  { %v4675_v33 = vpop.f32.mrf.mxu2  ;;  %6144 = vmatpush.bf16.msrb.mxu2 %v8382_v1  ;;  %v8710_v2 = vld [vmem:[#allocation5 + $0xa4] sm:$0xf0] }
 0x806   :  { %13353 = vst [vmem:[#allocation13_spill] sm:$0xff] %v11586_v14  ;;  %v4676_v20 = vadd.f32 %v4675_v33, %v4587_v38  ;;  %v4776_v25 = vpop.f32.mrf.mxu0  ;;  %v4865_v49 = vpop.f32.mrf.mxu1  ;;  %v8254_v33 = vor.u32 %v8694_v54, %v8253_v39  ;;  %v8446_v14 = vor.u32 %v8742_v53, %v8445_v48 }
 0x807   :  { %v4777_v35 = vadd.f32 %v4776_v25, %v13354_v63 }
 0x808   :  { %v11591_v8 = vadd.f32 %v11546_v24, %v4676_v20  ;;  %5966 = vmatpush.bf16.msrb.mxu0 %v8254_v33  ;;  %6233 = vmatpush.bf16.msrb.mxu3 %v8446_v14  ;;  %v13359_v33 = vld [vmem:[#allocation171_spill] sm:$0xff] }
 0x809   :  { %4815 = vmatmul.bf16.gmra.mxu0 %v13355_v36  ;;  %4904 = vmatmul.bf16.gmra.mxu1 %v13356_v28  ;;  %v4866_v38 = vadd.f32 %v4865_v49, %v4777_v35  ;;  %v8318_v35 = vor.u32 %v8710_v2, %v8317_v34 }
 0x80a   :  { %4993 = vmatmul.bf16.gmra.mxu2 %v13357_v62  ;;  %v11597_v20 = vpop.f32.mrf.mxu3 }
 0x80b   :  { %6055 = vmatpush.bf16.msrb.mxu1 %v8318_v35 }
 0x80d   :  { %v4954_v24 = vpop.f32.mrf.mxu2 }
 0x80e   :  { %v4955_v25 = vadd.f32 %v4954_v24, %v4866_v38  ;;  %v4778_v63 = vpop.f32.mrf.mxu0  ;;  %v4867_v36 = vpop.f32.mrf.mxu1  ;;  %8231 = vmatmul.msk.bf16.gmra.mxu3 %vm2582_vm0, %v13307_v23  ;;  %v13360_v24 = vld [vmem:[#allocation172_spill] sm:$0xff] }
 0x80f   :  { %v4779_v62 = vadd.f32 %v4778_v63, %v11273_v26  ;;  %v13358_v26 = vld [vmem:[#allocation59_spill] sm:$0xff] }
 0x810   :  { %v5044_v28 = vadd.f32 %v11556_v50, %v4955_v25 }
 0x811   :  { %v4868_v49 = vadd.f32 %v4867_v36, %v4779_v62 }
 0x812   :  { %v11603_v1 = vpop.f32.mrf.mxu3  ;;  %v5254_v38 = vmul.f32 0.2, %v5044_v28  ;;  %vm5126_vm11 = vcmp.gt.f32.partialorder %v5044_v28, 0.0 }
 0x814   :  { %v5382_v25 = vsel %vm5126_vm11, %v5044_v28, %v5254_v38 }
 0x815   :  { %v4956_v39 = vpop.f32.mrf.mxu2 }
 0x816   :  { %v4957_v54 = vadd.f32 %v4956_v39, %v4868_v49  ;;  %v4781_v48 = vpop.f32.mrf.mxu0  ;;  %v4870_v53 = vpop.f32.mrf.mxu1 }
 0x817   :  { %v4782_v50 = vadd.f32 %v4781_v48, %v11284_v10 }
 0x818   :  { %v5046_v14 = vadd.f32 %v11567_v55, %v4957_v54 }
 0x819   :  { %4820 = vmatmul.bf16.gmra.mxu0 %v13358_v26  ;;  %4909 = vmatmul.bf16.gmra.mxu1 %v13359_v33  ;;  %v4871_v36 = vadd.f32 %v4870_v53, %v4782_v50 }
 0x81a   :  { %vm5130_vm12 = vcmp.gt.f32.partialorder %v5046_v14, 0.0  ;;  %v5258_v23 = vmul.f32 0.2, %v5046_v14  ;;  %4998 = vmatmul.bf16.gmra.mxu2 %v13360_v24  ;;  %v11612_v2 = vpop.f32.mrf.mxu3  ;;  %v8373_v24 = vld [vmem:[#allocation5 + $0x110] sm:$0xf] }
 0x81c   :  { %v5386_v63 = vsel %vm5130_vm12, %v5046_v14, %v5258_v23  ;;  %v13361_v23 = vld [vmem:[#allocation67_spill] sm:$0xff] }
 0x81d   :  { %v11610_v62 = vpack.c.bf16 %v5386_v63, %v5382_v25  ;;  %v4959_v34 = vpop.f32.mrf.mxu2  ;;  %v8724_v25 = vld [vmem:[#allocation5 + $0x114] sm:$0xf0]  ;;  %v8245_v63 = vld [vmem:[#allocation5 + $0x10] sm:$0xf] }
 0x81e   :  { %v4960_v55 = vadd.f32 %v4959_v34, %v4871_v36  ;;  %v4783_v49 = vpop.f32.mrf.mxu0  ;;  %v4872_v10 = vpop.f32.mrf.mxu1  ;;  %8232 = vmatmul.msk.bf16.gmra.mxu3 %vm2582_vm0, %v13311_v17  ;;  %v13363_v17 = vld [vmem:[#allocation179_spill] sm:$0xff]  ;;  %v8692_v36 = vld [vmem:[#allocation5 + $0x14] sm:$0xf0] }
 0x81f   :  { %v4784_v39 = vadd.f32 %v4783_v49, %v11294_v41  ;;  %v8374_v49 = vor.u32 %v8724_v25, %v8373_v24 }
 0x820   :  { %v5049_v35 = vadd.f32 %v11577_v29, %v4960_v55  ;;  %v13362_v29 = vld [vmem:[#allocation178_spill] sm:$0xff] }
 0x821   :  { %v4873_v54 = vadd.f32 %v4872_v10, %v4784_v39  ;;  %v8246_v10 = vor.u32 %v8692_v36, %v8245_v63  ;;  %v8437_v39 = vld [vmem:[#allocation5 + $0x190] sm:$0xf]  ;;  %6145 = vmatpush.bf16.msrb.mxu2 %v8374_v49 }
 0x822   :  { %v11618_v28 = vpop.f32.mrf.mxu3  ;;  %v5262_v50 = vmul.f32 0.2, %v5049_v35  ;;  %vm5134_vm13 = vcmp.gt.f32.partialorder %v5049_v35, 0.0 }
 0x823   :  { %5967 = vmatpush.bf16.msrb.mxu0 %v8246_v10  ;;  %v13365_v10 = vld [vmem:[#allocation187_spill] sm:$0xff] }
 0x824   :  { %v5390_v34 = vsel %vm5134_vm13, %v5049_v35, %v5262_v50  ;;  %v8309_v50 = vld [vmem:[#allocation5 + $0x90] sm:$0xf] }
 0x825   :  { %v4961_v48 = vpop.f32.mrf.mxu2 }
 0x826   :  { %v4962_v53 = vadd.f32 %v4961_v48, %v4873_v54  ;;  %v4786_v38 = vpop.f32.mrf.mxu0  ;;  %v4875_v14 = vpop.f32.mrf.mxu1 }
 0x827   :  { %v4787_v33 = vadd.f32 %v4786_v38, %v11305_v47 }
 0x828   :  { %v5051_v26 = vadd.f32 %v11588_v43, %v4962_v53  ;;  %v8740_v43 = vld [vmem:[#allocation5 + $0x194] sm:$0xf0] }
 0x829   :  { %4825 = vmatmul.bf16.gmra.mxu0 %v13361_v23  ;;  %4914 = vmatmul.bf16.gmra.mxu1 %v13362_v29  ;;  %v4876_v55 = vadd.f32 %v4875_v14, %v4787_v33  ;;  %v8438_v48 = vor.u32 %v8740_v43, %v8437_v39  ;;  %v8708_v33 = vld [vmem:[#allocation5 + $0x94] sm:$0xf0] }
 0x82a   :  { %vm5138_vm14 = vcmp.gt.f32.partialorder %v5051_v26, 0.0  ;;  %v5266_v41 = vmul.f32 0.2, %v5051_v26  ;;  %5003 = vmatmul.bf16.gmra.mxu2 %v13363_v17  ;;  %v11625_v53 = vpop.f32.mrf.mxu3  ;;  %v13366_v39 = vld [vmem:[#allocation188_spill] sm:$0xff] }
 0x82b   :  { %6234 = vmatpush.bf16.msrb.mxu3 %v8438_v48 }
 0x82c   :  { %v5394_v54 = vsel %vm5138_vm14, %v5051_v26, %v5266_v41  ;;  %v8310_v41 = vor.u32 %v8708_v33, %v8309_v50 }
 0x82d   :  { %v4964_v47 = vpop.f32.mrf.mxu2  ;;  %v11627_v38 = vpack.c.bf16 %v5394_v54, %v5390_v34 }
 0x82e   :  { %v4965_v23 = vadd.f32 %v4964_v47, %v4876_v55  ;;  %v4788_v29 = vpop.f32.mrf.mxu0  ;;  %v4877_v17 = vpop.f32.mrf.mxu1  ;;  %8233 = vmatmul.msk.bf16.gmra.mxu3 %vm2582_vm0, %v13315_v19  ;;  %6056 = vmatpush.bf16.msrb.mxu1 %v8310_v41 }
 0x82f   :  { %v4789_v14 = vadd.f32 %v4788_v29, %v11315_v11  ;;  %v13364_v11 = vld [vmem:[#allocation75_spill] sm:$0xff] }
 0x830   :  { %v5054_v35 = vadd.f32 %v11597_v20, %v4965_v23 }
 0x831   :  { %v4878_v26 = vadd.f32 %v4877_v17, %v4789_v14 }
 0x832   :  { %v11633_v25 = vpop.f32.mrf.mxu3  ;;  %v5270_v55 = vmul.f32 0.2, %v5054_v35  ;;  %vm5142_vm15 = vcmp.gt.f32.partialorder %v5054_v35, 0.0 }
 0x834   :  { %v5398_v54 = vsel %vm5142_vm15, %v5054_v35, %v5270_v55 }
 0x835   :  { %v4966_v24 = vpop.f32.mrf.mxu2 }
 0x836   :  { %v4967_v63 = vadd.f32 %v4966_v24, %v4878_v26  ;;  %v4791_v36 = vpop.f32.mrf.mxu0  ;;  %v4880_v34 = vpop.f32.mrf.mxu1 }
 0x837   :  { %v4792_v20 = vadd.f32 %v4791_v36, %v11326_v18 }
 0x838   :  { %v5056_v49 = vadd.f32 %v11603_v1, %v4967_v63 }
 0x839   :  { %4830 = vmatmul.bf16.gmra.mxu0 %v13364_v11  ;;  %4919 = vmatmul.bf16.gmra.mxu1 %v13365_v10  ;;  %v4881_v43 = vadd.f32 %v4880_v34, %v4792_v20  ;;  %v8365_v20 = vld [vmem:[#allocation5 + $0x100] sm:$0xf]  ;;  %v8722_v11 = vld [vmem:[#allocation5 + $0x104] sm:$0xf0] }
 0x83a   :  { %vm5146_vm1 = vcmp.gt.f32.partialorder %v5056_v49, 0.0  ;;  %v5274_v19 = vmul.f32 0.2, %v5056_v49  ;;  %5008 = vmatmul.bf16.gmra.mxu2 %v13366_v39  ;;  %v11640_v23 = vpop.f32.mrf.mxu3  ;;  %v8237_v10 = vld [vmem:[#allocation5] sm:$0xf] }
 0x83c   :  { %v5402_v47 = vsel %vm5146_vm1, %v5056_v49, %v5274_v19  ;;  %v13367_v49 = vld [vmem:[#allocation83_spill] sm:$0xff]  ;;  %v8690_v19 = vld [vmem:[#allocation5 + $0x4] sm:$0xf0] }
 0x83d   :  { %v4969_v48 = vpop.f32.mrf.mxu2  ;;  %v11642_v29 = vpack.c.bf16 %v5402_v47, %v5398_v54  ;;  %v8366_v54 = vor.u32 %v8722_v11, %v8365_v20  ;;  %v8238_v47 = vor.u32 %v8690_v19, %v8237_v10  ;;  %v13371_v19 = vld [vmem:[#allocation205_spill] sm:$0xff] }
 0x83e   :  { %v4970_v1 = vadd.f32 %v4969_v48, %v4881_v43  ;;  %v4793_v17 = vpop.f32.mrf.mxu0  ;;  %v4882_v18 = vpop.f32.mrf.mxu1  ;;  %8234 = vmatmul.msk.bf16.gmra.mxu3 %vm2582_vm0, %v13319_v44  ;;  %v13369_v44 = vld [vmem:[#allocation197_spill] sm:$0xff] }
 0x83f   :  { %v4794_v50 = vadd.f32 %v4793_v17, %v11336_v59  ;;  %v8429_v48 = vld [vmem:[#allocation5 + $0x180] sm:$0xf]  ;;  %6146 = vmatpush.bf16.msrb.mxu2 %v8366_v54  ;;  %5968 = vmatpush.bf16.msrb.mxu0 %v8238_v47 }
 0x840   :  { %v5059_v14 = vadd.f32 %v11612_v2, %v4970_v1  ;;  %v13368_v2 = vld [vmem:[#allocation196_spill] sm:$0xff] }
 0x841   :  { %v4883_v33 = vadd.f32 %v4882_v18, %v4794_v50 }
 0x842   :  { %v11648_v41 = vpop.f32.mrf.mxu3  ;;  %v5278_v36 = vmul.f32 0.2, %v5059_v14  ;;  %vm5150_vm2 = vcmp.gt.f32.partialorder %v5059_v14, 0.0 }
 0x844   :  { %v5406_v39 = vsel %vm5150_vm2, %v5059_v14, %v5278_v36  ;;  %v8706_v36 = vld [vmem:[#allocation5 + $0x84] sm:$0xf0] }
 0x845   :  { %v4971_v26 = vpop.f32.mrf.mxu2 }
 0x846   :  { %v4972_v35 = vadd.f32 %v4971_v26, %v4883_v33  ;;  %v4796_v24 = vpop.f32.mrf.mxu0  ;;  %v4885_v63 = vpop.f32.mrf.mxu1 }
 0x847   :  { %v4797_v55 = vadd.f32 %v4796_v24, %v11347_v56 }
 0x848   :  { %v5061_v34 = vadd.f32 %v11618_v28, %v4972_v35  ;;  %v8738_v28 = vld [vmem:[#allocation5 + $0x184] sm:$0xf0] }
 0x849   :  { %4835 = vmatmul.bf16.gmra.mxu0 %v13367_v49  ;;  %4924 = vmatmul.bf16.gmra.mxu1 %v13368_v2  ;;  %v4886_v43 = vadd.f32 %v4885_v63, %v4797_v55  ;;  %v8430_v17 = vor.u32 %v8738_v28, %v8429_v48  ;;  %v8301_v63 = vld [vmem:[#allocation5 + $0x80] sm:$0xf] }
 0x84a   :  { %vm5154_vm3 = vcmp.gt.f32.partialorder %v5061_v34, 0.0  ;;  %v5282_v59 = vmul.f32 0.2, %v5061_v34  ;;  %5013 = vmatmul.bf16.gmra.mxu2 %v13369_v44  ;;  %v11655_v18 = vpop.f32.mrf.mxu3  ;;  %v8302_v55 = vor.u32 %v8706_v36, %v8301_v63 }
 0x84b   :  { %6235 = vmatpush.bf16.msrb.mxu3 %v8430_v17 }
 0x84c   :  { %v5410_v1 = vsel %vm5154_vm3, %v5061_v34, %v5282_v59  ;;  %6057 = vmatpush.bf16.msrb.mxu1 %v8302_v55 }
 0x84d   :  { %v4974_v56 = vpop.f32.mrf.mxu2  ;;  %v11657_v50 = vpack.c.bf16 %v5410_v1, %v5406_v39 }
 0x84e   :  { %v4975_v33 = vadd.f32 %v4974_v56, %v4886_v43  ;;  %v4798_v26 = vpop.f32.mrf.mxu0  ;;  %v4887_v35 = vpop.f32.mrf.mxu1  ;;  %6236 = vmatmul.bf16.vlgmr.msrb.gmra.mxu3 %v11610_v62  ;;  %v13372_v43 = vld [vmem:[#allocation206_spill] sm:$0xff] }
 0x84f   :  { %v4799_v24 = vadd.f32 %v4798_v26, %v11358_v22  ;;  %v13370_v22 = vld [vmem:[#allocation91_spill] sm:$0xff] }
 0x850   :  { %v5064_v14 = vadd.f32 %v11625_v53, %v4975_v33 }
 0x851   :  { %v4888_v34 = vadd.f32 %v4887_v35, %v4799_v24 }
 0x852   :  { %v11662_v2 = vpop.f32.mrf.mxu3  ;;  %v5286_v11 = vmul.f32 0.2, %v5064_v14  ;;  %vm5158_vm0 = vcmp.gt.f32.partialorder %v5064_v14, 0.0 }
 0x854   :  { %v5414_v47 = vsel %vm5158_vm0, %v5064_v14, %v5286_v11 }
 0x855   :  { %v4976_v49 = vpop.f32.mrf.mxu2 }
 0x856   :  { %v4977_v59 = vadd.f32 %v4976_v49, %v4888_v34  ;;  %v4801_v44 = vpop.f32.mrf.mxu0  ;;  %v4890_v20 = vpop.f32.mrf.mxu1 }
 0x857   :  { %v4802_v53 = vadd.f32 %v4801_v44, %v11369_v15  ;;  %v13373_v44 = vld [vmem:[#allocation99_spill] sm:$0xff] }
 0x858   :  { %v5066_v10 = vadd.f32 %v11633_v25, %v4977_v59 }
 0x859   :  { %4840 = vmatmul.bf16.gmra.mxu0 %v13370_v22  ;;  %4929 = vmatmul.bf16.gmra.mxu1 %v13371_v19  ;;  %v4891_v54 = vadd.f32 %v4890_v20, %v4802_v53  ;;  %v13376_v20 = vld [vmem:[#allocation38_spill] sm:$0xff]  ;;  %v8735_v22 = vld [vmem:[#allocation5 + $0x174] sm:$0xf]  ;;  %v8423_v19 = vld [vmem:[#allocation5 + $0x178] sm:$0xf0] }
 0x85a   :  { %vm5162_vm4 = vcmp.gt.f32.partialorder %v5066_v10, 0.0  ;;  %v5290_v39 = vmul.f32 0.2, %v5066_v10  ;;  %5018 = vmatmul.bf16.gmra.mxu2 %v13372_v43  ;;  %v11669_v1 = vpop.f32.mrf.mxu3  ;;  %v13377_v53 = vld [vmem:[#allocation214_spill] sm:$0xff]  ;;  %v8295_v43 = vld [vmem:[#allocation5 + $0x78] sm:$0xf0] }
 0x85c   :  { %v5418_v48 = vsel %vm5162_vm4, %v5066_v10, %v5290_v39  ;;  %v8703_v39 = vld [vmem:[#allocation5 + $0x74] sm:$0xf] }
 0x85d   :  { %v4979_v28 = vpop.f32.mrf.mxu2  ;;  %v11671_v56 = vpack.c.bf16 %v5418_v48, %v5414_v47  ;;  %v8298_v48 = vor.u32 %v8703_v39, %v8295_v43  ;;  %v13382_v43 = vld [vmem:[#allocation155_spill] sm:$0xff] }
 0x85e   :  { %v4980_v25 = vadd.f32 %v4979_v28, %v4891_v54  ;;  %v4803_v17 = vpop.f32.mrf.mxu0  ;;  %v4892_v15 = vpop.f32.mrf.mxu1  ;;  %6241 = vmatmul.bf16.gmra.mxu3 %v11627_v38  ;;  %v8487_v28 = vld [vmem:[#allocation5 + $0x1f8] sm:$0xf0] }
 0x85f   :  { %v4804_v26 = vadd.f32 %v4803_v17, %v11380_v0  ;;  %v13375_v0 = vld [vmem:[#allocation33_spill] sm:$0xff]  ;;  %6317 = vmatpush.bf16.msra.mxu0 %v8298_v48 }
 0x860   :  { %v5069_v33 = vadd.f32 %v11640_v23, %v4980_v25  ;;  %v13374_v23 = vld [vmem:[#allocation213_spill] sm:$0xff]  ;;  %v2643_v11 = vadd.f32 %v13376_v20, %v13375_v0  ;;  %v8359_v20 = vld [vmem:[#allocation5 + $0xf8] sm:$0xf0] }
 0x861   :  { %v4893_v35 = vadd.f32 %v4892_v15, %v4804_v26 }
 0x862   :  { %v11676_v63 = vpop.f32.mrf.mxu3  ;;  %v5294_v55 = vmul.f32 0.2, %v5069_v33  ;;  %vm5166_vm5 = vcmp.gt.f32.partialorder %v5069_v33, 0.0 }
 0x864   :  { %v5422_v54 = vsel %vm5166_vm5, %v5069_v33, %v5294_v55  ;;  %v13380_v33 = vld [vmem:[#allocation44_spill] sm:$0xff] }
 0x865   :  { %v4981_v24 = vpop.f32.mrf.mxu2 }
 0x866   :  { %v4982_v14 = vadd.f32 %v4981_v24, %v4893_v35  ;;  %v4806_v36 = vpop.f32.mrf.mxu0  ;;  %v4895_v34 = vpop.f32.mrf.mxu1  ;;  %v13379_v24 = vld [vmem:[#allocation39_spill] sm:$0xff] }
 0x867   :  { %v4807_v59 = vadd.f32 %v4806_v36, %v11391_v16  ;;  %v8751_v16 = vld [vmem:[#allocation5 + $0x1f4] sm:$0xf] }
 0x868   :  { %v5071_v49 = vadd.f32 %v11648_v41, %v4982_v14  ;;  %v8426_v41 = vor.u32 %v8735_v22, %v8423_v19  ;;  %v8490_v15 = vor.u32 %v8751_v16, %v8487_v28  ;;  %v2732_v14 = vadd.f32 %v13379_v24, %v2643_v11  ;;  %v13383_v28 = vld [vmem:[#allocation46_spill] sm:$0xff]  ;;  %v13386_v24 = vld [vmem:[#allocation156_spill] sm:$0xff] }
 0x869   :  { %4845 = vmatmul.bf16.gmra.mxu0 %v13373_v44  ;;  %4934 = vmatmul.bf16.gmra.mxu1 %v13374_v23  ;;  %v4896_v47 = vadd.f32 %v4895_v34, %v4807_v59  ;;  %v8719_v59 = vld [vmem:[#allocation5 + $0xf4] sm:$0xf] }
 0x86a   :  { %vm5170_vm6 = vcmp.gt.f32.partialorder %v5071_v49, 0.0  ;;  %v5298_v10 = vmul.f32 0.2, %v5071_v49  ;;  %5023 = vmatmul.bf16.gmra.mxu2 %v13377_v53  ;;  %v11685_v26 = vpop.f32.mrf.mxu3  ;;  %6584 = vmatpush.bf16.msra.mxu3 %v8490_v15  ;;  %v2821_v34 = vadd.f32 %v13380_v33, %v2732_v14  ;;  %v8362_v11 = vor.u32 %v8719_v59, %v8359_v20  ;;  %v13385_v15 = vld [vmem:[#allocation223_spill] sm:$0xff] }
 0x86b   :  { %6495 = vmatpush.bf16.msra.mxu2 %v8426_v41 }
 0x86c   :  { %v5426_v25 = vsel %vm5170_vm6, %v5071_v49, %v5298_v10  ;;  %v13381_v10 = vld [vmem:[#allocation45_spill] sm:$0xff]  ;;  %6406 = vmatpush.bf16.msra.mxu1 %v8362_v11 }
 0x86d   :  { %v4984_v17 = vpop.f32.mrf.mxu2  ;;  %v11687_v35 = vpack.c.bf16 %v5426_v25, %v5422_v54  ;;  %v2910_v53 = vadd.f32 %v13381_v10, %v2821_v34  ;;  %v2648_v25 = vadd.f32 %v13383_v28, %v13375_v0 }
 0x86e   :  { %v4985_v36 = vadd.f32 %v4984_v17, %v4896_v47  ;;  %v4808_v44 = vpop.f32.mrf.mxu0  ;;  %v4897_v23 = vpop.f32.mrf.mxu1  ;;  %6246 = vmatmul.bf16.gmra.mxu3 %v11642_v29  ;;  %v13384_v17 = vld [vmem:[#allocation109_spill] sm:$0xff] }
 0x86f   :  { %13378 = vst [vmem:[#allocation14_spill] sm:$0xff] %v11687_v35  ;;  %v4809_v49 = vadd.f32 %v4808_v44, %v11402_v58  ;;  %v2999_v54 = vadd.f32 %v13382_v43, %v2910_v53  ;;  %v13387_v44 = vld [vmem:[#allocation224_spill] sm:$0xff] }
 0x870   :  { %v5074_v55 = vadd.f32 %v11655_v18, %v4985_v36  ;;  %v13390_v43 = vld [vmem:[#allocation52_spill] sm:$0xff] }
 0x871   :  { %v4898_v22 = vadd.f32 %v4897_v23, %v4809_v49  ;;  %v3088_v14 = vadd.f32 %v13386_v24, %v2999_v54  ;;  %v13388_v23 = vld [vmem:[#allocation160_spill] sm:$0xff] }
 0x872   :  { %v11695_v39 = vpop.f32.mrf.mxu3  ;;  %v5302_v18 = vmul.f32 0.2, %v5074_v55  ;;  %vm5174_vm7 = vcmp.gt.f32.partialorder %v5074_v55, 0.0 }
 0x873   :  { %v3177_v33 = vadd.f32 %v13388_v23, %v3088_v14 }
 0x875   :  { %v4986_v19 = vpop.f32.mrf.mxu2  ;;  %vm5127_vm9 = vcmp.gt.f32.partialorder %v3177_v33, 0.0 }
 0x876   :  { %v4987_v47 = vadd.f32 %v4986_v19, %v4898_v22  ;;  %v4811_v41 = vpop.f32.mrf.mxu0  ;;  %v4900_v48 = vpop.f32.mrf.mxu1 }
 0x877   :  { %v4812_v16 = vadd.f32 %v4811_v41, %v11413_v45  ;;  %v13389_v45 = vld [vmem:[#allocation47_spill] sm:$0xff] }
 0x878   :  { %v5076_v58 = vadd.f32 %v11662_v2, %v4987_v47  ;;  %v5430_v2 = vsel %vm5174_vm7, %v5074_v55, %v5302_v18  ;;  %v2737_v59 = vadd.f32 %v13389_v45, %v2648_v25  ;;  %v5255_v47 = vmul.f32 0.2, %v3177_v33  ;;  %v13391_v55 = vld [vmem:[#allocation154_spill] sm:$0xff]  ;;  %v13392_v18 = vld [vmem:[#allocation53_spill] sm:$0xff] }
 0x879   :  { %4850 = vmatmul.bf16.gmra.mxu0 %v13384_v17  ;;  %4939 = vmatmul.bf16.gmra.mxu1 %v13385_v15  ;;  %v4901_v34 = vadd.f32 %v4900_v48, %v4812_v16  ;;  %v5251_v48 = vmul.f32 0.2, %v13391_v55  ;;  %vm5123_vm10 = vcmp.gt.f32.partialorder %v13391_v55, 0.0  ;;  %v13393_v17 = vld [vmem:[#allocation162_spill] sm:$0xff] }
 0x87a   :  { %vm5178_vm8 = vcmp.gt.f32.partialorder %v5076_v58, 0.0  ;;  %v5306_v36 = vmul.f32 0.2, %v5076_v58  ;;  %5028 = vmatmul.bf16.gmra.mxu2 %v13387_v44  ;;  %v11708_v10 = vpop.f32.mrf.mxu3  ;;  %v2826_v54 = vadd.f32 %v13390_v43, %v2737_v59  ;;  %v5383_v16 = vsel %vm5127_vm9, %v3177_v33, %v5255_v47  ;;  %v13394_v33 = vld [vmem:[#allocation163_spill] sm:$0xff]  ;;  %v13395_v59 = vld [vmem:[#allocation192_spill] sm:$0xff] }
 0x87b   :  { %v8733_v43 = vld [vmem:[#allocation5 + $0x164] sm:$0xf] }
 0x87c   :  { %v5434_v49 = vsel %vm5178_vm8, %v5076_v58, %v5306_v36  ;;  %v2915_v58 = vadd.f32 %v13392_v18, %v2826_v54  ;;  %v13398_v54 = vld [vmem:[#allocation167_spill] sm:$0xff] }
 0x87d   :  { %v4989_v20 = vpop.f32.mrf.mxu2  ;;  %v11710_v53 = vpack.c.bf16 %v5434_v49, %v5430_v2 }
 0x87e   :  { %v4990_v22 = vadd.f32 %v4989_v20, %v4901_v34  ;;  %v4813_v11 = vpop.f32.mrf.mxu0  ;;  %v4902_v19 = vpop.f32.mrf.mxu1  ;;  %6251 = vmatmul.bf16.gmra.mxu3 %v11657_v50  ;;  %v3004_v15 = vadd.f32 %v13393_v17, %v2915_v58  ;;  %v13396_v20 = vld [vmem:[#allocation54_spill] sm:$0xff] }
 0x87f   :  { %v4814_v28 = vadd.f32 %v4813_v11, %v11424_v60 }
 0x880   :  { %v5079_v41 = vadd.f32 %v11669_v1, %v4990_v22  ;;  %v5379_v1 = vsel %vm5123_vm10, %v13391_v55, %v5251_v48  ;;  %v3093_v45 = vadd.f32 %v13394_v33, %v3004_v15  ;;  %v2653_v22 = vadd.f32 %v13396_v20, %v13375_v0  ;;  %v8287_v55 = vld [vmem:[#allocation5 + $0x68] sm:$0xf0] }
 0x881   :  { %v4903_v25 = vadd.f32 %v4902_v19, %v4814_v28  ;;  %v11723_v23 = vpack.c.bf16 %v5383_v16, %v5379_v1  ;;  %v13397_v19 = vld [vmem:[#allocation66_spill] sm:$0xff]  ;;  %v8749_v16 = vld [vmem:[#allocation5 + $0x1e4] sm:$0xf] }
 0x882   :  { %v11720_v14 = vpop.f32.mrf.mxu3  ;;  %v5310_v34 = vmul.f32 0.2, %v5079_v41  ;;  %vm5182_vm11 = vcmp.gt.f32.partialorder %v5079_v41, 0.0  ;;  %v3182_v47 = vadd.f32 %v13398_v54, %v3093_v45  ;;  %v8415_v28 = vld [vmem:[#allocation5 + $0x168] sm:$0xf0] }
 0x883   :  { %v8418_v18 = vor.u32 %v8733_v43, %v8415_v28  ;;  %v8717_v28 = vld [vmem:[#allocation5 + $0xe4] sm:$0xf] }
 0x884   :  { %vm5135_vm13 = vcmp.gt.f32.partialorder %v3182_v47, 0.0 }
 0x885   :  { %v4991_v24 = vpop.f32.mrf.mxu2  ;;  %6496 = vmatpush.bf16.msra.mxu2 %v8418_v18 }
 0x886   :  { %v4992_v36 = vadd.f32 %v4991_v24, %v4903_v25  ;;  %v4816_v60 = vpop.f32.mrf.mxu0  ;;  %v4905_v44 = vpop.f32.mrf.mxu1  ;;  %v8479_v25 = vld [vmem:[#allocation5 + $0x1e8] sm:$0xf0] }
 0x887   :  { %v4817_v49 = vadd.f32 %v4816_v60, %v11434_v27  ;;  %v5438_v27 = vsel %vm5182_vm11, %v5079_v41, %v5310_v34  ;;  %v8482_v24 = vor.u32 %v8749_v16, %v8479_v25  ;;  %v13400_v60 = vld [vmem:[#allocation55_spill] sm:$0xff]  ;;  %v13401_v41 = vld [vmem:[#allocation60_spill] sm:$0xff]  ;;  %v5263_v34 = vmul.f32 0.2, %v3182_v47 }
 0x888   :  { %v5081_v2 = vadd.f32 %v11676_v63, %v4992_v36  ;;  %v8701_v63 = vld [vmem:[#allocation5 + $0x64] sm:$0xf]  ;;  %v2742_v33 = vadd.f32 %v13400_v60, %v2653_v22  ;;  %v8351_v22 = vld [vmem:[#allocation5 + $0xe8] sm:$0xf0] }
 0x889   :  { %5969 = vmatmul.bf16.vlgmr.msrb.gmra.mxu0 %v11723_v23  ;;  %6058 = vmatmul.bf16.vlgmr.msrb.gmra.mxu1 %v13395_v59  ;;  %v4906_v48 = vadd.f32 %v4905_v44, %v4817_v49  ;;  %v8290_v58 = vor.u32 %v8701_v63, %v8287_v55  ;;  %v13403_v63 = vld [vmem:[#allocation61_spill] sm:$0xff]  ;;  %v8354_v18 = vor.u32 %v8717_v28, %v8351_v22 }
 0x88a   :  { %vm5186_vm12 = vcmp.gt.f32.partialorder %v5081_v2, 0.0  ;;  %v5314_v11 = vmul.f32 0.2, %v5081_v2  ;;  %6147 = vmatmul.bf16.vlgmr.msrb.gmra.mxu2 %v13397_v19  ;;  %v11734_v1 = vpop.f32.mrf.mxu3  ;;  %6585 = vmatpush.bf16.msra.mxu3 %v8482_v24  ;;  %v2831_v44 = vadd.f32 %v13401_v41, %v2742_v33  ;;  %v13406_v41 = vld [vmem:[#allocation199_spill] sm:$0xff] }
 0x88b   :  { %6318 = vmatpush.bf16.msra.mxu0 %v8290_v58  ;;  %6407 = vmatpush.bf16.msra.mxu1 %v8354_v18 }
 0x88c   :  { %v5442_v17 = vsel %vm5186_vm12, %v5081_v2, %v5314_v11  ;;  %v13402_v11 = vld [vmem:[#allocation161_spill] sm:$0xff]  ;;  %v2920_v55 = vadd.f32 %v13403_v63, %v2831_v44  ;;  %v13407_v44 = vld [vmem:[#allocation170_spill] sm:$0xff] }
 0x88d   :  { %v4994_v15 = vpop.f32.mrf.mxu2  ;;  %v11736_v36 = vpack.c.bf16 %v5442_v17, %v5438_v27  ;;  %v5259_v43 = vmul.f32 0.2, %v13402_v11  ;;  %vm5131_vm14 = vcmp.gt.f32.partialorder %v13402_v11, 0.0 }
 0x88e   :  { %v4995_v20 = vadd.f32 %v4994_v15, %v4906_v48  ;;  %v4818_v45 = vpop.f32.mrf.mxu0  ;;  %v4907_v54 = vpop.f32.mrf.mxu1  ;;  %6256 = vmatmul.bf16.gmra.mxu3 %v11671_v56  ;;  %v5391_v48 = vsel %vm5135_vm13, %v3182_v47, %v5263_v34  ;;  %v13405_v47 = vld [vmem:[#allocation62_spill] sm:$0xff] }
 0x88f   :  { %13399 = vst [vmem:[#allocation127_spill] sm:$0xff] %v11736_v36  ;;  %v4819_v2 = vadd.f32 %v4818_v45, %v11445_v46  ;;  %v5387_v24 = vsel %vm5131_vm14, %v13402_v11, %v5259_v43  ;;  %v13408_v11 = vld [vmem:[#allocation74_spill] sm:$0xff] }
 0x890   :  { %v5084_v49 = vadd.f32 %v11685_v26, %v4995_v20  ;;  %v13404_v26 = vld [vmem:[#allocation169_spill] sm:$0xff]  ;;  %v11750_v60 = vpack.c.bf16 %v5391_v48, %v5387_v24  ;;  %v13409_v43 = vld [vmem:[#allocation174_spill] sm:$0xff] }
 0x891   :  { %v4908_v27 = vadd.f32 %v4907_v54, %v4819_v2  ;;  %v3009_v25 = vadd.f32 %v13404_v26, %v2920_v55  ;;  %v2658_v54 = vadd.f32 %v13405_v47, %v13375_v0 }
 0x892   :  { %v11746_v16 = vpop.f32.mrf.mxu3  ;;  %v5318_v33 = vmul.f32 0.2, %v5084_v49  ;;  %vm5190_vm15 = vcmp.gt.f32.partialorder %v5084_v49, 0.0 }
 0x893   :  { %v3098_v34 = vadd.f32 %v13407_v44, %v3009_v25  ;;  %v13411_v25 = vld [vmem:[#allocation68_spill] sm:$0xff] }
 0x895   :  { %v4996_v58 = vpop.f32.mrf.mxu2  ;;  %v3187_v28 = vadd.f32 %v13409_v43, %v3098_v34  ;;  %v13414_v34 = vld [vmem:[#allocation176_spill] sm:$0xff] }
 0x896   :  { %v4997_v46 = vadd.f32 %v4996_v58, %v4908_v27  ;;  %v4821_v17 = vpop.f32.mrf.mxu0  ;;  %v4910_v15 = vpop.f32.mrf.mxu1 }
 0x897   :  { %v4822_v45 = vadd.f32 %v4821_v17, %v11455_v9  ;;  %v13410_v9 = vld [vmem:[#allocation63_spill] sm:$0xff]  ;;  %v5271_v24 = vmul.f32 0.2, %v3187_v28  ;;  %vm5143_vm2 = vcmp.gt.f32.partialorder %v3187_v28, 0.0 }
 0x898   :  { %v5086_v20 = vadd.f32 %v11695_v39, %v4997_v46  ;;  %v5446_v39 = vsel %vm5190_vm15, %v5084_v49, %v5318_v33  ;;  %v2747_v55 = vadd.f32 %v13410_v9, %v2658_v54  ;;  %v13412_v49 = vld [vmem:[#allocation168_spill] sm:$0xff]  ;;  %v13413_v33 = vld [vmem:[#allocation69_spill] sm:$0xff] }
 0x899   :  { %5974 = vmatmul.bf16.gmra.mxu0 %v11750_v60  ;;  %6063 = vmatmul.bf16.gmra.mxu1 %v13406_v41  ;;  %v4911_v22 = vadd.f32 %v4910_v15, %v4822_v45  ;;  %v5267_v15 = vmul.f32 0.2, %v13412_v49  ;;  %vm5139_vm3 = vcmp.gt.f32.partialorder %v13412_v49, 0.0  ;;  %v5399_v54 = vsel %vm5143_vm2, %v3187_v28, %v5271_v24 }
 0x89a   :  { %vm5194_vm1 = vcmp.gt.f32.partialorder %v5086_v20, 0.0  ;;  %v5322_v2 = vmul.f32 0.2, %v5086_v20  ;;  %6152 = vmatmul.bf16.gmra.mxu2 %v13408_v11  ;;  %v11762_v48 = vpop.f32.mrf.mxu3  ;;  %v2836_v17 = vadd.f32 %v13411_v25, %v2747_v55  ;;  %v13418_v25 = vld [vmem:[#allocation70_spill] sm:$0xff] }
 0x89c   :  { %v5450_v63 = vsel %vm5194_vm1, %v5086_v20, %v5322_v2  ;;  %v2925_v20 = vadd.f32 %v13413_v33, %v2836_v17  ;;  %v2663_v17 = vadd.f32 %v13418_v25, %v13375_v0 }
 0x89d   :  { %v4999_v27 = vpop.f32.mrf.mxu2  ;;  %v11764_v18 = vpack.c.bf16 %v5450_v63, %v5446_v39 }
 0x89e   :  { %v5000_v58 = vadd.f32 %v4999_v27, %v4911_v22  ;;  %v4823_v26 = vpop.f32.mrf.mxu0  ;;  %v4912_v46 = vpop.f32.mrf.mxu1  ;;  %6261 = vmatmul.bf16.gmra.mxu3 %v11687_v35  ;;  %v3014_v2 = vadd.f32 %v13414_v34, %v2925_v20  ;;  %v8407_v20 = vld [vmem:[#allocation5 + $0x158] sm:$0xf0] }
 0x89f   :  { %v4824_v44 = vadd.f32 %v4823_v26, %v11466_v5  ;;  %v5395_v5 = vsel %vm5139_vm3, %v13412_v49, %v5267_v15  ;;  %v13416_v26 = vld [vmem:[#allocation177_spill] sm:$0xff]  ;;  %v8731_v49 = vld [vmem:[#allocation5 + $0x154] sm:$0xf]  ;;  %v13420_v15 = vld [vmem:[#allocation182_spill] sm:$0xff] }
 0x8a0   :  { %v5089_v47 = vadd.f32 %v11708_v10, %v5000_v58  ;;  %v11777_v55 = vpack.c.bf16 %v5399_v54, %v5395_v5  ;;  %v3103_v28 = vadd.f32 %v13416_v26, %v3014_v2  ;;  %v8410_v34 = vor.u32 %v8731_v49, %v8407_v20  ;;  %v8715_v20 = vld [vmem:[#allocation5 + $0xd4] sm:$0xf] }
 0x8a1   :  { %v4913_v45 = vadd.f32 %v4912_v46, %v4824_v44  ;;  %v13417_v46 = vld [vmem:[#allocation201_spill] sm:$0xff]  ;;  %v13419_v44 = vld [vmem:[#allocation82_spill] sm:$0xff] }
 0x8a2   :  { %v11774_v22 = vpop.f32.mrf.mxu3  ;;  %v5326_v9 = vmul.f32 0.2, %v5089_v47  ;;  %13415 = vst [vmem:[#allocation17_spill] sm:$0xff] %v11777_v55  ;;  %vm5198_vm0 = vcmp.gt.f32.partialorder %v5089_v47, 0.0  ;;  %v3192_v33 = vadd.f32 %v13420_v15, %v3103_v28  ;;  %6497 = vmatpush.bf16.msra.mxu2 %v8410_v34 }
 0x8a4   :  { %vm5151_vm5 = vcmp.gt.f32.partialorder %v3192_v33, 0.0 }
 0x8a5   :  { %v5001_v43 = vpop.f32.mrf.mxu2 }
 0x8a6   :  { %v5002_v39 = vadd.f32 %v5001_v43, %v4913_v45  ;;  %v4826_v10 = vpop.f32.mrf.mxu0  ;;  %v4915_v63 = vpop.f32.mrf.mxu1  ;;  %v8279_v45 = vld [vmem:[#allocation5 + $0x58] sm:$0xf0]  ;;  %v8747_v43 = vld [vmem:[#allocation5 + $0x1d4] sm:$0xf] }
 0x8a7   :  { %v4827_v58 = vadd.f32 %v4826_v10, %v11476_v7  ;;  %v5454_v7 = vsel %vm5198_vm0, %v5089_v47, %v5326_v9  ;;  %v13422_v47 = vld [vmem:[#allocation76_spill] sm:$0xff]  ;;  %v5279_v9 = vmul.f32 0.2, %v3192_v33 }
 0x8a8   :  { %v5091_v27 = vadd.f32 %v11720_v14, %v5002_v39  ;;  %v8699_v14 = vld [vmem:[#allocation5 + $0x54] sm:$0xf]  ;;  %v8471_v39 = vld [vmem:[#allocation5 + $0x1d8] sm:$0xf0] }
 0x8a9   :  { %5979 = vmatmul.bf16.gmra.mxu0 %v11777_v55  ;;  %6068 = vmatmul.bf16.gmra.mxu1 %v13417_v46  ;;  %v4916_v54 = vadd.f32 %v4915_v63, %v4827_v58  ;;  %v8282_v2 = vor.u32 %v8699_v14, %v8279_v45  ;;  %v8474_v26 = vor.u32 %v8747_v43, %v8471_v39 }
 0x8aa   :  { %vm5202_vm4 = vcmp.gt.f32.partialorder %v5091_v27, 0.0  ;;  %v5330_v24 = vmul.f32 0.2, %v5091_v27  ;;  %6157 = vmatmul.bf16.gmra.mxu2 %v13419_v44  ;;  %v11788_v25 = vpop.f32.mrf.mxu3  ;;  %v13421_v44 = vld [vmem:[#allocation71_spill] sm:$0xff] }
 0x8ab   :  { %v2752_v55 = vadd.f32 %v13421_v44, %v2663_v17  ;;  %6319 = vmatpush.bf16.msra.mxu0 %v8282_v2  ;;  %6586 = vmatpush.bf16.msra.mxu3 %v8474_v26  ;;  %v8343_v17 = vld [vmem:[#allocation5 + $0xd8] sm:$0xf0]  ;;  %v13424_v44 = vld [vmem:[#allocation77_spill] sm:$0xff] }
 0x8ac   :  { %v5458_v10 = vsel %vm5202_vm4, %v5091_v27, %v5330_v24  ;;  %v13423_v24 = vld [vmem:[#allocation175_spill] sm:$0xff] }
 0x8ad   :  { %v5004_v5 = vpop.f32.mrf.mxu2  ;;  %v11790_v46 = vpack.c.bf16 %v5458_v10, %v5454_v7  ;;  %v2841_v63 = vadd.f32 %v13422_v47, %v2752_v55  ;;  %v5275_v49 = vmul.f32 0.2, %v13423_v24  ;;  %vm5147_vm6 = vcmp.gt.f32.partialorder %v13423_v24, 0.0  ;;  %v13427_v47 = vld [vmem:[#allocation209_spill] sm:$0xff] }
 0x8ae   :  { %v5005_v35 = vadd.f32 %v5004_v5, %v4916_v54  ;;  %v4828_v28 = vpop.f32.mrf.mxu0  ;;  %v4917_v15 = vpop.f32.mrf.mxu1  ;;  %6266 = vmatmul.bf16.gmra.mxu3 %v11710_v53  ;;  %v5407_v7 = vsel %vm5151_vm5, %v3192_v33, %v5279_v9  ;;  %v8346_v54 = vor.u32 %v8715_v20, %v8343_v17  ;;  %v13426_v33 = vld [vmem:[#allocation78_spill] sm:$0xff] }
 0x8af   :  { %v4829_v27 = vadd.f32 %v4828_v28, %v11487_v31  ;;  %v2930_v14 = vadd.f32 %v13424_v44, %v2841_v63  ;;  %v5403_v39 = vsel %vm5147_vm6, %v13423_v24, %v5275_v49  ;;  %v13428_v63 = vld [vmem:[#allocation186_spill] sm:$0xff]  ;;  %v13430_v49 = vld [vmem:[#allocation191_spill] sm:$0xff] }
 0x8b0   :  { %v5094_v58 = vadd.f32 %v11734_v1, %v5005_v35  ;;  %v13425_v35 = vld [vmem:[#allocation185_spill] sm:$0xff]  ;;  %6408 = vmatpush.bf16.msra.mxu1 %v8346_v54  ;;  %v11804_v10 = vpack.c.bf16 %v5407_v7, %v5403_v39  ;;  %v13429_v24 = vld [vmem:[#allocation90_spill] sm:$0xff] }
 0x8b1   :  { %v4918_v45 = vadd.f32 %v4917_v15, %v4829_v27  ;;  %v3019_v1 = vadd.f32 %v13425_v35, %v2930_v14  ;;  %v2668_v15 = vadd.f32 %v13426_v33, %v13375_v0 }
 0x8b2   :  { %v11800_v34 = vpop.f32.mrf.mxu3  ;;  %v5334_v5 = vmul.f32 0.2, %v5094_v58  ;;  %vm5206_vm7 = vcmp.gt.f32.partialorder %v5094_v58, 0.0 }
 0x8b3   :  { %v3108_v9 = vadd.f32 %v13428_v63, %v3019_v1  ;;  %v13432_v1 = vld [vmem:[#allocation84_spill] sm:$0xff] }
 0x8b5   :  { %v5006_v55 = vpop.f32.mrf.mxu2  ;;  %v3197_v20 = vadd.f32 %v13430_v49, %v3108_v9  ;;  %v13435_v9 = vld [vmem:[#allocation194_spill] sm:$0xff] }
 0x8b6   :  { %v5007_v31 = vadd.f32 %v5006_v55, %v4918_v45  ;;  %v4831_v2 = vpop.f32.mrf.mxu0  ;;  %v4920_v43 = vpop.f32.mrf.mxu1 }
 0x8b7   :  { %v4832_v28 = vadd.f32 %v4831_v2, %v11497_v61  ;;  %v13431_v61 = vld [vmem:[#allocation79_spill] sm:$0xff]  ;;  %v5287_v39 = vmul.f32 0.2, %v3197_v20  ;;  %vm5159_vm9 = vcmp.gt.f32.partialorder %v3197_v20, 0.0 }
 0x8b8   :  { %v5096_v26 = vadd.f32 %v11746_v16, %v5007_v31  ;;  %v5462_v16 = vsel %vm5206_vm7, %v5094_v58, %v5334_v5  ;;  %v2757_v14 = vadd.f32 %v13431_v61, %v2668_v15  ;;  %v13433_v58 = vld [vmem:[#allocation184_spill] sm:$0xff]  ;;  %v13434_v5 = vld [vmem:[#allocation85_spill] sm:$0xff] }
 0x8b9   :  { %5984 = vmatmul.bf16.gmra.mxu0 %v11804_v10  ;;  %6073 = vmatmul.bf16.gmra.mxu1 %v13427_v47  ;;  %v4921_v17 = vadd.f32 %v4920_v43, %v4832_v28  ;;  %v5283_v43 = vmul.f32 0.2, %v13433_v58  ;;  %vm5155_vm10 = vcmp.gt.f32.partialorder %v13433_v58, 0.0  ;;  %v5415_v15 = vsel %vm5159_vm9, %v3197_v20, %v5287_v39 }
 0x8ba   :  { %vm5210_vm8 = vcmp.gt.f32.partialorder %v5096_v26, 0.0  ;;  %v5338_v27 = vmul.f32 0.2, %v5096_v26  ;;  %6162 = vmatmul.bf16.gmra.mxu2 %v13429_v24  ;;  %v11816_v7 = vpop.f32.mrf.mxu3  ;;  %v2846_v2 = vadd.f32 %v13432_v1, %v2757_v14  ;;  %v13439_v1 = vld [vmem:[#allocation86_spill] sm:$0xff] }
 0x8bc   :  { %v5466_v44 = vsel %vm5210_vm8, %v5096_v26, %v5338_v27  ;;  %v2935_v26 = vadd.f32 %v13434_v5, %v2846_v2  ;;  %v2673_v2 = vadd.f32 %v13439_v1, %v13375_v0 }
 0x8bd   :  { %v5009_v45 = vpop.f32.mrf.mxu2  ;;  %v11818_v54 = vpack.c.bf16 %v5466_v44, %v5462_v16 }
 0x8be   :  { %v5010_v55 = vadd.f32 %v5009_v45, %v4921_v17  ;;  %v4833_v35 = vpop.f32.mrf.mxu0  ;;  %v4922_v31 = vpop.f32.mrf.mxu1  ;;  %6271 = vmatmul.bf16.gmra.mxu3 %v11736_v36  ;;  %v3024_v27 = vadd.f32 %v13435_v9, %v2935_v26  ;;  %v8399_v26 = vld [vmem:[#allocation5 + $0x148] sm:$0xf0] }
 0x8bf   :  { %v4834_v63 = vadd.f32 %v4833_v35, %v11508_v32  ;;  %v5411_v32 = vsel %vm5155_vm10, %v13433_v58, %v5283_v43  ;;  %v13437_v35 = vld [vmem:[#allocation195_spill] sm:$0xff]  ;;  %v8729_v58 = vld [vmem:[#allocation5 + $0x144] sm:$0xf]  ;;  %v13441_v43 = vld [vmem:[#allocation200_spill] sm:$0xff] }
 0x8c0   :  { %v5099_v33 = vadd.f32 %v11762_v48, %v5010_v55  ;;  %v11831_v14 = vpack.c.bf16 %v5415_v15, %v5411_v32  ;;  %v3113_v20 = vadd.f32 %v13437_v35, %v3024_v27  ;;  %v8402_v9 = vor.u32 %v8729_v58, %v8399_v26  ;;  %v8713_v26 = vld [vmem:[#allocation5 + $0xc4] sm:$0xf] }
 0x8c1   :  { %v4923_v28 = vadd.f32 %v4922_v31, %v4834_v63  ;;  %v13438_v31 = vld [vmem:[#allocation217_spill] sm:$0xff]  ;;  %v13440_v63 = vld [vmem:[#allocation98_spill] sm:$0xff] }
 0x8c2   :  { %v11828_v17 = vpop.f32.mrf.mxu3  ;;  %v5342_v61 = vmul.f32 0.2, %v5099_v33  ;;  %13436 = vst [vmem:[#allocation18_spill] sm:$0xff] %v11831_v14  ;;  %vm5214_vm11 = vcmp.gt.f32.partialorder %v5099_v33, 0.0  ;;  %v3202_v5 = vadd.f32 %v13441_v43, %v3113_v20  ;;  %6498 = vmatpush.bf16.msra.mxu2 %v8402_v9  ;;  %v13447_v9 = vld [vmem:[#allocation203_spill] sm:$0xff] }
 0x8c4   :  { %vm5167_vm13 = vcmp.gt.f32.partialorder %v3202_v5, 0.0 }
 0x8c5   :  { %v5011_v49 = vpop.f32.mrf.mxu2 }
 0x8c6   :  { %v5012_v16 = vadd.f32 %v5011_v49, %v4923_v28  ;;  %v4836_v48 = vpop.f32.mrf.mxu0  ;;  %v4925_v44 = vpop.f32.mrf.mxu1  ;;  %v8271_v28 = vld [vmem:[#allocation5 + $0x48] sm:$0xf0]  ;;  %v8745_v49 = vld [vmem:[#allocation5 + $0x1c4] sm:$0xf] }
 0x8c7   :  { %v4837_v55 = vadd.f32 %v4836_v48, %v11518_v13  ;;  %v5470_v13 = vsel %vm5214_vm11, %v5099_v33, %v5342_v61  ;;  %v13444_v33 = vld [vmem:[#allocation92_spill] sm:$0xff]  ;;  %v5295_v61 = vmul.f32 0.2, %v3202_v5 }
 0x8c8   :  { %v5101_v45 = vadd.f32 %v11774_v22, %v5012_v16  ;;  %v8697_v22 = vld [vmem:[#allocation5 + $0x44] sm:$0xf]  ;;  %v8463_v16 = vld [vmem:[#allocation5 + $0x1c8] sm:$0xf0] }
 0x8c9   :  { %5989 = vmatmul.bf16.gmra.mxu0 %v11831_v14  ;;  %6078 = vmatmul.bf16.gmra.mxu1 %v13438_v31  ;;  %v4926_v15 = vadd.f32 %v4925_v44, %v4837_v55  ;;  %v8274_v27 = vor.u32 %v8697_v22, %v8271_v28  ;;  %v8466_v35 = vor.u32 %v8745_v49, %v8463_v16  ;;  %v8832_v22 = vmov 0  }
 0x8ca   :  { %vm5218_vm12 = vcmp.gt.f32.partialorder %v5101_v45, 0.0  ;;  %v5346_v39 = vmul.f32 0.2, %v5101_v45  ;;  %6167 = vmatmul.bf16.gmra.mxu2 %v13440_v63  ;;  %v11842_v1 = vpop.f32.mrf.mxu3  ;;  %v13443_v63 = vld [vmem:[#allocation87_spill] sm:$0xff]  ;;  %8762 = vset.pattern.permute.xlu0 %v8832_v22 }
 0x8cb   :  { %v2762_v31 = vadd.f32 %v13443_v63, %v2673_v2  ;;  %6320 = vmatpush.bf16.msra.mxu0 %v8274_v27  ;;  %6587 = vmatpush.bf16.msra.mxu3 %v8466_v35  ;;  %v7003_v2 = vld [vmem:[%s12532_s5 + $0x50] sm:$0xff] }
 0x8cc   :  { %v5474_v48 = vsel %vm5218_vm12, %v5101_v45, %v5346_v39  ;;  %v13445_v39 = vld [vmem:[#allocation193_spill] sm:$0xff]  ;;  %8761 = vset.pattern.permute.xlu2 %v8832_v22  ;;  %v8335_v63 = vld [vmem:[#allocation5 + $0xc8] sm:$0xf0]  ;;  %7077 = vperm.xlu0 %8762, %v7003_v2  }
 0x8cd   :  { %v5014_v32 = vpop.f32.mrf.mxu2  ;;  %v11844_v14 = vpack.c.bf16 %v5474_v48, %v5470_v13  ;;  %v2851_v44 = vadd.f32 %v13444_v33, %v2762_v31  ;;  %v5291_v58 = vmul.f32 0.2, %v13445_v39  ;;  %vm5163_vm14 = vcmp.gt.f32.partialorder %v13445_v39, 0.0  ;;  %8760 = vset.pattern.permute.xlu1 %v8832_v22  ;;  %v13452_v22 = vld [vmem:[#allocation208_spill] sm:$0xff] }
 0x8ce   :  { %v5015_v36 = vadd.f32 %v5014_v32, %v4926_v15  ;;  %v4838_v20 = vpop.f32.mrf.mxu0  ;;  %v4927_v43 = vpop.f32.mrf.mxu1  ;;  %6276 = vmatmul.bf16.gmra.mxu3 %v11764_v18  ;;  %v5423_v31 = vsel %vm5167_vm13, %v3202_v5, %v5295_v61  ;;  %v8338_v28 = vor.u32 %v8713_v26, %v8335_v63  ;;  %v13449_v61 = vld [vmem:[#allocation218_spill] sm:$0xff] }
 0x8cf   :  { %13442 = vst [vmem:[#allocation134_spill] sm:$0xff] %v11844_v14  ;;  %v4839_v45 = vadd.f32 %v4838_v20, %v11529_v51  ;;  %v5419_v32 = vsel %vm5163_vm14, %v13445_v39, %v5291_v58  ;;  %v13451_v58 = vld [vmem:[#allocation108_spill] sm:$0xff] }
 0x8d0   :  { %v5104_v55 = vadd.f32 %v11788_v25, %v5015_v36  ;;  %v13446_v36 = vld [vmem:[#allocation93_spill] sm:$0xff]  ;;  %6409 = vmatpush.bf16.msra.mxu1 %v8338_v28  ;;  %v11861_v35 = vpack.c.bf16 %v5423_v31, %v5419_v32 }
 0x8d1   :  { %v2940_v25 = vadd.f32 %v13446_v36, %v2851_v44  ;;  %v4928_v51 = vadd.f32 %v4927_v43, %v4839_v45  ;;  %v13448_v43 = vld [vmem:[#allocation94_spill] sm:$0xff]  ;;  %v13450_v45 = vld [vmem:[#allocation204_spill] sm:$0xff] }
 0x8d2   :  { %v11857_v15 = vpop.f32.mrf.mxu3  ;;  %v5350_v20 = vmul.f32 0.2, %v5104_v55  ;;  %v2678_v44 = vadd.f32 %v13448_v43, %v13375_v0  ;;  %vm5222_vm15 = vcmp.gt.f32.partialorder %v5104_v55, 0.0 }
 0x8d3   :  { %v3029_v27 = vadd.f32 %v13447_v9, %v2940_v25 }
 0x8d5   :  { %v5016_v13 = vpop.f32.mrf.mxu2  ;;  %v3118_v26 = vadd.f32 %v13450_v45, %v3029_v27  ;;  %v13454_v27 = vld [vmem:[#allocation100_spill] sm:$0xff] }
 0x8d6   :  { %v5017_v49 = vadd.f32 %v5016_v13, %v4928_v51  ;;  %v4841_v16 = vpop.f32.mrf.mxu0  ;;  %v4930_v48 = vpop.f32.mrf.mxu1 }
 0x8d7   :  { %v4842_v5 = vadd.f32 %v4841_v16, %v11539_v57  ;;  %v3207_v2 = vadd.f32 %v13452_v22, %v3118_v26  ;;  %v13453_v57 = vld [vmem:[#allocation95_spill] sm:$0xff] }
 0x8d8   :  { %v5106_v33 = vadd.f32 %v11800_v34, %v5017_v49  ;;  %v5478_v34 = vsel %vm5222_vm15, %v5104_v55, %v5350_v20  ;;  %v2767_v25 = vadd.f32 %v13453_v57, %v2678_v44  ;;  %v13455_v55 = vld [vmem:[#allocation202_spill] sm:$0xff]  ;;  %v13456_v20 = vld [vmem:[#allocation101_spill] sm:$0xff]  ;;  %v13457_v26 = vld [vmem:[#allocation211_spill] sm:$0xff] }
 0x8d9   :  { %5994 = vmatmul.bf16.gmra.mxu0 %v11861_v35  ;;  %6083 = vmatmul.bf16.gmra.mxu1 %v13449_v61  ;;  %v4931_v63 = vadd.f32 %v4930_v48, %v4842_v5  ;;  %v5303_v32 = vmul.f32 0.2, %v3207_v2  ;;  %vm5175_vm2 = vcmp.gt.f32.partialorder %v3207_v2, 0.0  ;;  %v5299_v48 = vmul.f32 0.2, %v13455_v55  ;;  %v6994_v57 = vld [vmem:[%s12532_s5 + $0x8] sm:$0xff] }
 0x8da   :  { %vm5226_vm1 = vcmp.gt.f32.partialorder %v5106_v33, 0.0  ;;  %v5354_v39 = vmul.f32 0.2, %v5106_v33  ;;  %6172 = vmatmul.bf16.gmra.mxu2 %v13451_v58  ;;  %v11873_v31 = vpop.f32.mrf.mxu3  ;;  %v2856_v16 = vadd.f32 %v13454_v27, %v2767_v25  ;;  %vm5171_vm3 = vcmp.gt.f32.partialorder %v13455_v55, 0.0  ;;  %7032 = vperm.xlu2 %8761, %v6994_v57   ;;  %v13460_v27 = vld [vmem:[#allocation147_spill] sm:$0xff] }
 0x8db   :  { %v5431_v44 = vsel %vm5175_vm2, %v3207_v2, %v5303_v32 }
 0x8dc   :  { %v5482_v36 = vsel %vm5226_vm1, %v5106_v33, %v5354_v39  ;;  %v2945_v33 = vadd.f32 %v13456_v20, %v2856_v16  ;;  %v13461_v16 = vld [vmem:[#allocation102_spill] sm:$0xff] }
 0x8dd   :  { %v5019_v51 = vpop.f32.mrf.mxu2  ;;  %v11875_v28 = vpack.c.bf16 %v5482_v36, %v5478_v34  ;;  %v2683_v32 = vadd.f32 %v13461_v16, %v13375_v0 }
 0x8de   :  { %v5020_v13 = vadd.f32 %v5019_v51, %v4931_v63  ;;  %v4843_v9 = vpop.f32.mrf.mxu0  ;;  %v4932_v49 = vpop.f32.mrf.mxu1  ;;  %6281 = vmatmul.bf16.gmra.mxu3 %v11790_v46  ;;  %v3034_v39 = vadd.f32 %v13457_v26, %v2945_v33  ;;  %v8391_v33 = vld [vmem:[#allocation5 + $0x138] sm:$0xf0] }
 0x8df   :  { %v4844_v45 = vadd.f32 %v4843_v9, %v11550_v6  ;;  %v5427_v6 = vsel %vm5171_vm3, %v13455_v55, %v5299_v48  ;;  %v13459_v9 = vld [vmem:[#allocation212_spill] sm:$0xff]  ;;  %v8727_v55 = vld [vmem:[#allocation5 + $0x134] sm:$0xf] }
 0x8e0   :  { %v5109_v43 = vadd.f32 %v11816_v7, %v5020_v13  ;;  %v11891_v51 = vpack.c.bf16 %v5431_v44, %v5427_v6  ;;  %v13462_v48 = vld [vmem:[#allocation216_spill] sm:$0xff]  ;;  %v8394_v26 = vor.u32 %v8727_v55, %v8391_v33  ;;  %v8711_v55 = vld [vmem:[#allocation5 + $0xb4] sm:$0xf] }
 0x8e1   :  { %v4933_v5 = vadd.f32 %v4932_v49, %v4844_v45  ;;  %v3123_v49 = vadd.f32 %v13459_v9, %v3034_v39  ;;  %v8327_v33 = vld [vmem:[#allocation5 + $0xb8] sm:$0xf0] }
 0x8e2   :  { %v11885_v63 = vpop.f32.mrf.mxu3  ;;  %v5358_v25 = vmul.f32 0.2, %v5109_v43  ;;  %13458 = vst [vmem:[#allocation21_spill] sm:$0xff] %v11891_v51  ;;  %vm5230_vm0 = vcmp.gt.f32.partialorder %v5109_v43, 0.0  ;;  %6499 = vmatpush.bf16.msra.mxu2 %v8394_v26  ;;  %v8330_v26 = vor.u32 %v8711_v55, %v8327_v33  ;;  %v13472_v55 = vld [vmem:[#allocation222_spill] sm:$0xff] }
 0x8e3   :  { %v3212_v20 = vadd.f32 %v13462_v48, %v3123_v49 }
 0x8e4   :  { %6410 = vmatpush.bf16.msra.mxu1 %v8330_v26 }
 0x8e5   :  { %v5021_v22 = vpop.f32.mrf.mxu2  ;;  %vm5183_vm5 = vcmp.gt.f32.partialorder %v3212_v20, 0.0 }
 0x8e6   :  { %v5022_v34 = vadd.f32 %v5021_v22, %v4933_v5  ;;  %v4846_v7 = vpop.f32.mrf.mxu0  ;;  %v4935_v36 = vpop.f32.mrf.mxu1  ;;  %v8263_v5 = vld [vmem:[#allocation5 + $0x38] sm:$0xf0]  ;;  %v8743_v22 = vld [vmem:[#allocation5 + $0x1b4] sm:$0xf] }
 0x8e7   :  { %v4847_v13 = vadd.f32 %v4846_v7, %v11560_v30  ;;  %v5486_v30 = vsel %vm5230_vm0, %v5109_v43, %v5358_v25  ;;  %v6997_v43 = vld [vmem:[%s12532_s5 + $0x20] sm:$0xff] }
 0x8e8   :  { %v5111_v2 = vadd.f32 %v11828_v17, %v5022_v34  ;;  %v8695_v17 = vld [vmem:[#allocation5 + $0x34] sm:$0xf]  ;;  %v8455_v34 = vld [vmem:[#allocation5 + $0x1b8] sm:$0xf0]  ;;  %7047 = vperm.xlu2 %8761, %v6997_v43   ;;  %v13468_v43 = vld [vmem:[#allocation110_spill] sm:$0xff] }
 0x8e9   :  { %5999 = vmatmul.bf16.gmra.mxu0 %v11891_v51  ;;  %6088 = vmatmul.bf16.gmra.mxu1 %v13460_v27  ;;  %v4936_v44 = vadd.f32 %v4935_v36, %v4847_v13  ;;  %v8266_v39 = vor.u32 %v8695_v17, %v8263_v5  ;;  %v8458_v57 = vor.u32 %v8743_v22, %v8455_v34  ;;  %v13464_v36 = vld [vmem:[#allocation104_spill] sm:$0xff]  ;;  %v13466_v17 = vld [vmem:[#allocation105_spill] sm:$0xff] }
 0x8ea   :  { %vm5234_vm4 = vcmp.gt.f32.partialorder %v5111_v2, 0.0  ;;  %v5362_v45 = vmul.f32 0.2, %v5111_v2  ;;  %6177 = vmatmul.bf16.gmra.mxu2 %v11396_v12  ;;  %v11902_v9 = vpop.f32.mrf.mxu3  ;;  %v13463_v12 = vld [vmem:[#allocation103_spill] sm:$0xff] }
 0x8eb   :  { %v2772_v51 = vadd.f32 %v13463_v12, %v2683_v32  ;;  %6321 = vmatpush.bf16.msra.mxu0 %v8266_v39  ;;  %6588 = vmatpush.bf16.msra.mxu3 %v8458_v57  ;;  %v13465_v12 = vld [vmem:[#allocation210_spill] sm:$0xff] }
 0x8ec   :  { %v5490_v7 = vsel %vm5234_vm4, %v5111_v2, %v5362_v45  ;;  %v5311_v2 = vmul.f32 0.2, %v3212_v20  ;;  %v5307_v32 = vmul.f32 0.2, %v13465_v12  ;;  %vm5179_vm6 = vcmp.gt.f32.partialorder %v13465_v12, 0.0 }
 0x8ed   :  { %v5024_v6 = vpop.f32.mrf.mxu2  ;;  %v11904_v16 = vpack.c.bf16 %v5490_v7, %v5486_v30  ;;  %v2861_v25 = vadd.f32 %v13464_v36, %v2772_v51  ;;  %v2688_v36 = vadd.f32 %v13468_v43, %v13375_v0 }
 0x8ee   :  { %v5025_v27 = vadd.f32 %v5024_v6, %v4936_v44  ;;  %v4848_v49 = vpop.f32.mrf.mxu0  ;;  %v4937_v48 = vpop.f32.mrf.mxu1  ;;  %6286 = vmatmul.bf16.gmra.mxu3 %v11818_v54  ;;  %v5439_v44 = vsel %vm5183_vm5, %v3212_v20, %v5311_v2  ;;  %v5435_v7 = vsel %vm5179_vm6, %v13465_v12, %v5307_v32  ;;  %v6999_v6 = vld [vmem:[%s12532_s5 + $0x30] sm:$0xff]  ;;  %v13471_v32 = vld [vmem:[#allocation116_spill] sm:$0xff] }
 0x8ef   :  { %v4849_v45 = vadd.f32 %v4848_v49, %v11571_v37  ;;  %v2950_v5 = vadd.f32 %v13466_v17, %v2861_v25  ;;  %v11924_v57 = vpack.c.bf16 %v5439_v44, %v5435_v7  ;;  %v13469_v25 = vld [vmem:[#allocation148_spill] sm:$0xff]  ;;  %v13470_v2 = vld [vmem:[#allocation221_spill] sm:$0xff] }
 0x8f0   :  { %v5114_v13 = vadd.f32 %v11842_v1, %v5025_v27  ;;  %v13467_v1 = vld [vmem:[#allocation220_spill] sm:$0xff]  ;;  %7057 = vperm.xlu2 %8761, %v6999_v6  }
 0x8f1   :  { %v4938_v30 = vadd.f32 %v4937_v48, %v4849_v45  ;;  %v3039_v27 = vadd.f32 %v13467_v1, %v2950_v5  ;;  %v13474_v7 = vld [vmem:[#allocation112_spill] sm:$0xff] }
 0x8f2   :  { %v11917_v39 = vpop.f32.mrf.mxu3  ;;  %v5366_v20 = vmul.f32 0.2, %v5114_v13  ;;  %vm5238_vm7 = vcmp.gt.f32.partialorder %v5114_v13, 0.0 }
 0x8f3   :  { %v3128_v45 = vadd.f32 %v13470_v2, %v3039_v27  ;;  %v7001_v27 = vld [vmem:[%s12532_s5 + $0x40] sm:$0xff] }
 0x8f5   :  { %v5026_v51 = vpop.f32.mrf.mxu2  ;;  %v3217_v33 = vadd.f32 %v13472_v55, %v3128_v45 }
 0x8f6   :  { %v5027_v37 = vadd.f32 %v5026_v51, %v4938_v30  ;;  %v4851_v22 = vpop.f32.mrf.mxu0  ;;  %v4940_v34 = vpop.f32.mrf.mxu1 }
 0x8f7   :  { %v4852_v48 = vadd.f32 %v4851_v22, %v11581_v42  ;;  %v13473_v42 = vld [vmem:[#allocation111_spill] sm:$0xff]  ;;  %vm5191_vm9 = vcmp.gt.f32.partialorder %v3217_v33, 0.0 }
 0x8f8   :  { %v5116_v49 = vadd.f32 %v11857_v15, %v5027_v37  ;;  %v5494_v15 = vsel %vm5238_vm7, %v5114_v13, %v5366_v20  ;;  %v2777_v30 = vadd.f32 %v13473_v42, %v2688_v36  ;;  %7067 = vperm.xlu2 %8761, %v7001_v27   ;;  %v13476_v36 = vld [vmem:[#allocation113_spill] sm:$0xff] }
 0x8f9   :  { %6004 = vmatmul.bf16.gmra.mxu0 %v11924_v57  ;;  %6093 = vmatmul.bf16.gmra.mxu1 %v13469_v25  ;;  %v4941_v17 = vadd.f32 %v4940_v34, %v4852_v48  ;;  %v5319_v34 = vmul.f32 0.2, %v3217_v33  ;;  %v13475_v48 = vld [vmem:[#allocation219_spill] sm:$0xff] }
 0x8fa   :  { %vm5242_vm8 = vcmp.gt.f32.partialorder %v5116_v49, 0.0  ;;  %v5370_v12 = vmul.f32 0.2, %v5116_v49  ;;  %6182 = vmatmul.bf16.gmra.mxu2 %v13471_v32  ;;  %v11936_v26 = vpop.f32.mrf.mxu3  ;;  %v2866_v6 = vadd.f32 %v13474_v7, %v2777_v30  ;;  %v5315_v43 = vmul.f32 0.2, %v13475_v48  ;;  %v13479_v7 = vld [vmem:[#allocation117_spill] sm:$0xff] }
 0x8fb   :  { %vm5187_vm10 = vcmp.gt.f32.partialorder %v13475_v48, 0.0  ;;  %v5447_v55 = vsel %vm5191_vm9, %v3217_v33, %v5319_v34  ;;  %v13480_v34 = vld [vmem:[#allocation228_spill] sm:$0xff] }
 0x8fc   :  { %v5498_v5 = vsel %vm5242_vm8, %v5116_v49, %v5370_v12  ;;  %v5635_v49 = vld [vmem:[%s12531_s4] sm:$0x3]  ;;  %v2955_v2 = vadd.f32 %v13476_v36, %v2866_v6  ;;  %v2693_v6 = vadd.f32 %v13479_v7, %v13375_v0  ;;  %v13482_v36 = vld [vmem:[#allocation229_spill] sm:$0xff]  ;;  %v13483_v7 = vld [vmem:[#allocation118_spill] sm:$0xff] }
 0x8fd   :  { %v5029_v44 = vpop.f32.mrf.mxu2  ;;  %v11938_v51 = vpack.c.bf16 %v5498_v5, %v5494_v15  ;;  %v11953_v12 = vperm.slane %v5635_v49, 0  ;;  %v13481_v49 = vld [vmem:[#allocation153_spill] sm:$0xff] }
 0x8fe   :  { %v5030_v1 = vadd.f32 %v5029_v44, %v4941_v17  ;;  %v4853_v37 = vpop.f32.mrf.mxu0  ;;  %v4942_v22 = vpop.f32.mrf.mxu1  ;;  %6291 = vmatmul.bf16.gmra.mxu3 %v11844_v14  ;;  %v5443_v44 = vsel %vm5187_vm10, %v13475_v48, %v5315_v43  ;;  %v8725_v43 = vld [vmem:[#allocation5 + $0x124] sm:$0xf] }
 0x8ff   :  { %v4854_v20 = vadd.f32 %v4853_v37, %v11591_v8  ;;  %v11962_v27 = vpack.c.bf16 %v5447_v55, %v5443_v44  ;;  %v8255_v55 = vld [vmem:[#allocation5 + $0x28] sm:$0xf0]  ;;  %v8741_v44 = vld [vmem:[#allocation5 + $0x1a4] sm:$0xf] }
 0x900   :  { %v5119_v13 = vadd.f32 %v11873_v31, %v5030_v1  ;;  %v13477_v31 = vld [vmem:[#allocation227_spill] sm:$0xff] }
 0x901   :  { %v4943_v45 = vadd.f32 %v4942_v22, %v4854_v20  ;;  %v3044_v17 = vadd.f32 %v13477_v31, %v2955_v2  ;;  %v7004_v1 = vld [vmem:[%s12532_s5 + $0x58] sm:$0xff]  ;;  %13478 = vst [vmem:[#allocation22_spill] sm:$0xff] %v11962_v27 }
 0x902   :  { %v11956_v15 = vpop.f32.mrf.mxu3  ;;  %v5374_v37 = vmul.f32 0.2, %v5119_v13  ;;  %7082 = vperm.xlu2 %8761, %v7004_v1   ;;  %vm5246_vm11 = vcmp.gt.f32.partialorder %v5119_v13, 0.0 }
 0x903   :  { %v3133_v20 = vadd.f32 %v13480_v34, %v3044_v17  ;;  %v8447_v17 = vld [vmem:[#allocation5 + $0x1a8] sm:$0xf0]  ;;  %v2782_v34 = vadd.f32 %v13483_v7, %v2693_v6 }
 0x904   :  { %v5502_v31 = vsel %vm5246_vm11, %v5119_v13, %v5374_v37  ;;  %v7006_v13 = vld [vmem:[%s12532_s5 + $0x68] sm:$0xff] }
 0x905   :  { %v5031_v8 = vpop.f32.mrf.mxu2  ;;  %v3222_v2 = vadd.f32 %v13482_v36, %v3133_v20 }
 0x906   :  { %v5032_v5 = vadd.f32 %v5031_v8, %v4943_v45  ;;  %v5970_v42 = vpop.f32.mrf.mxu0  ;;  %v6059_v30 = vpop.f32.mrf.mxu1  ;;  %v8383_v45 = vld [vmem:[#allocation5 + $0x128] sm:$0xf0] }
 0x907   :  { %v5971_v22 = vadd.f32 %v5970_v42, %v11953_v12  ;;  %vm5199_vm13 = vcmp.gt.f32.partialorder %v3222_v2, 0.0 }
 0x908   :  { %v5121_v33 = vadd.f32 %v11885_v63, %v5032_v5  ;;  %v8693_v63 = vld [vmem:[#allocation5 + $0x24] sm:$0xf]  ;;  %v8386_v5 = vor.u32 %v8725_v43, %v8383_v45 }
 0x909   :  { %6009 = vmatmul.bf16.gmra.mxu0 %v11962_v27  ;;  %6098 = vmatmul.bf16.gmra.mxu1 %v13481_v49  ;;  %v6060_v8 = vadd.f32 %v6059_v30, %v5971_v22  ;;  %v8258_v42 = vor.u32 %v8693_v63, %v8255_v55  ;;  %v8450_v49 = vor.u32 %v8741_v44, %v8447_v17  ;;  %v13484_v30 = vld [vmem:[#allocation121_spill] sm:$0xff]  ;;  %v13486_v63 = vld [vmem:[#allocation123_spill] sm:$0xff] }
 0x90a   :  { %vm5250_vm12 = vcmp.gt.f32.partialorder %v5121_v33, 0.0  ;;  %v5378_v48 = vmul.f32 0.2, %v5121_v33  ;;  %6187 = vmatmul.bf16.gmra.mxu2 %v11439_v21  ;;  %v11974_v14 = vpop.f32.mrf.mxu3  ;;  %v2871_v37 = vadd.f32 %v13484_v30, %v2782_v34  ;;  %7092 = vperm.xlu2 %8761, %v7006_v13   ;;  %v8709_v45 = vld [vmem:[#allocation5 + $0xa4] sm:$0xf]  ;;  %v13487_v44 = vld [vmem:[#allocation231_spill] sm:$0xff] }
 0x90b   :  { %6500 = vmatpush.bf16.msra.mxu2 %v8386_v5  ;;  %6322 = vmatpush.bf16.msra.mxu0 %v8258_v42  ;;  %v7008_v13 = vld [vmem:[%s12532_s5 + $0x78] sm:$0xff] }
 0x90c   :  { %v5506_v1 = vsel %vm5250_vm12, %v5121_v33, %v5378_v48  ;;  %6589 = vmatpush.bf16.msra.mxu3 %v8450_v49  ;;  %v5327_v33 = vmul.f32 0.2, %v3222_v2  ;;  %v13485_v48 = vld [vmem:[#allocation226_spill] sm:$0xff]  ;;  %v2960_v55 = vadd.f32 %v13486_v63, %v2871_v37  ;;  %v13488_v37 = vld [vmem:[#allocation124_spill] sm:$0xff] }
 0x90d   :  { %v6148_v27 = vpop.f32.mrf.mxu2  ;;  %v11976_v21 = vpack.c.bf16 %v5506_v1, %v5502_v31  ;;  %v5323_v43 = vmul.f32 0.2, %v13485_v48  ;;  %vm5195_vm15 = vcmp.gt.f32.partialorder %v13485_v48, 0.0  ;;  %v8319_v31 = vld [vmem:[#allocation5 + $0xa8] sm:$0xf0] }
 0x90e   :  { %v6149_v32 = vadd.f32 %v6148_v27, %v6060_v8  ;;  %v5972_v20 = vpop.f32.mrf.mxu0  ;;  %v6061_v36 = vpop.f32.mrf.mxu1  ;;  %6296 = vmatmul.bf16.gmra.mxu3 %v11875_v28  ;;  %v5455_v5 = vsel %vm5199_vm13, %v3222_v2, %v5327_v33  ;;  %v8322_v42 = vor.u32 %v8709_v45, %v8319_v31  ;;  %v3049_v17 = vadd.f32 %v13487_v44, %v2960_v55  ;;  %v7010_v44 = vld [vmem:[%s12532_s5 + $0x88] sm:$0xff] }
 0x90f   :  { %v5973_v6 = vadd.f32 %v5972_v20, %v11953_v12  ;;  %v5451_v20 = vsel %vm5195_vm15, %v13485_v48, %v5323_v43  ;;  %v2698_v33 = vadd.f32 %v13488_v37, %v13375_v0  ;;  %v13495_v37 = vld [vmem:[#allocation130_spill] sm:$0xff] }
 0x910   :  { %v6238_v22 = vadd.f32 %v11902_v9, %v6149_v32  ;;  %6411 = vmatpush.bf16.msra.mxu1 %v8322_v42 }
 0x911   :  { %v6062_v49 = vadd.f32 %v6061_v36, %v5973_v6  ;;  %v11995_v36 = vpack.c.bf16 %v5455_v5, %v5451_v20  ;;  %v13490_v6 = vld [vmem:[#allocation232_spill] sm:$0xff] }
 0x912   :  { %v6737_v27 = vmul.f32 0.2, %v6238_v22  ;;  %vm6673_vm14 = vcmp.gt.f32.partialorder %v6238_v22, 0.0  ;;  %v11988_v32 = vpop.f32.mrf.mxu3  ;;  %7102 = vperm.xlu2 %8761, %v7008_v13   ;;  %v3138_v48 = vadd.f32 %v13490_v6, %v3049_v17  ;;  %v13493_v17 = vld [vmem:[#allocation129_spill] sm:$0xff]  ;;  %v13494_v13 = vld [vmem:[#allocation230_spill] sm:$0xff] }
 0x913   :  { %vm5203_vm0 = vcmp.gt.f32.partialorder %v13494_v13, 0.0 }
 0x914   :  { %v6801_v8 = vsel %vm6673_vm14, %v6238_v22, %v6737_v27  ;;  %v13489_v22 = vld [vmem:[#allocation11_spill] sm:$0xff]  ;;  %v13491_v27 = vld [vmem:[#allocation233_spill] sm:$0xff] }
 0x915   :  { %v6150_v9 = vpop.f32.mrf.mxu2  ;;  %6865 = vxpose.xlu0.b32.start [1/16] %v6801_v8, 128  ;;  %v3227_v45 = vadd.f32 %v13491_v27, %v3138_v48  ;;  %v13496_v27 = vld [vmem:[#allocation235_spill] sm:$0xff] }
 0x916   :  { %v6151_v1 = vadd.f32 %v6150_v9, %v6062_v49  ;;  %v5975_v7 = vpop.f32.mrf.mxu0  ;;  %v6064_v34 = vpop.f32.mrf.mxu1 }
 0x917   :  { %v5976_v30 = vadd.f32 %v5975_v7, %v11953_v12  ;;  %v5335_v7 = vmul.f32 0.2, %v3227_v45  ;;  %vm5207_vm2 = vcmp.gt.f32.partialorder %v3227_v45, 0.0 }
 0x918   :  { %v6240_v2 = vadd.f32 %v11917_v39, %v6151_v1  ;;  %v13492_v39 = vld [vmem:[#allocation128_spill] sm:$0xff] }
 0x919   :  { %6014 = vmatmul.bf16.gmra.mxu0 %v11995_v36  ;;  %6103 = vmatmul.bf16.gmra.mxu1 %v13489_v22  ;;  %v6065_v63 = vadd.f32 %v6064_v34, %v5976_v30  ;;  %v2787_v31 = vadd.f32 %v13492_v39, %v2698_v33 }
 0x91a   :  { %v6739_v43 = vmul.f32 0.2, %v6240_v2  ;;  %6192 = vmatmul.bf16.gmra.mxu2 %v11460_v3  ;;  %vm6675_vm1 = vcmp.gt.f32.partialorder %v6240_v2, 0.0  ;;  %v12007_v8 = vpop.f32.mrf.mxu3  ;;  %7112 = vperm.xlu2 %8761, %v7010_v44  }
 0x91b   :  { %v2876_v1 = vadd.f32 %v13493_v17, %v2787_v31  ;;  %v13498_v17 = vld [vmem:[#allocation133_spill] sm:$0xff] }
 0x91c   :  { %v6803_v55 = vsel %vm6675_vm1, %v6240_v2, %v6739_v43  ;;  %v5331_v2 = vmul.f32 0.2, %v13494_v13  ;;  %v5463_v43 = vsel %vm5207_vm2, %v3227_v45, %v5335_v7  ;;  %v13499_v7 = vld [vmem:[#allocation236_spill] sm:$0xff] }
 0x91d   :  { %v6153_v49 = vpop.f32.mrf.mxu2  ;;  %6866 = vxpose.xlu0.b32.cont [2/16] %v6803_v55, 128  ;;  %v2965_v33 = vadd.f32 %v13495_v37, %v2876_v1  ;;  %v2703_v1 = vadd.f32 %v13498_v17, %v13375_v0  ;;  %v13502_v37 = vld [vmem:[#allocation237_spill] sm:$0xff] }
 0x91e   :  { %v6154_v5 = vadd.f32 %v6153_v49, %v6065_v63  ;;  %v5977_v42 = vpop.f32.mrf.mxu0  ;;  %v6066_v9 = vpop.f32.mrf.mxu1  ;;  %6301 = vmatmul.bf16.gmra.mxu3 %v11904_v16 }
 0x91f   :  { %v5978_v20 = vadd.f32 %v5977_v42, %v11953_v12  ;;  %v3054_v63 = vadd.f32 %v13496_v27, %v2965_v33  ;;  %v7012_v42 = vld [vmem:[%s12532_s5 + $0x98] sm:$0xff] }
 0x920   :  { %v6243_v34 = vadd.f32 %v11936_v26, %v6154_v5  ;;  %v5459_v5 = vsel %vm5203_vm0, %v13494_v13, %v5331_v2  ;;  %v13501_v2 = vld [vmem:[#allocation10_spill] sm:$0xff] }
 0x921   :  { %v6067_v6 = vadd.f32 %v6066_v9, %v5978_v20  ;;  %v12026_v44 = vpack.c.bf16 %v5463_v43, %v5459_v5  ;;  %v13500_v20 = vld [vmem:[#allocation15_spill] sm:$0xff] }
 0x922   :  { %vm6677_vm3 = vcmp.gt.f32.partialorder %v6243_v34, 0.0  ;;  %v6741_v30 = vmul.f32 0.2, %v6243_v34  ;;  %v12020_v26 = vpop.f32.mrf.mxu3  ;;  %7122 = vperm.xlu2 %8761, %v7012_v42  }
 0x923   :  { %13497 = vst [vmem:[#allocation23_spill] sm:$0xff] %v12026_v44 }
 0x924   :  { %v6805_v48 = vsel %vm6677_vm3, %v6243_v34, %v6741_v30  ;;  %v3143_v34 = vadd.f32 %v13499_v7, %v3054_v63  ;;  %v8723_v30 = vld [vmem:[#allocation5 + $0x114] sm:$0xf]  ;;  %v8439_v63 = vld [vmem:[#allocation5 + $0x198] sm:$0xf0] }
 0x925   :  { %v6155_v55 = vpop.f32.mrf.mxu2  ;;  %6867 = vxpose.xlu0.b32.cont [3/16] %v6805_v48, 128  ;;  %v8247_v48 = vld [vmem:[#allocation5 + $0x18] sm:$0xf0] }
 0x926   :  { %v6156_v39 = vadd.f32 %v6155_v55, %v6067_v6  ;;  %v5980_v31 = vpop.f32.mrf.mxu0  ;;  %v6069_v49 = vpop.f32.mrf.mxu1  ;;  %v3232_v33 = vadd.f32 %v13502_v37, %v3143_v34  ;;  %v8375_v6 = vld [vmem:[#allocation5 + $0x118] sm:$0xf0] }
 0x927   :  { %v5981_v9 = vadd.f32 %v5980_v31, %v11953_v12  ;;  %v8378_v55 = vor.u32 %v8723_v30, %v8375_v6  ;;  %v13503_v31 = vld [vmem:[#allocation135_spill] sm:$0xff]  ;;  %v13505_v30 = vld [vmem:[#allocation234_spill] sm:$0xff] }
 0x928   :  { %v6245_v45 = vadd.f32 %v11956_v15, %v6156_v39  ;;  %v8691_v15 = vld [vmem:[#allocation5 + $0x14] sm:$0xf]  ;;  %v2792_v5 = vadd.f32 %v13503_v31, %v2703_v1  ;;  %v5343_v34 = vmul.f32 0.2, %v3232_v33  ;;  %v5339_v37 = vmul.f32 0.2, %v13505_v30 }
 0x929   :  { %6019 = vmatmul.bf16.gmra.mxu0 %v12026_v44  ;;  %6108 = vmatmul.bf16.gmra.mxu1 %v13500_v20  ;;  %v6070_v43 = vadd.f32 %v6069_v49, %v5981_v9  ;;  %v8250_v0 = vor.u32 %v8691_v15, %v8247_v48  ;;  %v8739_v39 = vld [vmem:[#allocation5 + $0x194] sm:$0xf]  ;;  %v7014_v49 = vld [vmem:[%s12532_s5 + $0xa8] sm:$0xff]  ;;  %vm5215_vm5 = vcmp.gt.f32.partialorder %v3232_v33, 0.0  ;;  %vm5211_vm7 = vcmp.gt.f32.partialorder %v13505_v30, 0.0 }
 0x92a   :  { %v6743_v13 = vmul.f32 0.2, %v6245_v45  ;;  %6197 = vmatmul.bf16.gmra.mxu2 %v13501_v2  ;;  %vm6679_vm4 = vcmp.gt.f32.partialorder %v6245_v45, 0.0  ;;  %v8442_v17 = vor.u32 %v8739_v39, %v8439_v63  ;;  %v12038_v7 = vpop.f32.mrf.mxu3  ;;  %7132 = vperm.xlu2 %8761, %v7014_v49   ;;  %v8707_v15 = vld [vmem:[#allocation5 + $0x94] sm:$0xf]  ;;  %v13506_v48 = vld [vmem:[#allocation137_spill] sm:$0xff]  ;;  %v5471_v39 = vsel %vm5215_vm5, %v3232_v33, %v5343_v34 }
 0x92b   :  { %6501 = vmatpush.bf16.msra.mxu2 %v8378_v55  ;;  %6323 = vmatpush.bf16.msra.mxu0 %v8250_v0  ;;  %v13507_v31 = vld [vmem:[#allocation239_spill] sm:$0xff] }
 0x92c   :  { %v6807_v27 = vsel %vm6679_vm4, %v6245_v45, %v6743_v13  ;;  %v13504_v45 = vld [vmem:[#allocation136_spill] sm:$0xff]  ;;  %6590 = vmatpush.bf16.msra.mxu3 %v8442_v17 }
 0x92d   :  { %v6158_v42 = vpop.f32.mrf.mxu2  ;;  %6868 = vxpose.xlu0.b32.cont [4/16] %v6807_v27, 128  ;;  %v2881_v9 = vadd.f32 %v13504_v45, %v2792_v5  ;;  %v8311_v27 = vld [vmem:[#allocation5 + $0x98] sm:$0xf0]  ;;  %v5467_v45 = vsel %vm5211_vm7, %v13505_v30, %v5339_v37  ;;  %v13510_v37 = vld [vmem:[#allocation122_spill] sm:$0xff] }
 0x92e   :  { %v6159_v2 = vadd.f32 %v6158_v42, %v6070_v43  ;;  %v5982_v44 = vpop.f32.mrf.mxu0  ;;  %v6071_v20 = vpop.f32.mrf.mxu1  ;;  %6306 = vmatmul.bf16.gmra.mxu3 %v11938_v51  ;;  %v8314_v63 = vor.u32 %v8707_v15, %v8311_v27  ;;  %v12060_v33 = vpack.c.bf16 %v5471_v39, %v5467_v45  ;;  %v13511_v15 = vld [vmem:[#allocation241_spill] sm:$0xff] }
 0x92f   :  { %v5983_v13 = vadd.f32 %v5982_v44, %v11953_v12  ;;  %v2970_v43 = vadd.f32 %v13506_v48, %v2881_v9 }
 0x930   :  { %v6248_v1 = vadd.f32 %v11974_v14, %v6159_v2  ;;  %v6993_v2 = vld [vmem:[%s12532_s5] sm:$0xff]  ;;  %6412 = vmatpush.bf16.msra.mxu1 %v8314_v63 }
 0x931   :  { %v6072_v55 = vadd.f32 %v6071_v20, %v5983_v13  ;;  %v3059_v5 = vadd.f32 %v13507_v31, %v2970_v43  ;;  %7027 = vperm.xlu1 %8760, %v6993_v2   ;;  %v7016_v20 = vld [vmem:[%s12532_s5 + $0xb8] sm:$0xff]  ;;  %v13509_v13 = vld [vmem:[#allocation240_spill] sm:$0xff] }
 0x932   :  { %vm6681_vm6 = vcmp.gt.f32.partialorder %v6248_v1, 0.0  ;;  %v6745_v6 = vmul.f32 0.2, %v6248_v1  ;;  %v12050_v44 = vpop.f32.mrf.mxu3  ;;  %7142 = vperm.xlu2 %8761, %v7016_v20   ;;  %v7018_v2 = vld [vmem:[%s12532_s5 + $0xc8] sm:$0xff] }
 0x934   :  { %v6809_v0 = vsel %vm6681_vm6, %v6248_v1, %v6745_v6  ;;  %v13508_v1 = vld [vmem:[#allocation19_spill] sm:$0xff]  ;;  %v3148_v6 = vadd.f32 %v13509_v13, %v3059_v5 }
 0x935   :  { %v6160_v14 = vpop.f32.mrf.mxu2  ;;  %6869 = vxpose.xlu0.b32.cont [5/16] %v6809_v0, 128 }
 0x936   :  { %v6161_v42 = vadd.f32 %v6160_v14, %v6072_v55  ;;  %v5985_v17 = vpop.f32.mrf.mxu0  ;;  %v6074_v49 = vpop.f32.mrf.mxu1  ;;  %v3237_v48 = vadd.f32 %v13511_v15, %v3148_v6 }
 0x937   :  { %v5986_v34 = vadd.f32 %v5985_v17, %v11953_v12  ;;  %v13512_v17 = vld [vmem:[#allocation238_spill] sm:$0xff] }
 0x938   :  { %v6250_v9 = vadd.f32 %v11988_v32, %v6161_v42  ;;  %v6995_v32 = vld [vmem:[%s12532_s5 + $0x10] sm:$0xff]  ;;  %v5351_v31 = vmul.f32 0.2, %v3237_v48  ;;  %vm5223_vm9 = vcmp.gt.f32.partialorder %v3237_v48, 0.0  ;;  %vm5219_vm11 = vcmp.gt.f32.partialorder %v13512_v17, 0.0 }
 0x939   :  { %6024 = vmatmul.bf16.gmra.mxu0 %v12060_v33  ;;  %6113 = vmatmul.bf16.gmra.mxu1 %v13508_v1  ;;  %v6075_v43 = vadd.f32 %v6074_v49, %v5986_v34  ;;  %v5347_v49 = vmul.f32 0.2, %v13512_v17 }
 0x93a   :  { %v6747_v30 = vmul.f32 0.2, %v6250_v9  ;;  %6202 = vmatmul.bf16.gmra.mxu2 %v13510_v37  ;;  %vm6683_vm8 = vcmp.gt.f32.partialorder %v6250_v9, 0.0  ;;  %v12069_v0 = vpop.f32.mrf.mxu3  ;;  %7037 = vperm.xlu1 %8760, %v6995_v32   ;;  %v5479_v34 = vsel %vm5223_vm9, %v3237_v48, %v5351_v31  ;;  %v8367_v31 = vld [vmem:[#allocation5 + $0x108] sm:$0xf0] }
 0x93b   :  { %7152 = vperm.xlu2 %8761, %v7018_v2   ;;  %v8721_v2 = vld [vmem:[#allocation5 + $0x104] sm:$0xf] }
 0x93c   :  { %v6811_v27 = vsel %vm6683_vm8, %v6250_v9, %v6747_v30 }
 0x93d   :  { %v6163_v55 = vpop.f32.mrf.mxu2  ;;  %6870 = vxpose.xlu0.b32.cont [6/16] %v6811_v27, 128  ;;  %v5475_v27 = vsel %vm5219_vm11, %v13512_v17, %v5347_v49 }
 0x93e   :  { %v6164_v39 = vadd.f32 %v6163_v55, %v6075_v43  ;;  %v5987_v63 = vpop.f32.mrf.mxu0  ;;  %v6076_v14 = vpop.f32.mrf.mxu1  ;;  %6311 = vmatmul.bf16.gmra.mxu3 %v11976_v21  ;;  %v7020_v55 = vld [vmem:[%s12532_s5 + $0xd8] sm:$0xff]  ;;  %v12091_v32 = vpack.c.bf16 %v5479_v34, %v5475_v27 }
 0x93f   :  { %v5988_v42 = vadd.f32 %v5987_v63, %v11953_v12  ;;  %v13513_v63 = vld [vmem:[#allocation27_spill] sm:$0xff] }
 0x940   :  { %v6253_v5 = vadd.f32 %v12007_v8, %v6164_v39  ;;  %v6996_v8 = vld [vmem:[%s12532_s5 + $0x18] sm:$0xff] }
 0x941   :  { %v6077_v20 = vadd.f32 %v6076_v14, %v5988_v42  ;;  %v8239_v42 = vld [vmem:[#allocation5 + $0x8] sm:$0xf0] }
 0x942   :  { %vm6685_vm10 = vcmp.gt.f32.partialorder %v6253_v5, 0.0  ;;  %v6749_v45 = vmul.f32 0.2, %v6253_v5  ;;  %v12082_v6 = vpop.f32.mrf.mxu3  ;;  %7042 = vperm.xlu1 %8760, %v6996_v8  }
 0x943   :  { %7162 = vperm.xlu2 %8761, %v7020_v55  }
 0x944   :  { %v6813_v9 = vsel %vm6685_vm10, %v6253_v5, %v6749_v45  ;;  %v8689_v5 = vld [vmem:[#allocation5 + $0x4] sm:$0xf]  ;;  %v8370_v45 = vor.u32 %v8721_v2, %v8367_v31  ;;  %v8303_v31 = vld [vmem:[#allocation5 + $0x88] sm:$0xf0] }
 0x945   :  { %v6165_v13 = vpop.f32.mrf.mxu2  ;;  %6871 = vxpose.xlu0.b32.cont [7/16] %v6813_v9, 128  ;;  %v8737_v9 = vld [vmem:[#allocation5 + $0x184] sm:$0xf] }
 0x946   :  { %v6166_v30 = vadd.f32 %v6165_v13, %v6077_v20  ;;  %v5990_v15 = vpop.f32.mrf.mxu0  ;;  %v6079_v43 = vpop.f32.mrf.mxu1  ;;  %v8242_v20 = vor.u32 %v8689_v5, %v8239_v42  ;;  %6502 = vmatpush.bf16.msra.mxu2 %v8370_v45  ;;  %v8705_v2 = vld [vmem:[#allocation5 + $0x84] sm:$0xf] }
 0x947   :  { %v5991_v39 = vadd.f32 %v5990_v15, %v11953_v12 }
 0x948   :  { %v6255_v48 = vadd.f32 %v12020_v26, %v6166_v30  ;;  %v8431_v26 = vld [vmem:[#allocation5 + $0x188] sm:$0xf0]  ;;  %v6998_v30 = vld [vmem:[%s12532_s5 + $0x28] sm:$0xff]  ;;  %6324 = vmatpush.bf16.msra.mxu0 %v8242_v20 }
 0x949   :  { %6029 = vmatmul.bf16.gmra.mxu0 %v12091_v32  ;;  %6118 = vmatmul.bf16.gmra.mxu1 %v13513_v63  ;;  %v6080_v17 = vadd.f32 %v6079_v43, %v5991_v39  ;;  %v8434_v13 = vor.u32 %v8737_v9, %v8431_v26  ;;  %v7022_v43 = vld [vmem:[%s12532_s5 + $0xe8] sm:$0xff] }
 0x94a   :  { %v6751_v14 = vmul.f32 0.2, %v6255_v48  ;;  %6207 = vmatmul.bf16.gmra.mxu2 %v11523_v52  ;;  %vm6687_vm12 = vcmp.gt.f32.partialorder %v6255_v48, 0.0  ;;  %v12098_v8 = vpop.f32.mrf.mxu3  ;;  %7052 = vperm.xlu1 %8760, %v6998_v30   ;;  %v13515_v30 = vld [vmem:[#allocation183_spill] sm:$0xff] }
 0x94b   :  { %6591 = vmatpush.bf16.msra.mxu3 %v8434_v13  ;;  %7172 = vperm.xlu2 %8761, %v7022_v43   ;;  %v13514_v13 = vld [vmem:[#allocation141_spill] sm:$0xff] }
 0x94c   :  { %v6815_v49 = vsel %vm6687_vm12, %v6255_v48, %v6751_v14 }
 0x94d   :  { %v6168_v34 = vpop.f32.mrf.mxu2  ;;  %6872 = vxpose.xlu0.b32.cont [8/16] %v6815_v49, 128 }
 0x94e   :  { %v6169_v15 = vadd.f32 %v6168_v34, %v6080_v17  ;;  %v5992_v27 = vpop.f32.mrf.mxu0  ;;  %v6081_v55 = vpop.f32.mrf.mxu1  ;;  %6592 = vmatmul.bf16.vlgmr.msra.gmra.mxu3 %v11610_v62  ;;  %v8306_v17 = vor.u32 %v8705_v2, %v8303_v31 }
 0x94f   :  { %v5993_v39 = vadd.f32 %v5992_v27, %v11953_v12 }
 0x950   :  { %v6258_v48 = vadd.f32 %v12038_v7, %v6169_v15  ;;  %v7000_v7 = vld [vmem:[%s12532_s5 + $0x38] sm:$0xff]  ;;  %6413 = vmatpush.bf16.msra.mxu1 %v8306_v17 }
 0x951   :  { %v6082_v5 = vadd.f32 %v6081_v55, %v5993_v39 }
 0x952   :  { %vm6689_vm13 = vcmp.gt.f32.partialorder %v6258_v48, 0.0  ;;  %v6753_v14 = vmul.f32 0.2, %v6258_v48  ;;  %v12109_v45 = vpop.f32.mrf.mxu3  ;;  %7062 = vperm.xlu1 %8760, %v7000_v7  }
 0x954   :  { %v6817_v42 = vsel %vm6689_vm13, %v6258_v48, %v6753_v14 }
 0x955   :  { %v6170_v49 = vpop.f32.mrf.mxu2  ;;  %6873 = vxpose.xlu0.b32.cont [9/16] %v6817_v42, 128 }
 0x956   :  { %v6171_v20 = vadd.f32 %v6170_v49, %v6082_v5  ;;  %v5995_v9 = vpop.f32.mrf.mxu0  ;;  %v6084_v26 = vpop.f32.mrf.mxu1 }
 0x957   :  { %v5996_v62 = vadd.f32 %v5995_v9, %v11953_v12  ;;  %v7005_v9 = vld [vmem:[%s12532_s5 + $0x60] sm:$0xff] }
 0x958   :  { %v6260_v34 = vadd.f32 %v12050_v44, %v6171_v20  ;;  %v7002_v44 = vld [vmem:[%s12532_s5 + $0x48] sm:$0xff] }
 0x959   :  { %6034 = vmatmul.bf16.gmra.mxu0 %v13514_v13  ;;  %6123 = vmatmul.bf16.gmra.mxu1 %v13515_v30  ;;  %v6085_v27 = vadd.f32 %v6084_v26, %v5996_v62 }
 0x95a   :  { %v6755_v15 = vmul.f32 0.2, %v6260_v34  ;;  %6212 = vmatmul.bf16.gmra.mxu2 %v11544_v40  ;;  %vm6691_vm14 = vcmp.gt.f32.partialorder %v6260_v34, 0.0  ;;  %v12119_v48 = vpop.f32.mrf.mxu3  ;;  %7072 = vperm.xlu1 %8760, %v7002_v44  }
 0x95c   :  { %v6819_v55 = vsel %vm6691_vm14, %v6260_v34, %v6755_v15 }
 0x95d   :  { %v6173_v43 = vpop.f32.mrf.mxu2  ;;  %6874 = vxpose.xlu0.b32.cont [10/16] %v6819_v55, 128 }
 0x95e   :  { %v6174_v39 = vadd.f32 %v6173_v43, %v6085_v27  ;;  %v5997_v14 = vpop.f32.mrf.mxu0  ;;  %v6086_v2 = vpop.f32.mrf.mxu1  ;;  %6597 = vmatmul.bf16.gmra.mxu3 %v11627_v38  ;;  %v13516_v27 = vld [vmem:[#allocation142_spill] sm:$0xff]  ;;  %v13517_v38 = vld [vmem:[#allocation31_spill] sm:$0xff] }
 0x95f   :  { %v5998_v5 = vadd.f32 %v5997_v14, %v11953_v12 }
 0x960   :  { %v6263_v31 = vadd.f32 %v12069_v0, %v6174_v39 }
 0x961   :  { %v6087_v17 = vadd.f32 %v6086_v2, %v5998_v5 }
 0x962   :  { %vm6693_vm15 = vcmp.gt.f32.partialorder %v6263_v31, 0.0  ;;  %v6757_v42 = vmul.f32 0.2, %v6263_v31  ;;  %v12127_v20 = vpop.f32.mrf.mxu3  ;;  %7087 = vperm.xlu1 %8760, %v7005_v9  }
 0x964   :  { %v6821_v49 = vsel %vm6693_vm15, %v6263_v31, %v6757_v42 }
 0x965   :  { %v6175_v7 = vpop.f32.mrf.mxu2  ;;  %6875 = vxpose.xlu0.b32.cont [11/16] %v6821_v49, 128 }
 0x966   :  { %v6176_v26 = vadd.f32 %v6175_v7, %v6087_v17  ;;  %v6000_v34 = vpop.f32.mrf.mxu0  ;;  %v6089_v62 = vpop.f32.mrf.mxu1 }
 0x967   :  { %v6001_v15 = vadd.f32 %v6000_v34, %v11953_v12 }
 0x968   :  { %v6265_v0 = vadd.f32 %v12082_v6, %v6176_v26  ;;  %v7007_v6 = vld [vmem:[%s12532_s5 + $0x70] sm:$0xff] }
 0x969   :  { %6039 = vmatmul.bf16.gmra.mxu0 %v13516_v27  ;;  %6128 = vmatmul.bf16.gmra.mxu1 %v13517_v38  ;;  %v6090_v43 = vadd.f32 %v6089_v62, %v6001_v15  ;;  %v7009_v62 = vld [vmem:[%s12532_s5 + $0x80] sm:$0xff] }
 0x96a   :  { %v6759_v55 = vmul.f32 0.2, %v6265_v0  ;;  %6217 = vmatmul.bf16.gmra.mxu2 %v11565_v4  ;;  %vm6695_vm1 = vcmp.gt.f32.partialorder %v6265_v0, 0.0  ;;  %v12137_v14 = vpop.f32.mrf.mxu3  ;;  %7097 = vperm.xlu1 %8760, %v7007_v6   ;;  %v13520_v6 = vld [vmem:[#allocation13_spill] sm:$0xff] }
 0x96c   :  { %v6823_v44 = vsel %vm6695_vm1, %v6265_v0, %v6759_v55 }
 0x96d   :  { %v6178_v39 = vpop.f32.mrf.mxu2  ;;  %6876 = vxpose.xlu0.b32.cont [12/16] %v6823_v44, 128  ;;  %v13518_v44 = vld [vmem:[#allocation143_spill] sm:$0xff] }
 0x96e   :  { %v6179_v2 = vadd.f32 %v6178_v39, %v6090_v43  ;;  %v6002_v31 = vpop.f32.mrf.mxu0  ;;  %v6091_v5 = vpop.f32.mrf.mxu1  ;;  %6602 = vmatmul.bf16.gmra.mxu3 %v11642_v29  ;;  %v13519_v29 = vld [vmem:[#allocation190_spill] sm:$0xff] }
 0x96f   :  { %v6003_v17 = vadd.f32 %v6002_v31, %v11953_v12 }
 0x970   :  { %v6268_v42 = vadd.f32 %v12098_v8, %v6179_v2 }
 0x971   :  { %v6092_v7 = vadd.f32 %v6091_v5, %v6003_v17 }
 0x972   :  { %vm6697_vm2 = vcmp.gt.f32.partialorder %v6268_v42, 0.0  ;;  %v6761_v49 = vmul.f32 0.2, %v6268_v42  ;;  %v12145_v34 = vpop.f32.mrf.mxu3  ;;  %7107 = vperm.xlu1 %8760, %v7009_v62  }
 0x974   :  { %v6825_v9 = vsel %vm6697_vm2, %v6268_v42, %v6761_v49 }
 0x975   :  { %v6180_v26 = vpop.f32.mrf.mxu2  ;;  %6877 = vxpose.xlu0.b32.cont [13/16] %v6825_v9, 128 }
 0x976   :  { %v6181_v0 = vadd.f32 %v6180_v26, %v6092_v7  ;;  %v6005_v15 = vpop.f32.mrf.mxu0  ;;  %v6094_v55 = vpop.f32.mrf.mxu1 }
 0x977   :  { %v6006_v43 = vadd.f32 %v6005_v15, %v11953_v12 }
 0x978   :  { %v6270_v8 = vadd.f32 %v12109_v45, %v6181_v0  ;;  %v7011_v45 = vld [vmem:[%s12532_s5 + $0x90] sm:$0xff] }
 0x979   :  { %6044 = vmatmul.bf16.gmra.mxu0 %v13518_v44  ;;  %6133 = vmatmul.bf16.gmra.mxu1 %v13519_v29  ;;  %v6095_v2 = vadd.f32 %v6094_v55, %v6006_v43  ;;  %v7013_v43 = vld [vmem:[%s12532_s5 + $0xa0] sm:$0xff] }
 0x97a   :  { %v6763_v39 = vmul.f32 0.2, %v6270_v8  ;;  %6222 = vmatmul.bf16.gmra.mxu2 %v13520_v6  ;;  %vm6699_vm3 = vcmp.gt.f32.partialorder %v6270_v8, 0.0  ;;  %v12155_v42 = vpop.f32.mrf.mxu3  ;;  %7117 = vperm.xlu1 %8760, %v7011_v45  }
 0x97c   :  { %v6827_v31 = vsel %vm6699_vm3, %v6270_v8, %v6763_v39 }
 0x97d   :  { %v6183_v5 = vpop.f32.mrf.mxu2  ;;  %6878 = vxpose.xlu0.b32.cont [14/16] %v6827_v31, 128 }
 0x97e   :  { %v6184_v17 = vadd.f32 %v6183_v5, %v6095_v2  ;;  %v6007_v49 = vpop.f32.mrf.mxu0  ;;  %v6096_v7 = vpop.f32.mrf.mxu1  ;;  %6607 = vmatmul.bf16.gmra.mxu3 %v11657_v50 }
 0x97f   :  { %v6008_v26 = vadd.f32 %v6007_v49, %v11953_v12 }
 0x980   :  { %v6273_v9 = vadd.f32 %v12119_v48, %v6184_v17 }
 0x981   :  { %v6097_v0 = vadd.f32 %v6096_v7, %v6008_v26 }
 0x982   :  { %vm6701_vm0 = vcmp.gt.f32.partialorder %v6273_v9, 0.0  ;;  %v6765_v62 = vmul.f32 0.2, %v6273_v9  ;;  %v12163_v8 = vpop.f32.mrf.mxu3  ;;  %7127 = vperm.xlu1 %8760, %v7013_v43  }
 0x984   :  { %v6829_v15 = vsel %vm6701_vm0, %v6273_v9, %v6765_v62 }
 0x985   :  { %v6185_v55 = vpop.f32.mrf.mxu2  ;;  %6879 = vxpose.xlu0.b32.cont [15/16] %v6829_v15, 128 }
 0x986   :  { %v6186_v39 = vadd.f32 %v6185_v55, %v6097_v0  ;;  %v6010_v2 = vpop.f32.mrf.mxu0  ;;  %v6099_v31 = vpop.f32.mrf.mxu1 }
 0x987   :  { %v6011_v5 = vadd.f32 %v6010_v2, %v11953_v12 }
 0x988   :  { %v6275_v48 = vadd.f32 %v12127_v20, %v6186_v39  ;;  %v7015_v20 = vld [vmem:[%s12532_s5 + $0xb0] sm:$0xff]  ;;  %v7017_v39 = vld [vmem:[%s12532_s5 + $0xc0] sm:$0xff] }
 0x989   :  { %6325 = vmatmul.bf16.vlgmr.msra.gmra.mxu0 %v11723_v23  ;;  %6414 = vmatmul.bf16.vlgmr.msra.gmra.mxu1 %v13395_v59  ;;  %v6100_v45 = vadd.f32 %v6099_v31, %v6011_v5 }
 0x98a   :  { %v6767_v50 = vmul.f32 0.2, %v6275_v48  ;;  %6503 = vmatmul.bf16.vlgmr.msra.gmra.mxu2 %v13397_v19  ;;  %vm6703_vm4 = vcmp.gt.f32.partialorder %v6275_v48, 0.0  ;;  %v12173_v7 = vpop.f32.mrf.mxu3  ;;  %7137 = vperm.xlu1 %8760, %v7015_v20  }
 0x98c   :  { %v6831_v17 = vsel %vm6703_vm4, %v6275_v48, %v6767_v50 }
 0x98d   :  { %v6188_v49 = vpop.f32.mrf.mxu2  ;;  %6880 = vxpose.xlu0.b32.end [16/16] %v6831_v17, 128 }
 0x98e   :  { %v6189_v9 = vadd.f32 %v6188_v49, %v6100_v45  ;;  %v6012_v26 = vpop.f32.mrf.mxu0  ;;  %v6101_v62 = vpop.f32.mrf.mxu1  ;;  %6612 = vmatmul.bf16.gmra.mxu3 %v11671_v56 }
 0x98f   :  { %v6013_v59 = vadd.f32 %v6012_v26, %v11953_v12 }
 0x990   :  { %v6278_v23 = vadd.f32 %v12137_v14, %v6189_v9 }
 0x991   :  { %v6102_v0 = vadd.f32 %v6101_v62, %v6013_v59 }
 0x992   :  { %v6769_v19 = vmul.f32 0.2, %v6278_v23  ;;  %vm6705_vm5 = vcmp.gt.f32.partialorder %v6278_v23, 0.0  ;;  %v12181_v43 = vpop.f32.mrf.mxu3  ;;  %7147 = vperm.xlu1 %8760, %v7017_v39  }
 0x994   :  { %v6833_v15 = vsel %vm6705_vm5, %v6278_v23, %v6769_v19  ;;  %v13521_v23 = vld [vmem:[#allocation14_spill] sm:$0xff] }
 0x995   :  { %v6190_v55 = vpop.f32.mrf.mxu2  ;;  %6929 = vxpose.xlu2.b32.start [1/16] %v6833_v15, 128 }
 0x996   :  { %v6191_v2 = vadd.f32 %v6190_v55, %v6102_v0  ;;  %v6015_v31 = vpop.f32.mrf.mxu0  ;;  %v6104_v48 = vpop.f32.mrf.mxu1  ;;  %v7021_v55 = vld [vmem:[%s12532_s5 + $0xe0] sm:$0xff] }
 0x997   :  { %v6016_v5 = vadd.f32 %v6015_v31, %v11953_v12 }
 0x998   :  { %v6280_v14 = vadd.f32 %v12145_v34, %v6191_v2  ;;  %v7019_v34 = vld [vmem:[%s12532_s5 + $0xd0] sm:$0xff] }
 0x999   :  { %6330 = vmatmul.bf16.gmra.mxu0 %v11750_v60  ;;  %6419 = vmatmul.bf16.gmra.mxu1 %v13406_v41  ;;  %v6105_v50 = vadd.f32 %v6104_v48, %v6016_v5  ;;  %v12196_v60 = vpop.permute.xlu2 %7032  ;;  %v13522_v5 = vld [vmem:[#allocation17_spill] sm:$0xff] }
 0x99a   :  { %v6771_v56 = vmul.f32 0.2, %v6280_v14  ;;  %6508 = vmatmul.bf16.gmra.mxu2 %v13408_v11  ;;  %vm6707_vm6 = vcmp.gt.f32.partialorder %v6280_v14, 0.0  ;;  %v12191_v49 = vpop.f32.mrf.mxu3  ;;  %7157 = vperm.xlu1 %8760, %v7019_v34  }
 0x99c   :  { %v6835_v45 = vsel %vm6707_vm6, %v6280_v14, %v6771_v56  ;;  %v13523_v56 = vld [vmem:[#allocation201_spill] sm:$0xff] }
 0x99d   :  { %v6193_v17 = vpop.f32.mrf.mxu2  ;;  %6930 = vxpose.xlu2.b32.cont [2/16] %v6835_v45, 128  ;;  %v13524_v45 = vld [vmem:[#allocation82_spill] sm:$0xff] }
 0x99e   :  { %v6194_v20 = vadd.f32 %v6193_v17, %v6105_v50  ;;  %v6017_v9 = vpop.f32.mrf.mxu0  ;;  %v6106_v26 = vpop.f32.mrf.mxu1  ;;  %6617 = vmatmul.bf16.gmra.mxu3 %v13521_v23 }
 0x99f   :  { %v6018_v11 = vadd.f32 %v6017_v9, %v11953_v12 }
 0x9a0   :  { %v6283_v41 = vadd.f32 %v12155_v42, %v6194_v20 }
 0x9a1   :  { %v6107_v59 = vadd.f32 %v6106_v26, %v6018_v11  ;;  %v12206_v42 = vpop.permute.xlu2 %7047 }
 0x9a2   :  { %vm6709_vm7 = vcmp.gt.f32.partialorder %v6283_v41, 0.0  ;;  %v6773_v62 = vmul.f32 0.2, %v6283_v41  ;;  %v12201_v15 = vpop.f32.mrf.mxu3  ;;  %7167 = vperm.xlu1 %8760, %v7021_v55  }
 0x9a4   :  { %v6837_v19 = vsel %vm6709_vm7, %v6283_v41, %v6773_v62  ;;  %v12218_v62 = vpop.permute.xlu0 %7077 }
 0x9a5   :  { %v6195_v0 = vpop.f32.mrf.mxu2  ;;  %6931 = vxpose.xlu2.b32.cont [3/16] %v6837_v19, 128 }
 0x9a6   :  { %v6196_v39 = vadd.f32 %v6195_v0, %v6107_v59  ;;  %v6020_v2 = vpop.f32.mrf.mxu0  ;;  %v6109_v31 = vpop.f32.mrf.mxu1 }
 0x9a7   :  { %v6021_v14 = vadd.f32 %v6020_v2, %v11953_v12 }
 0x9a8   :  { %v6285_v48 = vadd.f32 %v12163_v8, %v6196_v39  ;;  %v7023_v8 = vld [vmem:[%s12532_s5 + $0xf0] sm:$0xff] }
 0x9a9   :  { %6335 = vmatmul.bf16.gmra.mxu0 %v13522_v5  ;;  %6424 = vmatmul.bf16.gmra.mxu1 %v13523_v56  ;;  %v6110_v17 = vadd.f32 %v6109_v31, %v6021_v14  ;;  %v12222_v19 = vpop.permute.xlu2 %7057 }
 0x9aa   :  { %v6775_v50 = vmul.f32 0.2, %v6285_v48  ;;  %6513 = vmatmul.bf16.gmra.mxu2 %v13524_v45  ;;  %vm6711_vm8 = vcmp.gt.f32.partialorder %v6285_v48, 0.0  ;;  %v12213_v9 = vpop.f32.mrf.mxu3  ;;  %7177 = vperm.xlu1 %8760, %v7023_v8  }
 0x9ac   :  { %v6839_v34 = vsel %vm6711_vm8, %v6285_v48, %v6775_v50 }
 0x9ad   :  { %v6198_v20 = vpop.f32.mrf.mxu2  ;;  %6932 = vxpose.xlu2.b32.cont [4/16] %v6839_v34, 128 }
 0x9ae   :  { %v6199_v26 = vadd.f32 %v6198_v20, %v6110_v17  ;;  %v6022_v41 = vpop.f32.mrf.mxu0  ;;  %v6111_v11 = vpop.f32.mrf.mxu1  ;;  %6622 = vmatmul.bf16.gmra.mxu3 %v11710_v53 }
 0x9af   :  { %v6023_v59 = vadd.f32 %v6022_v41, %v11953_v12  ;;  %v12234_v20 = vpop.permute.xlu1 %7027 }
 0x9b0   :  { %v6288_v23 = vadd.f32 %v12173_v7, %v6199_v26 }
 0x9b1   :  { %v6112_v55 = vadd.f32 %v6111_v11, %v6023_v59  ;;  %v12232_v53 = vpop.permute.xlu2 %7067 }
 0x9b2   :  { %vm6713_vm9 = vcmp.gt.f32.partialorder %v6288_v23, 0.0  ;;  %v6777_v0 = vmul.f32 0.2, %v6288_v23  ;;  %v12225_v31 = vpop.f32.mrf.mxu3 }
 0x9b4   :  { %v6841_v39 = vsel %vm6713_vm9, %v6288_v23, %v6777_v0 }
 0x9b5   :  { %v6200_v2 = vpop.f32.mrf.mxu2  ;;  %6933 = vxpose.xlu2.b32.cont [5/16] %v6841_v39, 128 }
 0x9b6   :  { %v6201_v48 = vadd.f32 %v6200_v2, %v6112_v55  ;;  %v6025_v14 = vpop.f32.mrf.mxu0  ;;  %v6114_v5 = vpop.f32.mrf.mxu1  ;;  %v13525_v55 = vld [vmem:[#allocation127_spill] sm:$0xff] }
 0x9b7   :  { %v6026_v7 = vadd.f32 %v6025_v14, %v11953_v12 }
 0x9b8   :  { %v6290_v56 = vadd.f32 %v12181_v43, %v6201_v48 }
 0x9b9   :  { %6340 = vmatmul.bf16.gmra.mxu0 %v11804_v10  ;;  %6429 = vmatmul.bf16.gmra.mxu1 %v13427_v47  ;;  %v6881_v50 = vpop.trf.xlu0  ;;  %v6115_v17 = vadd.f32 %v6114_v5, %v6026_v7  ;;  %v12243_v14 = vpop.permute.xlu2 %7082 }
 0x9ba   :  { %v6779_v45 = vmul.f32 0.2, %v6290_v56  ;;  %6518 = vmatmul.bf16.gmra.mxu2 %v13429_v24  ;;  %vm6715_vm10 = vcmp.gt.f32.partialorder %v6290_v56, 0.0  ;;  %v12236_v43 = vpop.f32.mrf.mxu3  ;;  %v7185_v24 = vmul.f32 %v12234_v20, %v6881_v50  ;;  %v12247_v50 = vpop.permute.xlu1 %7037 }
 0x9bc   :  { %v6843_v34 = vsel %vm6715_vm10, %v6290_v56, %v6779_v45 }
 0x9bd   :  { %v6203_v8 = vpop.f32.mrf.mxu2  ;;  %6934 = vxpose.xlu2.b32.cont [6/16] %v6843_v34, 128 }
 0x9be   :  { %v6204_v26 = vadd.f32 %v6203_v8, %v6115_v17  ;;  %v6027_v41 = vpop.f32.mrf.mxu0  ;;  %v6116_v10 = vpop.f32.mrf.mxu1  ;;  %6627 = vmatmul.bf16.gmra.mxu3 %v13525_v55  ;;  %v13526_v8 = vld [vmem:[#allocation217_spill] sm:$0xff] }
 0x9bf   :  { %v6028_v11 = vadd.f32 %v6027_v41, %v11953_v12 }
 0x9c0   :  { %v6293_v47 = vadd.f32 %v12191_v49, %v6204_v26  ;;  %v13527_v26 = vld [vmem:[#allocation18_spill] sm:$0xff] }
 0x9c1   :  { %v6882_v23 = vpop.trf.xlu0  ;;  %v6117_v39 = vadd.f32 %v6116_v10, %v6028_v11 }
 0x9c2   :  { %vm6717_vm11 = vcmp.gt.f32.partialorder %v6293_v47, 0.0  ;;  %v6781_v59 = vmul.f32 0.2, %v6293_v47  ;;  %v7187_v0 = vmul.f32 %v12196_v60, %v6882_v23  ;;  %v12245_v56 = vpop.f32.mrf.mxu3 }
 0x9c4   :  { %v6845_v2 = vsel %vm6717_vm11, %v6293_v47, %v6781_v59  ;;  %v7249_v48 = vadd.f32 %v7187_v0, %v7185_v24  ;;  %v13528_v47 = vld [vmem:[#allocation98_spill] sm:$0xff] }
 0x9c5   :  { %v6205_v5 = vpop.f32.mrf.mxu2  ;;  %6935 = vxpose.xlu2.b32.cont [7/16] %v6845_v2, 128 }
 0x9c6   :  { %v6206_v49 = vadd.f32 %v6205_v5, %v6117_v39  ;;  %v6030_v7 = vpop.f32.mrf.mxu0  ;;  %v6119_v45 = vpop.f32.mrf.mxu1 }
 0x9c7   :  { %v6031_v34 = vadd.f32 %v6030_v7, %v11953_v12  ;;  %v12259_v7 = vpop.permute.xlu2 %7092 }
 0x9c8   :  { %v6295_v17 = vadd.f32 %v12201_v15, %v6206_v49 }
 0x9c9   :  { %6434 = vmatmul.bf16.gmra.mxu1 %v13526_v8  ;;  %6345 = vmatmul.bf16.gmra.mxu0 %v13527_v26  ;;  %v6883_v41 = vpop.trf.xlu0  ;;  %v6120_v24 = vadd.f32 %v6119_v45, %v6031_v34  ;;  %v12261_v8 = vpop.permute.xlu1 %7042 }
 0x9ca   :  { %v6783_v10 = vmul.f32 0.2, %v6295_v17  ;;  %6523 = vmatmul.bf16.gmra.mxu2 %v13528_v47  ;;  %vm6719_vm12 = vcmp.gt.f32.partialorder %v6295_v17, 0.0  ;;  %v7189_v11 = vmul.f32 %v12247_v50, %v6883_v41  ;;  %v12255_v55 = vpop.f32.mrf.mxu3 }
 0x9cc   :  { %v6847_v23 = vsel %vm6719_vm12, %v6295_v17, %v6783_v10  ;;  %v7250_v59 = vadd.f32 %v7249_v48, %v7189_v11 }
 0x9cd   :  { %v6208_v0 = vpop.f32.mrf.mxu2  ;;  %6936 = vxpose.xlu2.b32.cont [8/16] %v6847_v23, 128 }
 0x9ce   :  { %v6209_v15 = vadd.f32 %v6208_v0, %v6120_v24  ;;  %v6032_v39 = vpop.f32.mrf.mxu0  ;;  %v6121_v2 = vpop.f32.mrf.mxu1  ;;  %6632 = vmatmul.bf16.gmra.mxu3 %v11764_v18 }
 0x9cf   :  { %v6033_v49 = vadd.f32 %v6032_v39, %v11953_v12  ;;  %v12273_v39 = vpop.permute.xlu2 %7102 }
 0x9d0   :  { %v6298_v5 = vadd.f32 %v12213_v9, %v6209_v15 }
 0x9d1   :  { %v6884_v26 = vpop.trf.xlu0  ;;  %v6122_v17 = vadd.f32 %v6121_v2, %v6033_v49 }
 0x9d2   :  { %vm6721_vm13 = vcmp.gt.f32.partialorder %v6298_v5, 0.0  ;;  %v6785_v45 = vmul.f32 0.2, %v6298_v5  ;;  %v7191_v48 = vmul.f32 %v12261_v8, %v6884_v26  ;;  %v12265_v47 = vpop.f32.mrf.mxu3 }
 0x9d4   :  { %v6849_v34 = vsel %vm6721_vm13, %v6298_v5, %v6785_v45  ;;  %v7251_v41 = vadd.f32 %v7250_v59, %v7191_v48 }
 0x9d5   :  { %v6210_v10 = vpop.f32.mrf.mxu2  ;;  %6937 = vxpose.xlu2.b32.cont [9/16] %v6849_v34, 128 }
 0x9d6   :  { %v6211_v9 = vadd.f32 %v6210_v10, %v6122_v17  ;;  %v6035_v11 = vpop.f32.mrf.mxu0  ;;  %v6124_v24 = vpop.f32.mrf.mxu1 }
 0x9d7   :  { %v6036_v0 = vadd.f32 %v6035_v11, %v11953_v12 }
 0x9d8   :  { %v6300_v23 = vadd.f32 %v12225_v31, %v6211_v9 }
 0x9d9   :  { %6439 = vmatmul.bf16.gmra.mxu1 %v13449_v61  ;;  %6350 = vmatmul.bf16.gmra.mxu0 %v11861_v35  ;;  %v6885_v15 = vpop.trf.xlu0  ;;  %v6125_v2 = vadd.f32 %v6124_v24, %v6036_v0 }
 0x9da   :  { %v6787_v18 = vmul.f32 0.2, %v6300_v23  ;;  %6528 = vmatmul.bf16.gmra.mxu2 %v13451_v58  ;;  %vm6723_vm14 = vcmp.gt.f32.partialorder %v6300_v23, 0.0  ;;  %v7193_v59 = vmul.f32 %v12206_v42, %v6885_v15  ;;  %v12275_v31 = vpop.f32.mrf.mxu3  ;;  %v12279_v58 = vpop.permute.xlu1 %7052 }
 0x9dc   :  { %v6851_v5 = vsel %vm6723_vm14, %v6300_v23, %v6787_v18  ;;  %v7252_v49 = vadd.f32 %v7251_v41, %v7193_v59  ;;  %v12283_v23 = vpop.permute.xlu2 %7112 }
 0x9dd   :  { %v6213_v26 = vpop.f32.mrf.mxu2  ;;  %6938 = vxpose.xlu2.b32.cont [10/16] %v6851_v5, 128 }
 0x9de   :  { %v6214_v45 = vadd.f32 %v6213_v26, %v6125_v2  ;;  %v6037_v61 = vpop.f32.mrf.mxu0  ;;  %v6126_v48 = vpop.f32.mrf.mxu1  ;;  %6637 = vmatmul.bf16.gmra.mxu3 %v11790_v46  ;;  %v13529_v26 = vld [vmem:[#allocation147_spill] sm:$0xff] }
 0x9df   :  { %v6038_v17 = vadd.f32 %v6037_v61, %v11953_v12 }
 0x9e0   :  { %v6303_v35 = vadd.f32 %v12236_v43, %v6214_v45  ;;  %v13530_v45 = vld [vmem:[#allocation21_spill] sm:$0xff] }
 0x9e1   :  { %v6886_v34 = vpop.trf.xlu0  ;;  %v6127_v41 = vadd.f32 %v6126_v48, %v6038_v17 }
 0x9e2   :  { %vm6725_vm15 = vcmp.gt.f32.partialorder %v6303_v35, 0.0  ;;  %v6789_v10 = vmul.f32 0.2, %v6303_v35  ;;  %v7195_v9 = vmul.f32 %v12279_v58, %v6886_v34  ;;  %v12285_v15 = vpop.f32.mrf.mxu3 }
 0x9e4   :  { %v6853_v11 = vsel %vm6725_vm15, %v6303_v35, %v6789_v10  ;;  %v7253_v24 = vadd.f32 %v7252_v49, %v7195_v9  ;;  %v13531_v49 = vld [vmem:[#allocation149_spill] sm:$0xff] }
 0x9e5   :  { %v6215_v0 = vpop.f32.mrf.mxu2  ;;  %6939 = vxpose.xlu2.b32.cont [11/16] %v6853_v11, 128 }
 0x9e6   :  { %v6216_v43 = vadd.f32 %v6215_v0, %v6127_v41  ;;  %v6040_v18 = vpop.f32.mrf.mxu0  ;;  %v6129_v59 = vpop.f32.mrf.mxu1 }
 0x9e7   :  { %v6041_v5 = vadd.f32 %v6040_v18, %v11953_v12  ;;  %v12297_v18 = vpop.permute.xlu2 %7122 }
 0x9e8   :  { %v6305_v2 = vadd.f32 %v12245_v56, %v6216_v43 }
 0x9e9   :  { %6444 = vmatmul.bf16.gmra.mxu1 %v13529_v26  ;;  %6355 = vmatmul.bf16.gmra.mxu0 %v13530_v45  ;;  %v6887_v46 = vpop.trf.xlu0  ;;  %v6130_v35 = vadd.f32 %v6129_v59, %v6041_v5  ;;  %v12299_v26 = vpop.permute.xlu1 %7062 }
 0x9ea   :  { %v6791_v61 = vmul.f32 0.2, %v6305_v2  ;;  %6533 = vmatmul.bf16.gmra.mxu2 %v13531_v49  ;;  %vm6727_vm1 = vcmp.gt.f32.partialorder %v6305_v2, 0.0  ;;  %v7197_v48 = vmul.f32 %v12222_v19, %v6887_v46  ;;  %v12293_v9 = vpop.f32.mrf.mxu3 }
 0x9ec   :  { %v6855_v17 = vsel %vm6727_vm1, %v6305_v2, %v6791_v61  ;;  %v7254_v34 = vadd.f32 %v7253_v24, %v7197_v48 }
 0x9ed   :  { %v6218_v10 = vpop.f32.mrf.mxu2  ;;  %6940 = vxpose.xlu2.b32.cont [12/16] %v6855_v17, 128 }
 0x9ee   :  { %v6219_v56 = vadd.f32 %v6218_v10, %v6130_v35  ;;  %v6042_v41 = vpop.f32.mrf.mxu0  ;;  %v6131_v11 = vpop.f32.mrf.mxu1  ;;  %6642 = vmatmul.bf16.gmra.mxu3 %v11818_v54 }
 0x9ef   :  { %v6043_v43 = vadd.f32 %v6042_v41, %v11953_v12  ;;  %v13532_v41 = vld [vmem:[#allocation116_spill] sm:$0xff] }
 0x9f0   :  { %v6308_v0 = vadd.f32 %v12255_v55, %v6219_v56 }
 0x9f1   :  { %v6888_v45 = vpop.trf.xlu0  ;;  %v6132_v2 = vadd.f32 %v6131_v11, %v6043_v43 }
 0x9f2   :  { %vm6729_vm2 = vcmp.gt.f32.partialorder %v6308_v0, 0.0  ;;  %v6793_v59 = vmul.f32 0.2, %v6308_v0  ;;  %v7199_v24 = vmul.f32 %v12299_v26, %v6888_v45  ;;  %v12303_v49 = vpop.f32.mrf.mxu3 }
 0x9f4   :  { %v6857_v5 = vsel %vm6729_vm2, %v6308_v0, %v6793_v59  ;;  %v7255_v46 = vadd.f32 %v7254_v34, %v7199_v24  ;;  %v12310_v34 = vpop.permute.xlu2 %7132 }
 0x9f5   :  { %v6220_v61 = vpop.f32.mrf.mxu2  ;;  %6941 = vxpose.xlu2.b32.cont [13/16] %v6857_v5, 128 }
 0x9f6   :  { %v6221_v55 = vadd.f32 %v6220_v61, %v6132_v2  ;;  %v6045_v48 = vpop.f32.mrf.mxu0  ;;  %v6134_v35 = vpop.f32.mrf.mxu1 }
 0x9f7   :  { %v6046_v10 = vadd.f32 %v6045_v48, %v11953_v12  ;;  %v12317_v61 = vpop.permute.xlu1 %7072 }
 0x9f8   :  { %v6310_v17 = vadd.f32 %v12265_v47, %v6221_v55 }
 0x9f9   :  { %6449 = vmatmul.bf16.gmra.mxu1 %v13469_v25  ;;  %6360 = vmatmul.bf16.gmra.mxu0 %v11924_v57  ;;  %v6889_v56 = vpop.trf.xlu0  ;;  %v6135_v0 = vadd.f32 %v6134_v35, %v6046_v10 }
 0x9fa   :  { %v6795_v54 = vmul.f32 0.2, %v6310_v17  ;;  %6538 = vmatmul.bf16.gmra.mxu2 %v13532_v41  ;;  %vm6731_vm3 = vcmp.gt.f32.partialorder %v6310_v17, 0.0  ;;  %v7201_v11 = vmul.f32 %v12232_v53, %v6889_v56  ;;  %v12313_v47 = vpop.f32.mrf.mxu3  ;;  %v8773_v56 = vld [vmem:[%s12531_s4] sm:$0x3] }
 0x9fc   :  { %v6859_v43 = vsel %vm6731_vm3, %v6310_v17, %v6795_v54  ;;  %v7256_v45 = vadd.f32 %v7255_v46, %v7201_v11  ;;  %v13533_v17 = vld [vmem:[#allocation134_spill] sm:$0xff]  ;;  %v12324_v54 = vperm.slane %v8773_v56, 1 }
 0x9fd   :  { %v6223_v59 = vpop.f32.mrf.mxu2  ;;  %6942 = vxpose.xlu2.b32.cont [14/16] %v6859_v43, 128 }
 0x9fe   :  { %v6224_v24 = vadd.f32 %v6223_v59, %v6135_v0  ;;  %v6047_v25 = vpop.f32.mrf.mxu0  ;;  %v6136_v2 = vpop.f32.mrf.mxu1  ;;  %6647 = vmatmul.bf16.gmra.mxu3 %v13533_v17 }
 0x9ff   :  { %v6048_v5 = vadd.f32 %v6047_v25, %v11953_v12 }
 0xa00   :  { %v6313_v57 = vadd.f32 %v12275_v31, %v6224_v24  ;;  %v12326_v31 = vpop.permute.xlu2 %7142 }
 0xa01   :  { %v6890_v55 = vpop.trf.xlu0  ;;  %v6137_v46 = vadd.f32 %v6136_v2, %v6048_v5  ;;  %13534 = vst [vmem:[#allocation140_spill] sm:$0xff] %v12326_v31  ;;  %v13535_v2 = vld [vmem:[#allocation153_spill] sm:$0xff] }
 0xa02   :  { %vm6733_vm0 = vcmp.gt.f32.partialorder %v6313_v57, 0.0  ;;  %v6797_v48 = vmul.f32 0.2, %v6313_v57  ;;  %v7203_v35 = vmul.f32 %v12317_v61, %v6890_v55  ;;  %v12328_v11 = vpop.f32.mrf.mxu3 }
 0xa04   :  { %v6861_v10 = vsel %vm6733_vm0, %v6313_v57, %v6797_v48  ;;  %v7257_v12 = vadd.f32 %v7256_v45, %v7203_v35  ;;  %v13536_v57 = vld [vmem:[#allocation22_spill] sm:$0xff]  ;;  %v13537_v48 = vld [vmem:[#allocation9_spill] sm:$0xff] }
 0xa05   :  { %v6225_v41 = vpop.f32.mrf.mxu2  ;;  %6943 = vxpose.xlu2.b32.cont [15/16] %v6861_v10, 128 }
 0xa06   :  { %v6226_v0 = vadd.f32 %v6225_v41, %v6137_v46  ;;  %v6326_v43 = vpop.f32.mrf.mxu0  ;;  %v6415_v59 = vpop.f32.mrf.mxu1 }
 0xa07   :  { %v6327_v25 = vadd.f32 %v6326_v43, %v12324_v54 }
 0xa08   :  { %v6315_v24 = vadd.f32 %v12285_v15, %v6226_v0 }
 0xa09   :  { %6454 = vmatmul.bf16.gmra.mxu1 %v13535_v2  ;;  %6365 = vmatmul.bf16.gmra.mxu0 %v13536_v57  ;;  %v6891_v5 = vpop.trf.xlu0  ;;  %v6416_v35 = vadd.f32 %v6415_v59, %v6327_v25  ;;  %v12340_v57 = vpop.permute.xlu2 %7152 }
 0xa0a   :  { %v6799_v55 = vmul.f32 0.2, %v6315_v24  ;;  %6543 = vmatmul.bf16.gmra.mxu2 %v13537_v48  ;;  %vm6735_vm4 = vcmp.gt.f32.partialorder %v6315_v24, 0.0  ;;  %v7205_v45 = vmul.f32 %v12218_v62, %v6891_v5  ;;  %v12336_v56 = vpop.f32.mrf.mxu3 }
 0xa0c   :  { %v6863_v17 = vsel %vm6735_vm4, %v6315_v24, %v6799_v55  ;;  %v7258_v46 = vadd.f32 %v7257_v12, %v7205_v45 }
 0xa0d   :  { %v6504_v10 = vpop.f32.mrf.mxu2  ;;  %6944 = vxpose.xlu2.b32.end [16/16] %v6863_v17, 128 }
 0xa0e   :  { %v6505_v15 = vadd.f32 %v6504_v10, %v6416_v35  ;;  %v6328_v41 = vpop.f32.mrf.mxu0  ;;  %v6417_v0 = vpop.f32.mrf.mxu1  ;;  %6652 = vmatmul.bf16.gmra.mxu3 %v11875_v28 }
 0xa0f   :  { %v6329_v2 = vadd.f32 %v6328_v41, %v12324_v54 }
 0xa10   :  { %v6594_v43 = vadd.f32 %v12293_v9, %v6505_v15  ;;  %v12348_v15 = vpop.permute.xlu1 %7087 }
 0xa11   :  { %v6892_v48 = vpop.trf.xlu0  ;;  %v6418_v12 = vadd.f32 %v6417_v0, %v6329_v2 }
 0xa12   :  { %v6738_v31 = vmul.f32 0.2, %v6594_v43  ;;  %vm6674_vm5 = vcmp.gt.f32.partialorder %v6594_v43, 0.0  ;;  %v7207_v59 = vmul.f32 %v12243_v14, %v6892_v48  ;;  %v12344_v55 = vpop.f32.mrf.mxu3 }
 0xa14   :  { %v6802_v24 = vsel %vm6674_vm5, %v6594_v43, %v6738_v31  ;;  %v7259_v25 = vadd.f32 %v7258_v46, %v7207_v59  ;;  %v12353_v46 = vpop.permute.xlu2 %7162 }
 0xa15   :  { %v6506_v5 = vpop.f32.mrf.mxu2  ;;  %6897 = vxpose.xlu1.b32.start [1/16] %v6802_v24, 128 }
 0xa16   :  { %v6507_v45 = vadd.f32 %v6506_v5, %v6418_v12  ;;  %v6331_v9 = vpop.f32.mrf.mxu0  ;;  %v6420_v35 = vpop.f32.mrf.mxu1 }
 0xa17   :  { %v6332_v10 = vadd.f32 %v6331_v9, %v12324_v54 }
 0xa18   :  { %v6596_v17 = vadd.f32 %v12303_v49, %v6507_v45 }
 0xa19   :  { %6459 = vmatmul.bf16.gmra.mxu1 %v13489_v22  ;;  %6370 = vmatmul.bf16.gmra.mxu0 %v11995_v36  ;;  %v6893_v28 = vpop.trf.xlu0  ;;  %v6421_v0 = vadd.f32 %v6420_v35, %v6332_v10 }
 0xa1a   :  { %v6740_v31 = vmul.f32 0.2, %v6596_v17  ;;  %6548 = vmatmul.bf16.gmra.mxu2 %v11460_v3  ;;  %vm6676_vm6 = vcmp.gt.f32.partialorder %v6596_v17, 0.0  ;;  %v7209_v41 = vmul.f32 %v12348_v15, %v6893_v28  ;;  %v12356_v48 = vpop.f32.mrf.mxu3 }
 0xa1c   :  { %v6804_v43 = vsel %vm6676_vm6, %v6596_v17, %v6740_v31  ;;  %v7260_v49 = vadd.f32 %v7259_v25, %v7209_v41  ;;  %v12362_v35 = vpop.permute.xlu2 %7172 }
 0xa1d   :  { %v6509_v2 = vpop.f32.mrf.mxu2  ;;  %6898 = vxpose.xlu1.b32.cont [2/16] %v6804_v43, 128 }
 0xa1e   :  { %v6510_v59 = vadd.f32 %v6509_v2, %v6421_v0  ;;  %v6333_v22 = vpop.f32.mrf.mxu0  ;;  %v6422_v12 = vpop.f32.mrf.mxu1  ;;  %6657 = vmatmul.bf16.gmra.mxu3 %v11904_v16  ;;  %v13539_v16 = vld [vmem:[#allocation23_spill] sm:$0xff] }
 0xa1f   :  { %v6334_v24 = vadd.f32 %v6333_v22, %v12324_v54  ;;  %v12368_v2 = vpop.permute.xlu1 %7097 }
 0xa20   :  { %v6599_v36 = vadd.f32 %v12313_v47, %v6510_v59  ;;  %v13538_v59 = vld [vmem:[#allocation15_spill] sm:$0xff] }
 0xa21   :  { %v6894_v3 = vpop.trf.xlu0  ;;  %v6423_v9 = vadd.f32 %v6422_v12, %v6334_v24 }
 0xa22   :  { %vm6678_vm7 = vcmp.gt.f32.partialorder %v6599_v36, 0.0  ;;  %v6742_v5 = vmul.f32 0.2, %v6599_v36  ;;  %v7211_v45 = vmul.f32 %v12259_v7, %v6894_v3  ;;  %v12364_v28 = vpop.f32.mrf.mxu3 }
 0xa24   :  { %v6806_v25 = vsel %vm6678_vm7, %v6599_v36, %v6742_v5  ;;  %v7261_v17 = vadd.f32 %v7260_v49, %v7211_v45  ;;  %v13540_v49 = vld [vmem:[#allocation10_spill] sm:$0xff] }
 0xa25   :  { %v6511_v10 = vpop.f32.mrf.mxu2  ;;  %6899 = vxpose.xlu1.b32.cont [3/16] %v6806_v25, 128 }
 0xa26   :  { %v6512_v31 = vadd.f32 %v6511_v10, %v6423_v9  ;;  %v6336_v47 = vpop.f32.mrf.mxu0  ;;  %v6425_v41 = vpop.f32.mrf.mxu1 }
 0xa27   :  { %v6337_v43 = vadd.f32 %v6336_v47, %v12324_v54 }
 0xa28   :  { %v6601_v0 = vadd.f32 %v12328_v11, %v6512_v31 }
 0xa29   :  { %6464 = vmatmul.bf16.gmra.mxu1 %v13538_v59  ;;  %6375 = vmatmul.bf16.gmra.mxu0 %v13539_v16  ;;  %v6895_v22 = vpop.trf.xlu0  ;;  %v6426_v24 = vadd.f32 %v6425_v41, %v6337_v43 }
 0xa2a   :  { %v6744_v12 = vmul.f32 0.2, %v6601_v0  ;;  %6553 = vmatmul.bf16.gmra.mxu2 %v13540_v49  ;;  %vm6680_vm8 = vcmp.gt.f32.partialorder %v6601_v0, 0.0  ;;  %v7213_v36 = vmul.f32 %v12368_v2, %v6895_v22  ;;  %v12376_v45 = vpop.f32.mrf.mxu3 }
 0xa2c   :  { %v6808_v3 = vsel %vm6680_vm8, %v6601_v0, %v6744_v12  ;;  %v12374_v5 = vadd.f32 %v7261_v17, %v7213_v36 }
 0xa2d   :  { %v6514_v11 = vpop.f32.mrf.mxu2  ;;  %6900 = vxpose.xlu1.b32.cont [4/16] %v6808_v3, 128 }
 0xa2e   :  { %v6515_v9 = vadd.f32 %v6514_v11, %v6426_v24  ;;  %v6945_v25 = vpop.trf.xlu2  ;;  %v6338_v10 = vpop.f32.mrf.mxu0  ;;  %6662 = vmatmul.bf16.gmra.mxu3 %v11938_v51 }
 0xa2f   :  { %v6427_v31 = vpop.f32.mrf.mxu1  ;;  %v6339_v59 = vadd.f32 %v6338_v10, %v12324_v54  ;;  %v7186_v17 = vmul.f32 %v12234_v20, %v6945_v25 }
 0xa30   :  { %v6604_v47 = vadd.f32 %v12336_v56, %v6515_v9 }
 0xa31   :  { %v6428_v41 = vadd.f32 %v6427_v31, %v6339_v59 }
 0xa32   :  { %vm6682_vm9 = vcmp.gt.f32.partialorder %v6604_v47, 0.0  ;;  %v6746_v16 = vmul.f32 0.2, %v6604_v47  ;;  %v12382_v22 = vpop.f32.mrf.mxu3 }
 0xa34   :  { %v6810_v0 = vsel %vm6682_vm9, %v6604_v47, %v6746_v16 }
 0xa35   :  { %v6516_v43 = vpop.f32.mrf.mxu2  ;;  %6901 = vxpose.xlu1.b32.cont [5/16] %v6810_v0, 128 }
 0xa36   :  { %v6517_v12 = vadd.f32 %v6516_v43, %v6428_v41  ;;  %v6946_v49 = vpop.trf.xlu2  ;;  %v6341_v36 = vpop.f32.mrf.mxu0 }
 0xa37   :  { %v7188_v24 = vmul.f32 %v12196_v60, %v6946_v49  ;;  %v6430_v56 = vpop.f32.mrf.mxu1  ;;  %v6342_v11 = vadd.f32 %v6341_v36, %v12324_v54 }
 0xa38   :  { %v6606_v3 = vadd.f32 %v12344_v55, %v6517_v12 }
 0xa39   :  { %v7286_v9 = vadd.f32 %v7188_v24, %v7186_v17  ;;  %6469 = vmatmul.bf16.gmra.mxu1 %v13508_v1  ;;  %6380 = vmatmul.bf16.gmra.mxu0 %v12060_v33  ;;  %v6431_v20 = vadd.f32 %v6430_v56, %v6342_v11 }
 0xa3a   :  { %v6748_v51 = vmul.f32 0.2, %v6606_v3  ;;  %6558 = vmatmul.bf16.gmra.mxu2 %v13510_v37  ;;  %vm6684_vm10 = vcmp.gt.f32.partialorder %v6606_v3, 0.0  ;;  %v12390_v31 = vpop.f32.mrf.mxu3 }
 0xa3c   :  { %v6812_v25 = vsel %vm6684_vm10, %v6606_v3, %v6748_v51 }
 0xa3d   :  { %v6519_v10 = vpop.f32.mrf.mxu2  ;;  %6902 = vxpose.xlu1.b32.cont [6/16] %v6812_v25, 128 }
 0xa3e   :  { %v6520_v60 = vadd.f32 %v6519_v10, %v6431_v20  ;;  %v6947_v47 = vpop.trf.xlu2  ;;  %v6343_v55 = vpop.f32.mrf.mxu0  ;;  %6667 = vmatmul.bf16.gmra.mxu3 %v11976_v21 }
 0xa3f   :  { %v7190_v59 = vmul.f32 %v12247_v50, %v6947_v47  ;;  %v6432_v16 = vpop.f32.mrf.mxu1  ;;  %v6344_v33 = vadd.f32 %v6343_v55, %v12324_v54 }
 0xa40   :  { %v6609_v1 = vadd.f32 %v12356_v48, %v6520_v60 }
 0xa41   :  { %v7287_v41 = vadd.f32 %v7286_v9, %v7190_v59  ;;  %v6433_v0 = vadd.f32 %v6432_v16, %v6344_v33 }
 0xa42   :  { %vm6686_vm11 = vcmp.gt.f32.partialorder %v6609_v1, 0.0  ;;  %v6750_v37 = vmul.f32 0.2, %v6609_v1  ;;  %v12396_v12 = vpop.f32.mrf.mxu3 }
 0xa44   :  { %v6814_v17 = vsel %vm6686_vm11, %v6609_v1, %v6750_v37 }
 0xa45   :  { %v6521_v43 = vpop.f32.mrf.mxu2  ;;  %6903 = vxpose.xlu1.b32.cont [7/16] %v6814_v17, 128 }
 0xa46   :  { %v6522_v49 = vadd.f32 %v6521_v43, %v6433_v0  ;;  %v6948_v36 = vpop.trf.xlu2  ;;  %v6346_v24 = vpop.f32.mrf.mxu0 }
 0xa47   :  { %v7192_v50 = vmul.f32 %v12261_v8, %v6948_v36  ;;  %v6435_v56 = vpop.f32.mrf.mxu1  ;;  %v6347_v3 = vadd.f32 %v6346_v24, %v12324_v54 }
 0xa48   :  { %v6611_v48 = vadd.f32 %v12364_v28, %v6522_v49 }
 0xa49   :  { %v7288_v11 = vadd.f32 %v7287_v41, %v7192_v50  ;;  %6385 = vmatmul.bf16.gmra.mxu0 %v12091_v32  ;;  %6474 = vmatmul.bf16.gmra.mxu1 %v13513_v63  ;;  %v6436_v9 = vadd.f32 %v6435_v56, %v6347_v3 }
 0xa4a   :  { %v6752_v21 = vmul.f32 0.2, %v6611_v48  ;;  %6563 = vmatmul.bf16.gmra.mxu2 %v11523_v52  ;;  %vm6688_vm12 = vcmp.gt.f32.partialorder %v6611_v48, 0.0  ;;  %v6623_v25 = vpop.f32.mrf.mxu3 }
 0xa4c   :  { %v6816_v51 = vsel %vm6688_vm12, %v6611_v48, %v6752_v21 }
 0xa4d   :  { %v6524_v20 = vpop.f32.mrf.mxu2  ;;  %6904 = vxpose.xlu1.b32.cont [8/16] %v6816_v51, 128 }
 0xa4e   :  { %v6525_v8 = vadd.f32 %v6524_v20, %v6436_v9  ;;  %v6949_v10 = vpop.trf.xlu2  ;;  %v6348_v60 = vpop.f32.mrf.mxu0 }
 0xa4f   :  { %v7194_v28 = vmul.f32 %v12206_v42, %v6949_v10  ;;  %v6437_v47 = vpop.f32.mrf.mxu1  ;;  %v6349_v32 = vadd.f32 %v6348_v60, %v12324_v54  ;;  %v12421_v60 = vpop.permute.xlu1 %7107 }
 0xa50   :  { %v6614_v55 = vadd.f32 %v12376_v45, %v6525_v8 }
 0xa51   :  { %v12407_v63 = vadd.f32 %v7288_v11, %v7194_v28  ;;  %v6438_v59 = vadd.f32 %v6437_v47, %v6349_v32 }
 0xa52   :  { %vm6690_vm13 = vcmp.gt.f32.partialorder %v6614_v55, 0.0  ;;  %v6754_v52 = vmul.f32 0.2, %v6614_v55  ;;  %v6625_v33 = vpop.f32.mrf.mxu3 }
 0xa54   :  { %v6818_v16 = vsel %vm6690_vm13, %v6614_v55, %v6754_v52 }
 0xa55   :  { %v6526_v1 = vpop.f32.mrf.mxu2  ;;  %6905 = vxpose.xlu1.b32.cont [9/16] %v6818_v16, 128 }
 0xa56   :  { %v6527_v41 = vadd.f32 %v6526_v1, %v6438_v59  ;;  %v6351_v37 = vpop.f32.mrf.mxu0 }
 0xa57   :  { %v6440_v0 = vpop.f32.mrf.mxu1  ;;  %v6352_v42 = vadd.f32 %v6351_v37, %v12324_v54  ;;  %v12427_v37 = vpop.permute.xlu1 %7117 }
 0xa58   :  { %v6616_v17 = vadd.f32 %v12382_v22, %v6527_v41 }
 0xa59   :  { %6390 = vmatmul.bf16.gmra.mxu0 %v13514_v13  ;;  %6479 = vmatmul.bf16.gmra.mxu1 %v13515_v30  ;;  %v6441_v43 = vadd.f32 %v6440_v0, %v6352_v42 }
 0xa5a   :  { %vm6692_vm14 = vcmp.gt.f32.partialorder %v6616_v17, 0.0  ;;  %v6756_v45 = vmul.f32 0.2, %v6616_v17  ;;  %6568 = vmatmul.bf16.gmra.mxu2 %v11544_v40  ;;  %v6628_v24 = vpop.f32.mrf.mxu3 }
 0xa5c   :  { %v6820_v49 = vsel %vm6692_vm14, %v6616_v17, %v6756_v45 }
 0xa5d   :  { %v6529_v36 = vpop.f32.mrf.mxu2  ;;  %6906 = vxpose.xlu1.b32.cont [10/16] %v6820_v49, 128 }
 0xa5e   :  { %v6530_v50 = vadd.f32 %v6529_v36, %v6441_v43  ;;  %v6353_v56 = vpop.f32.mrf.mxu0 }
 0xa5f   :  { %v6442_v48 = vpop.f32.mrf.mxu1  ;;  %v6354_v3 = vadd.f32 %v6353_v56, %v12324_v54 }
 0xa60   :  { %v6619_v22 = vadd.f32 %v12390_v31, %v6530_v50 }
 0xa61   :  { %v6443_v11 = vadd.f32 %v6442_v48, %v6354_v3 }
 0xa62   :  { %vm6694_vm15 = vcmp.gt.f32.partialorder %v6619_v22, 0.0  ;;  %v6758_v13 = vmul.f32 0.2, %v6619_v22  ;;  %v6630_v20 = vpop.f32.mrf.mxu3 }
 0xa64   :  { %v6822_v30 = vsel %vm6694_vm15, %v6619_v22, %v6758_v13  ;;  %v12433_v13 = vpop.permute.xlu1 %7127 }
 0xa65   :  { %v6531_v21 = vpop.f32.mrf.mxu2  ;;  %6907 = vxpose.xlu1.b32.cont [11/16] %v6822_v30, 128 }
 0xa66   :  { %v6532_v9 = vadd.f32 %v6531_v21, %v6443_v11  ;;  %v6356_v40 = vpop.f32.mrf.mxu0 }
 0xa67   :  { %v6445_v51 = vpop.f32.mrf.mxu1  ;;  %v6357_v10 = vadd.f32 %v6356_v40, %v12324_v54 }
 0xa68   :  { %v6621_v8 = vadd.f32 %v12396_v12, %v6532_v9 }
 0xa69   :  { %6395 = vmatmul.bf16.gmra.mxu0 %v13516_v27  ;;  %6484 = vmatmul.bf16.gmra.mxu1 %v13517_v38  ;;  %v6446_v28 = vadd.f32 %v6445_v51, %v6357_v10  ;;  %v7024_v38 = vld [vmem:[%s12532_s5 + $0xf8] sm:$0xff] }
 0xa6a   :  { %vm6696_vm1 = vcmp.gt.f32.partialorder %v6621_v8, 0.0  ;;  %v6760_v31 = vmul.f32 0.2, %v6621_v8  ;;  %6573 = vmatmul.bf16.gmra.mxu2 %v11565_v4  ;;  %v6633_v1 = vpop.f32.mrf.mxu3 }
 0xa6c   :  { %v6824_v47 = vsel %vm6696_vm1, %v6621_v8, %v6760_v31 }
 0xa6d   :  { %v6534_v55 = vpop.f32.mrf.mxu2  ;;  %6908 = vxpose.xlu1.b32.cont [12/16] %v6824_v47, 128 }
 0xa6e   :  { %v6535_v32 = vadd.f32 %v6534_v55, %v6446_v28  ;;  %v6358_v52 = vpop.f32.mrf.mxu0  ;;  %v12437_v28 = vpop.permute.xlu1 %7137 }
 0xa6f   :  { %v6447_v59 = vpop.f32.mrf.mxu1  ;;  %v6359_v16 = vadd.f32 %v6358_v52, %v12324_v54 }
 0xa70   :  { %v6624_v12 = vadd.f32 %v6623_v25, %v6535_v32 }
 0xa71   :  { %v6448_v4 = vadd.f32 %v6447_v59, %v6359_v16 }
 0xa72   :  { %vm6698_vm2 = vcmp.gt.f32.partialorder %v6624_v12, 0.0  ;;  %v6762_v27 = vmul.f32 0.2, %v6624_v12  ;;  %v6635_v36 = vpop.f32.mrf.mxu3 }
 0xa74   :  { %v6826_v41 = vsel %vm6698_vm2, %v6624_v12, %v6762_v27 }
 0xa75   :  { %v6536_v0 = vpop.f32.mrf.mxu2  ;;  %6909 = vxpose.xlu1.b32.cont [13/16] %v6826_v41, 128 }
 0xa76   :  { %v6537_v17 = vadd.f32 %v6536_v0, %v6448_v4  ;;  %7182 = vperm.xlu2 %8761, %v7024_v38   ;;  %v6361_v42 = vpop.f32.mrf.mxu0 }
 0xa77   :  { %v6450_v45 = vpop.f32.mrf.mxu1  ;;  %v6362_v43 = vadd.f32 %v6361_v42, %v12324_v54 }
 0xa78   :  { %v6626_v25 = vadd.f32 %v6625_v33, %v6537_v17 }
 0xa79   :  { %6400 = vmatmul.bf16.gmra.mxu0 %v13518_v44  ;;  %6489 = vmatmul.bf16.gmra.mxu1 %v13519_v29  ;;  %v6451_v50 = vadd.f32 %v6450_v45, %v6362_v43 }
 0xa7a   :  { %vm6700_vm3 = vcmp.gt.f32.partialorder %v6626_v25, 0.0  ;;  %v6764_v49 = vmul.f32 0.2, %v6626_v25  ;;  %6578 = vmatmul.bf16.gmra.mxu2 %v13520_v6  ;;  %v6638_v6 = vpop.f32.mrf.mxu3 }
 0xa7c   :  { %v6828_v56 = vsel %vm6700_vm3, %v6626_v25, %v6764_v49 }
 0xa7d   :  { %v6539_v48 = vpop.f32.mrf.mxu2  ;;  %6910 = vxpose.xlu1.b32.cont [14/16] %v6828_v56, 128 }
 0xa7e   :  { %v6540_v22 = vadd.f32 %v6539_v48, %v6451_v50  ;;  %v6363_v3 = vpop.f32.mrf.mxu0 }
 0xa7f   :  { %v6452_v33 = vpop.f32.mrf.mxu1  ;;  %v6364_v30 = vadd.f32 %v6363_v3, %v12324_v54 }
 0xa80   :  { %v6629_v11 = vadd.f32 %v6628_v24, %v6540_v22 }
 0xa81   :  { %v6453_v29 = vadd.f32 %v6452_v33, %v6364_v30 }
 0xa82   :  { %vm6702_vm0 = vcmp.gt.f32.partialorder %v6629_v11, 0.0  ;;  %v6766_v44 = vmul.f32 0.2, %v6629_v11  ;;  %v6640_v16 = vpop.f32.mrf.mxu3 }
 0xa84   :  { %v6830_v21 = vsel %vm6702_vm0, %v6629_v11, %v6766_v44 }
 0xa85   :  { %v6541_v9 = vpop.f32.mrf.mxu2  ;;  %6911 = vxpose.xlu1.b32.cont [15/16] %v6830_v21, 128 }
 0xa86   :  { %v6542_v40 = vadd.f32 %v6541_v9, %v6453_v29  ;;  %v6366_v51 = vpop.f32.mrf.mxu0 }
 0xa87   :  { %v6455_v8 = vpop.f32.mrf.mxu1  ;;  %v6367_v31 = vadd.f32 %v6366_v51, %v12324_v54 }
 0xa88   :  { %v6631_v10 = vadd.f32 %v6630_v20, %v6542_v40  ;;  %v12440_v20 = vpop.permute.xlu1 %7147 }
 0xa89   :  { %v6456_v24 = vadd.f32 %v6455_v8, %v6367_v31 }
 0xa8a   :  { %vm6704_vm4 = vcmp.gt.f32.partialorder %v6631_v10, 0.0  ;;  %v6768_v47 = vmul.f32 0.2, %v6631_v10  ;;  %v6643_v50 = vpop.f32.mrf.mxu3 }
 0xa8c   :  { %v6832_v55 = vsel %vm6704_vm4, %v6631_v10, %v6768_v47 }
 0xa8d   :  { %v6544_v32 = vpop.f32.mrf.mxu2  ;;  %6912 = vxpose.xlu1.b32.end [16/16] %v6832_v55, 128 }
 0xa8e   :  { %v6545_v52 = vadd.f32 %v6544_v32, %v6456_v24  ;;  %v6368_v59 = vpop.f32.mrf.mxu0 }
 0xa8f   :  { %v6457_v12 = vpop.f32.mrf.mxu1  ;;  %v6369_v38 = vadd.f32 %v6368_v59, %v12324_v54 }
 0xa90   :  { %v6634_v27 = vadd.f32 %v6633_v1, %v6545_v52  ;;  %v12443_v22 = vpop.permute.xlu1 %7157 }
 0xa91   :  { %v6458_v41 = vadd.f32 %v6457_v12, %v6369_v38 }
 0xa92   :  { %v6770_v4 = vmul.f32 0.2, %v6634_v27  ;;  %vm6706_vm5 = vcmp.gt.f32.partialorder %v6634_v27, 0.0 }
 0xa94   :  { %v6834_v0 = vsel %vm6706_vm5, %v6634_v27, %v6770_v4 }
 0xa95   :  { %v6546_v17 = vpop.f32.mrf.mxu2  ;;  %6961 = vxpose.xlu0.b32.start [1/16] %v6834_v0, 128 }
 0xa96   :  { %v6547_v42 = vadd.f32 %v6546_v17, %v6458_v41  ;;  %v6371_v45 = vpop.f32.mrf.mxu0 }
 0xa97   :  { %v6460_v25 = vpop.f32.mrf.mxu1  ;;  %v6372_v49 = vadd.f32 %v6371_v45, %v12324_v54 }
 0xa98   :  { %v6636_v43 = vadd.f32 %v6635_v36, %v6547_v42  ;;  %v6645_v36 = vpop.f32.mrf.mxu3  ;;  %v12446_v31 = vpop.permute.xlu1 %7167 }
 0xa99   :  { %v6461_v1 = vadd.f32 %v6460_v25, %v6372_v49 }
 0xa9a   :  { %vm6708_vm6 = vcmp.gt.f32.partialorder %v6636_v43, 0.0  ;;  %v6772_v56 = vmul.f32 0.2, %v6636_v43 }
 0xa9c   :  { %v6836_v48 = vsel %vm6708_vm6, %v6636_v43, %v6772_v56 }
 0xa9d   :  { %v6549_v3 = vpop.f32.mrf.mxu2  ;;  %6962 = vxpose.xlu0.b32.cont [2/16] %v6836_v48, 128 }
 0xa9e   :  { %v6550_v33 = vadd.f32 %v6549_v3, %v6461_v1  ;;  %v6373_v11 = vpop.f32.mrf.mxu0 }
 0xa9f   :  { %v6462_v30 = vpop.f32.mrf.mxu1  ;;  %v6374_v29 = vadd.f32 %v6373_v11, %v12324_v54 }
 0xaa0   :  { %v6639_v44 = vadd.f32 %v6638_v6, %v6550_v33  ;;  %v6648_v12 = vpop.f32.mrf.mxu3  ;;  %v12450_v17 = vpop.permute.xlu1 %7177 }
 0xaa1   :  { %v6463_v9 = vadd.f32 %v6462_v30, %v6374_v29 }
 0xaa2   :  { %vm6710_vm7 = vcmp.gt.f32.partialorder %v6639_v44, 0.0  ;;  %v6774_v21 = vmul.f32 0.2, %v6639_v44 }
 0xaa4   :  { %v6838_v40 = vsel %vm6710_vm7, %v6639_v44, %v6774_v21 }
 0xaa5   :  { %v6551_v51 = vpop.f32.mrf.mxu2  ;;  %6963 = vxpose.xlu0.b32.cont [3/16] %v6838_v40, 128 }
 0xaa6   :  { %v6552_v8 = vadd.f32 %v6551_v51, %v6463_v9  ;;  %v6376_v10 = vpop.f32.mrf.mxu0 }
 0xaa7   :  { %v6465_v47 = vpop.f32.mrf.mxu1  ;;  %v6377_v55 = vadd.f32 %v6376_v10, %v12324_v54 }
 0xaa8   :  { %v6641_v24 = vadd.f32 %v6640_v16, %v6552_v8  ;;  %v6896_v16 = vpop.trf.xlu0  ;;  %v6650_v3 = vpop.f32.mrf.mxu3 }
 0xaa9   :  { %v6466_v6 = vadd.f32 %v6465_v47, %v6377_v55  ;;  %v7215_v49 = vmul.f32 %v12273_v39, %v6896_v16 }
 0xaaa   :  { %vm6712_vm8 = vcmp.gt.f32.partialorder %v6641_v24, 0.0  ;;  %v6776_v32 = vmul.f32 0.2, %v6641_v24 }
 0xaab   :  { %v7263_v30 = vadd.f32 %v12374_v5, %v7215_v49 }
 0xaac   :  { %v6840_v52 = vsel %vm6712_vm8, %v6641_v24, %v6776_v32 }
 0xaad   :  { %v6554_v59 = vpop.f32.mrf.mxu2  ;;  %6964 = vxpose.xlu0.b32.cont [4/16] %v6840_v52, 128 }
 0xaae   :  { %v6555_v27 = vadd.f32 %v6554_v59, %v6466_v6  ;;  %v6378_v38 = vpop.f32.mrf.mxu0 }
 0xaaf   :  { %v6467_v4 = vpop.f32.mrf.mxu1  ;;  %v6379_v0 = vadd.f32 %v6378_v38, %v12324_v54 }
 0xab0   :  { %v6644_v41 = vadd.f32 %v6643_v50, %v6555_v27  ;;  %v6653_v32 = vpop.f32.mrf.mxu3 }
 0xab1   :  { %v6468_v45 = vadd.f32 %v6467_v4, %v6379_v0 }
 0xab2   :  { %vm6714_vm9 = vcmp.gt.f32.partialorder %v6644_v41, 0.0  ;;  %v6778_v42 = vmul.f32 0.2, %v6644_v41 }
 0xab4   :  { %v6842_v25 = vsel %vm6714_vm9, %v6644_v41, %v6778_v42 }
 0xab5   :  { %v6556_v43 = vpop.f32.mrf.mxu2  ;;  %6965 = vxpose.xlu0.b32.cont [5/16] %v6842_v25, 128 }
 0xab6   :  { %v6557_v56 = vadd.f32 %v6556_v43, %v6468_v45  ;;  %v6381_v1 = vpop.f32.mrf.mxu0 }
 0xab7   :  { %v6470_v48 = vpop.f32.mrf.mxu1  ;;  %v6382_v50 = vadd.f32 %v6381_v1, %v12324_v54 }
 0xab8   :  { %v6646_v33 = vadd.f32 %v6645_v36, %v6557_v56  ;;  %v6655_v43 = vpop.f32.mrf.mxu3 }
 0xab9   :  { %v6913_v11 = vpop.trf.xlu1  ;;  %v6471_v21 = vadd.f32 %v6470_v48, %v6382_v50 }
 0xaba   :  { %vm6716_vm10 = vcmp.gt.f32.partialorder %v6646_v33, 0.0  ;;  %v6780_v44 = vmul.f32 0.2, %v6646_v33  ;;  %v7217_v29 = vmul.f32 %v12421_v60, %v6913_v11  ;;  %v12460_v11 = vpop.trf.xlu2 }
 0xabc   :  { %v7264_v9 = vadd.f32 %v7263_v30, %v7217_v29  ;;  %v6844_v40 = vsel %vm6716_vm10, %v6646_v33, %v6780_v44 }
 0xabd   :  { %v6559_v51 = vpop.f32.mrf.mxu2  ;;  %6966 = vxpose.xlu0.b32.cont [6/16] %v6844_v40, 128 }
 0xabe   :  { %v6560_v8 = vadd.f32 %v6559_v51, %v6471_v21  ;;  %v6383_v10 = vpop.f32.mrf.mxu0 }
 0xabf   :  { %v6472_v47 = vpop.f32.mrf.mxu1  ;;  %v6384_v36 = vadd.f32 %v6383_v10, %v12324_v54 }
 0xac0   :  { %v6649_v24 = vadd.f32 %v6648_v12, %v6560_v8 }
 0xac1   :  { %v6914_v55 = vpop.trf.xlu1  ;;  %v6473_v52 = vadd.f32 %v6472_v47, %v6384_v36  ;;  %v6658_v47 = vpop.f32.mrf.mxu3 }
 0xac2   :  { %vm6718_vm11 = vcmp.gt.f32.partialorder %v6649_v24, 0.0  ;;  %v6782_v6 = vmul.f32 0.2, %v6649_v24  ;;  %v7219_v5 = vmul.f32 %v12283_v23, %v6914_v55 }
 0xac4   :  { %v7265_v59 = vadd.f32 %v7264_v9, %v7219_v5  ;;  %v6846_v27 = vsel %vm6718_vm11, %v6649_v24, %v6782_v6 }
 0xac5   :  { %v6561_v38 = vpop.f32.mrf.mxu2  ;;  %6967 = vxpose.xlu0.b32.cont [7/16] %v6846_v27, 128 }
 0xac6   :  { %v6562_v4 = vadd.f32 %v6561_v38, %v6473_v52  ;;  %v6386_v41 = vpop.f32.mrf.mxu0 }
 0xac7   :  { %v6475_v0 = vpop.f32.mrf.mxu1  ;;  %v6387_v16 = vadd.f32 %v6386_v41, %v12324_v54 }
 0xac8   :  { %v6651_v42 = vadd.f32 %v6650_v3, %v6562_v4 }
 0xac9   :  { %v6915_v12 = vpop.trf.xlu1  ;;  %v6476_v49 = vadd.f32 %v6475_v0, %v6387_v16 }
 0xaca   :  { %vm6720_vm12 = vcmp.gt.f32.partialorder %v6651_v42, 0.0  ;;  %v6784_v45 = vmul.f32 0.2, %v6651_v42  ;;  %v7221_v25 = vmul.f32 %v12427_v37, %v6915_v12 }
 0xacc   :  { %v7266_v56 = vadd.f32 %v7265_v59, %v7221_v25  ;;  %v6848_v1 = vsel %vm6720_vm12, %v6651_v42, %v6784_v45  ;;  %v6660_v45 = vpop.f32.mrf.mxu3  ;;  %vm7373_vm12 = vcmask 1040384  }
 0xacd   :  { %v6564_v48 = vpop.f32.mrf.mxu2  ;;  %6968 = vxpose.xlu0.b32.cont [8/16] %v6848_v1, 128 }
 0xace   :  { %v6565_v33 = vadd.f32 %v6564_v48, %v6476_v49  ;;  %v6388_v50 = vpop.f32.mrf.mxu0 }
 0xacf   :  { %v6477_v30 = vpop.f32.mrf.mxu1  ;;  %v6389_v3 = vadd.f32 %v6388_v50, %v12324_v54 }
 0xad0   :  { %v6654_v44 = vadd.f32 %v6653_v32, %v6565_v33  ;;  %v12465_v32 = vpop.trf.xlu2  ;;  %v7323_v33 = vld [vmem:[#allocation2] sm:$0x1] }
 0xad1   :  { %v6916_v29 = vpop.trf.xlu1  ;;  %v6478_v40 = vadd.f32 %v6477_v30, %v6389_v3 }
 0xad2   :  { %vm6722_vm13 = vcmp.gt.f32.partialorder %v6654_v44, 0.0  ;;  %v6786_v21 = vmul.f32 0.2, %v6654_v44  ;;  %v7223_v9 = vmul.f32 %v12297_v18, %v6916_v29 }
 0xad4   :  { %v7267_v51 = vadd.f32 %v7266_v56, %v7223_v9  ;;  %v6850_v8 = vsel %vm6722_vm13, %v6654_v44, %v6786_v21  ;;  %v6663_v9 = vpop.f32.mrf.mxu3 }
 0xad5   :  { %v6566_v10 = vpop.f32.mrf.mxu2  ;;  %6969 = vxpose.xlu0.b32.cont [9/16] %v6850_v8, 128 }
 0xad6   :  { %v6567_v24 = vadd.f32 %v6566_v10, %v6478_v40  ;;  %v6391_v36 = vpop.f32.mrf.mxu0 }
 0xad7   :  { %v6480_v55 = vpop.f32.mrf.mxu1  ;;  %v6392_v5 = vadd.f32 %v6391_v36, %v12324_v54 }
 0xad8   :  { %v6656_v6 = vadd.f32 %v6655_v43, %v6567_v24  ;;  %v12471_v56 = vpop.trf.xlu2 }
 0xad9   :  { %v6917_v52 = vpop.trf.xlu1  ;;  %v6481_v38 = vadd.f32 %v6480_v55, %v6392_v5 }
 0xada   :  { %vm6724_vm14 = vcmp.gt.f32.partialorder %v6656_v6, 0.0  ;;  %v6788_v59 = vmul.f32 0.2, %v6656_v6  ;;  %v7225_v27 = vmul.f32 %v12433_v13, %v6917_v52 }
 0xadc   :  { %v12468_v4 = vadd.f32 %v7267_v51, %v7225_v27  ;;  %v6852_v41 = vsel %vm6724_vm14, %v6656_v6, %v6788_v59  ;;  %v6665_v59 = vpop.f32.mrf.mxu3 }
 0xadd   :  { %v6569_v0 = vpop.f32.mrf.mxu2  ;;  %6970 = vxpose.xlu0.b32.cont [10/16] %v6852_v41, 128 }
 0xade   :  { %v6570_v42 = vadd.f32 %v6569_v0, %v6481_v38  ;;  %v6393_v16 = vpop.f32.mrf.mxu0 }
 0xadf   :  { %v6482_v12 = vpop.f32.mrf.mxu1  ;;  %v6394_v43 = vadd.f32 %v6393_v16, %v12324_v54 }
 0xae0   :  { %v6659_v25 = vadd.f32 %v6658_v47, %v6570_v42  ;;  %v6953_v10 = vpop.trf.xlu2 }
 0xae1   :  { %v6483_v1 = vadd.f32 %v6482_v12, %v6394_v43 }
 0xae2   :  { %vm6726_vm15 = vcmp.gt.f32.partialorder %v6659_v25, 0.0  ;;  %v6790_v49 = vmul.f32 0.2, %v6659_v25 }
 0xae4   :  { %v6854_v48 = vsel %vm6726_vm15, %v6659_v25, %v6790_v49 }
 0xae5   :  { %v6571_v50 = vpop.f32.mrf.mxu2  ;;  %6971 = vxpose.xlu0.b32.cont [11/16] %v6854_v48, 128 }
 0xae6   :  { %v6572_v30 = vadd.f32 %v6571_v50, %v6483_v1  ;;  %v6396_v44 = vpop.f32.mrf.mxu0 }
 0xae7   :  { %v6485_v3 = vpop.f32.mrf.mxu1  ;;  %7326 = vperm.xlu1 %8760, %v7323_v33   ;;  %v6397_v21 = vadd.f32 %v6396_v44, %v12324_v54  ;;  %v6668_v33 = vpop.f32.mrf.mxu3 }
 0xae8   :  { %v6661_v29 = vadd.f32 %v6660_v45, %v6572_v30  ;;  %v6954_v16 = vpop.trf.xlu2 }
 0xae9   :  { %v6486_v51 = vadd.f32 %v6485_v3, %v6397_v21 }
 0xaea   :  { %vm6728_vm1 = vcmp.gt.f32.partialorder %v6661_v29, 0.0  ;;  %v6792_v40 = vmul.f32 0.2, %v6661_v29 }
 0xaec   :  { %v6856_v8 = vsel %vm6728_vm1, %v6661_v29, %v6792_v40 }
 0xaed   :  { %v6574_v47 = vpop.f32.mrf.mxu2  ;;  %6972 = vxpose.xlu0.b32.cont [12/16] %v6856_v8, 128 }
 0xaee   :  { %v6575_v24 = vadd.f32 %v6574_v47, %v6486_v51  ;;  %v6398_v36 = vpop.f32.mrf.mxu0 }
 0xaef   :  { %v6487_v55 = vpop.f32.mrf.mxu1  ;;  %v6399_v5 = vadd.f32 %v6398_v36, %v12324_v54 }
 0xaf0   :  { %v6664_v6 = vadd.f32 %v6663_v9, %v6575_v24  ;;  %v6955_v29 = vpop.trf.xlu2  ;;  %v6670_v24 = vpop.f32.mrf.mxu3 }
 0xaf1   :  { %v6488_v27 = vadd.f32 %v6487_v55, %v6399_v5 }
 0xaf2   :  { %vm6730_vm2 = vcmp.gt.f32.partialorder %v6664_v6, 0.0  ;;  %v6794_v52 = vmul.f32 0.2, %v6664_v6 }
 0xaf4   :  { %v6858_v38 = vsel %vm6730_vm2, %v6664_v6, %v6794_v52 }
 0xaf5   :  { %v6576_v41 = vpop.f32.mrf.mxu2  ;;  %6973 = vxpose.xlu0.b32.cont [13/16] %v6858_v38, 128 }
 0xaf6   :  { %v6577_v0 = vadd.f32 %v6576_v41, %v6488_v27  ;;  %v6401_v42 = vpop.f32.mrf.mxu0  ;;  %v7198_v27 = vmul.f32 %v12222_v19, %v12465_v32  ;;  %v7200_v41 = vmul.f32 %v12299_v26, %v12471_v56 }
 0xaf7   :  { %v6402_v45 = vadd.f32 %v6401_v42, %v12324_v54  ;;  %v6490_v25 = vpop.f32.mrf.mxu1  ;;  %v7202_v42 = vmul.f32 %v12232_v53, %v6953_v10 }
 0xaf8   :  { %v6666_v12 = vadd.f32 %v6665_v59, %v6577_v0  ;;  %v6956_v6 = vpop.trf.xlu2 }
 0xaf9   :  { %v6491_v49 = vadd.f32 %v6490_v25, %v6402_v45  ;;  %v7204_v25 = vmul.f32 %v12317_v61, %v6954_v16 }
 0xafa   :  { %vm6732_vm3 = vcmp.gt.f32.partialorder %v6666_v12, 0.0  ;;  %v6796_v43 = vmul.f32 0.2, %v6666_v12 }
 0xafc   :  { %v6860_v1 = vsel %vm6732_vm3, %v6666_v12, %v6796_v43  ;;  %v6918_v43 = vpop.trf.xlu1 }
 0xafd   :  { %v6579_v48 = vpop.f32.mrf.mxu2  ;;  %6974 = vxpose.xlu0.b32.cont [14/16] %v6860_v1, 128  ;;  %v7206_v1 = vmul.f32 %v12218_v62, %v6955_v29 }
 0xafe   :  { %v6580_v50 = vadd.f32 %v6579_v48, %v6491_v49  ;;  %v6403_v30 = vpop.f32.mrf.mxu0 }
 0xaff   :  { %v6404_v3 = vadd.f32 %v6403_v30, %v12324_v54  ;;  %v6492_v9 = vpop.f32.mrf.mxu1  ;;  %v7196_v54 = vmul.f32 %v12279_v58, %v12460_v11  ;;  %v7208_v11 = vmul.f32 %v12243_v14, %v6956_v6 }
 0xb00   :  { %v6669_v44 = vadd.f32 %v6668_v33, %v6580_v50  ;;  %v6957_v52 = vpop.trf.xlu2 }
 0xb01   :  { %v6493_v40 = vadd.f32 %v6492_v9, %v6404_v3  ;;  %v7290_v38 = vadd.f32 %v12407_v63, %v7196_v54  ;;  %v7210_v63 = vmul.f32 %v12348_v15, %v6957_v52 }
 0xb02   :  { %vm6734_vm0 = vcmp.gt.f32.partialorder %v6669_v44, 0.0  ;;  %v6798_v21 = vmul.f32 0.2, %v6669_v44 }
 0xb03   :  { %v7291_v0 = vadd.f32 %v7290_v38, %v7198_v27 }
 0xb04   :  { %v6862_v51 = vsel %vm6734_vm0, %v6669_v44, %v6798_v21  ;;  %v6919_v10 = vpop.trf.xlu1 }
 0xb05   :  { %v6581_v8 = vpop.f32.mrf.mxu2  ;;  %6975 = vxpose.xlu0.b32.cont [15/16] %v6862_v51, 128  ;;  %v7292_v45 = vadd.f32 %v7291_v0, %v7200_v41  ;;  %v7229_v27 = vmul.f32 %v12437_v28, %v6919_v10  ;;  %v13541_v41 = vld [vmem:[#allocation140_spill] sm:$0xff] }
 0xb06   :  { %v6582_v47 = vadd.f32 %v6581_v8, %v6493_v40 }
 0xb07   :  { %v7293_v49 = vadd.f32 %v7292_v45, %v7202_v42 }
 0xb08   :  { %v6671_v36 = vadd.f32 %v6670_v24, %v6582_v47  ;;  %v6958_v59 = vpop.trf.xlu2 }
 0xb09   :  { %v7294_v58 = vadd.f32 %v7293_v49, %v7204_v25  ;;  %v7212_v26 = vmul.f32 %v12259_v7, %v6958_v59 }
 0xb0a   :  { %vm6736_vm4 = vcmp.gt.f32.partialorder %v6671_v36, 0.0  ;;  %v6800_v55 = vmul.f32 0.2, %v6671_v36 }
 0xb0b   :  { %v7295_v19 = vadd.f32 %v7294_v58, %v7206_v1 }
 0xb0c   :  { %v6864_v5 = vsel %vm6736_vm4, %v6671_v36, %v6800_v55  ;;  %v6920_v44 = vpop.trf.xlu1 }
 0xb0d   :  { %6976 = vxpose.xlu0.b32.end [16/16] %v6864_v5, 128  ;;  %v7296_v32 = vadd.f32 %v7295_v19, %v7208_v11  ;;  %v7231_v0 = vmul.f32 %v13541_v41, %v6920_v44 }
 0xb0f   :  { %v7297_v48 = vadd.f32 %v7296_v32, %v7210_v63 }
 0xb10   :  { %v6959_v12 = vpop.trf.xlu2 }
 0xb11   :  { %v7214_v53 = vmul.f32 %v12368_v2, %v6959_v12  ;;  %v7298_v33 = vadd.f32 %v7297_v48, %v7212_v26 }
 0xb13   :  { %v7299_v16 = vadd.f32 %v7298_v33, %v7214_v53 }
 0xb14   :  { %v6921_v7 = vpop.trf.xlu1 }
 0xb18   :  { %v6960_v56 = vpop.trf.xlu2 }
 0xb19   :  { %v7216_v61 = vmul.f32 %v12273_v39, %v6960_v56 }
 0xb1b   :  { %v7300_v62 = vadd.f32 %v7299_v16, %v7216_v61 }
 0xb1c   :  { %v6922_v39 = vpop.trf.xlu1 }
 0xb1d   :  { %v7235_v25 = vmul.f32 %v12340_v57, %v6922_v39 }
 0xb20   :  { %v7183_v53 = vpop.permute.xlu2 %7182 }
 0xb24   :  { %v6923_v36 = vpop.trf.xlu1 }
 0xb25   :  { %v7237_v1 = vmul.f32 %v12443_v22, %v6923_v36 }
 0xb2c   :  { %v6924_v6 = vpop.trf.xlu1 }
 0xb39   :  { %v6977_v50 = vpop.trf.xlu0 }
 0xb3a   :  { %v7218_v30 = vmul.f32 %v12421_v60, %v6977_v50 }
 0xb3c   :  { %v7301_v14 = vadd.f32 %v7300_v62, %v7218_v30 }
 0xb41   :  { %v6978_v3 = vpop.trf.xlu0 }
 0xb42   :  { %v7220_v15 = vmul.f32 %v12283_v23, %v6978_v3  ;;  %v6925_v23 = vpop.trf.xlu1 }
 0xb43   :  { %v7241_v63 = vmul.f32 %v12446_v31, %v6925_v23 }
 0xb44   :  { %v7302_v29 = vadd.f32 %v7301_v14, %v7220_v15 }
 0xb49   :  { %v6979_v21 = vpop.trf.xlu0 }
 0xb4a   :  { %v7222_v9 = vmul.f32 %v12427_v37, %v6979_v21  ;;  %v6926_v54 = vpop.trf.xlu1  ;;  %v7227_v37 = vmul.f32 %v12310_v34, %v6918_v43  ;;  %v7239_v43 = vmul.f32 %v12353_v46, %v6924_v6 }
 0xb4b   :  { %v7243_v32 = vmul.f32 %v12362_v35, %v6926_v54 }
 0xb4c   :  { %v7303_v2 = vadd.f32 %v7302_v29, %v7222_v9 }
 0xb51   :  { %v6980_v40 = vpop.trf.xlu0 }
 0xb52   :  { %v7224_v51 = vmul.f32 %v12297_v18, %v6980_v40  ;;  %v7269_v18 = vadd.f32 %v12468_v4, %v7227_v37  ;;  %v6927_v12 = vpop.trf.xlu1 }
 0xb53   :  { %v7245_v48 = vmul.f32 %v12450_v17, %v6927_v12 }
 0xb54   :  { %v7304_v8 = vadd.f32 %v7303_v2, %v7224_v51  ;;  %v7270_v42 = vadd.f32 %v7269_v18, %v7229_v27 }
 0xb56   :  { %v7271_v45 = vadd.f32 %v7270_v42, %v7231_v0 }
 0xb59   :  { %v6981_v47 = vpop.trf.xlu0 }
 0xb5a   :  { %v7226_v24 = vmul.f32 %v12433_v13, %v6981_v47  ;;  %v7233_v13 = vmul.f32 %v12440_v20, %v6921_v7  ;;  %v6928_v26 = vpop.trf.xlu1 }
 0xb5b   :  { %v7247_v61 = vmul.f32 %v7183_v53, %v6928_v26 }
 0xb5c   :  { %v7305_v60 = vadd.f32 %v7304_v8, %v7226_v24  ;;  %v7272_v49 = vadd.f32 %v7271_v45, %v7233_v13 }
 0xb5e   :  { %v7273_v11 = vadd.f32 %v7272_v49, %v7235_v25 }
 0xb60   :  { %v7274_v19 = vadd.f32 %v7273_v11, %v7237_v1 }
 0xb61   :  { %v6982_v55 = vpop.trf.xlu0 }
 0xb62   :  { %v7275_v4 = vadd.f32 %v7274_v19, %v7239_v43  ;;  %v7228_v14 = vmul.f32 %v12310_v34, %v6982_v55  ;;  %v7327_v36 = vpop.permute.xlu1 %7326 }
 0xb64   :  { %v7276_v56 = vadd.f32 %v7275_v4, %v7241_v63  ;;  %v7306_v15 = vadd.f32 %v7305_v60, %v7228_v14 }
 0xb66   :  { %v7277_v33 = vadd.f32 %v7276_v56, %v7243_v32 }
 0xb68   :  { %v7278_v16 = vadd.f32 %v7277_v33, %v7245_v48 }
 0xb69   :  { %v6983_v5 = vpop.trf.xlu0 }
 0xb6a   :  { %v7279_v50 = vadd.f32 %v7278_v16, %v7247_v61  ;;  %v7230_v3 = vmul.f32 %v12437_v28, %v6983_v5  ;;  %v7329_v5 = vperm.slane %v7327_v36, 0  ;;  %v7376_v16 = vlaneseq }
 0xb6c   :  { %v7280_v30 = vrot.slane %v7279_v50, 4  ;;  %v7307_v9 = vadd.f32 %v7306_v15, %v7230_v3  ;;  %vm7378_vm14 = vcmp.lt.s32.totalorder %v7376_v16, 256 }
 0xb6e   :  { %v7281_v44 = vadd.f32 %v7280_v30, %v7279_v50 }
 0xb70   :  { %v7282_v21 = vrot.slane %v7281_v44, 2 }
 0xb71   :  { %v6984_v52 = vpop.trf.xlu0 }
 0xb72   :  { %v7232_v29 = vmul.f32 %v13541_v41, %v6984_v52  ;;  %v7283_v39 = vadd.f32 %v7282_v21, %v7281_v44 }
 0xb74   :  { %v7308_v40 = vadd.f32 %v7307_v9, %v7232_v29  ;;  %v7284_v60 = vrot.slane %v7283_v39, 1 }
 0xb76   :  { %v7285_v52 = vadd.f32 %v7284_v60, %v7283_v39 }
 0xb78   :  { %v7330_v54 = vadd.f32 %v7329_v5, %v7285_v52 }
 0xb79   :  { %v6985_v59 = vpop.trf.xlu0 }
 0xb7a   :  { %v7234_v2 = vmul.f32 %v12440_v20, %v6985_v59 }
 0xb7c   :  { %v7309_v8 = vadd.f32 %v7308_v40, %v7234_v2 }
 0xb81   :  { %v6986_v38 = vpop.trf.xlu0 }
 0xb82   :  { %v7236_v51 = vmul.f32 %v12340_v57, %v6986_v38 }
 0xb84   :  { %v7310_v24 = vadd.f32 %v7309_v8, %v7236_v51 }
 0xb89   :  { %v6987_v58 = vpop.trf.xlu0 }
 0xb8a   :  { %v7238_v47 = vmul.f32 %v12443_v22, %v6987_v58 }
 0xb8c   :  { %v7311_v55 = vadd.f32 %v7310_v24, %v7238_v47 }
 0xb91   :  { %v6988_v10 = vpop.trf.xlu0 }
 0xb92   :  { %v7240_v34 = vmul.f32 %v12353_v46, %v6988_v10  ;;  %v8491_v46 = vmul.f32 -1.442695, %v7330_v54 }
 0xb94   :  { %v7312_v23 = vadd.f32 %v7311_v55, %v7240_v34  ;;  %8763 = vpow2.f32 %v8491_v46 }
 0xb99   :  { %v6989_v62 = vpop.trf.xlu0 }
 0xb9a   :  { %v7242_v6 = vmul.f32 %v12446_v31, %v6989_v62  ;;  %v8764_v13 = vpop.eup %8763 }
 0xb9c   :  { %v7313_v59 = vadd.f32 %v7312_v23, %v7242_v6 }
 0xba1   :  { %v6990_v7 = vpop.trf.xlu0 }
 0xba2   :  { %v7244_v20 = vmul.f32 %v12362_v35, %v6990_v7  ;;  %v7338_v35 = vadd.f32 1.0, %v8764_v13 }
 0xba4   :  { %v7314_v37 = vadd.f32 %v7313_v59, %v7244_v20  ;;  %8765 = vrcp.f32 %v7338_v35  ;;  %vm7345_vm7 = vweird.f32 %v7338_v35  ;;  %v7351_v10 = vand.u32 2147483648, %v7338_v35 }
 0xba5   :  { %v7349_v61 = vand.u32 2147483647, %v7338_v35 }
 0xba6   :  { %v7352_v44 = vor.u32 1.1754944e-38, %v7351_v10 }
 0xba7   :  { %vm7350_vm13 = vcmp.eq.f32.partialorder %v7349_v61, 8.507059e+37 }
 0xba9   :  { %v6991_v28 = vpop.trf.xlu0 }
 0xbaa   :  { %v7246_v57 = vmul.f32 %v12450_v17, %v6991_v28  ;;  %v8766_v17 = vpop.eup %8765 }
 0xbab   :  { %v7341_v11 = vmul.f32 %v8766_v17, %v7338_v35  ;;  %vm7346_vm5 = vweird.f32 %v8766_v17 }
 0xbac   :  { %v7315_v27 = vadd.f32 %v7314_v37, %v7246_v57  ;;  %vm12518_vm8 = vmor %vm7345_vm7, %vm7346_vm5 }
 0xbad   :  { %v7342_v43 = vsub.f32 1.0, %v7341_v11 }
 0xbaf   :  { %v7343_v63 = vmul.f32 %v8766_v17, %v7342_v43 }
 0xbb1   :  { %v6992_v22 = vpop.trf.xlu0  ;;  %v7344_v56 = vadd.f32 %v8766_v17, %v7343_v63 }
 0xbb2   :  { %v7248_v38 = vmul.f32 %v7183_v53, %v6992_v22 }
 0xbb3   :  { %v7348_v30 = vsel %vm12518_vm8, %v8766_v17, %v7344_v56 }
 0xbb4   :  { %v7316_v18 = vadd.f32 %v7315_v27, %v7248_v38  ;;  %v7353_v29 = vsel %vm7350_vm13, %v7352_v44, %v7348_v30 }
 0xbb6   :  { %v7317_v41 = vrot.slane %v7316_v18, 4 }
 0xbb8   :  { %v7318_v0 = vadd.f32 %v7317_v41, %v7316_v18 }
 0xbba   :  { %v7319_v42 = vrot.slane %v7318_v0, 2 }
 0xbbc   :  { %v7320_v31 = vadd.f32 %v7319_v42, %v7318_v0 }
 0xbbe   :  { %v7321_v12 = vrot.slane %v7320_v31, 1 }
 0xbc0   :  { %v7322_v45 = vadd.f32 %v7321_v12, %v7320_v31 }
 0xbc2   :  { %v7331_v25 = vadd.f32 %v7329_v5, %v7322_v45 }
 0xbc4   :  { %v8492_v49 = vmul.f32 -1.442695, %v7331_v25 }
 0xbc6   :  { %8767 = vpow2.f32 %v8492_v49 }
 0xbcc   :  { %v8768_v1 = vpop.eup %8767 }
 0xbcd   :  { %v7339_v58 = vadd.f32 1.0, %v8768_v1 }
 0xbcf   :  { %8769 = vrcp.f32 %v7339_v58  ;;  %v7366_v26 = vand.u32 2147483648, %v7339_v58  ;;  %v7364_v53 = vand.u32 2147483647, %v7339_v58  ;;  %vm7360_vm9 = vweird.f32 %v7339_v58 }
 0xbd1   :  { %v7367_v62 = vor.u32 1.1754944e-38, %v7366_v26  ;;  %vm7365_vm11 = vcmp.eq.f32.partialorder %v7364_v53, 8.507059e+37 }
 0xbd5   :  { %v8770_v19 = vpop.eup %8769 }
 0xbd6   :  { %v7356_v4 = vmul.f32 %v8770_v19, %v7339_v58  ;;  %vm7361_vm6 = vweird.f32 %v8770_v19 }
 0xbd7   :  { %vm7362_vm10 = vmor %vm7360_vm9, %vm7361_vm6 }
 0xbd8   :  { %v7357_v32 = vsub.f32 1.0, %v7356_v4 }
 0xbda   :  { %v7358_v48 = vmul.f32 %v8770_v19, %v7357_v32 }
 0xbdc   :  { %v7359_v50 = vadd.f32 %v8770_v19, %v7358_v48 }
 0xbde   :  { %v7363_v14 = vsel %vm7362_vm10, %v8770_v19, %v7359_v50 }
 0xbdf   :  { %v7368_v3 = vsel %vm7365_vm11, %v7367_v62, %v7363_v14 }
 0xbe0   :  { %v7372_v15 = vrot.slane %v7368_v3, 7 }
 0xbe2   :  { %v7374_v7 = vsel %vm7373_vm12, %v7353_v29, %v7372_v15 }
 0xbe3   :  { %7380 = vst.msk [vmem:[%s12534_s7] sm:$0x3] %vm7378_vm14, %v7374_v7 }
 0xbe4   :  { %7385 = vsyncpa [#allocation4], 1 }
 0xbe5   :  { %7386 = vsyncpa [#allocation6], 1 }

</bundles_post_ra>
